<compile_context>
chip_gen: v7x
topology: tpu7x:2x2x1
jax: 0.10.0
libtpu: 0.0.40
codegen_flags: <defaults>
</compile_context>

<pallas_src>
import jax
import jax.numpy as jnp
from jax.experimental import pallas as pl
from jax.experimental.pallas import tpu as pltpu  # noqa: F401  (kept for TPU-specific tuning hooks)


# ----------------------------------------------------------------------------
# Fused kernel: both towers' 2-layer LSTMs over the full sequence + final fc
# ----------------------------------------------------------------------------
def _make_fused_kernel(num_layers, seq_len):
    def kernel(x_ref, *refs):
        # refs layout: [wih_0, whh_0, b_0, ..., wih_{L-1}, whh_{L-1}, b_{L-1},
        #               fc_w_t, fc_b, out]
        layer_refs = [refs[3 * l: 3 * l + 3] for l in range(num_layers)]
        fcw_ref = refs[3 * num_layers]       # (2H, K)
        fcb_ref = refs[3 * num_layers + 1]   # (1, K)
        out_ref = refs[3 * num_layers + 2]   # (B, K)

        B = x_ref.shape[0]
        H2 = layer_refs[0][1].shape[1]       # 2 * hidden_size (both towers)

        # Hoist bias loads out of the time loop.
        biases = [b_ref[...] for (_, _, b_ref) in layer_refs]   # each (4, 1, 2H)

        def cell(x_t, h, c, wih_ref, whh_ref, b):
            # Per-gate, lane-aligned block-diagonal matmuls: one dot advances
            # BOTH towers (gate order [i, f, g, o]).
            def gate(g):
                return (jnp.dot(x_t, wih_ref[g], preferred_element_type=jnp.float32)
                        + jnp.dot(h, whh_ref[g], preferred_element_type=jnp.float32)
                        + b[g])

            i_g = jax.nn.sigmoid(gate(0))
            f_g = jax.nn.sigmoid(gate(1))
            g_g = jnp.tanh(gate(2))
            o_g = jax.nn.sigmoid(gate(3))
            c_new = f_g * c + i_g * g_g
            h_new = o_g * jnp.tanh(c_new)
            return h_new, c_new

        x = x_ref[...]                               # (B, T, 2I) whole sequence
        zeros = jnp.zeros((B, H2), jnp.float32)
        hs = [zeros] * num_layers
        cs = [zeros] * num_layers

        for t in range(seq_len):                     # fully unrolled, static
            inp = x[:, t, :]                         # (B, 2*in) static slice
            for l in range(num_layers):              # stacked layers fused per step
                wih_ref, whh_ref, _ = layer_refs[l]
                hs[l], cs[l] = cell(inp, hs[l], cs[l], wih_ref, whh_ref, biases[l])
                inp = hs[l]

        # hs[-1] == concat(h_tower0_last, h_tower1_last)  -> final Linear in-kernel.
        out_ref[...] = (jnp.dot(hs[-1], fcw_ref[...],
                                preferred_element_type=jnp.float32)
                        + fcb_ref[...]).astype(out_ref.dtype)

    return kernel


# ----------------------------------------------------------------------------
# Wrapper: one pallas_call for the whole forward
# ----------------------------------------------------------------------------
def _loganomaly_forward_fn(x_cat, layer_params, fc_w_t, fc_b2):
    """x_cat: (B, T, 2I) -- towers concatenated on the feature axis.
    layer_params: list over layers of (wih_bd (4, 2*in, 2H), whh_bd (4, 2H, 2H),
                                       b (4, 1, 2H)) block-diagonal per gate.
    fc_w_t: (2H, K);  fc_b2: (1, K)."""
    B, T, _ = x_cat.shape
    K = fc_w_t.shape[1]
    num_layers = len(layer_params)

    flat_inputs = [x_cat]
    for (wih, whh, b) in layer_params:
        flat_inputs += [wih, whh, b]
    flat_inputs += [fc_w_t, fc_b2]

    return pl.pallas_call(
        _make_fused_kernel(num_layers, T),
        out_shape=jax.ShapeDtypeStruct((B, K), jnp.float32),
    )(*flat_inputs)


loganomaly_forward = jax.jit(_loganomaly_forward_fn)


# ----------------------------------------------------------------------------
# Parameter packing (PyTorch layout -> per-gate, block-diagonal two-tower layout)
# ----------------------------------------------------------------------------
def init_lstm_params(key, input_size, hidden_size, num_layers):
    """PyTorch-style raw params: per layer (w_ih (4H,in), w_hh (4H,H), b_ih, b_hh)."""
    params = []
    bound = 1.0 / jnp.sqrt(hidden_size)
    for layer in range(num_layers):
        in_sz = input_size if layer == 0 else hidden_size
        key, k1, k2, k3, k4 = jax.random.split(key, 5)
        w_ih = jax.random.uniform(k1, (4 * hidden_size, in_sz), jnp.float32, -bound, bound)
        w_hh = jax.random.uniform(k2, (4 * hidden_size, hidden_size), jnp.float32, -bound, bound)
        b_ih = jax.random.uniform(k3, (4 * hidden_size,), jnp.float32, -bound, bound)
        b_hh = jax.random.uniform(k4, (4 * hidden_size,), jnp.float32, -bound, bound)
        params.append((w_ih, w_hh, b_ih, b_hh))
    return params, key


def pack_block_diag_params(raw0, raw1, hidden_size):
    """Pack two towers' per-layer params into per-gate block-diagonal layout."""
    H = hidden_size
    packed = []
    for p0, p1 in zip(raw0, raw1):
        (w_ih0, w_hh0, b_ih0, b_hh0) = p0
        (w_ih1, w_hh1, b_ih1, b_hh1) = p1
        in_sz = w_ih0.shape[1]

        # (4H, in) -> (4, in, H) per gate (x @ W_g^T layout).
        wi0 = w_ih0.reshape(4, H, in_sz).transpose(0, 2, 1)
        wi1 = w_ih1.reshape(4, H, in_sz).transpose(0, 2, 1)
        wh0 = w_hh0.reshape(4, H, H).transpose(0, 2, 1)
        wh1 = w_hh1.reshape(4, H, H).transpose(0, 2, 1)
        b0 = (b_ih0 + b_hh0).reshape(4, 1, H)
        b1 = (b_ih1 + b_hh1).reshape(4, 1, H)

        zi = jnp.zeros((4, in_sz, H), jnp.float32)
        wih_bd = jnp.concatenate(
            [jnp.concatenate([wi0, zi], axis=2),
             jnp.concatenate([zi, wi1], axis=2)], axis=1)        # (4, 2*in, 2H)
        zh = jnp.zeros((4, H, H), jnp.float32)
        whh_bd = jnp.concatenate(
            [jnp.concatenate([wh0, zh], axis=2),
             jnp.concatenate([zh, wh1], axis=2)], axis=1)        # (4, 2H, 2H)
        b_bd = jnp.concatenate([b0, b1], axis=2)                  # (4, 1, 2H)
        packed.append((wih_bd, whh_bd, b_bd))
    return packed


# ----------------------------------------------------------------------------
# Pure-JAX reference (for correctness check)
# ----------------------------------------------------------------------------
def _ref_lstm_stack(x_bti, raw_layers):
    B = x_bti.shape[0]
    x = x_bti
    for (w_ih, w_hh, b_ih, b_hh) in raw_layers:
        H = w_hh.shape[1]
        bias = b_ih + b_hh

        def step(carry, xt):
            h, c = carry
            gates = xt @ w_ih.T + h @ w_hh.T + bias
            i = jax.nn.sigmoid(gates[:, 0 * H:1 * H])
            f = jax.nn.sigmoid(gates[:, 1 * H:2 * H])
            g = jnp.tanh(gates[:, 2 * H:3 * H])
            o = jax.nn.sigmoid(gates[:, 3 * H:4 * H])
            c = f * c + i * g
            h = o * jnp.tanh(c)
            return (h, c), h

        h0 = jnp.zeros((B, H), jnp.float32)
        c0 = jnp.zeros((B, H), jnp.float32)
        _, ys = jax.lax.scan(step, (h0, c0), jnp.transpose(x, (1, 0, 2)))
        x = jnp.transpose(ys, (1, 0, 2))
    return x


def _ref_forward(input0, input1, raw0, raw1, fc_w, fc_b):
    o0 = _ref_lstm_stack(input0, raw0)[:, -1, :]
    o1 = _ref_lstm_stack(input1, raw1)[:, -1, :]
    return jnp.concatenate([o0, o1], -1) @ fc_w.T + fc_b


# ----------------------------------------------------------------------------
if __name__ == "__main__":
    input_size, hidden_size, num_layers, num_keys = 16, 32, 2, 24
    B, T = 2, 8

    key = jax.random.PRNGKey(0)
    raw0, key = init_lstm_params(key, input_size, hidden_size, num_layers)
    raw1, key = init_lstm_params(key, input_size, hidden_size, num_layers)

    bound = 1.0 / jnp.sqrt(2 * hidden_size)
    key, kw, kb, kx0, kx1 = jax.random.split(key, 5)
    fc_w = jax.random.uniform(kw, (num_keys, 2 * hidden_size), jnp.float32, -bound, bound)
    fc_b = jax.random.uniform(kb, (num_keys,), jnp.float32, -bound, bound)

    # features[0], features[1] — both batch-first (B, T, input_size)
    input0 = jax.random.normal(kx0, (B, T, input_size), jnp.float32)
    input1 = jax.random.normal(kx1, (B, T, input_size), jnp.float32)

    # Pack for the fused kernel.
    layer_params = pack_block_diag_params(raw0, raw1, hidden_size)
    fc_w_t = fc_w.T                                   # (2H, K); matches [h0 | h1] lanes
    fc_b2 = fc_b.reshape(1, num_keys)
    x_cat = jnp.concatenate([input0, input1], axis=-1)  # (B, T, 2I)

    out = loganomaly_forward(x_cat, layer_params, fc_w_t, fc_b2)
    out = jax.block_until_ready(out)

    ref = _ref_forward(input0, input1, raw0, raw1, fc_w, fc_b)
    assert out.shape == (B, num_keys)
    assert jnp.allclose(out, ref, atol=1e-4, rtol=1e-4), "Pallas output mismatch vs reference"

    print("KERNEL_OK")
</pallas_src>

<mosaic_0001>
module attributes {stable_mosaic.version = 11 : i64} {
  func.func @kernel(%arg0: memref<2x8x32xf32, #tpu.memory_space<vmem>>, %arg1: memref<4x32x64xf32, #tpu.memory_space<vmem>>, %arg2: memref<4x64x64xf32, #tpu.memory_space<vmem>>, %arg3: memref<4x1x64xf32, #tpu.memory_space<vmem>>, %arg4: memref<4x64x64xf32, #tpu.memory_space<vmem>>, %arg5: memref<4x64x64xf32, #tpu.memory_space<vmem>>, %arg6: memref<4x1x64xf32, #tpu.memory_space<vmem>>, %arg7: memref<64x24xf32, #tpu.memory_space<vmem>>, %arg8: memref<1x24xf32, #tpu.memory_space<vmem>>, %arg9: memref<2x24xf32, #tpu.memory_space<vmem>>) attributes {dimension_semantics = [], scalar_prefetch = 0 : i64, scratch_operands = 0 : i64, tpu.core_type = #tpu.core_type<tc>} {
    %c0 = arith.constant 0 : index
    %c0_0 = arith.constant 0 : index
    %c0_1 = arith.constant 0 : index
    %0 = vector.load %arg3[%c0, %c0_0, %c0_1] : memref<4x1x64xf32, #tpu.memory_space<vmem>>, vector<4x1x64xf32>
    %c0_2 = arith.constant 0 : index
    %c0_3 = arith.constant 0 : index
    %c0_4 = arith.constant 0 : index
    %1 = vector.load %arg6[%c0_2, %c0_3, %c0_4] : memref<4x1x64xf32, #tpu.memory_space<vmem>>, vector<4x1x64xf32>
    %c0_5 = arith.constant 0 : index
    %c0_6 = arith.constant 0 : index
    %c0_7 = arith.constant 0 : index
    %2 = vector.load %arg0[%c0_5, %c0_6, %c0_7] : memref<2x8x32xf32, #tpu.memory_space<vmem>>, vector<2x8x32xf32>
    %cst = arith.constant 0.000000e+00 : f32
    %3 = vector.broadcast %cst : f32 to vector<2x64xf32>
    %4 = vector.extract_strided_slice %2 {offsets = [0, 0, 0], sizes = [2, 1, 32], strides = [1, 1, 1]} : vector<2x8x32xf32> to vector<2x1x32xf32>
    %5 = vector.shape_cast %4 : vector<2x1x32xf32> to vector<2x32xf32>
    %c0_8 = arith.constant 0 : index
    %c0_9 = arith.constant 0 : index
    %c0_10 = arith.constant 0 : index
    %6 = vector.load %arg1[%c0_8, %c0_9, %c0_10] : memref<4x32x64xf32, #tpu.memory_space<vmem>>, vector<1x32x64xf32>
    %7 = vector.shape_cast %6 : vector<1x32x64xf32> to vector<32x64xf32>
    %cst_11 = arith.constant dense<0.000000e+00> : vector<2x64xf32>
    %8 = tpu.matmul %5, %7, %cst_11 {dimension_numbers = #tpu.dot_dimension_numbers<[1], [0], [0], [1], [0, 0, 1, 1], [], []>} : vector<2x32xf32>, vector<32x64xf32>, vector<2x64xf32> -> vector<2x64xf32>
    %c0_12 = arith.constant 0 : index
    %c0_13 = arith.constant 0 : index
    %c0_14 = arith.constant 0 : index
    %9 = vector.load %arg2[%c0_12, %c0_13, %c0_14] : memref<4x64x64xf32, #tpu.memory_space<vmem>>, vector<1x64x64xf32>
    %10 = vector.shape_cast %9 : vector<1x64x64xf32> to vector<64x64xf32>
    %cst_15 = arith.constant dense<0.000000e+00> : vector<2x64xf32>
    %11 = tpu.matmul %3, %10, %cst_15 {dimension_numbers = #tpu.dot_dimension_numbers<[1], [0], [0], [1], [0, 0, 1, 1], [], []>} : vector<2x64xf32>, vector<64x64xf32>, vector<2x64xf32> -> vector<2x64xf32>
    %12 = arith.addf %8, %11 : vector<2x64xf32>
    %13 = vector.extract_strided_slice %0 {offsets = [0, 0, 0], sizes = [1, 1, 64], strides = [1, 1, 1]} : vector<4x1x64xf32> to vector<1x1x64xf32>
    %14 = vector.shape_cast %13 : vector<1x1x64xf32> to vector<1x64xf32>
    %15 = vector.broadcast %14 : vector<1x64xf32> to vector<2x64xf32>
    %16 = arith.addf %12, %15 : vector<2x64xf32>
    %17 = arith.negf %16 : vector<2x64xf32>
    %18 = math.exp %17 : vector<2x64xf32>
    %cst_16 = arith.constant 1.000000e+00 : f32
    %19 = vector.broadcast %cst_16 : f32 to vector<2x64xf32>
    %20 = arith.addf %19, %18 : vector<2x64xf32>
    %21 = arith.divf %19, %20 : vector<2x64xf32>
    %c1 = arith.constant 1 : index
    %c0_17 = arith.constant 0 : index
    %c0_18 = arith.constant 0 : index
    %22 = vector.load %arg1[%c1, %c0_17, %c0_18] : memref<4x32x64xf32, #tpu.memory_space<vmem>>, vector<1x32x64xf32>
    %23 = vector.shape_cast %22 : vector<1x32x64xf32> to vector<32x64xf32>
    %cst_19 = arith.constant dense<0.000000e+00> : vector<2x64xf32>
    %24 = tpu.matmul %5, %23, %cst_19 {dimension_numbers = #tpu.dot_dimension_numbers<[1], [0], [0], [1], [0, 0, 1, 1], [], []>} : vector<2x32xf32>, vector<32x64xf32>, vector<2x64xf32> -> vector<2x64xf32>
    %c1_20 = arith.constant 1 : index
    %c0_21 = arith.constant 0 : index
    %c0_22 = arith.constant 0 : index
    %25 = vector.load %arg2[%c1_20, %c0_21, %c0_22] : memref<4x64x64xf32, #tpu.memory_space<vmem>>, vector<1x64x64xf32>
    %26 = vector.shape_cast %25 : vector<1x64x64xf32> to vector<64x64xf32>
    %cst_23 = arith.constant dense<0.000000e+00> : vector<2x64xf32>
    %27 = tpu.matmul %3, %26, %cst_23 {dimension_numbers = #tpu.dot_dimension_numbers<[1], [0], [0], [1], [0, 0, 1, 1], [], []>} : vector<2x64xf32>, vector<64x64xf32>, vector<2x64xf32> -> vector<2x64xf32>
    %28 = arith.addf %24, %27 : vector<2x64xf32>
    %29 = vector.extract_strided_slice %0 {offsets = [1, 0, 0], sizes = [1, 1, 64], strides = [1, 1, 1]} : vector<4x1x64xf32> to vector<1x1x64xf32>
    %30 = vector.shape_cast %29 : vector<1x1x64xf32> to vector<1x64xf32>
    %31 = vector.broadcast %30 : vector<1x64xf32> to vector<2x64xf32>
    %32 = arith.addf %28, %31 : vector<2x64xf32>
    %33 = arith.negf %32 : vector<2x64xf32>
    %34 = math.exp %33 : vector<2x64xf32>
    %cst_24 = arith.constant 1.000000e+00 : f32
    %35 = vector.broadcast %cst_24 : f32 to vector<2x64xf32>
    %36 = arith.addf %35, %34 : vector<2x64xf32>
    %37 = arith.divf %35, %36 : vector<2x64xf32>
    %c2 = arith.constant 2 : index
    %c0_25 = arith.constant 0 : index
    %c0_26 = arith.constant 0 : index
    %38 = vector.load %arg1[%c2, %c0_25, %c0_26] : memref<4x32x64xf32, #tpu.memory_space<vmem>>, vector<1x32x64xf32>
    %39 = vector.shape_cast %38 : vector<1x32x64xf32> to vector<32x64xf32>
    %cst_27 = arith.constant dense<0.000000e+00> : vector<2x64xf32>
    %40 = tpu.matmul %5, %39, %cst_27 {dimension_numbers = #tpu.dot_dimension_numbers<[1], [0], [0], [1], [0, 0, 1, 1], [], []>} : vector<2x32xf32>, vector<32x64xf32>, vector<2x64xf32> -> vector<2x64xf32>
    %c2_28 = arith.constant 2 : index
    %c0_29 = arith.constant 0 : index
    %c0_30 = arith.constant 0 : index
    %41 = vector.load %arg2[%c2_28, %c0_29, %c0_30] : memref<4x64x64xf32, #tpu.memory_space<vmem>>, vector<1x64x64xf32>
    %42 = vector.shape_cast %41 : vector<1x64x64xf32> to vector<64x64xf32>
    %cst_31 = arith.constant dense<0.000000e+00> : vector<2x64xf32>
    %43 = tpu.matmul %3, %42, %cst_31 {dimension_numbers = #tpu.dot_dimension_numbers<[1], [0], [0], [1], [0, 0, 1, 1], [], []>} : vector<2x64xf32>, vector<64x64xf32>, vector<2x64xf32> -> vector<2x64xf32>
    %44 = arith.addf %40, %43 : vector<2x64xf32>
    %45 = vector.extract_strided_slice %0 {offsets = [2, 0, 0], sizes = [1, 1, 64], strides = [1, 1, 1]} : vector<4x1x64xf32> to vector<1x1x64xf32>
    %46 = vector.shape_cast %45 : vector<1x1x64xf32> to vector<1x64xf32>
    %47 = vector.broadcast %46 : vector<1x64xf32> to vector<2x64xf32>
    %48 = arith.addf %44, %47 : vector<2x64xf32>
    %49 = math.tanh %48 : vector<2x64xf32>
    %c3 = arith.constant 3 : index
    %c0_32 = arith.constant 0 : index
    %c0_33 = arith.constant 0 : index
    %50 = vector.load %arg1[%c3, %c0_32, %c0_33] : memref<4x32x64xf32, #tpu.memory_space<vmem>>, vector<1x32x64xf32>
    %51 = vector.shape_cast %50 : vector<1x32x64xf32> to vector<32x64xf32>
    %cst_34 = arith.constant dense<0.000000e+00> : vector<2x64xf32>
    %52 = tpu.matmul %5, %51, %cst_34 {dimension_numbers = #tpu.dot_dimension_numbers<[1], [0], [0], [1], [0, 0, 1, 1], [], []>} : vector<2x32xf32>, vector<32x64xf32>, vector<2x64xf32> -> vector<2x64xf32>
    %c3_35 = arith.constant 3 : index
    %c0_36 = arith.constant 0 : index
    %c0_37 = arith.constant 0 : index
    %53 = vector.load %arg2[%c3_35, %c0_36, %c0_37] : memref<4x64x64xf32, #tpu.memory_space<vmem>>, vector<1x64x64xf32>
    %54 = vector.shape_cast %53 : vector<1x64x64xf32> to vector<64x64xf32>
    %cst_38 = arith.constant dense<0.000000e+00> : vector<2x64xf32>
    %55 = tpu.matmul %3, %54, %cst_38 {dimension_numbers = #tpu.dot_dimension_numbers<[1], [0], [0], [1], [0, 0, 1, 1], [], []>} : vector<2x64xf32>, vector<64x64xf32>, vector<2x64xf32> -> vector<2x64xf32>
    %56 = arith.addf %52, %55 : vector<2x64xf32>
    %57 = vector.extract_strided_slice %0 {offsets = [3, 0, 0], sizes = [1, 1, 64], strides = [1, 1, 1]} : vector<4x1x64xf32> to vector<1x1x64xf32>
    %58 = vector.shape_cast %57 : vector<1x1x64xf32> to vector<1x64xf32>
    %59 = vector.broadcast %58 : vector<1x64xf32> to vector<2x64xf32>
    %60 = arith.addf %56, %59 : vector<2x64xf32>
    %61 = arith.negf %60 : vector<2x64xf32>
    %62 = math.exp %61 : vector<2x64xf32>
    %cst_39 = arith.constant 1.000000e+00 : f32
    %63 = vector.broadcast %cst_39 : f32 to vector<2x64xf32>
    %64 = arith.addf %63, %62 : vector<2x64xf32>
    %65 = arith.divf %63, %64 : vector<2x64xf32>
    %66 = arith.mulf %37, %3 : vector<2x64xf32>
    %67 = arith.mulf %21, %49 : vector<2x64xf32>
    %68 = arith.addf %66, %67 : vector<2x64xf32>
    %69 = math.tanh %68 : vector<2x64xf32>
    %70 = arith.mulf %65, %69 : vector<2x64xf32>
    %c0_40 = arith.constant 0 : index
    %c0_41 = arith.constant 0 : index
    %c0_42 = arith.constant 0 : index
    %71 = vector.load %arg4[%c0_40, %c0_41, %c0_42] : memref<4x64x64xf32, #tpu.memory_space<vmem>>, vector<1x64x64xf32>
    %72 = vector.shape_cast %71 : vector<1x64x64xf32> to vector<64x64xf32>
    %cst_43 = arith.constant dense<0.000000e+00> : vector<2x64xf32>
    %73 = tpu.matmul %70, %72, %cst_43 {dimension_numbers = #tpu.dot_dimension_numbers<[1], [0], [0], [1], [0, 0, 1, 1], [], []>} : vector<2x64xf32>, vector<64x64xf32>, vector<2x64xf32> -> vector<2x64xf32>
    %c0_44 = arith.constant 0 : index
    %c0_45 = arith.constant 0 : index
    %c0_46 = arith.constant 0 : index
    %74 = vector.load %arg5[%c0_44, %c0_45, %c0_46] : memref<4x64x64xf32, #tpu.memory_space<vmem>>, vector<1x64x64xf32>
    %75 = vector.shape_cast %74 : vector<1x64x64xf32> to vector<64x64xf32>
    %cst_47 = arith.constant dense<0.000000e+00> : vector<2x64xf32>
    %76 = tpu.matmul %3, %75, %cst_47 {dimension_numbers = #tpu.dot_dimension_numbers<[1], [0], [0], [1], [0, 0, 1, 1], [], []>} : vector<2x64xf32>, vector<64x64xf32>, vector<2x64xf32> -> vector<2x64xf32>
    %77 = arith.addf %73, %76 : vector<2x64xf32>
    %78 = vector.extract_strided_slice %1 {offsets = [0, 0, 0], sizes = [1, 1, 64], strides = [1, 1, 1]} : vector<4x1x64xf32> to vector<1x1x64xf32>
    %79 = vector.shape_cast %78 : vector<1x1x64xf32> to vector<1x64xf32>
    %80 = vector.broadcast %79 : vector<1x64xf32> to vector<2x64xf32>
    %81 = arith.addf %77, %80 : vector<2x64xf32>
    %82 = arith.negf %81 : vector<2x64xf32>
    %83 = math.exp %82 : vector<2x64xf32>
    %cst_48 = arith.constant 1.000000e+00 : f32
    %84 = vector.broadcast %cst_48 : f32 to vector<2x64xf32>
    %85 = arith.addf %84, %83 : vector<2x64xf32>
    %86 = arith.divf %84, %85 : vector<2x64xf32>
    %c1_49 = arith.constant 1 : index
    %c0_50 = arith.constant 0 : index
    %c0_51 = arith.constant 0 : index
    %87 = vector.load %arg4[%c1_49, %c0_50, %c0_51] : memref<4x64x64xf32, #tpu.memory_space<vmem>>, vector<1x64x64xf32>
    %88 = vector.shape_cast %87 : vector<1x64x64xf32> to vector<64x64xf32>
    %cst_52 = arith.constant dense<0.000000e+00> : vector<2x64xf32>
    %89 = tpu.matmul %70, %88, %cst_52 {dimension_numbers = #tpu.dot_dimension_numbers<[1], [0], [0], [1], [0, 0, 1, 1], [], []>} : vector<2x64xf32>, vector<64x64xf32>, vector<2x64xf32> -> vector<2x64xf32>
    %c1_53 = arith.constant 1 : index
    %c0_54 = arith.constant 0 : index
    %c0_55 = arith.constant 0 : index
    %90 = vector.load %arg5[%c1_53, %c0_54, %c0_55] : memref<4x64x64xf32, #tpu.memory_space<vmem>>, vector<1x64x64xf32>
    %91 = vector.shape_cast %90 : vector<1x64x64xf32> to vector<64x64xf32>
    %cst_56 = arith.constant dense<0.000000e+00> : vector<2x64xf32>
    %92 = tpu.matmul %3, %91, %cst_56 {dimension_numbers = #tpu.dot_dimension_numbers<[1], [0], [0], [1], [0, 0, 1, 1], [], []>} : vector<2x64xf32>, vector<64x64xf32>, vector<2x64xf32> -> vector<2x64xf32>
    %93 = arith.addf %89, %92 : vector<2x64xf32>
    %94 = vector.extract_strided_slice %1 {offsets = [1, 0, 0], sizes = [1, 1, 64], strides = [1, 1, 1]} : vector<4x1x64xf32> to vector<1x1x64xf32>
    %95 = vector.shape_cast %94 : vector<1x1x64xf32> to vector<1x64xf32>
    %96 = vector.broadcast %95 : vector<1x64xf32> to vector<2x64xf32>
    %97 = arith.addf %93, %96 : vector<2x64xf32>
    %98 = arith.negf %97 : vector<2x64xf32>
    %99 = math.exp %98 : vector<2x64xf32>
    %cst_57 = arith.constant 1.000000e+00 : f32
    %100 = vector.broadcast %cst_57 : f32 to vector<2x64xf32>
    %101 = arith.addf %100, %99 : vector<2x64xf32>
    %102 = arith.divf %100, %101 : vector<2x64xf32>
    %c2_58 = arith.constant 2 : index
    %c0_59 = arith.constant 0 : index
    %c0_60 = arith.constant 0 : index
    %103 = vector.load %arg4[%c2_58, %c0_59, %c0_60] : memref<4x64x64xf32, #tpu.memory_space<vmem>>, vector<1x64x64xf32>
    %104 = vector.shape_cast %103 : vector<1x64x64xf32> to vector<64x64xf32>
    %cst_61 = arith.constant dense<0.000000e+00> : vector<2x64xf32>
    %105 = tpu.matmul %70, %104, %cst_61 {dimension_numbers = #tpu.dot_dimension_numbers<[1], [0], [0], [1], [0, 0, 1, 1], [], []>} : vector<2x64xf32>, vector<64x64xf32>, vector<2x64xf32> -> vector<2x64xf32>
    %c2_62 = arith.constant 2 : index
    %c0_63 = arith.constant 0 : index
    %c0_64 = arith.constant 0 : index
    %106 = vector.load %arg5[%c2_62, %c0_63, %c0_64] : memref<4x64x64xf32, #tpu.memory_space<vmem>>, vector<1x64x64xf32>
    %107 = vector.shape_cast %106 : vector<1x64x64xf32> to vector<64x64xf32>
    %cst_65 = arith.constant dense<0.000000e+00> : vector<2x64xf32>
    %108 = tpu.matmul %3, %107, %cst_65 {dimension_numbers = #tpu.dot_dimension_numbers<[1], [0], [0], [1], [0, 0, 1, 1], [], []>} : vector<2x64xf32>, vector<64x64xf32>, vector<2x64xf32> -> vector<2x64xf32>
    %109 = arith.addf %105, %108 : vector<2x64xf32>
    %110 = vector.extract_strided_slice %1 {offsets = [2, 0, 0], sizes = [1, 1, 64], strides = [1, 1, 1]} : vector<4x1x64xf32> to vector<1x1x64xf32>
    %111 = vector.shape_cast %110 : vector<1x1x64xf32> to vector<1x64xf32>
    %112 = vector.broadcast %111 : vector<1x64xf32> to vector<2x64xf32>
    %113 = arith.addf %109, %112 : vector<2x64xf32>
    %114 = math.tanh %113 : vector<2x64xf32>
    %c3_66 = arith.constant 3 : index
    %c0_67 = arith.constant 0 : index
    %c0_68 = arith.constant 0 : index
    %115 = vector.load %arg4[%c3_66, %c0_67, %c0_68] : memref<4x64x64xf32, #tpu.memory_space<vmem>>, vector<1x64x64xf32>
    %116 = vector.shape_cast %115 : vector<1x64x64xf32> to vector<64x64xf32>
    %cst_69 = arith.constant dense<0.000000e+00> : vector<2x64xf32>
    %117 = tpu.matmul %70, %116, %cst_69 {dimension_numbers = #tpu.dot_dimension_numbers<[1], [0], [0], [1], [0, 0, 1, 1], [], []>} : vector<2x64xf32>, vector<64x64xf32>, vector<2x64xf32> -> vector<2x64xf32>
    %c3_70 = arith.constant 3 : index
    %c0_71 = arith.constant 0 : index
    %c0_72 = arith.constant 0 : index
    %118 = vector.load %arg5[%c3_70, %c0_71, %c0_72] : memref<4x64x64xf32, #tpu.memory_space<vmem>>, vector<1x64x64xf32>
    %119 = vector.shape_cast %118 : vector<1x64x64xf32> to vector<64x64xf32>
    %cst_73 = arith.constant dense<0.000000e+00> : vector<2x64xf32>
    %120 = tpu.matmul %3, %119, %cst_73 {dimension_numbers = #tpu.dot_dimension_numbers<[1], [0], [0], [1], [0, 0, 1, 1], [], []>} : vector<2x64xf32>, vector<64x64xf32>, vector<2x64xf32> -> vector<2x64xf32>
    %121 = arith.addf %117, %120 : vector<2x64xf32>
    %122 = vector.extract_strided_slice %1 {offsets = [3, 0, 0], sizes = [1, 1, 64], strides = [1, 1, 1]} : vector<4x1x64xf32> to vector<1x1x64xf32>
    %123 = vector.shape_cast %122 : vector<1x1x64xf32> to vector<1x64xf32>
    %124 = vector.broadcast %123 : vector<1x64xf32> to vector<2x64xf32>
    %125 = arith.addf %121, %124 : vector<2x64xf32>
    %126 = arith.negf %125 : vector<2x64xf32>
    %127 = math.exp %126 : vector<2x64xf32>
    %cst_74 = arith.constant 1.000000e+00 : f32
    %128 = vector.broadcast %cst_74 : f32 to vector<2x64xf32>
    %129 = arith.addf %128, %127 : vector<2x64xf32>
    %130 = arith.divf %128, %129 : vector<2x64xf32>
    %131 = arith.mulf %102, %3 : vector<2x64xf32>
    %132 = arith.mulf %86, %114 : vector<2x64xf32>
    %133 = arith.addf %131, %132 : vector<2x64xf32>
    %134 = math.tanh %133 : vector<2x64xf32>
    %135 = arith.mulf %130, %134 : vector<2x64xf32>
    %136 = vector.extract_strided_slice %2 {offsets = [0, 1, 0], sizes = [2, 1, 32], strides = [1, 1, 1]} : vector<2x8x32xf32> to vector<2x1x32xf32>
    %137 = vector.shape_cast %136 : vector<2x1x32xf32> to vector<2x32xf32>
    %c0_75 = arith.constant 0 : index
    %c0_76 = arith.constant 0 : index
    %c0_77 = arith.constant 0 : index
    %138 = vector.load %arg1[%c0_75, %c0_76, %c0_77] : memref<4x32x64xf32, #tpu.memory_space<vmem>>, vector<1x32x64xf32>
    %139 = vector.shape_cast %138 : vector<1x32x64xf32> to vector<32x64xf32>
    %cst_78 = arith.constant dense<0.000000e+00> : vector<2x64xf32>
    %140 = tpu.matmul %137, %139, %cst_78 {dimension_numbers = #tpu.dot_dimension_numbers<[1], [0], [0], [1], [0, 0, 1, 1], [], []>} : vector<2x32xf32>, vector<32x64xf32>, vector<2x64xf32> -> vector<2x64xf32>
    %c0_79 = arith.constant 0 : index
    %c0_80 = arith.constant 0 : index
    %c0_81 = arith.constant 0 : index
    %141 = vector.load %arg2[%c0_79, %c0_80, %c0_81] : memref<4x64x64xf32, #tpu.memory_space<vmem>>, vector<1x64x64xf32>
    %142 = vector.shape_cast %141 : vector<1x64x64xf32> to vector<64x64xf32>
    %cst_82 = arith.constant dense<0.000000e+00> : vector<2x64xf32>
    %143 = tpu.matmul %70, %142, %cst_82 {dimension_numbers = #tpu.dot_dimension_numbers<[1], [0], [0], [1], [0, 0, 1, 1], [], []>} : vector<2x64xf32>, vector<64x64xf32>, vector<2x64xf32> -> vector<2x64xf32>
    %144 = arith.addf %140, %143 : vector<2x64xf32>
    %145 = vector.extract_strided_slice %0 {offsets = [0, 0, 0], sizes = [1, 1, 64], strides = [1, 1, 1]} : vector<4x1x64xf32> to vector<1x1x64xf32>
    %146 = vector.shape_cast %145 : vector<1x1x64xf32> to vector<1x64xf32>
    %147 = vector.broadcast %146 : vector<1x64xf32> to vector<2x64xf32>
    %148 = arith.addf %144, %147 : vector<2x64xf32>
    %149 = arith.negf %148 : vector<2x64xf32>
    %150 = math.exp %149 : vector<2x64xf32>
    %cst_83 = arith.constant 1.000000e+00 : f32
    %151 = vector.broadcast %cst_83 : f32 to vector<2x64xf32>
    %152 = arith.addf %151, %150 : vector<2x64xf32>
    %153 = arith.divf %151, %152 : vector<2x64xf32>
    %c1_84 = arith.constant 1 : index
    %c0_85 = arith.constant 0 : index
    %c0_86 = arith.constant 0 : index
    %154 = vector.load %arg1[%c1_84, %c0_85, %c0_86] : memref<4x32x64xf32, #tpu.memory_space<vmem>>, vector<1x32x64xf32>
    %155 = vector.shape_cast %154 : vector<1x32x64xf32> to vector<32x64xf32>
    %cst_87 = arith.constant dense<0.000000e+00> : vector<2x64xf32>
    %156 = tpu.matmul %137, %155, %cst_87 {dimension_numbers = #tpu.dot_dimension_numbers<[1], [0], [0], [1], [0, 0, 1, 1], [], []>} : vector<2x32xf32>, vector<32x64xf32>, vector<2x64xf32> -> vector<2x64xf32>
    %c1_88 = arith.constant 1 : index
    %c0_89 = arith.constant 0 : index
    %c0_90 = arith.constant 0 : index
    %157 = vector.load %arg2[%c1_88, %c0_89, %c0_90] : memref<4x64x64xf32, #tpu.memory_space<vmem>>, vector<1x64x64xf32>
    %158 = vector.shape_cast %157 : vector<1x64x64xf32> to vector<64x64xf32>
    %cst_91 = arith.constant dense<0.000000e+00> : vector<2x64xf32>
    %159 = tpu.matmul %70, %158, %cst_91 {dimension_numbers = #tpu.dot_dimension_numbers<[1], [0], [0], [1], [0, 0, 1, 1], [], []>} : vector<2x64xf32>, vector<64x64xf32>, vector<2x64xf32> -> vector<2x64xf32>
    %160 = arith.addf %156, %159 : vector<2x64xf32>
    %161 = vector.extract_strided_slice %0 {offsets = [1, 0, 0], sizes = [1, 1, 64], strides = [1, 1, 1]} : vector<4x1x64xf32> to vector<1x1x64xf32>
    %162 = vector.shape_cast %161 : vector<1x1x64xf32> to vector<1x64xf32>
    %163 = vector.broadcast %162 : vector<1x64xf32> to vector<2x64xf32>
    %164 = arith.addf %160, %163 : vector<2x64xf32>
    %165 = arith.negf %164 : vector<2x64xf32>
    %166 = math.exp %165 : vector<2x64xf32>
    %cst_92 = arith.constant 1.000000e+00 : f32
    %167 = vector.broadcast %cst_92 : f32 to vector<2x64xf32>
    %168 = arith.addf %167, %166 : vector<2x64xf32>
    %169 = arith.divf %167, %168 : vector<2x64xf32>
    %c2_93 = arith.constant 2 : index
    %c0_94 = arith.constant 0 : index
    %c0_95 = arith.constant 0 : index
    %170 = vector.load %arg1[%c2_93, %c0_94, %c0_95] : memref<4x32x64xf32, #tpu.memory_space<vmem>>, vector<1x32x64xf32>
    %171 = vector.shape_cast %170 : vector<1x32x64xf32> to vector<32x64xf32>
    %cst_96 = arith.constant dense<0.000000e+00> : vector<2x64xf32>
    %172 = tpu.matmul %137, %171, %cst_96 {dimension_numbers = #tpu.dot_dimension_numbers<[1], [0], [0], [1], [0, 0, 1, 1], [], []>} : vector<2x32xf32>, vector<32x64xf32>, vector<2x64xf32> -> vector<2x64xf32>
    %c2_97 = arith.constant 2 : index
    %c0_98 = arith.constant 0 : index
    %c0_99 = arith.constant 0 : index
    %173 = vector.load %arg2[%c2_97, %c0_98, %c0_99] : memref<4x64x64xf32, #tpu.memory_space<vmem>>, vector<1x64x64xf32>
    %174 = vector.shape_cast %173 : vector<1x64x64xf32> to vector<64x64xf32>
    %cst_100 = arith.constant dense<0.000000e+00> : vector<2x64xf32>
    %175 = tpu.matmul %70, %174, %cst_100 {dimension_numbers = #tpu.dot_dimension_numbers<[1], [0], [0], [1], [0, 0, 1, 1], [], []>} : vector<2x64xf32>, vector<64x64xf32>, vector<2x64xf32> -> vector<2x64xf32>
    %176 = arith.addf %172, %175 : vector<2x64xf32>
    %177 = vector.extract_strided_slice %0 {offsets = [2, 0, 0], sizes = [1, 1, 64], strides = [1, 1, 1]} : vector<4x1x64xf32> to vector<1x1x64xf32>
    %178 = vector.shape_cast %177 : vector<1x1x64xf32> to vector<1x64xf32>
    %179 = vector.broadcast %178 : vector<1x64xf32> to vector<2x64xf32>
    %180 = arith.addf %176, %179 : vector<2x64xf32>
    %181 = math.tanh %180 : vector<2x64xf32>
    %c3_101 = arith.constant 3 : index
    %c0_102 = arith.constant 0 : index
    %c0_103 = arith.constant 0 : index
    %182 = vector.load %arg1[%c3_101, %c0_102, %c0_103] : memref<4x32x64xf32, #tpu.memory_space<vmem>>, vector<1x32x64xf32>
    %183 = vector.shape_cast %182 : vector<1x32x64xf32> to vector<32x64xf32>
    %cst_104 = arith.constant dense<0.000000e+00> : vector<2x64xf32>
    %184 = tpu.matmul %137, %183, %cst_104 {dimension_numbers = #tpu.dot_dimension_numbers<[1], [0], [0], [1], [0, 0, 1, 1], [], []>} : vector<2x32xf32>, vector<32x64xf32>, vector<2x64xf32> -> vector<2x64xf32>
    %c3_105 = arith.constant 3 : index
    %c0_106 = arith.constant 0 : index
    %c0_107 = arith.constant 0 : index
    %185 = vector.load %arg2[%c3_105, %c0_106, %c0_107] : memref<4x64x64xf32, #tpu.memory_space<vmem>>, vector<1x64x64xf32>
    %186 = vector.shape_cast %185 : vector<1x64x64xf32> to vector<64x64xf32>
    %cst_108 = arith.constant dense<0.000000e+00> : vector<2x64xf32>
    %187 = tpu.matmul %70, %186, %cst_108 {dimension_numbers = #tpu.dot_dimension_numbers<[1], [0], [0], [1], [0, 0, 1, 1], [], []>} : vector<2x64xf32>, vector<64x64xf32>, vector<2x64xf32> -> vector<2x64xf32>
    %188 = arith.addf %184, %187 : vector<2x64xf32>
    %189 = vector.extract_strided_slice %0 {offsets = [3, 0, 0], sizes = [1, 1, 64], strides = [1, 1, 1]} : vector<4x1x64xf32> to vector<1x1x64xf32>
    %190 = vector.shape_cast %189 : vector<1x1x64xf32> to vector<1x64xf32>
    %191 = vector.broadcast %190 : vector<1x64xf32> to vector<2x64xf32>
    %192 = arith.addf %188, %191 : vector<2x64xf32>
    %193 = arith.negf %192 : vector<2x64xf32>
    %194 = math.exp %193 : vector<2x64xf32>
    %cst_109 = arith.constant 1.000000e+00 : f32
    %195 = vector.broadcast %cst_109 : f32 to vector<2x64xf32>
    %196 = arith.addf %195, %194 : vector<2x64xf32>
    %197 = arith.divf %195, %196 : vector<2x64xf32>
    %198 = arith.mulf %169, %68 : vector<2x64xf32>
    %199 = arith.mulf %153, %181 : vector<2x64xf32>
    %200 = arith.addf %198, %199 : vector<2x64xf32>
    %201 = math.tanh %200 : vector<2x64xf32>
    %202 = arith.mulf %197, %201 : vector<2x64xf32>
    %c0_110 = arith.constant 0 : index
    %c0_111 = arith.constant 0 : index
    %c0_112 = arith.constant 0 : index
    %203 = vector.load %arg4[%c0_110, %c0_111, %c0_112] : memref<4x64x64xf32, #tpu.memory_space<vmem>>, vector<1x64x64xf32>
    %204 = vector.shape_cast %203 : vector<1x64x64xf32> to vector<64x64xf32>
    %cst_113 = arith.constant dense<0.000000e+00> : vector<2x64xf32>
    %205 = tpu.matmul %202, %204, %cst_113 {dimension_numbers = #tpu.dot_dimension_numbers<[1], [0], [0], [1], [0, 0, 1, 1], [], []>} : vector<2x64xf32>, vector<64x64xf32>, vector<2x64xf32> -> vector<2x64xf32>
    %c0_114 = arith.constant 0 : index
    %c0_115 = arith.constant 0 : index
    %c0_116 = arith.constant 0 : index
    %206 = vector.load %arg5[%c0_114, %c0_115, %c0_116] : memref<4x64x64xf32, #tpu.memory_space<vmem>>, vector<1x64x64xf32>
    %207 = vector.shape_cast %206 : vector<1x64x64xf32> to vector<64x64xf32>
    %cst_117 = arith.constant dense<0.000000e+00> : vector<2x64xf32>
    %208 = tpu.matmul %135, %207, %cst_117 {dimension_numbers = #tpu.dot_dimension_numbers<[1], [0], [0], [1], [0, 0, 1, 1], [], []>} : vector<2x64xf32>, vector<64x64xf32>, vector<2x64xf32> -> vector<2x64xf32>
    %209 = arith.addf %205, %208 : vector<2x64xf32>
    %210 = vector.extract_strided_slice %1 {offsets = [0, 0, 0], sizes = [1, 1, 64], strides = [1, 1, 1]} : vector<4x1x64xf32> to vector<1x1x64xf32>
    %211 = vector.shape_cast %210 : vector<1x1x64xf32> to vector<1x64xf32>
    %212 = vector.broadcast %211 : vector<1x64xf32> to vector<2x64xf32>
    %213 = arith.addf %209, %212 : vector<2x64xf32>
    %214 = arith.negf %213 : vector<2x64xf32>
    %215 = math.exp %214 : vector<2x64xf32>
    %cst_118 = arith.constant 1.000000e+00 : f32
    %216 = vector.broadcast %cst_118 : f32 to vector<2x64xf32>
    %217 = arith.addf %216, %215 : vector<2x64xf32>
    %218 = arith.divf %216, %217 : vector<2x64xf32>
    %c1_119 = arith.constant 1 : index
    %c0_120 = arith.constant 0 : index
    %c0_121 = arith.constant 0 : index
    %219 = vector.load %arg4[%c1_119, %c0_120, %c0_121] : memref<4x64x64xf32, #tpu.memory_space<vmem>>, vector<1x64x64xf32>
    %220 = vector.shape_cast %219 : vector<1x64x64xf32> to vector<64x64xf32>
    %cst_122 = arith.constant dense<0.000000e+00> : vector<2x64xf32>
    %221 = tpu.matmul %202, %220, %cst_122 {dimension_numbers = #tpu.dot_dimension_numbers<[1], [0], [0], [1], [0, 0, 1, 1], [], []>} : vector<2x64xf32>, vector<64x64xf32>, vector<2x64xf32> -> vector<2x64xf32>
    %c1_123 = arith.constant 1 : index
    %c0_124 = arith.constant 0 : index
    %c0_125 = arith.constant 0 : index
    %222 = vector.load %arg5[%c1_123, %c0_124, %c0_125] : memref<4x64x64xf32, #tpu.memory_space<vmem>>, vector<1x64x64xf32>
    %223 = vector.shape_cast %222 : vector<1x64x64xf32> to vector<64x64xf32>
    %cst_126 = arith.constant dense<0.000000e+00> : vector<2x64xf32>
    %224 = tpu.matmul %135, %223, %cst_126 {dimension_numbers = #tpu.dot_dimension_numbers<[1], [0], [0], [1], [0, 0, 1, 1], [], []>} : vector<2x64xf32>, vector<64x64xf32>, vector<2x64xf32> -> vector<2x64xf32>
    %225 = arith.addf %221, %224 : vector<2x64xf32>
    %226 = vector.extract_strided_slice %1 {offsets = [1, 0, 0], sizes = [1, 1, 64], strides = [1, 1, 1]} : vector<4x1x64xf32> to vector<1x1x64xf32>
    %227 = vector.shape_cast %226 : vector<1x1x64xf32> to vector<1x64xf32>
    %228 = vector.broadcast %227 : vector<1x64xf32> to vector<2x64xf32>
    %229 = arith.addf %225, %228 : vector<2x64xf32>
    %230 = arith.negf %229 : vector<2x64xf32>
    %231 = math.exp %230 : vector<2x64xf32>
    %cst_127 = arith.constant 1.000000e+00 : f32
    %232 = vector.broadcast %cst_127 : f32 to vector<2x64xf32>
    %233 = arith.addf %232, %231 : vector<2x64xf32>
    %234 = arith.divf %232, %233 : vector<2x64xf32>
    %c2_128 = arith.constant 2 : index
    %c0_129 = arith.constant 0 : index
    %c0_130 = arith.constant 0 : index
    %235 = vector.load %arg4[%c2_128, %c0_129, %c0_130] : memref<4x64x64xf32, #tpu.memory_space<vmem>>, vector<1x64x64xf32>
    %236 = vector.shape_cast %235 : vector<1x64x64xf32> to vector<64x64xf32>
    %cst_131 = arith.constant dense<0.000000e+00> : vector<2x64xf32>
    %237 = tpu.matmul %202, %236, %cst_131 {dimension_numbers = #tpu.dot_dimension_numbers<[1], [0], [0], [1], [0, 0, 1, 1], [], []>} : vector<2x64xf32>, vector<64x64xf32>, vector<2x64xf32> -> vector<2x64xf32>
    %c2_132 = arith.constant 2 : index
    %c0_133 = arith.constant 0 : index
    %c0_134 = arith.constant 0 : index
    %238 = vector.load %arg5[%c2_132, %c0_133, %c0_134] : memref<4x64x64xf32, #tpu.memory_space<vmem>>, vector<1x64x64xf32>
    %239 = vector.shape_cast %238 : vector<1x64x64xf32> to vector<64x64xf32>
    %cst_135 = arith.constant dense<0.000000e+00> : vector<2x64xf32>
    %240 = tpu.matmul %135, %239, %cst_135 {dimension_numbers = #tpu.dot_dimension_numbers<[1], [0], [0], [1], [0, 0, 1, 1], [], []>} : vector<2x64xf32>, vector<64x64xf32>, vector<2x64xf32> -> vector<2x64xf32>
    %241 = arith.addf %237, %240 : vector<2x64xf32>
    %242 = vector.extract_strided_slice %1 {offsets = [2, 0, 0], sizes = [1, 1, 64], strides = [1, 1, 1]} : vector<4x1x64xf32> to vector<1x1x64xf32>
    %243 = vector.shape_cast %242 : vector<1x1x64xf32> to vector<1x64xf32>
    %244 = vector.broadcast %243 : vector<1x64xf32> to vector<2x64xf32>
    %245 = arith.addf %241, %244 : vector<2x64xf32>
    %246 = math.tanh %245 : vector<2x64xf32>
    %c3_136 = arith.constant 3 : index
    %c0_137 = arith.constant 0 : index
    %c0_138 = arith.constant 0 : index
    %247 = vector.load %arg4[%c3_136, %c0_137, %c0_138] : memref<4x64x64xf32, #tpu.memory_space<vmem>>, vector<1x64x64xf32>
    %248 = vector.shape_cast %247 : vector<1x64x64xf32> to vector<64x64xf32>
    %cst_139 = arith.constant dense<0.000000e+00> : vector<2x64xf32>
    %249 = tpu.matmul %202, %248, %cst_139 {dimension_numbers = #tpu.dot_dimension_numbers<[1], [0], [0], [1], [0, 0, 1, 1], [], []>} : vector<2x64xf32>, vector<64x64xf32>, vector<2x64xf32> -> vector<2x64xf32>
    %c3_140 = arith.constant 3 : index
    %c0_141 = arith.constant 0 : index
    %c0_142 = arith.constant 0 : index
    %250 = vector.load %arg5[%c3_140, %c0_141, %c0_142] : memref<4x64x64xf32, #tpu.memory_space<vmem>>, vector<1x64x64xf32>
    %251 = vector.shape_cast %250 : vector<1x64x64xf32> to vector<64x64xf32>
    %cst_143 = arith.constant dense<0.000000e+00> : vector<2x64xf32>
    %252 = tpu.matmul %135, %251, %cst_143 {dimension_numbers = #tpu.dot_dimension_numbers<[1], [0], [0], [1], [0, 0, 1, 1], [], []>} : vector<2x64xf32>, vector<64x64xf32>, vector<2x64xf32> -> vector<2x64xf32>
    %253 = arith.addf %249, %252 : vector<2x64xf32>
    %254 = vector.extract_strided_slice %1 {offsets = [3, 0, 0], sizes = [1, 1, 64], strides = [1, 1, 1]} : vector<4x1x64xf32> to vector<1x1x64xf32>
    %255 = vector.shape_cast %254 : vector<1x1x64xf32> to vector<1x64xf32>
    %256 = vector.broadcast %255 : vector<1x64xf32> to vector<2x64xf32>
    %257 = arith.addf %253, %256 : vector<2x64xf32>
    %258 = arith.negf %257 : vector<2x64xf32>
    %259 = math.exp %258 : vector<2x64xf32>
    %cst_144 = arith.constant 1.000000e+00 : f32
    %260 = vector.broadcast %cst_144 : f32 to vector<2x64xf32>
    %261 = arith.addf %260, %259 : vector<2x64xf32>
    %262 = arith.divf %260, %261 : vector<2x64xf32>
    %263 = arith.mulf %234, %133 : vector<2x64xf32>
    %264 = arith.mulf %218, %246 : vector<2x64xf32>
    %265 = arith.addf %263, %264 : vector<2x64xf32>
    %266 = math.tanh %265 : vector<2x64xf32>
    %267 = arith.mulf %262, %266 : vector<2x64xf32>
    %268 = vector.extract_strided_slice %2 {offsets = [0, 2, 0], sizes = [2, 1, 32], strides = [1, 1, 1]} : vector<2x8x32xf32> to vector<2x1x32xf32>
    %269 = vector.shape_cast %268 : vector<2x1x32xf32> to vector<2x32xf32>
    %c0_145 = arith.constant 0 : index
    %c0_146 = arith.constant 0 : index
    %c0_147 = arith.constant 0 : index
    %270 = vector.load %arg1[%c0_145, %c0_146, %c0_147] : memref<4x32x64xf32, #tpu.memory_space<vmem>>, vector<1x32x64xf32>
    %271 = vector.shape_cast %270 : vector<1x32x64xf32> to vector<32x64xf32>
    %cst_148 = arith.constant dense<0.000000e+00> : vector<2x64xf32>
    %272 = tpu.matmul %269, %271, %cst_148 {dimension_numbers = #tpu.dot_dimension_numbers<[1], [0], [0], [1], [0, 0, 1, 1], [], []>} : vector<2x32xf32>, vector<32x64xf32>, vector<2x64xf32> -> vector<2x64xf32>
    %c0_149 = arith.constant 0 : index
    %c0_150 = arith.constant 0 : index
    %c0_151 = arith.constant 0 : index
    %273 = vector.load %arg2[%c0_149, %c0_150, %c0_151] : memref<4x64x64xf32, #tpu.memory_space<vmem>>, vector<1x64x64xf32>
    %274 = vector.shape_cast %273 : vector<1x64x64xf32> to vector<64x64xf32>
    %cst_152 = arith.constant dense<0.000000e+00> : vector<2x64xf32>
    %275 = tpu.matmul %202, %274, %cst_152 {dimension_numbers = #tpu.dot_dimension_numbers<[1], [0], [0], [1], [0, 0, 1, 1], [], []>} : vector<2x64xf32>, vector<64x64xf32>, vector<2x64xf32> -> vector<2x64xf32>
    %276 = arith.addf %272, %275 : vector<2x64xf32>
    %277 = vector.extract_strided_slice %0 {offsets = [0, 0, 0], sizes = [1, 1, 64], strides = [1, 1, 1]} : vector<4x1x64xf32> to vector<1x1x64xf32>
    %278 = vector.shape_cast %277 : vector<1x1x64xf32> to vector<1x64xf32>
    %279 = vector.broadcast %278 : vector<1x64xf32> to vector<2x64xf32>
    %280 = arith.addf %276, %279 : vector<2x64xf32>
    %281 = arith.negf %280 : vector<2x64xf32>
    %282 = math.exp %281 : vector<2x64xf32>
    %cst_153 = arith.constant 1.000000e+00 : f32
    %283 = vector.broadcast %cst_153 : f32 to vector<2x64xf32>
    %284 = arith.addf %283, %282 : vector<2x64xf32>
    %285 = arith.divf %283, %284 : vector<2x64xf32>
    %c1_154 = arith.constant 1 : index
    %c0_155 = arith.constant 0 : index
    %c0_156 = arith.constant 0 : index
    %286 = vector.load %arg1[%c1_154, %c0_155, %c0_156] : memref<4x32x64xf32, #tpu.memory_space<vmem>>, vector<1x32x64xf32>
    %287 = vector.shape_cast %286 : vector<1x32x64xf32> to vector<32x64xf32>
    %cst_157 = arith.constant dense<0.000000e+00> : vector<2x64xf32>
    %288 = tpu.matmul %269, %287, %cst_157 {dimension_numbers = #tpu.dot_dimension_numbers<[1], [0], [0], [1], [0, 0, 1, 1], [], []>} : vector<2x32xf32>, vector<32x64xf32>, vector<2x64xf32> -> vector<2x64xf32>
    %c1_158 = arith.constant 1 : index
    %c0_159 = arith.constant 0 : index
    %c0_160 = arith.constant 0 : index
    %289 = vector.load %arg2[%c1_158, %c0_159, %c0_160] : memref<4x64x64xf32, #tpu.memory_space<vmem>>, vector<1x64x64xf32>
    %290 = vector.shape_cast %289 : vector<1x64x64xf32> to vector<64x64xf32>
    %cst_161 = arith.constant dense<0.000000e+00> : vector<2x64xf32>
    %291 = tpu.matmul %202, %290, %cst_161 {dimension_numbers = #tpu.dot_dimension_numbers<[1], [0], [0], [1], [0, 0, 1, 1], [], []>} : vector<2x64xf32>, vector<64x64xf32>, vector<2x64xf32> -> vector<2x64xf32>
    %292 = arith.addf %288, %291 : vector<2x64xf32>
    %293 = vector.extract_strided_slice %0 {offsets = [1, 0, 0], sizes = [1, 1, 64], strides = [1, 1, 1]} : vector<4x1x64xf32> to vector<1x1x64xf32>
    %294 = vector.shape_cast %293 : vector<1x1x64xf32> to vector<1x64xf32>
    %295 = vector.broadcast %294 : vector<1x64xf32> to vector<2x64xf32>
    %296 = arith.addf %292, %295 : vector<2x64xf32>
    %297 = arith.negf %296 : vector<2x64xf32>
    %298 = math.exp %297 : vector<2x64xf32>
    %cst_162 = arith.constant 1.000000e+00 : f32
    %299 = vector.broadcast %cst_162 : f32 to vector<2x64xf32>
    %300 = arith.addf %299, %298 : vector<2x64xf32>
    %301 = arith.divf %299, %300 : vector<2x64xf32>
    %c2_163 = arith.constant 2 : index
    %c0_164 = arith.constant 0 : index
    %c0_165 = arith.constant 0 : index
    %302 = vector.load %arg1[%c2_163, %c0_164, %c0_165] : memref<4x32x64xf32, #tpu.memory_space<vmem>>, vector<1x32x64xf32>
    %303 = vector.shape_cast %302 : vector<1x32x64xf32> to vector<32x64xf32>
    %cst_166 = arith.constant dense<0.000000e+00> : vector<2x64xf32>
    %304 = tpu.matmul %269, %303, %cst_166 {dimension_numbers = #tpu.dot_dimension_numbers<[1], [0], [0], [1], [0, 0, 1, 1], [], []>} : vector<2x32xf32>, vector<32x64xf32>, vector<2x64xf32> -> vector<2x64xf32>
    %c2_167 = arith.constant 2 : index
    %c0_168 = arith.constant 0 : index
    %c0_169 = arith.constant 0 : index
    %305 = vector.load %arg2[%c2_167, %c0_168, %c0_169] : memref<4x64x64xf32, #tpu.memory_space<vmem>>, vector<1x64x64xf32>
    %306 = vector.shape_cast %305 : vector<1x64x64xf32> to vector<64x64xf32>
    %cst_170 = arith.constant dense<0.000000e+00> : vector<2x64xf32>
    %307 = tpu.matmul %202, %306, %cst_170 {dimension_numbers = #tpu.dot_dimension_numbers<[1], [0], [0], [1], [0, 0, 1, 1], [], []>} : vector<2x64xf32>, vector<64x64xf32>, vector<2x64xf32> -> vector<2x64xf32>
    %308 = arith.addf %304, %307 : vector<2x64xf32>
    %309 = vector.extract_strided_slice %0 {offsets = [2, 0, 0], sizes = [1, 1, 64], strides = [1, 1, 1]} : vector<4x1x64xf32> to vector<1x1x64xf32>
    %310 = vector.shape_cast %309 : vector<1x1x64xf32> to vector<1x64xf32>
    %311 = vector.broadcast %310 : vector<1x64xf32> to vector<2x64xf32>
    %312 = arith.addf %308, %311 : vector<2x64xf32>
    %313 = math.tanh %312 : vector<2x64xf32>
    %c3_171 = arith.constant 3 : index
    %c0_172 = arith.constant 0 : index
    %c0_173 = arith.constant 0 : index
    %314 = vector.load %arg1[%c3_171, %c0_172, %c0_173] : memref<4x32x64xf32, #tpu.memory_space<vmem>>, vector<1x32x64xf32>
    %315 = vector.shape_cast %314 : vector<1x32x64xf32> to vector<32x64xf32>
    %cst_174 = arith.constant dense<0.000000e+00> : vector<2x64xf32>
    %316 = tpu.matmul %269, %315, %cst_174 {dimension_numbers = #tpu.dot_dimension_numbers<[1], [0], [0], [1], [0, 0, 1, 1], [], []>} : vector<2x32xf32>, vector<32x64xf32>, vector<2x64xf32> -> vector<2x64xf32>
    %c3_175 = arith.constant 3 : index
    %c0_176 = arith.constant 0 : index
    %c0_177 = arith.constant 0 : index
    %317 = vector.load %arg2[%c3_175, %c0_176, %c0_177] : memref<4x64x64xf32, #tpu.memory_space<vmem>>, vector<1x64x64xf32>
    %318 = vector.shape_cast %317 : vector<1x64x64xf32> to vector<64x64xf32>
    %cst_178 = arith.constant dense<0.000000e+00> : vector<2x64xf32>
    %319 = tpu.matmul %202, %318, %cst_178 {dimension_numbers = #tpu.dot_dimension_numbers<[1], [0], [0], [1], [0, 0, 1, 1], [], []>} : vector<2x64xf32>, vector<64x64xf32>, vector<2x64xf32> -> vector<2x64xf32>
    %320 = arith.addf %316, %319 : vector<2x64xf32>
    %321 = vector.extract_strided_slice %0 {offsets = [3, 0, 0], sizes = [1, 1, 64], strides = [1, 1, 1]} : vector<4x1x64xf32> to vector<1x1x64xf32>
    %322 = vector.shape_cast %321 : vector<1x1x64xf32> to vector<1x64xf32>
    %323 = vector.broadcast %322 : vector<1x64xf32> to vector<2x64xf32>
    %324 = arith.addf %320, %323 : vector<2x64xf32>
    %325 = arith.negf %324 : vector<2x64xf32>
    %326 = math.exp %325 : vector<2x64xf32>
    %cst_179 = arith.constant 1.000000e+00 : f32
    %327 = vector.broadcast %cst_179 : f32 to vector<2x64xf32>
    %328 = arith.addf %327, %326 : vector<2x64xf32>
    %329 = arith.divf %327, %328 : vector<2x64xf32>
    %330 = arith.mulf %301, %200 : vector<2x64xf32>
    %331 = arith.mulf %285, %313 : vector<2x64xf32>
    %332 = arith.addf %330, %331 : vector<2x64xf32>
    %333 = math.tanh %332 : vector<2x64xf32>
    %334 = arith.mulf %329, %333 : vector<2x64xf32>
    %c0_180 = arith.constant 0 : index
    %c0_181 = arith.constant 0 : index
    %c0_182 = arith.constant 0 : index
    %335 = vector.load %arg4[%c0_180, %c0_181, %c0_182] : memref<4x64x64xf32, #tpu.memory_space<vmem>>, vector<1x64x64xf32>
    %336 = vector.shape_cast %335 : vector<1x64x64xf32> to vector<64x64xf32>
    %cst_183 = arith.constant dense<0.000000e+00> : vector<2x64xf32>
    %337 = tpu.matmul %334, %336, %cst_183 {dimension_numbers = #tpu.dot_dimension_numbers<[1], [0], [0], [1], [0, 0, 1, 1], [], []>} : vector<2x64xf32>, vector<64x64xf32>, vector<2x64xf32> -> vector<2x64xf32>
    %c0_184 = arith.constant 0 : index
    %c0_185 = arith.constant 0 : index
    %c0_186 = arith.constant 0 : index
    %338 = vector.load %arg5[%c0_184, %c0_185, %c0_186] : memref<4x64x64xf32, #tpu.memory_space<vmem>>, vector<1x64x64xf32>
    %339 = vector.shape_cast %338 : vector<1x64x64xf32> to vector<64x64xf32>
    %cst_187 = arith.constant dense<0.000000e+00> : vector<2x64xf32>
    %340 = tpu.matmul %267, %339, %cst_187 {dimension_numbers = #tpu.dot_dimension_numbers<[1], [0], [0], [1], [0, 0, 1, 1], [], []>} : vector<2x64xf32>, vector<64x64xf32>, vector<2x64xf32> -> vector<2x64xf32>
    %341 = arith.addf %337, %340 : vector<2x64xf32>
    %342 = vector.extract_strided_slice %1 {offsets = [0, 0, 0], sizes = [1, 1, 64], strides = [1, 1, 1]} : vector<4x1x64xf32> to vector<1x1x64xf32>
    %343 = vector.shape_cast %342 : vector<1x1x64xf32> to vector<1x64xf32>
    %344 = vector.broadcast %343 : vector<1x64xf32> to vector<2x64xf32>
    %345 = arith.addf %341, %344 : vector<2x64xf32>
    %346 = arith.negf %345 : vector<2x64xf32>
    %347 = math.exp %346 : vector<2x64xf32>
    %cst_188 = arith.constant 1.000000e+00 : f32
    %348 = vector.broadcast %cst_188 : f32 to vector<2x64xf32>
    %349 = arith.addf %348, %347 : vector<2x64xf32>
    %350 = arith.divf %348, %349 : vector<2x64xf32>
    %c1_189 = arith.constant 1 : index
    %c0_190 = arith.constant 0 : index
    %c0_191 = arith.constant 0 : index
    %351 = vector.load %arg4[%c1_189, %c0_190, %c0_191] : memref<4x64x64xf32, #tpu.memory_space<vmem>>, vector<1x64x64xf32>
    %352 = vector.shape_cast %351 : vector<1x64x64xf32> to vector<64x64xf32>
    %cst_192 = arith.constant dense<0.000000e+00> : vector<2x64xf32>
    %353 = tpu.matmul %334, %352, %cst_192 {dimension_numbers = #tpu.dot_dimension_numbers<[1], [0], [0], [1], [0, 0, 1, 1], [], []>} : vector<2x64xf32>, vector<64x64xf32>, vector<2x64xf32> -> vector<2x64xf32>
    %c1_193 = arith.constant 1 : index
    %c0_194 = arith.constant 0 : index
    %c0_195 = arith.constant 0 : index
    %354 = vector.load %arg5[%c1_193, %c0_194, %c0_195] : memref<4x64x64xf32, #tpu.memory_space<vmem>>, vector<1x64x64xf32>
    %355 = vector.shape_cast %354 : vector<1x64x64xf32> to vector<64x64xf32>
    %cst_196 = arith.constant dense<0.000000e+00> : vector<2x64xf32>
    %356 = tpu.matmul %267, %355, %cst_196 {dimension_numbers = #tpu.dot_dimension_numbers<[1], [0], [0], [1], [0, 0, 1, 1], [], []>} : vector<2x64xf32>, vector<64x64xf32>, vector<2x64xf32> -> vector<2x64xf32>
    %357 = arith.addf %353, %356 : vector<2x64xf32>
    %358 = vector.extract_strided_slice %1 {offsets = [1, 0, 0], sizes = [1, 1, 64], strides = [1, 1, 1]} : vector<4x1x64xf32> to vector<1x1x64xf32>
    %359 = vector.shape_cast %358 : vector<1x1x64xf32> to vector<1x64xf32>
    %360 = vector.broadcast %359 : vector<1x64xf32> to vector<2x64xf32>
    %361 = arith.addf %357, %360 : vector<2x64xf32>
    %362 = arith.negf %361 : vector<2x64xf32>
    %363 = math.exp %362 : vector<2x64xf32>
    %cst_197 = arith.constant 1.000000e+00 : f32
    %364 = vector.broadcast %cst_197 : f32 to vector<2x64xf32>
    %365 = arith.addf %364, %363 : vector<2x64xf32>
    %366 = arith.divf %364, %365 : vector<2x64xf32>
    %c2_198 = arith.constant 2 : index
    %c0_199 = arith.constant 0 : index
    %c0_200 = arith.constant 0 : index
    %367 = vector.load %arg4[%c2_198, %c0_199, %c0_200] : memref<4x64x64xf32, #tpu.memory_space<vmem>>, vector<1x64x64xf32>
    %368 = vector.shape_cast %367 : vector<1x64x64xf32> to vector<64x64xf32>
    %cst_201 = arith.constant dense<0.000000e+00> : vector<2x64xf32>
    %369 = tpu.matmul %334, %368, %cst_201 {dimension_numbers = #tpu.dot_dimension_numbers<[1], [0], [0], [1], [0, 0, 1, 1], [], []>} : vector<2x64xf32>, vector<64x64xf32>, vector<2x64xf32> -> vector<2x64xf32>
    %c2_202 = arith.constant 2 : index
    %c0_203 = arith.constant 0 : index
    %c0_204 = arith.constant 0 : index
    %370 = vector.load %arg5[%c2_202, %c0_203, %c0_204] : memref<4x64x64xf32, #tpu.memory_space<vmem>>, vector<1x64x64xf32>
    %371 = vector.shape_cast %370 : vector<1x64x64xf32> to vector<64x64xf32>
    %cst_205 = arith.constant dense<0.000000e+00> : vector<2x64xf32>
    %372 = tpu.matmul %267, %371, %cst_205 {dimension_numbers = #tpu.dot_dimension_numbers<[1], [0], [0], [1], [0, 0, 1, 1], [], []>} : vector<2x64xf32>, vector<64x64xf32>, vector<2x64xf32> -> vector<2x64xf32>
    %373 = arith.addf %369, %372 : vector<2x64xf32>
    %374 = vector.extract_strided_slice %1 {offsets = [2, 0, 0], sizes = [1, 1, 64], strides = [1, 1, 1]} : vector<4x1x64xf32> to vector<1x1x64xf32>
    %375 = vector.shape_cast %374 : vector<1x1x64xf32> to vector<1x64xf32>
    %376 = vector.broadcast %375 : vector<1x64xf32> to vector<2x64xf32>
    %377 = arith.addf %373, %376 : vector<2x64xf32>
    %378 = math.tanh %377 : vector<2x64xf32>
    %c3_206 = arith.constant 3 : index
    %c0_207 = arith.constant 0 : index
    %c0_208 = arith.constant 0 : index
    %379 = vector.load %arg4[%c3_206, %c0_207, %c0_208] : memref<4x64x64xf32, #tpu.memory_space<vmem>>, vector<1x64x64xf32>
    %380 = vector.shape_cast %379 : vector<1x64x64xf32> to vector<64x64xf32>
    %cst_209 = arith.constant dense<0.000000e+00> : vector<2x64xf32>
    %381 = tpu.matmul %334, %380, %cst_209 {dimension_numbers = #tpu.dot_dimension_numbers<[1], [0], [0], [1], [0, 0, 1, 1], [], []>} : vector<2x64xf32>, vector<64x64xf32>, vector<2x64xf32> -> vector<2x64xf32>
    %c3_210 = arith.constant 3 : index
    %c0_211 = arith.constant 0 : index
    %c0_212 = arith.constant 0 : index
    %382 = vector.load %arg5[%c3_210, %c0_211, %c0_212] : memref<4x64x64xf32, #tpu.memory_space<vmem>>, vector<1x64x64xf32>
    %383 = vector.shape_cast %382 : vector<1x64x64xf32> to vector<64x64xf32>
    %cst_213 = arith.constant dense<0.000000e+00> : vector<2x64xf32>
    %384 = tpu.matmul %267, %383, %cst_213 {dimension_numbers = #tpu.dot_dimension_numbers<[1], [0], [0], [1], [0, 0, 1, 1], [], []>} : vector<2x64xf32>, vector<64x64xf32>, vector<2x64xf32> -> vector<2x64xf32>
    %385 = arith.addf %381, %384 : vector<2x64xf32>
    %386 = vector.extract_strided_slice %1 {offsets = [3, 0, 0], sizes = [1, 1, 64], strides = [1, 1, 1]} : vector<4x1x64xf32> to vector<1x1x64xf32>
    %387 = vector.shape_cast %386 : vector<1x1x64xf32> to vector<1x64xf32>
    %388 = vector.broadcast %387 : vector<1x64xf32> to vector<2x64xf32>
    %389 = arith.addf %385, %388 : vector<2x64xf32>
    %390 = arith.negf %389 : vector<2x64xf32>
    %391 = math.exp %390 : vector<2x64xf32>
    %cst_214 = arith.constant 1.000000e+00 : f32
    %392 = vector.broadcast %cst_214 : f32 to vector<2x64xf32>
    %393 = arith.addf %392, %391 : vector<2x64xf32>
    %394 = arith.divf %392, %393 : vector<2x64xf32>
    %395 = arith.mulf %366, %265 : vector<2x64xf32>
    %396 = arith.mulf %350, %378 : vector<2x64xf32>
    %397 = arith.addf %395, %396 : vector<2x64xf32>
    %398 = math.tanh %397 : vector<2x64xf32>
    %399 = arith.mulf %394, %398 : vector<2x64xf32>
    %400 = vector.extract_strided_slice %2 {offsets = [0, 3, 0], sizes = [2, 1, 32], strides = [1, 1, 1]} : vector<2x8x32xf32> to vector<2x1x32xf32>
    %401 = vector.shape_cast %400 : vector<2x1x32xf32> to vector<2x32xf32>
    %c0_215 = arith.constant 0 : index
    %c0_216 = arith.constant 0 : index
    %c0_217 = arith.constant 0 : index
    %402 = vector.load %arg1[%c0_215, %c0_216, %c0_217] : memref<4x32x64xf32, #tpu.memory_space<vmem>>, vector<1x32x64xf32>
    %403 = vector.shape_cast %402 : vector<1x32x64xf32> to vector<32x64xf32>
    %cst_218 = arith.constant dense<0.000000e+00> : vector<2x64xf32>
    %404 = tpu.matmul %401, %403, %cst_218 {dimension_numbers = #tpu.dot_dimension_numbers<[1], [0], [0], [1], [0, 0, 1, 1], [], []>} : vector<2x32xf32>, vector<32x64xf32>, vector<2x64xf32> -> vector<2x64xf32>
    %c0_219 = arith.constant 0 : index
    %c0_220 = arith.constant 0 : index
    %c0_221 = arith.constant 0 : index
    %405 = vector.load %arg2[%c0_219, %c0_220, %c0_221] : memref<4x64x64xf32, #tpu.memory_space<vmem>>, vector<1x64x64xf32>
    %406 = vector.shape_cast %405 : vector<1x64x64xf32> to vector<64x64xf32>
    %cst_222 = arith.constant dense<0.000000e+00> : vector<2x64xf32>
    %407 = tpu.matmul %334, %406, %cst_222 {dimension_numbers = #tpu.dot_dimension_numbers<[1], [0], [0], [1], [0, 0, 1, 1], [], []>} : vector<2x64xf32>, vector<64x64xf32>, vector<2x64xf32> -> vector<2x64xf32>
    %408 = arith.addf %404, %407 : vector<2x64xf32>
    %409 = vector.extract_strided_slice %0 {offsets = [0, 0, 0], sizes = [1, 1, 64], strides = [1, 1, 1]} : vector<4x1x64xf32> to vector<1x1x64xf32>
    %410 = vector.shape_cast %409 : vector<1x1x64xf32> to vector<1x64xf32>
    %411 = vector.broadcast %410 : vector<1x64xf32> to vector<2x64xf32>
    %412 = arith.addf %408, %411 : vector<2x64xf32>
    %413 = arith.negf %412 : vector<2x64xf32>
    %414 = math.exp %413 : vector<2x64xf32>
    %cst_223 = arith.constant 1.000000e+00 : f32
    %415 = vector.broadcast %cst_223 : f32 to vector<2x64xf32>
    %416 = arith.addf %415, %414 : vector<2x64xf32>
    %417 = arith.divf %415, %416 : vector<2x64xf32>
    %c1_224 = arith.constant 1 : index
    %c0_225 = arith.constant 0 : index
    %c0_226 = arith.constant 0 : index
    %418 = vector.load %arg1[%c1_224, %c0_225, %c0_226] : memref<4x32x64xf32, #tpu.memory_space<vmem>>, vector<1x32x64xf32>
    %419 = vector.shape_cast %418 : vector<1x32x64xf32> to vector<32x64xf32>
    %cst_227 = arith.constant dense<0.000000e+00> : vector<2x64xf32>
    %420 = tpu.matmul %401, %419, %cst_227 {dimension_numbers = #tpu.dot_dimension_numbers<[1], [0], [0], [1], [0, 0, 1, 1], [], []>} : vector<2x32xf32>, vector<32x64xf32>, vector<2x64xf32> -> vector<2x64xf32>
    %c1_228 = arith.constant 1 : index
    %c0_229 = arith.constant 0 : index
    %c0_230 = arith.constant 0 : index
    %421 = vector.load %arg2[%c1_228, %c0_229, %c0_230] : memref<4x64x64xf32, #tpu.memory_space<vmem>>, vector<1x64x64xf32>
    %422 = vector.shape_cast %421 : vector<1x64x64xf32> to vector<64x64xf32>
    %cst_231 = arith.constant dense<0.000000e+00> : vector<2x64xf32>
    %423 = tpu.matmul %334, %422, %cst_231 {dimension_numbers = #tpu.dot_dimension_numbers<[1], [0], [0], [1], [0, 0, 1, 1], [], []>} : vector<2x64xf32>, vector<64x64xf32>, vector<2x64xf32> -> vector<2x64xf32>
    %424 = arith.addf %420, %423 : vector<2x64xf32>
    %425 = vector.extract_strided_slice %0 {offsets = [1, 0, 0], sizes = [1, 1, 64], strides = [1, 1, 1]} : vector<4x1x64xf32> to vector<1x1x64xf32>
    %426 = vector.shape_cast %425 : vector<1x1x64xf32> to vector<1x64xf32>
    %427 = vector.broadcast %426 : vector<1x64xf32> to vector<2x64xf32>
    %428 = arith.addf %424, %427 : vector<2x64xf32>
    %429 = arith.negf %428 : vector<2x64xf32>
    %430 = math.exp %429 : vector<2x64xf32>
    %cst_232 = arith.constant 1.000000e+00 : f32
    %431 = vector.broadcast %cst_232 : f32 to vector<2x64xf32>
    %432 = arith.addf %431, %430 : vector<2x64xf32>
    %433 = arith.divf %431, %432 : vector<2x64xf32>
    %c2_233 = arith.constant 2 : index
    %c0_234 = arith.constant 0 : index
    %c0_235 = arith.constant 0 : index
    %434 = vector.load %arg1[%c2_233, %c0_234, %c0_235] : memref<4x32x64xf32, #tpu.memory_space<vmem>>, vector<1x32x64xf32>
    %435 = vector.shape_cast %434 : vector<1x32x64xf32> to vector<32x64xf32>
    %cst_236 = arith.constant dense<0.000000e+00> : vector<2x64xf32>
    %436 = tpu.matmul %401, %435, %cst_236 {dimension_numbers = #tpu.dot_dimension_numbers<[1], [0], [0], [1], [0, 0, 1, 1], [], []>} : vector<2x32xf32>, vector<32x64xf32>, vector<2x64xf32> -> vector<2x64xf32>
    %c2_237 = arith.constant 2 : index
    %c0_238 = arith.constant 0 : index
    %c0_239 = arith.constant 0 : index
    %437 = vector.load %arg2[%c2_237, %c0_238, %c0_239] : memref<4x64x64xf32, #tpu.memory_space<vmem>>, vector<1x64x64xf32>
    %438 = vector.shape_cast %437 : vector<1x64x64xf32> to vector<64x64xf32>
    %cst_240 = arith.constant dense<0.000000e+00> : vector<2x64xf32>
    %439 = tpu.matmul %334, %438, %cst_240 {dimension_numbers = #tpu.dot_dimension_numbers<[1], [0], [0], [1], [0, 0, 1, 1], [], []>} : vector<2x64xf32>, vector<64x64xf32>, vector<2x64xf32> -> vector<2x64xf32>
    %440 = arith.addf %436, %439 : vector<2x64xf32>
    %441 = vector.extract_strided_slice %0 {offsets = [2, 0, 0], sizes = [1, 1, 64], strides = [1, 1, 1]} : vector<4x1x64xf32> to vector<1x1x64xf32>
    %442 = vector.shape_cast %441 : vector<1x1x64xf32> to vector<1x64xf32>
    %443 = vector.broadcast %442 : vector<1x64xf32> to vector<2x64xf32>
    %444 = arith.addf %440, %443 : vector<2x64xf32>
    %445 = math.tanh %444 : vector<2x64xf32>
    %c3_241 = arith.constant 3 : index
    %c0_242 = arith.constant 0 : index
    %c0_243 = arith.constant 0 : index
    %446 = vector.load %arg1[%c3_241, %c0_242, %c0_243] : memref<4x32x64xf32, #tpu.memory_space<vmem>>, vector<1x32x64xf32>
    %447 = vector.shape_cast %446 : vector<1x32x64xf32> to vector<32x64xf32>
    %cst_244 = arith.constant dense<0.000000e+00> : vector<2x64xf32>
    %448 = tpu.matmul %401, %447, %cst_244 {dimension_numbers = #tpu.dot_dimension_numbers<[1], [0], [0], [1], [0, 0, 1, 1], [], []>} : vector<2x32xf32>, vector<32x64xf32>, vector<2x64xf32> -> vector<2x64xf32>
    %c3_245 = arith.constant 3 : index
    %c0_246 = arith.constant 0 : index
    %c0_247 = arith.constant 0 : index
    %449 = vector.load %arg2[%c3_245, %c0_246, %c0_247] : memref<4x64x64xf32, #tpu.memory_space<vmem>>, vector<1x64x64xf32>
    %450 = vector.shape_cast %449 : vector<1x64x64xf32> to vector<64x64xf32>
    %cst_248 = arith.constant dense<0.000000e+00> : vector<2x64xf32>
    %451 = tpu.matmul %334, %450, %cst_248 {dimension_numbers = #tpu.dot_dimension_numbers<[1], [0], [0], [1], [0, 0, 1, 1], [], []>} : vector<2x64xf32>, vector<64x64xf32>, vector<2x64xf32> -> vector<2x64xf32>
    %452 = arith.addf %448, %451 : vector<2x64xf32>
    %453 = vector.extract_strided_slice %0 {offsets = [3, 0, 0], sizes = [1, 1, 64], strides = [1, 1, 1]} : vector<4x1x64xf32> to vector<1x1x64xf32>
    %454 = vector.shape_cast %453 : vector<1x1x64xf32> to vector<1x64xf32>
    %455 = vector.broadcast %454 : vector<1x64xf32> to vector<2x64xf32>
    %456 = arith.addf %452, %455 : vector<2x64xf32>
    %457 = arith.negf %456 : vector<2x64xf32>
    %458 = math.exp %457 : vector<2x64xf32>
    %cst_249 = arith.constant 1.000000e+00 : f32
    %459 = vector.broadcast %cst_249 : f32 to vector<2x64xf32>
    %460 = arith.addf %459, %458 : vector<2x64xf32>
    %461 = arith.divf %459, %460 : vector<2x64xf32>
    %462 = arith.mulf %433, %332 : vector<2x64xf32>
    %463 = arith.mulf %417, %445 : vector<2x64xf32>
    %464 = arith.addf %462, %463 : vector<2x64xf32>
    %465 = math.tanh %464 : vector<2x64xf32>
    %466 = arith.mulf %461, %465 : vector<2x64xf32>
    %c0_250 = arith.constant 0 : index
    %c0_251 = arith.constant 0 : index
    %c0_252 = arith.constant 0 : index
    %467 = vector.load %arg4[%c0_250, %c0_251, %c0_252] : memref<4x64x64xf32, #tpu.memory_space<vmem>>, vector<1x64x64xf32>
    %468 = vector.shape_cast %467 : vector<1x64x64xf32> to vector<64x64xf32>
    %cst_253 = arith.constant dense<0.000000e+00> : vector<2x64xf32>
    %469 = tpu.matmul %466, %468, %cst_253 {dimension_numbers = #tpu.dot_dimension_numbers<[1], [0], [0], [1], [0, 0, 1, 1], [], []>} : vector<2x64xf32>, vector<64x64xf32>, vector<2x64xf32> -> vector<2x64xf32>
    %c0_254 = arith.constant 0 : index
    %c0_255 = arith.constant 0 : index
    %c0_256 = arith.constant 0 : index
    %470 = vector.load %arg5[%c0_254, %c0_255, %c0_256] : memref<4x64x64xf32, #tpu.memory_space<vmem>>, vector<1x64x64xf32>
    %471 = vector.shape_cast %470 : vector<1x64x64xf32> to vector<64x64xf32>
    %cst_257 = arith.constant dense<0.000000e+00> : vector<2x64xf32>
    %472 = tpu.matmul %399, %471, %cst_257 {dimension_numbers = #tpu.dot_dimension_numbers<[1], [0], [0], [1], [0, 0, 1, 1], [], []>} : vector<2x64xf32>, vector<64x64xf32>, vector<2x64xf32> -> vector<2x64xf32>
    %473 = arith.addf %469, %472 : vector<2x64xf32>
    %474 = vector.extract_strided_slice %1 {offsets = [0, 0, 0], sizes = [1, 1, 64], strides = [1, 1, 1]} : vector<4x1x64xf32> to vector<1x1x64xf32>
    %475 = vector.shape_cast %474 : vector<1x1x64xf32> to vector<1x64xf32>
    %476 = vector.broadcast %475 : vector<1x64xf32> to vector<2x64xf32>
    %477 = arith.addf %473, %476 : vector<2x64xf32>
    %478 = arith.negf %477 : vector<2x64xf32>
    %479 = math.exp %478 : vector<2x64xf32>
    %cst_258 = arith.constant 1.000000e+00 : f32
    %480 = vector.broadcast %cst_258 : f32 to vector<2x64xf32>
    %481 = arith.addf %480, %479 : vector<2x64xf32>
    %482 = arith.divf %480, %481 : vector<2x64xf32>
    %c1_259 = arith.constant 1 : index
    %c0_260 = arith.constant 0 : index
    %c0_261 = arith.constant 0 : index
    %483 = vector.load %arg4[%c1_259, %c0_260, %c0_261] : memref<4x64x64xf32, #tpu.memory_space<vmem>>, vector<1x64x64xf32>
    %484 = vector.shape_cast %483 : vector<1x64x64xf32> to vector<64x64xf32>
    %cst_262 = arith.constant dense<0.000000e+00> : vector<2x64xf32>
    %485 = tpu.matmul %466, %484, %cst_262 {dimension_numbers = #tpu.dot_dimension_numbers<[1], [0], [0], [1], [0, 0, 1, 1], [], []>} : vector<2x64xf32>, vector<64x64xf32>, vector<2x64xf32> -> vector<2x64xf32>
    %c1_263 = arith.constant 1 : index
    %c0_264 = arith.constant 0 : index
    %c0_265 = arith.constant 0 : index
    %486 = vector.load %arg5[%c1_263, %c0_264, %c0_265] : memref<4x64x64xf32, #tpu.memory_space<vmem>>, vector<1x64x64xf32>
    %487 = vector.shape_cast %486 : vector<1x64x64xf32> to vector<64x64xf32>
    %cst_266 = arith.constant dense<0.000000e+00> : vector<2x64xf32>
    %488 = tpu.matmul %399, %487, %cst_266 {dimension_numbers = #tpu.dot_dimension_numbers<[1], [0], [0], [1], [0, 0, 1, 1], [], []>} : vector<2x64xf32>, vector<64x64xf32>, vector<2x64xf32> -> vector<2x64xf32>
    %489 = arith.addf %485, %488 : vector<2x64xf32>
    %490 = vector.extract_strided_slice %1 {offsets = [1, 0, 0], sizes = [1, 1, 64], strides = [1, 1, 1]} : vector<4x1x64xf32> to vector<1x1x64xf32>
    %491 = vector.shape_cast %490 : vector<1x1x64xf32> to vector<1x64xf32>
    %492 = vector.broadcast %491 : vector<1x64xf32> to vector<2x64xf32>
    %493 = arith.addf %489, %492 : vector<2x64xf32>
    %494 = arith.negf %493 : vector<2x64xf32>
    %495 = math.exp %494 : vector<2x64xf32>
    %cst_267 = arith.constant 1.000000e+00 : f32
    %496 = vector.broadcast %cst_267 : f32 to vector<2x64xf32>
    %497 = arith.addf %496, %495 : vector<2x64xf32>
    %498 = arith.divf %496, %497 : vector<2x64xf32>
    %c2_268 = arith.constant 2 : index
    %c0_269 = arith.constant 0 : index
    %c0_270 = arith.constant 0 : index
    %499 = vector.load %arg4[%c2_268, %c0_269, %c0_270] : memref<4x64x64xf32, #tpu.memory_space<vmem>>, vector<1x64x64xf32>
    %500 = vector.shape_cast %499 : vector<1x64x64xf32> to vector<64x64xf32>
    %cst_271 = arith.constant dense<0.000000e+00> : vector<2x64xf32>
    %501 = tpu.matmul %466, %500, %cst_271 {dimension_numbers = #tpu.dot_dimension_numbers<[1], [0], [0], [1], [0, 0, 1, 1], [], []>} : vector<2x64xf32>, vector<64x64xf32>, vector<2x64xf32> -> vector<2x64xf32>
    %c2_272 = arith.constant 2 : index
    %c0_273 = arith.constant 0 : index
    %c0_274 = arith.constant 0 : index
    %502 = vector.load %arg5[%c2_272, %c0_273, %c0_274] : memref<4x64x64xf32, #tpu.memory_space<vmem>>, vector<1x64x64xf32>
    %503 = vector.shape_cast %502 : vector<1x64x64xf32> to vector<64x64xf32>
    %cst_275 = arith.constant dense<0.000000e+00> : vector<2x64xf32>
    %504 = tpu.matmul %399, %503, %cst_275 {dimension_numbers = #tpu.dot_dimension_numbers<[1], [0], [0], [1], [0, 0, 1, 1], [], []>} : vector<2x64xf32>, vector<64x64xf32>, vector<2x64xf32> -> vector<2x64xf32>
    %505 = arith.addf %501, %504 : vector<2x64xf32>
    %506 = vector.extract_strided_slice %1 {offsets = [2, 0, 0], sizes = [1, 1, 64], strides = [1, 1, 1]} : vector<4x1x64xf32> to vector<1x1x64xf32>
    %507 = vector.shape_cast %506 : vector<1x1x64xf32> to vector<1x64xf32>
    %508 = vector.broadcast %507 : vector<1x64xf32> to vector<2x64xf32>
    %509 = arith.addf %505, %508 : vector<2x64xf32>
    %510 = math.tanh %509 : vector<2x64xf32>
    %c3_276 = arith.constant 3 : index
    %c0_277 = arith.constant 0 : index
    %c0_278 = arith.constant 0 : index
    %511 = vector.load %arg4[%c3_276, %c0_277, %c0_278] : memref<4x64x64xf32, #tpu.memory_space<vmem>>, vector<1x64x64xf32>
    %512 = vector.shape_cast %511 : vector<1x64x64xf32> to vector<64x64xf32>
    %cst_279 = arith.constant dense<0.000000e+00> : vector<2x64xf32>
    %513 = tpu.matmul %466, %512, %cst_279 {dimension_numbers = #tpu.dot_dimension_numbers<[1], [0], [0], [1], [0, 0, 1, 1], [], []>} : vector<2x64xf32>, vector<64x64xf32>, vector<2x64xf32> -> vector<2x64xf32>
    %c3_280 = arith.constant 3 : index
    %c0_281 = arith.constant 0 : index
    %c0_282 = arith.constant 0 : index
    %514 = vector.load %arg5[%c3_280, %c0_281, %c0_282] : memref<4x64x64xf32, #tpu.memory_space<vmem>>, vector<1x64x64xf32>
    %515 = vector.shape_cast %514 : vector<1x64x64xf32> to vector<64x64xf32>
    %cst_283 = arith.constant dense<0.000000e+00> : vector<2x64xf32>
    %516 = tpu.matmul %399, %515, %cst_283 {dimension_numbers = #tpu.dot_dimension_numbers<[1], [0], [0], [1], [0, 0, 1, 1], [], []>} : vector<2x64xf32>, vector<64x64xf32>, vector<2x64xf32> -> vector<2x64xf32>
    %517 = arith.addf %513, %516 : vector<2x64xf32>
    %518 = vector.extract_strided_slice %1 {offsets = [3, 0, 0], sizes = [1, 1, 64], strides = [1, 1, 1]} : vector<4x1x64xf32> to vector<1x1x64xf32>
    %519 = vector.shape_cast %518 : vector<1x1x64xf32> to vector<1x64xf32>
    %520 = vector.broadcast %519 : vector<1x64xf32> to vector<2x64xf32>
    %521 = arith.addf %517, %520 : vector<2x64xf32>
    %522 = arith.negf %521 : vector<2x64xf32>
    %523 = math.exp %522 : vector<2x64xf32>
    %cst_284 = arith.constant 1.000000e+00 : f32
    %524 = vector.broadcast %cst_284 : f32 to vector<2x64xf32>
    %525 = arith.addf %524, %523 : vector<2x64xf32>
    %526 = arith.divf %524, %525 : vector<2x64xf32>
    %527 = arith.mulf %498, %397 : vector<2x64xf32>
    %528 = arith.mulf %482, %510 : vector<2x64xf32>
    %529 = arith.addf %527, %528 : vector<2x64xf32>
    %530 = math.tanh %529 : vector<2x64xf32>
    %531 = arith.mulf %526, %530 : vector<2x64xf32>
    %532 = vector.extract_strided_slice %2 {offsets = [0, 4, 0], sizes = [2, 1, 32], strides = [1, 1, 1]} : vector<2x8x32xf32> to vector<2x1x32xf32>
    %533 = vector.shape_cast %532 : vector<2x1x32xf32> to vector<2x32xf32>
    %c0_285 = arith.constant 0 : index
    %c0_286 = arith.constant 0 : index
    %c0_287 = arith.constant 0 : index
    %534 = vector.load %arg1[%c0_285, %c0_286, %c0_287] : memref<4x32x64xf32, #tpu.memory_space<vmem>>, vector<1x32x64xf32>
    %535 = vector.shape_cast %534 : vector<1x32x64xf32> to vector<32x64xf32>
    %cst_288 = arith.constant dense<0.000000e+00> : vector<2x64xf32>
    %536 = tpu.matmul %533, %535, %cst_288 {dimension_numbers = #tpu.dot_dimension_numbers<[1], [0], [0], [1], [0, 0, 1, 1], [], []>} : vector<2x32xf32>, vector<32x64xf32>, vector<2x64xf32> -> vector<2x64xf32>
    %c0_289 = arith.constant 0 : index
    %c0_290 = arith.constant 0 : index
    %c0_291 = arith.constant 0 : index
    %537 = vector.load %arg2[%c0_289, %c0_290, %c0_291] : memref<4x64x64xf32, #tpu.memory_space<vmem>>, vector<1x64x64xf32>
    %538 = vector.shape_cast %537 : vector<1x64x64xf32> to vector<64x64xf32>
    %cst_292 = arith.constant dense<0.000000e+00> : vector<2x64xf32>
    %539 = tpu.matmul %466, %538, %cst_292 {dimension_numbers = #tpu.dot_dimension_numbers<[1], [0], [0], [1], [0, 0, 1, 1], [], []>} : vector<2x64xf32>, vector<64x64xf32>, vector<2x64xf32> -> vector<2x64xf32>
    %540 = arith.addf %536, %539 : vector<2x64xf32>
    %541 = vector.extract_strided_slice %0 {offsets = [0, 0, 0], sizes = [1, 1, 64], strides = [1, 1, 1]} : vector<4x1x64xf32> to vector<1x1x64xf32>
    %542 = vector.shape_cast %541 : vector<1x1x64xf32> to vector<1x64xf32>
    %543 = vector.broadcast %542 : vector<1x64xf32> to vector<2x64xf32>
    %544 = arith.addf %540, %543 : vector<2x64xf32>
    %545 = arith.negf %544 : vector<2x64xf32>
    %546 = math.exp %545 : vector<2x64xf32>
    %cst_293 = arith.constant 1.000000e+00 : f32
    %547 = vector.broadcast %cst_293 : f32 to vector<2x64xf32>
    %548 = arith.addf %547, %546 : vector<2x64xf32>
    %549 = arith.divf %547, %548 : vector<2x64xf32>
    %c1_294 = arith.constant 1 : index
    %c0_295 = arith.constant 0 : index
    %c0_296 = arith.constant 0 : index
    %550 = vector.load %arg1[%c1_294, %c0_295, %c0_296] : memref<4x32x64xf32, #tpu.memory_space<vmem>>, vector<1x32x64xf32>
    %551 = vector.shape_cast %550 : vector<1x32x64xf32> to vector<32x64xf32>
    %cst_297 = arith.constant dense<0.000000e+00> : vector<2x64xf32>
    %552 = tpu.matmul %533, %551, %cst_297 {dimension_numbers = #tpu.dot_dimension_numbers<[1], [0], [0], [1], [0, 0, 1, 1], [], []>} : vector<2x32xf32>, vector<32x64xf32>, vector<2x64xf32> -> vector<2x64xf32>
    %c1_298 = arith.constant 1 : index
    %c0_299 = arith.constant 0 : index
    %c0_300 = arith.constant 0 : index
    %553 = vector.load %arg2[%c1_298, %c0_299, %c0_300] : memref<4x64x64xf32, #tpu.memory_space<vmem>>, vector<1x64x64xf32>
    %554 = vector.shape_cast %553 : vector<1x64x64xf32> to vector<64x64xf32>
    %cst_301 = arith.constant dense<0.000000e+00> : vector<2x64xf32>
    %555 = tpu.matmul %466, %554, %cst_301 {dimension_numbers = #tpu.dot_dimension_numbers<[1], [0], [0], [1], [0, 0, 1, 1], [], []>} : vector<2x64xf32>, vector<64x64xf32>, vector<2x64xf32> -> vector<2x64xf32>
    %556 = arith.addf %552, %555 : vector<2x64xf32>
    %557 = vector.extract_strided_slice %0 {offsets = [1, 0, 0], sizes = [1, 1, 64], strides = [1, 1, 1]} : vector<4x1x64xf32> to vector<1x1x64xf32>
    %558 = vector.shape_cast %557 : vector<1x1x64xf32> to vector<1x64xf32>
    %559 = vector.broadcast %558 : vector<1x64xf32> to vector<2x64xf32>
    %560 = arith.addf %556, %559 : vector<2x64xf32>
    %561 = arith.negf %560 : vector<2x64xf32>
    %562 = math.exp %561 : vector<2x64xf32>
    %cst_302 = arith.constant 1.000000e+00 : f32
    %563 = vector.broadcast %cst_302 : f32 to vector<2x64xf32>
    %564 = arith.addf %563, %562 : vector<2x64xf32>
    %565 = arith.divf %563, %564 : vector<2x64xf32>
    %c2_303 = arith.constant 2 : index
    %c0_304 = arith.constant 0 : index
    %c0_305 = arith.constant 0 : index
    %566 = vector.load %arg1[%c2_303, %c0_304, %c0_305] : memref<4x32x64xf32, #tpu.memory_space<vmem>>, vector<1x32x64xf32>
    %567 = vector.shape_cast %566 : vector<1x32x64xf32> to vector<32x64xf32>
    %cst_306 = arith.constant dense<0.000000e+00> : vector<2x64xf32>
    %568 = tpu.matmul %533, %567, %cst_306 {dimension_numbers = #tpu.dot_dimension_numbers<[1], [0], [0], [1], [0, 0, 1, 1], [], []>} : vector<2x32xf32>, vector<32x64xf32>, vector<2x64xf32> -> vector<2x64xf32>
    %c2_307 = arith.constant 2 : index
    %c0_308 = arith.constant 0 : index
    %c0_309 = arith.constant 0 : index
    %569 = vector.load %arg2[%c2_307, %c0_308, %c0_309] : memref<4x64x64xf32, #tpu.memory_space<vmem>>, vector<1x64x64xf32>
    %570 = vector.shape_cast %569 : vector<1x64x64xf32> to vector<64x64xf32>
    %cst_310 = arith.constant dense<0.000000e+00> : vector<2x64xf32>
    %571 = tpu.matmul %466, %570, %cst_310 {dimension_numbers = #tpu.dot_dimension_numbers<[1], [0], [0], [1], [0, 0, 1, 1], [], []>} : vector<2x64xf32>, vector<64x64xf32>, vector<2x64xf32> -> vector<2x64xf32>
    %572 = arith.addf %568, %571 : vector<2x64xf32>
    %573 = vector.extract_strided_slice %0 {offsets = [2, 0, 0], sizes = [1, 1, 64], strides = [1, 1, 1]} : vector<4x1x64xf32> to vector<1x1x64xf32>
    %574 = vector.shape_cast %573 : vector<1x1x64xf32> to vector<1x64xf32>
    %575 = vector.broadcast %574 : vector<1x64xf32> to vector<2x64xf32>
    %576 = arith.addf %572, %575 : vector<2x64xf32>
    %577 = math.tanh %576 : vector<2x64xf32>
    %c3_311 = arith.constant 3 : index
    %c0_312 = arith.constant 0 : index
    %c0_313 = arith.constant 0 : index
    %578 = vector.load %arg1[%c3_311, %c0_312, %c0_313] : memref<4x32x64xf32, #tpu.memory_space<vmem>>, vector<1x32x64xf32>
    %579 = vector.shape_cast %578 : vector<1x32x64xf32> to vector<32x64xf32>
    %cst_314 = arith.constant dense<0.000000e+00> : vector<2x64xf32>
    %580 = tpu.matmul %533, %579, %cst_314 {dimension_numbers = #tpu.dot_dimension_numbers<[1], [0], [0], [1], [0, 0, 1, 1], [], []>} : vector<2x32xf32>, vector<32x64xf32>, vector<2x64xf32> -> vector<2x64xf32>
    %c3_315 = arith.constant 3 : index
    %c0_316 = arith.constant 0 : index
    %c0_317 = arith.constant 0 : index
    %581 = vector.load %arg2[%c3_315, %c0_316, %c0_317] : memref<4x64x64xf32, #tpu.memory_space<vmem>>, vector<1x64x64xf32>
    %582 = vector.shape_cast %581 : vector<1x64x64xf32> to vector<64x64xf32>
    %cst_318 = arith.constant dense<0.000000e+00> : vector<2x64xf32>
    %583 = tpu.matmul %466, %582, %cst_318 {dimension_numbers = #tpu.dot_dimension_numbers<[1], [0], [0], [1], [0, 0, 1, 1], [], []>} : vector<2x64xf32>, vector<64x64xf32>, vector<2x64xf32> -> vector<2x64xf32>
    %584 = arith.addf %580, %583 : vector<2x64xf32>
    %585 = vector.extract_strided_slice %0 {offsets = [3, 0, 0], sizes = [1, 1, 64], strides = [1, 1, 1]} : vector<4x1x64xf32> to vector<1x1x64xf32>
    %586 = vector.shape_cast %585 : vector<1x1x64xf32> to vector<1x64xf32>
    %587 = vector.broadcast %586 : vector<1x64xf32> to vector<2x64xf32>
    %588 = arith.addf %584, %587 : vector<2x64xf32>
    %589 = arith.negf %588 : vector<2x64xf32>
    %590 = math.exp %589 : vector<2x64xf32>
    %cst_319 = arith.constant 1.000000e+00 : f32
    %591 = vector.broadcast %cst_319 : f32 to vector<2x64xf32>
    %592 = arith.addf %591, %590 : vector<2x64xf32>
    %593 = arith.divf %591, %592 : vector<2x64xf32>
    %594 = arith.mulf %565, %464 : vector<2x64xf32>
    %595 = arith.mulf %549, %577 : vector<2x64xf32>
    %596 = arith.addf %594, %595 : vector<2x64xf32>
    %597 = math.tanh %596 : vector<2x64xf32>
    %598 = arith.mulf %593, %597 : vector<2x64xf32>
    %c0_320 = arith.constant 0 : index
    %c0_321 = arith.constant 0 : index
    %c0_322 = arith.constant 0 : index
    %599 = vector.load %arg4[%c0_320, %c0_321, %c0_322] : memref<4x64x64xf32, #tpu.memory_space<vmem>>, vector<1x64x64xf32>
    %600 = vector.shape_cast %599 : vector<1x64x64xf32> to vector<64x64xf32>
    %cst_323 = arith.constant dense<0.000000e+00> : vector<2x64xf32>
    %601 = tpu.matmul %598, %600, %cst_323 {dimension_numbers = #tpu.dot_dimension_numbers<[1], [0], [0], [1], [0, 0, 1, 1], [], []>} : vector<2x64xf32>, vector<64x64xf32>, vector<2x64xf32> -> vector<2x64xf32>
    %c0_324 = arith.constant 0 : index
    %c0_325 = arith.constant 0 : index
    %c0_326 = arith.constant 0 : index
    %602 = vector.load %arg5[%c0_324, %c0_325, %c0_326] : memref<4x64x64xf32, #tpu.memory_space<vmem>>, vector<1x64x64xf32>
    %603 = vector.shape_cast %602 : vector<1x64x64xf32> to vector<64x64xf32>
    %cst_327 = arith.constant dense<0.000000e+00> : vector<2x64xf32>
    %604 = tpu.matmul %531, %603, %cst_327 {dimension_numbers = #tpu.dot_dimension_numbers<[1], [0], [0], [1], [0, 0, 1, 1], [], []>} : vector<2x64xf32>, vector<64x64xf32>, vector<2x64xf32> -> vector<2x64xf32>
    %605 = arith.addf %601, %604 : vector<2x64xf32>
    %606 = vector.extract_strided_slice %1 {offsets = [0, 0, 0], sizes = [1, 1, 64], strides = [1, 1, 1]} : vector<4x1x64xf32> to vector<1x1x64xf32>
    %607 = vector.shape_cast %606 : vector<1x1x64xf32> to vector<1x64xf32>
    %608 = vector.broadcast %607 : vector<1x64xf32> to vector<2x64xf32>
    %609 = arith.addf %605, %608 : vector<2x64xf32>
    %610 = arith.negf %609 : vector<2x64xf32>
    %611 = math.exp %610 : vector<2x64xf32>
    %cst_328 = arith.constant 1.000000e+00 : f32
    %612 = vector.broadcast %cst_328 : f32 to vector<2x64xf32>
    %613 = arith.addf %612, %611 : vector<2x64xf32>
    %614 = arith.divf %612, %613 : vector<2x64xf32>
    %c1_329 = arith.constant 1 : index
    %c0_330 = arith.constant 0 : index
    %c0_331 = arith.constant 0 : index
    %615 = vector.load %arg4[%c1_329, %c0_330, %c0_331] : memref<4x64x64xf32, #tpu.memory_space<vmem>>, vector<1x64x64xf32>
    %616 = vector.shape_cast %615 : vector<1x64x64xf32> to vector<64x64xf32>
    %cst_332 = arith.constant dense<0.000000e+00> : vector<2x64xf32>
    %617 = tpu.matmul %598, %616, %cst_332 {dimension_numbers = #tpu.dot_dimension_numbers<[1], [0], [0], [1], [0, 0, 1, 1], [], []>} : vector<2x64xf32>, vector<64x64xf32>, vector<2x64xf32> -> vector<2x64xf32>
    %c1_333 = arith.constant 1 : index
    %c0_334 = arith.constant 0 : index
    %c0_335 = arith.constant 0 : index
    %618 = vector.load %arg5[%c1_333, %c0_334, %c0_335] : memref<4x64x64xf32, #tpu.memory_space<vmem>>, vector<1x64x64xf32>
    %619 = vector.shape_cast %618 : vector<1x64x64xf32> to vector<64x64xf32>
    %cst_336 = arith.constant dense<0.000000e+00> : vector<2x64xf32>
    %620 = tpu.matmul %531, %619, %cst_336 {dimension_numbers = #tpu.dot_dimension_numbers<[1], [0], [0], [1], [0, 0, 1, 1], [], []>} : vector<2x64xf32>, vector<64x64xf32>, vector<2x64xf32> -> vector<2x64xf32>
    %621 = arith.addf %617, %620 : vector<2x64xf32>
    %622 = vector.extract_strided_slice %1 {offsets = [1, 0, 0], sizes = [1, 1, 64], strides = [1, 1, 1]} : vector<4x1x64xf32> to vector<1x1x64xf32>
    %623 = vector.shape_cast %622 : vector<1x1x64xf32> to vector<1x64xf32>
    %624 = vector.broadcast %623 : vector<1x64xf32> to vector<2x64xf32>
    %625 = arith.addf %621, %624 : vector<2x64xf32>
    %626 = arith.negf %625 : vector<2x64xf32>
    %627 = math.exp %626 : vector<2x64xf32>
    %cst_337 = arith.constant 1.000000e+00 : f32
    %628 = vector.broadcast %cst_337 : f32 to vector<2x64xf32>
    %629 = arith.addf %628, %627 : vector<2x64xf32>
    %630 = arith.divf %628, %629 : vector<2x64xf32>
    %c2_338 = arith.constant 2 : index
    %c0_339 = arith.constant 0 : index
    %c0_340 = arith.constant 0 : index
    %631 = vector.load %arg4[%c2_338, %c0_339, %c0_340] : memref<4x64x64xf32, #tpu.memory_space<vmem>>, vector<1x64x64xf32>
    %632 = vector.shape_cast %631 : vector<1x64x64xf32> to vector<64x64xf32>
    %cst_341 = arith.constant dense<0.000000e+00> : vector<2x64xf32>
    %633 = tpu.matmul %598, %632, %cst_341 {dimension_numbers = #tpu.dot_dimension_numbers<[1], [0], [0], [1], [0, 0, 1, 1], [], []>} : vector<2x64xf32>, vector<64x64xf32>, vector<2x64xf32> -> vector<2x64xf32>
    %c2_342 = arith.constant 2 : index
    %c0_343 = arith.constant 0 : index
    %c0_344 = arith.constant 0 : index
    %634 = vector.load %arg5[%c2_342, %c0_343, %c0_344] : memref<4x64x64xf32, #tpu.memory_space<vmem>>, vector<1x64x64xf32>
    %635 = vector.shape_cast %634 : vector<1x64x64xf32> to vector<64x64xf32>
    %cst_345 = arith.constant dense<0.000000e+00> : vector<2x64xf32>
    %636 = tpu.matmul %531, %635, %cst_345 {dimension_numbers = #tpu.dot_dimension_numbers<[1], [0], [0], [1], [0, 0, 1, 1], [], []>} : vector<2x64xf32>, vector<64x64xf32>, vector<2x64xf32> -> vector<2x64xf32>
    %637 = arith.addf %633, %636 : vector<2x64xf32>
    %638 = vector.extract_strided_slice %1 {offsets = [2, 0, 0], sizes = [1, 1, 64], strides = [1, 1, 1]} : vector<4x1x64xf32> to vector<1x1x64xf32>
    %639 = vector.shape_cast %638 : vector<1x1x64xf32> to vector<1x64xf32>
    %640 = vector.broadcast %639 : vector<1x64xf32> to vector<2x64xf32>
    %641 = arith.addf %637, %640 : vector<2x64xf32>
    %642 = math.tanh %641 : vector<2x64xf32>
    %c3_346 = arith.constant 3 : index
    %c0_347 = arith.constant 0 : index
    %c0_348 = arith.constant 0 : index
    %643 = vector.load %arg4[%c3_346, %c0_347, %c0_348] : memref<4x64x64xf32, #tpu.memory_space<vmem>>, vector<1x64x64xf32>
    %644 = vector.shape_cast %643 : vector<1x64x64xf32> to vector<64x64xf32>
    %cst_349 = arith.constant dense<0.000000e+00> : vector<2x64xf32>
    %645 = tpu.matmul %598, %644, %cst_349 {dimension_numbers = #tpu.dot_dimension_numbers<[1], [0], [0], [1], [0, 0, 1, 1], [], []>} : vector<2x64xf32>, vector<64x64xf32>, vector<2x64xf32> -> vector<2x64xf32>
    %c3_350 = arith.constant 3 : index
    %c0_351 = arith.constant 0 : index
    %c0_352 = arith.constant 0 : index
    %646 = vector.load %arg5[%c3_350, %c0_351, %c0_352] : memref<4x64x64xf32, #tpu.memory_space<vmem>>, vector<1x64x64xf32>
    %647 = vector.shape_cast %646 : vector<1x64x64xf32> to vector<64x64xf32>
    %cst_353 = arith.constant dense<0.000000e+00> : vector<2x64xf32>
    %648 = tpu.matmul %531, %647, %cst_353 {dimension_numbers = #tpu.dot_dimension_numbers<[1], [0], [0], [1], [0, 0, 1, 1], [], []>} : vector<2x64xf32>, vector<64x64xf32>, vector<2x64xf32> -> vector<2x64xf32>
    %649 = arith.addf %645, %648 : vector<2x64xf32>
    %650 = vector.extract_strided_slice %1 {offsets = [3, 0, 0], sizes = [1, 1, 64], strides = [1, 1, 1]} : vector<4x1x64xf32> to vector<1x1x64xf32>
    %651 = vector.shape_cast %650 : vector<1x1x64xf32> to vector<1x64xf32>
    %652 = vector.broadcast %651 : vector<1x64xf32> to vector<2x64xf32>
    %653 = arith.addf %649, %652 : vector<2x64xf32>
    %654 = arith.negf %653 : vector<2x64xf32>
    %655 = math.exp %654 : vector<2x64xf32>
    %cst_354 = arith.constant 1.000000e+00 : f32
    %656 = vector.broadcast %cst_354 : f32 to vector<2x64xf32>
    %657 = arith.addf %656, %655 : vector<2x64xf32>
    %658 = arith.divf %656, %657 : vector<2x64xf32>
    %659 = arith.mulf %630, %529 : vector<2x64xf32>
    %660 = arith.mulf %614, %642 : vector<2x64xf32>
    %661 = arith.addf %659, %660 : vector<2x64xf32>
    %662 = math.tanh %661 : vector<2x64xf32>
    %663 = arith.mulf %658, %662 : vector<2x64xf32>
    %664 = vector.extract_strided_slice %2 {offsets = [0, 5, 0], sizes = [2, 1, 32], strides = [1, 1, 1]} : vector<2x8x32xf32> to vector<2x1x32xf32>
    %665 = vector.shape_cast %664 : vector<2x1x32xf32> to vector<2x32xf32>
    %c0_355 = arith.constant 0 : index
    %c0_356 = arith.constant 0 : index
    %c0_357 = arith.constant 0 : index
    %666 = vector.load %arg1[%c0_355, %c0_356, %c0_357] : memref<4x32x64xf32, #tpu.memory_space<vmem>>, vector<1x32x64xf32>
    %667 = vector.shape_cast %666 : vector<1x32x64xf32> to vector<32x64xf32>
    %cst_358 = arith.constant dense<0.000000e+00> : vector<2x64xf32>
    %668 = tpu.matmul %665, %667, %cst_358 {dimension_numbers = #tpu.dot_dimension_numbers<[1], [0], [0], [1], [0, 0, 1, 1], [], []>} : vector<2x32xf32>, vector<32x64xf32>, vector<2x64xf32> -> vector<2x64xf32>
    %c0_359 = arith.constant 0 : index
    %c0_360 = arith.constant 0 : index
    %c0_361 = arith.constant 0 : index
    %669 = vector.load %arg2[%c0_359, %c0_360, %c0_361] : memref<4x64x64xf32, #tpu.memory_space<vmem>>, vector<1x64x64xf32>
    %670 = vector.shape_cast %669 : vector<1x64x64xf32> to vector<64x64xf32>
    %cst_362 = arith.constant dense<0.000000e+00> : vector<2x64xf32>
    %671 = tpu.matmul %598, %670, %cst_362 {dimension_numbers = #tpu.dot_dimension_numbers<[1], [0], [0], [1], [0, 0, 1, 1], [], []>} : vector<2x64xf32>, vector<64x64xf32>, vector<2x64xf32> -> vector<2x64xf32>
    %672 = arith.addf %668, %671 : vector<2x64xf32>
    %673 = vector.extract_strided_slice %0 {offsets = [0, 0, 0], sizes = [1, 1, 64], strides = [1, 1, 1]} : vector<4x1x64xf32> to vector<1x1x64xf32>
    %674 = vector.shape_cast %673 : vector<1x1x64xf32> to vector<1x64xf32>
    %675 = vector.broadcast %674 : vector<1x64xf32> to vector<2x64xf32>
    %676 = arith.addf %672, %675 : vector<2x64xf32>
    %677 = arith.negf %676 : vector<2x64xf32>
    %678 = math.exp %677 : vector<2x64xf32>
    %cst_363 = arith.constant 1.000000e+00 : f32
    %679 = vector.broadcast %cst_363 : f32 to vector<2x64xf32>
    %680 = arith.addf %679, %678 : vector<2x64xf32>
    %681 = arith.divf %679, %680 : vector<2x64xf32>
    %c1_364 = arith.constant 1 : index
    %c0_365 = arith.constant 0 : index
    %c0_366 = arith.constant 0 : index
    %682 = vector.load %arg1[%c1_364, %c0_365, %c0_366] : memref<4x32x64xf32, #tpu.memory_space<vmem>>, vector<1x32x64xf32>
    %683 = vector.shape_cast %682 : vector<1x32x64xf32> to vector<32x64xf32>
    %cst_367 = arith.constant dense<0.000000e+00> : vector<2x64xf32>
    %684 = tpu.matmul %665, %683, %cst_367 {dimension_numbers = #tpu.dot_dimension_numbers<[1], [0], [0], [1], [0, 0, 1, 1], [], []>} : vector<2x32xf32>, vector<32x64xf32>, vector<2x64xf32> -> vector<2x64xf32>
    %c1_368 = arith.constant 1 : index
    %c0_369 = arith.constant 0 : index
    %c0_370 = arith.constant 0 : index
    %685 = vector.load %arg2[%c1_368, %c0_369, %c0_370] : memref<4x64x64xf32, #tpu.memory_space<vmem>>, vector<1x64x64xf32>
    %686 = vector.shape_cast %685 : vector<1x64x64xf32> to vector<64x64xf32>
    %cst_371 = arith.constant dense<0.000000e+00> : vector<2x64xf32>
    %687 = tpu.matmul %598, %686, %cst_371 {dimension_numbers = #tpu.dot_dimension_numbers<[1], [0], [0], [1], [0, 0, 1, 1], [], []>} : vector<2x64xf32>, vector<64x64xf32>, vector<2x64xf32> -> vector<2x64xf32>
    %688 = arith.addf %684, %687 : vector<2x64xf32>
    %689 = vector.extract_strided_slice %0 {offsets = [1, 0, 0], sizes = [1, 1, 64], strides = [1, 1, 1]} : vector<4x1x64xf32> to vector<1x1x64xf32>
    %690 = vector.shape_cast %689 : vector<1x1x64xf32> to vector<1x64xf32>
    %691 = vector.broadcast %690 : vector<1x64xf32> to vector<2x64xf32>
    %692 = arith.addf %688, %691 : vector<2x64xf32>
    %693 = arith.negf %692 : vector<2x64xf32>
    %694 = math.exp %693 : vector<2x64xf32>
    %cst_372 = arith.constant 1.000000e+00 : f32
    %695 = vector.broadcast %cst_372 : f32 to vector<2x64xf32>
    %696 = arith.addf %695, %694 : vector<2x64xf32>
    %697 = arith.divf %695, %696 : vector<2x64xf32>
    %c2_373 = arith.constant 2 : index
    %c0_374 = arith.constant 0 : index
    %c0_375 = arith.constant 0 : index
    %698 = vector.load %arg1[%c2_373, %c0_374, %c0_375] : memref<4x32x64xf32, #tpu.memory_space<vmem>>, vector<1x32x64xf32>
    %699 = vector.shape_cast %698 : vector<1x32x64xf32> to vector<32x64xf32>
    %cst_376 = arith.constant dense<0.000000e+00> : vector<2x64xf32>
    %700 = tpu.matmul %665, %699, %cst_376 {dimension_numbers = #tpu.dot_dimension_numbers<[1], [0], [0], [1], [0, 0, 1, 1], [], []>} : vector<2x32xf32>, vector<32x64xf32>, vector<2x64xf32> -> vector<2x64xf32>
    %c2_377 = arith.constant 2 : index
    %c0_378 = arith.constant 0 : index
    %c0_379 = arith.constant 0 : index
    %701 = vector.load %arg2[%c2_377, %c0_378, %c0_379] : memref<4x64x64xf32, #tpu.memory_space<vmem>>, vector<1x64x64xf32>
    %702 = vector.shape_cast %701 : vector<1x64x64xf32> to vector<64x64xf32>
    %cst_380 = arith.constant dense<0.000000e+00> : vector<2x64xf32>
    %703 = tpu.matmul %598, %702, %cst_380 {dimension_numbers = #tpu.dot_dimension_numbers<[1], [0], [0], [1], [0, 0, 1, 1], [], []>} : vector<2x64xf32>, vector<64x64xf32>, vector<2x64xf32> -> vector<2x64xf32>
    %704 = arith.addf %700, %703 : vector<2x64xf32>
    %705 = vector.extract_strided_slice %0 {offsets = [2, 0, 0], sizes = [1, 1, 64], strides = [1, 1, 1]} : vector<4x1x64xf32> to vector<1x1x64xf32>
    %706 = vector.shape_cast %705 : vector<1x1x64xf32> to vector<1x64xf32>
    %707 = vector.broadcast %706 : vector<1x64xf32> to vector<2x64xf32>
    %708 = arith.addf %704, %707 : vector<2x64xf32>
    %709 = math.tanh %708 : vector<2x64xf32>
    %c3_381 = arith.constant 3 : index
    %c0_382 = arith.constant 0 : index
    %c0_383 = arith.constant 0 : index
    %710 = vector.load %arg1[%c3_381, %c0_382, %c0_383] : memref<4x32x64xf32, #tpu.memory_space<vmem>>, vector<1x32x64xf32>
    %711 = vector.shape_cast %710 : vector<1x32x64xf32> to vector<32x64xf32>
    %cst_384 = arith.constant dense<0.000000e+00> : vector<2x64xf32>
    %712 = tpu.matmul %665, %711, %cst_384 {dimension_numbers = #tpu.dot_dimension_numbers<[1], [0], [0], [1], [0, 0, 1, 1], [], []>} : vector<2x32xf32>, vector<32x64xf32>, vector<2x64xf32> -> vector<2x64xf32>
    %c3_385 = arith.constant 3 : index
    %c0_386 = arith.constant 0 : index
    %c0_387 = arith.constant 0 : index
    %713 = vector.load %arg2[%c3_385, %c0_386, %c0_387] : memref<4x64x64xf32, #tpu.memory_space<vmem>>, vector<1x64x64xf32>
    %714 = vector.shape_cast %713 : vector<1x64x64xf32> to vector<64x64xf32>
    %cst_388 = arith.constant dense<0.000000e+00> : vector<2x64xf32>
    %715 = tpu.matmul %598, %714, %cst_388 {dimension_numbers = #tpu.dot_dimension_numbers<[1], [0], [0], [1], [0, 0, 1, 1], [], []>} : vector<2x64xf32>, vector<64x64xf32>, vector<2x64xf32> -> vector<2x64xf32>
    %716 = arith.addf %712, %715 : vector<2x64xf32>
    %717 = vector.extract_strided_slice %0 {offsets = [3, 0, 0], sizes = [1, 1, 64], strides = [1, 1, 1]} : vector<4x1x64xf32> to vector<1x1x64xf32>
    %718 = vector.shape_cast %717 : vector<1x1x64xf32> to vector<1x64xf32>
    %719 = vector.broadcast %718 : vector<1x64xf32> to vector<2x64xf32>
    %720 = arith.addf %716, %719 : vector<2x64xf32>
    %721 = arith.negf %720 : vector<2x64xf32>
    %722 = math.exp %721 : vector<2x64xf32>
    %cst_389 = arith.constant 1.000000e+00 : f32
    %723 = vector.broadcast %cst_389 : f32 to vector<2x64xf32>
    %724 = arith.addf %723, %722 : vector<2x64xf32>
    %725 = arith.divf %723, %724 : vector<2x64xf32>
    %726 = arith.mulf %697, %596 : vector<2x64xf32>
    %727 = arith.mulf %681, %709 : vector<2x64xf32>
    %728 = arith.addf %726, %727 : vector<2x64xf32>
    %729 = math.tanh %728 : vector<2x64xf32>
    %730 = arith.mulf %725, %729 : vector<2x64xf32>
    %c0_390 = arith.constant 0 : index
    %c0_391 = arith.constant 0 : index
    %c0_392 = arith.constant 0 : index
    %731 = vector.load %arg4[%c0_390, %c0_391, %c0_392] : memref<4x64x64xf32, #tpu.memory_space<vmem>>, vector<1x64x64xf32>
    %732 = vector.shape_cast %731 : vector<1x64x64xf32> to vector<64x64xf32>
    %cst_393 = arith.constant dense<0.000000e+00> : vector<2x64xf32>
    %733 = tpu.matmul %730, %732, %cst_393 {dimension_numbers = #tpu.dot_dimension_numbers<[1], [0], [0], [1], [0, 0, 1, 1], [], []>} : vector<2x64xf32>, vector<64x64xf32>, vector<2x64xf32> -> vector<2x64xf32>
    %c0_394 = arith.constant 0 : index
    %c0_395 = arith.constant 0 : index
    %c0_396 = arith.constant 0 : index
    %734 = vector.load %arg5[%c0_394, %c0_395, %c0_396] : memref<4x64x64xf32, #tpu.memory_space<vmem>>, vector<1x64x64xf32>
    %735 = vector.shape_cast %734 : vector<1x64x64xf32> to vector<64x64xf32>
    %cst_397 = arith.constant dense<0.000000e+00> : vector<2x64xf32>
    %736 = tpu.matmul %663, %735, %cst_397 {dimension_numbers = #tpu.dot_dimension_numbers<[1], [0], [0], [1], [0, 0, 1, 1], [], []>} : vector<2x64xf32>, vector<64x64xf32>, vector<2x64xf32> -> vector<2x64xf32>
    %737 = arith.addf %733, %736 : vector<2x64xf32>
    %738 = vector.extract_strided_slice %1 {offsets = [0, 0, 0], sizes = [1, 1, 64], strides = [1, 1, 1]} : vector<4x1x64xf32> to vector<1x1x64xf32>
    %739 = vector.shape_cast %738 : vector<1x1x64xf32> to vector<1x64xf32>
    %740 = vector.broadcast %739 : vector<1x64xf32> to vector<2x64xf32>
    %741 = arith.addf %737, %740 : vector<2x64xf32>
    %742 = arith.negf %741 : vector<2x64xf32>
    %743 = math.exp %742 : vector<2x64xf32>
    %cst_398 = arith.constant 1.000000e+00 : f32
    %744 = vector.broadcast %cst_398 : f32 to vector<2x64xf32>
    %745 = arith.addf %744, %743 : vector<2x64xf32>
    %746 = arith.divf %744, %745 : vector<2x64xf32>
    %c1_399 = arith.constant 1 : index
    %c0_400 = arith.constant 0 : index
    %c0_401 = arith.constant 0 : index
    %747 = vector.load %arg4[%c1_399, %c0_400, %c0_401] : memref<4x64x64xf32, #tpu.memory_space<vmem>>, vector<1x64x64xf32>
    %748 = vector.shape_cast %747 : vector<1x64x64xf32> to vector<64x64xf32>
    %cst_402 = arith.constant dense<0.000000e+00> : vector<2x64xf32>
    %749 = tpu.matmul %730, %748, %cst_402 {dimension_numbers = #tpu.dot_dimension_numbers<[1], [0], [0], [1], [0, 0, 1, 1], [], []>} : vector<2x64xf32>, vector<64x64xf32>, vector<2x64xf32> -> vector<2x64xf32>
    %c1_403 = arith.constant 1 : index
    %c0_404 = arith.constant 0 : index
    %c0_405 = arith.constant 0 : index
    %750 = vector.load %arg5[%c1_403, %c0_404, %c0_405] : memref<4x64x64xf32, #tpu.memory_space<vmem>>, vector<1x64x64xf32>
    %751 = vector.shape_cast %750 : vector<1x64x64xf32> to vector<64x64xf32>
    %cst_406 = arith.constant dense<0.000000e+00> : vector<2x64xf32>
    %752 = tpu.matmul %663, %751, %cst_406 {dimension_numbers = #tpu.dot_dimension_numbers<[1], [0], [0], [1], [0, 0, 1, 1], [], []>} : vector<2x64xf32>, vector<64x64xf32>, vector<2x64xf32> -> vector<2x64xf32>
    %753 = arith.addf %749, %752 : vector<2x64xf32>
    %754 = vector.extract_strided_slice %1 {offsets = [1, 0, 0], sizes = [1, 1, 64], strides = [1, 1, 1]} : vector<4x1x64xf32> to vector<1x1x64xf32>
    %755 = vector.shape_cast %754 : vector<1x1x64xf32> to vector<1x64xf32>
    %756 = vector.broadcast %755 : vector<1x64xf32> to vector<2x64xf32>
    %757 = arith.addf %753, %756 : vector<2x64xf32>
    %758 = arith.negf %757 : vector<2x64xf32>
    %759 = math.exp %758 : vector<2x64xf32>
    %cst_407 = arith.constant 1.000000e+00 : f32
    %760 = vector.broadcast %cst_407 : f32 to vector<2x64xf32>
    %761 = arith.addf %760, %759 : vector<2x64xf32>
    %762 = arith.divf %760, %761 : vector<2x64xf32>
    %c2_408 = arith.constant 2 : index
    %c0_409 = arith.constant 0 : index
    %c0_410 = arith.constant 0 : index
    %763 = vector.load %arg4[%c2_408, %c0_409, %c0_410] : memref<4x64x64xf32, #tpu.memory_space<vmem>>, vector<1x64x64xf32>
    %764 = vector.shape_cast %763 : vector<1x64x64xf32> to vector<64x64xf32>
    %cst_411 = arith.constant dense<0.000000e+00> : vector<2x64xf32>
    %765 = tpu.matmul %730, %764, %cst_411 {dimension_numbers = #tpu.dot_dimension_numbers<[1], [0], [0], [1], [0, 0, 1, 1], [], []>} : vector<2x64xf32>, vector<64x64xf32>, vector<2x64xf32> -> vector<2x64xf32>
    %c2_412 = arith.constant 2 : index
    %c0_413 = arith.constant 0 : index
    %c0_414 = arith.constant 0 : index
    %766 = vector.load %arg5[%c2_412, %c0_413, %c0_414] : memref<4x64x64xf32, #tpu.memory_space<vmem>>, vector<1x64x64xf32>
    %767 = vector.shape_cast %766 : vector<1x64x64xf32> to vector<64x64xf32>
    %cst_415 = arith.constant dense<0.000000e+00> : vector<2x64xf32>
    %768 = tpu.matmul %663, %767, %cst_415 {dimension_numbers = #tpu.dot_dimension_numbers<[1], [0], [0], [1], [0, 0, 1, 1], [], []>} : vector<2x64xf32>, vector<64x64xf32>, vector<2x64xf32> -> vector<2x64xf32>
    %769 = arith.addf %765, %768 : vector<2x64xf32>
    %770 = vector.extract_strided_slice %1 {offsets = [2, 0, 0], sizes = [1, 1, 64], strides = [1, 1, 1]} : vector<4x1x64xf32> to vector<1x1x64xf32>
    %771 = vector.shape_cast %770 : vector<1x1x64xf32> to vector<1x64xf32>
    %772 = vector.broadcast %771 : vector<1x64xf32> to vector<2x64xf32>
    %773 = arith.addf %769, %772 : vector<2x64xf32>
    %774 = math.tanh %773 : vector<2x64xf32>
    %c3_416 = arith.constant 3 : index
    %c0_417 = arith.constant 0 : index
    %c0_418 = arith.constant 0 : index
    %775 = vector.load %arg4[%c3_416, %c0_417, %c0_418] : memref<4x64x64xf32, #tpu.memory_space<vmem>>, vector<1x64x64xf32>
    %776 = vector.shape_cast %775 : vector<1x64x64xf32> to vector<64x64xf32>
    %cst_419 = arith.constant dense<0.000000e+00> : vector<2x64xf32>
    %777 = tpu.matmul %730, %776, %cst_419 {dimension_numbers = #tpu.dot_dimension_numbers<[1], [0], [0], [1], [0, 0, 1, 1], [], []>} : vector<2x64xf32>, vector<64x64xf32>, vector<2x64xf32> -> vector<2x64xf32>
    %c3_420 = arith.constant 3 : index
    %c0_421 = arith.constant 0 : index
    %c0_422 = arith.constant 0 : index
    %778 = vector.load %arg5[%c3_420, %c0_421, %c0_422] : memref<4x64x64xf32, #tpu.memory_space<vmem>>, vector<1x64x64xf32>
    %779 = vector.shape_cast %778 : vector<1x64x64xf32> to vector<64x64xf32>
    %cst_423 = arith.constant dense<0.000000e+00> : vector<2x64xf32>
    %780 = tpu.matmul %663, %779, %cst_423 {dimension_numbers = #tpu.dot_dimension_numbers<[1], [0], [0], [1], [0, 0, 1, 1], [], []>} : vector<2x64xf32>, vector<64x64xf32>, vector<2x64xf32> -> vector<2x64xf32>
    %781 = arith.addf %777, %780 : vector<2x64xf32>
    %782 = vector.extract_strided_slice %1 {offsets = [3, 0, 0], sizes = [1, 1, 64], strides = [1, 1, 1]} : vector<4x1x64xf32> to vector<1x1x64xf32>
    %783 = vector.shape_cast %782 : vector<1x1x64xf32> to vector<1x64xf32>
    %784 = vector.broadcast %783 : vector<1x64xf32> to vector<2x64xf32>
    %785 = arith.addf %781, %784 : vector<2x64xf32>
    %786 = arith.negf %785 : vector<2x64xf32>
    %787 = math.exp %786 : vector<2x64xf32>
    %cst_424 = arith.constant 1.000000e+00 : f32
    %788 = vector.broadcast %cst_424 : f32 to vector<2x64xf32>
    %789 = arith.addf %788, %787 : vector<2x64xf32>
    %790 = arith.divf %788, %789 : vector<2x64xf32>
    %791 = arith.mulf %762, %661 : vector<2x64xf32>
    %792 = arith.mulf %746, %774 : vector<2x64xf32>
    %793 = arith.addf %791, %792 : vector<2x64xf32>
    %794 = math.tanh %793 : vector<2x64xf32>
    %795 = arith.mulf %790, %794 : vector<2x64xf32>
    %796 = vector.extract_strided_slice %2 {offsets = [0, 6, 0], sizes = [2, 1, 32], strides = [1, 1, 1]} : vector<2x8x32xf32> to vector<2x1x32xf32>
    %797 = vector.shape_cast %796 : vector<2x1x32xf32> to vector<2x32xf32>
    %c0_425 = arith.constant 0 : index
    %c0_426 = arith.constant 0 : index
    %c0_427 = arith.constant 0 : index
    %798 = vector.load %arg1[%c0_425, %c0_426, %c0_427] : memref<4x32x64xf32, #tpu.memory_space<vmem>>, vector<1x32x64xf32>
    %799 = vector.shape_cast %798 : vector<1x32x64xf32> to vector<32x64xf32>
    %cst_428 = arith.constant dense<0.000000e+00> : vector<2x64xf32>
    %800 = tpu.matmul %797, %799, %cst_428 {dimension_numbers = #tpu.dot_dimension_numbers<[1], [0], [0], [1], [0, 0, 1, 1], [], []>} : vector<2x32xf32>, vector<32x64xf32>, vector<2x64xf32> -> vector<2x64xf32>
    %c0_429 = arith.constant 0 : index
    %c0_430 = arith.constant 0 : index
    %c0_431 = arith.constant 0 : index
    %801 = vector.load %arg2[%c0_429, %c0_430, %c0_431] : memref<4x64x64xf32, #tpu.memory_space<vmem>>, vector<1x64x64xf32>
    %802 = vector.shape_cast %801 : vector<1x64x64xf32> to vector<64x64xf32>
    %cst_432 = arith.constant dense<0.000000e+00> : vector<2x64xf32>
    %803 = tpu.matmul %730, %802, %cst_432 {dimension_numbers = #tpu.dot_dimension_numbers<[1], [0], [0], [1], [0, 0, 1, 1], [], []>} : vector<2x64xf32>, vector<64x64xf32>, vector<2x64xf32> -> vector<2x64xf32>
    %804 = arith.addf %800, %803 : vector<2x64xf32>
    %805 = vector.extract_strided_slice %0 {offsets = [0, 0, 0], sizes = [1, 1, 64], strides = [1, 1, 1]} : vector<4x1x64xf32> to vector<1x1x64xf32>
    %806 = vector.shape_cast %805 : vector<1x1x64xf32> to vector<1x64xf32>
    %807 = vector.broadcast %806 : vector<1x64xf32> to vector<2x64xf32>
    %808 = arith.addf %804, %807 : vector<2x64xf32>
    %809 = arith.negf %808 : vector<2x64xf32>
    %810 = math.exp %809 : vector<2x64xf32>
    %cst_433 = arith.constant 1.000000e+00 : f32
    %811 = vector.broadcast %cst_433 : f32 to vector<2x64xf32>
    %812 = arith.addf %811, %810 : vector<2x64xf32>
    %813 = arith.divf %811, %812 : vector<2x64xf32>
    %c1_434 = arith.constant 1 : index
    %c0_435 = arith.constant 0 : index
    %c0_436 = arith.constant 0 : index
    %814 = vector.load %arg1[%c1_434, %c0_435, %c0_436] : memref<4x32x64xf32, #tpu.memory_space<vmem>>, vector<1x32x64xf32>
    %815 = vector.shape_cast %814 : vector<1x32x64xf32> to vector<32x64xf32>
    %cst_437 = arith.constant dense<0.000000e+00> : vector<2x64xf32>
    %816 = tpu.matmul %797, %815, %cst_437 {dimension_numbers = #tpu.dot_dimension_numbers<[1], [0], [0], [1], [0, 0, 1, 1], [], []>} : vector<2x32xf32>, vector<32x64xf32>, vector<2x64xf32> -> vector<2x64xf32>
    %c1_438 = arith.constant 1 : index
    %c0_439 = arith.constant 0 : index
    %c0_440 = arith.constant 0 : index
    %817 = vector.load %arg2[%c1_438, %c0_439, %c0_440] : memref<4x64x64xf32, #tpu.memory_space<vmem>>, vector<1x64x64xf32>
    %818 = vector.shape_cast %817 : vector<1x64x64xf32> to vector<64x64xf32>
    %cst_441 = arith.constant dense<0.000000e+00> : vector<2x64xf32>
    %819 = tpu.matmul %730, %818, %cst_441 {dimension_numbers = #tpu.dot_dimension_numbers<[1], [0], [0], [1], [0, 0, 1, 1], [], []>} : vector<2x64xf32>, vector<64x64xf32>, vector<2x64xf32> -> vector<2x64xf32>
    %820 = arith.addf %816, %819 : vector<2x64xf32>
    %821 = vector.extract_strided_slice %0 {offsets = [1, 0, 0], sizes = [1, 1, 64], strides = [1, 1, 1]} : vector<4x1x64xf32> to vector<1x1x64xf32>
    %822 = vector.shape_cast %821 : vector<1x1x64xf32> to vector<1x64xf32>
    %823 = vector.broadcast %822 : vector<1x64xf32> to vector<2x64xf32>
    %824 = arith.addf %820, %823 : vector<2x64xf32>
    %825 = arith.negf %824 : vector<2x64xf32>
    %826 = math.exp %825 : vector<2x64xf32>
    %cst_442 = arith.constant 1.000000e+00 : f32
    %827 = vector.broadcast %cst_442 : f32 to vector<2x64xf32>
    %828 = arith.addf %827, %826 : vector<2x64xf32>
    %829 = arith.divf %827, %828 : vector<2x64xf32>
    %c2_443 = arith.constant 2 : index
    %c0_444 = arith.constant 0 : index
    %c0_445 = arith.constant 0 : index
    %830 = vector.load %arg1[%c2_443, %c0_444, %c0_445] : memref<4x32x64xf32, #tpu.memory_space<vmem>>, vector<1x32x64xf32>
    %831 = vector.shape_cast %830 : vector<1x32x64xf32> to vector<32x64xf32>
    %cst_446 = arith.constant dense<0.000000e+00> : vector<2x64xf32>
    %832 = tpu.matmul %797, %831, %cst_446 {dimension_numbers = #tpu.dot_dimension_numbers<[1], [0], [0], [1], [0, 0, 1, 1], [], []>} : vector<2x32xf32>, vector<32x64xf32>, vector<2x64xf32> -> vector<2x64xf32>
    %c2_447 = arith.constant 2 : index
    %c0_448 = arith.constant 0 : index
    %c0_449 = arith.constant 0 : index
    %833 = vector.load %arg2[%c2_447, %c0_448, %c0_449] : memref<4x64x64xf32, #tpu.memory_space<vmem>>, vector<1x64x64xf32>
    %834 = vector.shape_cast %833 : vector<1x64x64xf32> to vector<64x64xf32>
    %cst_450 = arith.constant dense<0.000000e+00> : vector<2x64xf32>
    %835 = tpu.matmul %730, %834, %cst_450 {dimension_numbers = #tpu.dot_dimension_numbers<[1], [0], [0], [1], [0, 0, 1, 1], [], []>} : vector<2x64xf32>, vector<64x64xf32>, vector<2x64xf32> -> vector<2x64xf32>
    %836 = arith.addf %832, %835 : vector<2x64xf32>
    %837 = vector.extract_strided_slice %0 {offsets = [2, 0, 0], sizes = [1, 1, 64], strides = [1, 1, 1]} : vector<4x1x64xf32> to vector<1x1x64xf32>
    %838 = vector.shape_cast %837 : vector<1x1x64xf32> to vector<1x64xf32>
    %839 = vector.broadcast %838 : vector<1x64xf32> to vector<2x64xf32>
    %840 = arith.addf %836, %839 : vector<2x64xf32>
    %841 = math.tanh %840 : vector<2x64xf32>
    %c3_451 = arith.constant 3 : index
    %c0_452 = arith.constant 0 : index
    %c0_453 = arith.constant 0 : index
    %842 = vector.load %arg1[%c3_451, %c0_452, %c0_453] : memref<4x32x64xf32, #tpu.memory_space<vmem>>, vector<1x32x64xf32>
    %843 = vector.shape_cast %842 : vector<1x32x64xf32> to vector<32x64xf32>
    %cst_454 = arith.constant dense<0.000000e+00> : vector<2x64xf32>
    %844 = tpu.matmul %797, %843, %cst_454 {dimension_numbers = #tpu.dot_dimension_numbers<[1], [0], [0], [1], [0, 0, 1, 1], [], []>} : vector<2x32xf32>, vector<32x64xf32>, vector<2x64xf32> -> vector<2x64xf32>
    %c3_455 = arith.constant 3 : index
    %c0_456 = arith.constant 0 : index
    %c0_457 = arith.constant 0 : index
    %845 = vector.load %arg2[%c3_455, %c0_456, %c0_457] : memref<4x64x64xf32, #tpu.memory_space<vmem>>, vector<1x64x64xf32>
    %846 = vector.shape_cast %845 : vector<1x64x64xf32> to vector<64x64xf32>
    %cst_458 = arith.constant dense<0.000000e+00> : vector<2x64xf32>
    %847 = tpu.matmul %730, %846, %cst_458 {dimension_numbers = #tpu.dot_dimension_numbers<[1], [0], [0], [1], [0, 0, 1, 1], [], []>} : vector<2x64xf32>, vector<64x64xf32>, vector<2x64xf32> -> vector<2x64xf32>
    %848 = arith.addf %844, %847 : vector<2x64xf32>
    %849 = vector.extract_strided_slice %0 {offsets = [3, 0, 0], sizes = [1, 1, 64], strides = [1, 1, 1]} : vector<4x1x64xf32> to vector<1x1x64xf32>
    %850 = vector.shape_cast %849 : vector<1x1x64xf32> to vector<1x64xf32>
    %851 = vector.broadcast %850 : vector<1x64xf32> to vector<2x64xf32>
    %852 = arith.addf %848, %851 : vector<2x64xf32>
    %853 = arith.negf %852 : vector<2x64xf32>
    %854 = math.exp %853 : vector<2x64xf32>
    %cst_459 = arith.constant 1.000000e+00 : f32
    %855 = vector.broadcast %cst_459 : f32 to vector<2x64xf32>
    %856 = arith.addf %855, %854 : vector<2x64xf32>
    %857 = arith.divf %855, %856 : vector<2x64xf32>
    %858 = arith.mulf %829, %728 : vector<2x64xf32>
    %859 = arith.mulf %813, %841 : vector<2x64xf32>
    %860 = arith.addf %858, %859 : vector<2x64xf32>
    %861 = math.tanh %860 : vector<2x64xf32>
    %862 = arith.mulf %857, %861 : vector<2x64xf32>
    %c0_460 = arith.constant 0 : index
    %c0_461 = arith.constant 0 : index
    %c0_462 = arith.constant 0 : index
    %863 = vector.load %arg4[%c0_460, %c0_461, %c0_462] : memref<4x64x64xf32, #tpu.memory_space<vmem>>, vector<1x64x64xf32>
    %864 = vector.shape_cast %863 : vector<1x64x64xf32> to vector<64x64xf32>
    %cst_463 = arith.constant dense<0.000000e+00> : vector<2x64xf32>
    %865 = tpu.matmul %862, %864, %cst_463 {dimension_numbers = #tpu.dot_dimension_numbers<[1], [0], [0], [1], [0, 0, 1, 1], [], []>} : vector<2x64xf32>, vector<64x64xf32>, vector<2x64xf32> -> vector<2x64xf32>
    %c0_464 = arith.constant 0 : index
    %c0_465 = arith.constant 0 : index
    %c0_466 = arith.constant 0 : index
    %866 = vector.load %arg5[%c0_464, %c0_465, %c0_466] : memref<4x64x64xf32, #tpu.memory_space<vmem>>, vector<1x64x64xf32>
    %867 = vector.shape_cast %866 : vector<1x64x64xf32> to vector<64x64xf32>
    %cst_467 = arith.constant dense<0.000000e+00> : vector<2x64xf32>
    %868 = tpu.matmul %795, %867, %cst_467 {dimension_numbers = #tpu.dot_dimension_numbers<[1], [0], [0], [1], [0, 0, 1, 1], [], []>} : vector<2x64xf32>, vector<64x64xf32>, vector<2x64xf32> -> vector<2x64xf32>
    %869 = arith.addf %865, %868 : vector<2x64xf32>
    %870 = vector.extract_strided_slice %1 {offsets = [0, 0, 0], sizes = [1, 1, 64], strides = [1, 1, 1]} : vector<4x1x64xf32> to vector<1x1x64xf32>
    %871 = vector.shape_cast %870 : vector<1x1x64xf32> to vector<1x64xf32>
    %872 = vector.broadcast %871 : vector<1x64xf32> to vector<2x64xf32>
    %873 = arith.addf %869, %872 : vector<2x64xf32>
    %874 = arith.negf %873 : vector<2x64xf32>
    %875 = math.exp %874 : vector<2x64xf32>
    %cst_468 = arith.constant 1.000000e+00 : f32
    %876 = vector.broadcast %cst_468 : f32 to vector<2x64xf32>
    %877 = arith.addf %876, %875 : vector<2x64xf32>
    %878 = arith.divf %876, %877 : vector<2x64xf32>
    %c1_469 = arith.constant 1 : index
    %c0_470 = arith.constant 0 : index
    %c0_471 = arith.constant 0 : index
    %879 = vector.load %arg4[%c1_469, %c0_470, %c0_471] : memref<4x64x64xf32, #tpu.memory_space<vmem>>, vector<1x64x64xf32>
    %880 = vector.shape_cast %879 : vector<1x64x64xf32> to vector<64x64xf32>
    %cst_472 = arith.constant dense<0.000000e+00> : vector<2x64xf32>
    %881 = tpu.matmul %862, %880, %cst_472 {dimension_numbers = #tpu.dot_dimension_numbers<[1], [0], [0], [1], [0, 0, 1, 1], [], []>} : vector<2x64xf32>, vector<64x64xf32>, vector<2x64xf32> -> vector<2x64xf32>
    %c1_473 = arith.constant 1 : index
    %c0_474 = arith.constant 0 : index
    %c0_475 = arith.constant 0 : index
    %882 = vector.load %arg5[%c1_473, %c0_474, %c0_475] : memref<4x64x64xf32, #tpu.memory_space<vmem>>, vector<1x64x64xf32>
    %883 = vector.shape_cast %882 : vector<1x64x64xf32> to vector<64x64xf32>
    %cst_476 = arith.constant dense<0.000000e+00> : vector<2x64xf32>
    %884 = tpu.matmul %795, %883, %cst_476 {dimension_numbers = #tpu.dot_dimension_numbers<[1], [0], [0], [1], [0, 0, 1, 1], [], []>} : vector<2x64xf32>, vector<64x64xf32>, vector<2x64xf32> -> vector<2x64xf32>
    %885 = arith.addf %881, %884 : vector<2x64xf32>
    %886 = vector.extract_strided_slice %1 {offsets = [1, 0, 0], sizes = [1, 1, 64], strides = [1, 1, 1]} : vector<4x1x64xf32> to vector<1x1x64xf32>
    %887 = vector.shape_cast %886 : vector<1x1x64xf32> to vector<1x64xf32>
    %888 = vector.broadcast %887 : vector<1x64xf32> to vector<2x64xf32>
    %889 = arith.addf %885, %888 : vector<2x64xf32>
    %890 = arith.negf %889 : vector<2x64xf32>
    %891 = math.exp %890 : vector<2x64xf32>
    %cst_477 = arith.constant 1.000000e+00 : f32
    %892 = vector.broadcast %cst_477 : f32 to vector<2x64xf32>
    %893 = arith.addf %892, %891 : vector<2x64xf32>
    %894 = arith.divf %892, %893 : vector<2x64xf32>
    %c2_478 = arith.constant 2 : index
    %c0_479 = arith.constant 0 : index
    %c0_480 = arith.constant 0 : index
    %895 = vector.load %arg4[%c2_478, %c0_479, %c0_480] : memref<4x64x64xf32, #tpu.memory_space<vmem>>, vector<1x64x64xf32>
    %896 = vector.shape_cast %895 : vector<1x64x64xf32> to vector<64x64xf32>
    %cst_481 = arith.constant dense<0.000000e+00> : vector<2x64xf32>
    %897 = tpu.matmul %862, %896, %cst_481 {dimension_numbers = #tpu.dot_dimension_numbers<[1], [0], [0], [1], [0, 0, 1, 1], [], []>} : vector<2x64xf32>, vector<64x64xf32>, vector<2x64xf32> -> vector<2x64xf32>
    %c2_482 = arith.constant 2 : index
    %c0_483 = arith.constant 0 : index
    %c0_484 = arith.constant 0 : index
    %898 = vector.load %arg5[%c2_482, %c0_483, %c0_484] : memref<4x64x64xf32, #tpu.memory_space<vmem>>, vector<1x64x64xf32>
    %899 = vector.shape_cast %898 : vector<1x64x64xf32> to vector<64x64xf32>
    %cst_485 = arith.constant dense<0.000000e+00> : vector<2x64xf32>
    %900 = tpu.matmul %795, %899, %cst_485 {dimension_numbers = #tpu.dot_dimension_numbers<[1], [0], [0], [1], [0, 0, 1, 1], [], []>} : vector<2x64xf32>, vector<64x64xf32>, vector<2x64xf32> -> vector<2x64xf32>
    %901 = arith.addf %897, %900 : vector<2x64xf32>
    %902 = vector.extract_strided_slice %1 {offsets = [2, 0, 0], sizes = [1, 1, 64], strides = [1, 1, 1]} : vector<4x1x64xf32> to vector<1x1x64xf32>
    %903 = vector.shape_cast %902 : vector<1x1x64xf32> to vector<1x64xf32>
    %904 = vector.broadcast %903 : vector<1x64xf32> to vector<2x64xf32>
    %905 = arith.addf %901, %904 : vector<2x64xf32>
    %906 = math.tanh %905 : vector<2x64xf32>
    %c3_486 = arith.constant 3 : index
    %c0_487 = arith.constant 0 : index
    %c0_488 = arith.constant 0 : index
    %907 = vector.load %arg4[%c3_486, %c0_487, %c0_488] : memref<4x64x64xf32, #tpu.memory_space<vmem>>, vector<1x64x64xf32>
    %908 = vector.shape_cast %907 : vector<1x64x64xf32> to vector<64x64xf32>
    %cst_489 = arith.constant dense<0.000000e+00> : vector<2x64xf32>
    %909 = tpu.matmul %862, %908, %cst_489 {dimension_numbers = #tpu.dot_dimension_numbers<[1], [0], [0], [1], [0, 0, 1, 1], [], []>} : vector<2x64xf32>, vector<64x64xf32>, vector<2x64xf32> -> vector<2x64xf32>
    %c3_490 = arith.constant 3 : index
    %c0_491 = arith.constant 0 : index
    %c0_492 = arith.constant 0 : index
    %910 = vector.load %arg5[%c3_490, %c0_491, %c0_492] : memref<4x64x64xf32, #tpu.memory_space<vmem>>, vector<1x64x64xf32>
    %911 = vector.shape_cast %910 : vector<1x64x64xf32> to vector<64x64xf32>
    %cst_493 = arith.constant dense<0.000000e+00> : vector<2x64xf32>
    %912 = tpu.matmul %795, %911, %cst_493 {dimension_numbers = #tpu.dot_dimension_numbers<[1], [0], [0], [1], [0, 0, 1, 1], [], []>} : vector<2x64xf32>, vector<64x64xf32>, vector<2x64xf32> -> vector<2x64xf32>
    %913 = arith.addf %909, %912 : vector<2x64xf32>
    %914 = vector.extract_strided_slice %1 {offsets = [3, 0, 0], sizes = [1, 1, 64], strides = [1, 1, 1]} : vector<4x1x64xf32> to vector<1x1x64xf32>
    %915 = vector.shape_cast %914 : vector<1x1x64xf32> to vector<1x64xf32>
    %916 = vector.broadcast %915 : vector<1x64xf32> to vector<2x64xf32>
    %917 = arith.addf %913, %916 : vector<2x64xf32>
    %918 = arith.negf %917 : vector<2x64xf32>
    %919 = math.exp %918 : vector<2x64xf32>
    %cst_494 = arith.constant 1.000000e+00 : f32
    %920 = vector.broadcast %cst_494 : f32 to vector<2x64xf32>
    %921 = arith.addf %920, %919 : vector<2x64xf32>
    %922 = arith.divf %920, %921 : vector<2x64xf32>
    %923 = arith.mulf %894, %793 : vector<2x64xf32>
    %924 = arith.mulf %878, %906 : vector<2x64xf32>
    %925 = arith.addf %923, %924 : vector<2x64xf32>
    %926 = math.tanh %925 : vector<2x64xf32>
    %927 = arith.mulf %922, %926 : vector<2x64xf32>
    %928 = vector.extract_strided_slice %2 {offsets = [0, 7, 0], sizes = [2, 1, 32], strides = [1, 1, 1]} : vector<2x8x32xf32> to vector<2x1x32xf32>
    %929 = vector.shape_cast %928 : vector<2x1x32xf32> to vector<2x32xf32>
    %c0_495 = arith.constant 0 : index
    %c0_496 = arith.constant 0 : index
    %c0_497 = arith.constant 0 : index
    %930 = vector.load %arg1[%c0_495, %c0_496, %c0_497] : memref<4x32x64xf32, #tpu.memory_space<vmem>>, vector<1x32x64xf32>
    %931 = vector.shape_cast %930 : vector<1x32x64xf32> to vector<32x64xf32>
    %cst_498 = arith.constant dense<0.000000e+00> : vector<2x64xf32>
    %932 = tpu.matmul %929, %931, %cst_498 {dimension_numbers = #tpu.dot_dimension_numbers<[1], [0], [0], [1], [0, 0, 1, 1], [], []>} : vector<2x32xf32>, vector<32x64xf32>, vector<2x64xf32> -> vector<2x64xf32>
    %c0_499 = arith.constant 0 : index
    %c0_500 = arith.constant 0 : index
    %c0_501 = arith.constant 0 : index
    %933 = vector.load %arg2[%c0_499, %c0_500, %c0_501] : memref<4x64x64xf32, #tpu.memory_space<vmem>>, vector<1x64x64xf32>
    %934 = vector.shape_cast %933 : vector<1x64x64xf32> to vector<64x64xf32>
    %cst_502 = arith.constant dense<0.000000e+00> : vector<2x64xf32>
    %935 = tpu.matmul %862, %934, %cst_502 {dimension_numbers = #tpu.dot_dimension_numbers<[1], [0], [0], [1], [0, 0, 1, 1], [], []>} : vector<2x64xf32>, vector<64x64xf32>, vector<2x64xf32> -> vector<2x64xf32>
    %936 = arith.addf %932, %935 : vector<2x64xf32>
    %937 = vector.extract_strided_slice %0 {offsets = [0, 0, 0], sizes = [1, 1, 64], strides = [1, 1, 1]} : vector<4x1x64xf32> to vector<1x1x64xf32>
    %938 = vector.shape_cast %937 : vector<1x1x64xf32> to vector<1x64xf32>
    %939 = vector.broadcast %938 : vector<1x64xf32> to vector<2x64xf32>
    %940 = arith.addf %936, %939 : vector<2x64xf32>
    %941 = arith.negf %940 : vector<2x64xf32>
    %942 = math.exp %941 : vector<2x64xf32>
    %cst_503 = arith.constant 1.000000e+00 : f32
    %943 = vector.broadcast %cst_503 : f32 to vector<2x64xf32>
    %944 = arith.addf %943, %942 : vector<2x64xf32>
    %945 = arith.divf %943, %944 : vector<2x64xf32>
    %c1_504 = arith.constant 1 : index
    %c0_505 = arith.constant 0 : index
    %c0_506 = arith.constant 0 : index
    %946 = vector.load %arg1[%c1_504, %c0_505, %c0_506] : memref<4x32x64xf32, #tpu.memory_space<vmem>>, vector<1x32x64xf32>
    %947 = vector.shape_cast %946 : vector<1x32x64xf32> to vector<32x64xf32>
    %cst_507 = arith.constant dense<0.000000e+00> : vector<2x64xf32>
    %948 = tpu.matmul %929, %947, %cst_507 {dimension_numbers = #tpu.dot_dimension_numbers<[1], [0], [0], [1], [0, 0, 1, 1], [], []>} : vector<2x32xf32>, vector<32x64xf32>, vector<2x64xf32> -> vector<2x64xf32>
    %c1_508 = arith.constant 1 : index
    %c0_509 = arith.constant 0 : index
    %c0_510 = arith.constant 0 : index
    %949 = vector.load %arg2[%c1_508, %c0_509, %c0_510] : memref<4x64x64xf32, #tpu.memory_space<vmem>>, vector<1x64x64xf32>
    %950 = vector.shape_cast %949 : vector<1x64x64xf32> to vector<64x64xf32>
    %cst_511 = arith.constant dense<0.000000e+00> : vector<2x64xf32>
    %951 = tpu.matmul %862, %950, %cst_511 {dimension_numbers = #tpu.dot_dimension_numbers<[1], [0], [0], [1], [0, 0, 1, 1], [], []>} : vector<2x64xf32>, vector<64x64xf32>, vector<2x64xf32> -> vector<2x64xf32>
    %952 = arith.addf %948, %951 : vector<2x64xf32>
    %953 = vector.extract_strided_slice %0 {offsets = [1, 0, 0], sizes = [1, 1, 64], strides = [1, 1, 1]} : vector<4x1x64xf32> to vector<1x1x64xf32>
    %954 = vector.shape_cast %953 : vector<1x1x64xf32> to vector<1x64xf32>
    %955 = vector.broadcast %954 : vector<1x64xf32> to vector<2x64xf32>
    %956 = arith.addf %952, %955 : vector<2x64xf32>
    %957 = arith.negf %956 : vector<2x64xf32>
    %958 = math.exp %957 : vector<2x64xf32>
    %cst_512 = arith.constant 1.000000e+00 : f32
    %959 = vector.broadcast %cst_512 : f32 to vector<2x64xf32>
    %960 = arith.addf %959, %958 : vector<2x64xf32>
    %961 = arith.divf %959, %960 : vector<2x64xf32>
    %c2_513 = arith.constant 2 : index
    %c0_514 = arith.constant 0 : index
    %c0_515 = arith.constant 0 : index
    %962 = vector.load %arg1[%c2_513, %c0_514, %c0_515] : memref<4x32x64xf32, #tpu.memory_space<vmem>>, vector<1x32x64xf32>
    %963 = vector.shape_cast %962 : vector<1x32x64xf32> to vector<32x64xf32>
    %cst_516 = arith.constant dense<0.000000e+00> : vector<2x64xf32>
    %964 = tpu.matmul %929, %963, %cst_516 {dimension_numbers = #tpu.dot_dimension_numbers<[1], [0], [0], [1], [0, 0, 1, 1], [], []>} : vector<2x32xf32>, vector<32x64xf32>, vector<2x64xf32> -> vector<2x64xf32>
    %c2_517 = arith.constant 2 : index
    %c0_518 = arith.constant 0 : index
    %c0_519 = arith.constant 0 : index
    %965 = vector.load %arg2[%c2_517, %c0_518, %c0_519] : memref<4x64x64xf32, #tpu.memory_space<vmem>>, vector<1x64x64xf32>
    %966 = vector.shape_cast %965 : vector<1x64x64xf32> to vector<64x64xf32>
    %cst_520 = arith.constant dense<0.000000e+00> : vector<2x64xf32>
    %967 = tpu.matmul %862, %966, %cst_520 {dimension_numbers = #tpu.dot_dimension_numbers<[1], [0], [0], [1], [0, 0, 1, 1], [], []>} : vector<2x64xf32>, vector<64x64xf32>, vector<2x64xf32> -> vector<2x64xf32>
    %968 = arith.addf %964, %967 : vector<2x64xf32>
    %969 = vector.extract_strided_slice %0 {offsets = [2, 0, 0], sizes = [1, 1, 64], strides = [1, 1, 1]} : vector<4x1x64xf32> to vector<1x1x64xf32>
    %970 = vector.shape_cast %969 : vector<1x1x64xf32> to vector<1x64xf32>
    %971 = vector.broadcast %970 : vector<1x64xf32> to vector<2x64xf32>
    %972 = arith.addf %968, %971 : vector<2x64xf32>
    %973 = math.tanh %972 : vector<2x64xf32>
    %c3_521 = arith.constant 3 : index
    %c0_522 = arith.constant 0 : index
    %c0_523 = arith.constant 0 : index
    %974 = vector.load %arg1[%c3_521, %c0_522, %c0_523] : memref<4x32x64xf32, #tpu.memory_space<vmem>>, vector<1x32x64xf32>
    %975 = vector.shape_cast %974 : vector<1x32x64xf32> to vector<32x64xf32>
    %cst_524 = arith.constant dense<0.000000e+00> : vector<2x64xf32>
    %976 = tpu.matmul %929, %975, %cst_524 {dimension_numbers = #tpu.dot_dimension_numbers<[1], [0], [0], [1], [0, 0, 1, 1], [], []>} : vector<2x32xf32>, vector<32x64xf32>, vector<2x64xf32> -> vector<2x64xf32>
    %c3_525 = arith.constant 3 : index
    %c0_526 = arith.constant 0 : index
    %c0_527 = arith.constant 0 : index
    %977 = vector.load %arg2[%c3_525, %c0_526, %c0_527] : memref<4x64x64xf32, #tpu.memory_space<vmem>>, vector<1x64x64xf32>
    %978 = vector.shape_cast %977 : vector<1x64x64xf32> to vector<64x64xf32>
    %cst_528 = arith.constant dense<0.000000e+00> : vector<2x64xf32>
    %979 = tpu.matmul %862, %978, %cst_528 {dimension_numbers = #tpu.dot_dimension_numbers<[1], [0], [0], [1], [0, 0, 1, 1], [], []>} : vector<2x64xf32>, vector<64x64xf32>, vector<2x64xf32> -> vector<2x64xf32>
    %980 = arith.addf %976, %979 : vector<2x64xf32>
    %981 = vector.extract_strided_slice %0 {offsets = [3, 0, 0], sizes = [1, 1, 64], strides = [1, 1, 1]} : vector<4x1x64xf32> to vector<1x1x64xf32>
    %982 = vector.shape_cast %981 : vector<1x1x64xf32> to vector<1x64xf32>
    %983 = vector.broadcast %982 : vector<1x64xf32> to vector<2x64xf32>
    %984 = arith.addf %980, %983 : vector<2x64xf32>
    %985 = arith.negf %984 : vector<2x64xf32>
    %986 = math.exp %985 : vector<2x64xf32>
    %cst_529 = arith.constant 1.000000e+00 : f32
    %987 = vector.broadcast %cst_529 : f32 to vector<2x64xf32>
    %988 = arith.addf %987, %986 : vector<2x64xf32>
    %989 = arith.divf %987, %988 : vector<2x64xf32>
    %990 = arith.mulf %961, %860 : vector<2x64xf32>
    %991 = arith.mulf %945, %973 : vector<2x64xf32>
    %992 = arith.addf %990, %991 : vector<2x64xf32>
    %993 = math.tanh %992 : vector<2x64xf32>
    %994 = arith.mulf %989, %993 : vector<2x64xf32>
    %c0_530 = arith.constant 0 : index
    %c0_531 = arith.constant 0 : index
    %c0_532 = arith.constant 0 : index
    %995 = vector.load %arg4[%c0_530, %c0_531, %c0_532] : memref<4x64x64xf32, #tpu.memory_space<vmem>>, vector<1x64x64xf32>
    %996 = vector.shape_cast %995 : vector<1x64x64xf32> to vector<64x64xf32>
    %cst_533 = arith.constant dense<0.000000e+00> : vector<2x64xf32>
    %997 = tpu.matmul %994, %996, %cst_533 {dimension_numbers = #tpu.dot_dimension_numbers<[1], [0], [0], [1], [0, 0, 1, 1], [], []>} : vector<2x64xf32>, vector<64x64xf32>, vector<2x64xf32> -> vector<2x64xf32>
    %c0_534 = arith.constant 0 : index
    %c0_535 = arith.constant 0 : index
    %c0_536 = arith.constant 0 : index
    %998 = vector.load %arg5[%c0_534, %c0_535, %c0_536] : memref<4x64x64xf32, #tpu.memory_space<vmem>>, vector<1x64x64xf32>
    %999 = vector.shape_cast %998 : vector<1x64x64xf32> to vector<64x64xf32>
    %cst_537 = arith.constant dense<0.000000e+00> : vector<2x64xf32>
    %1000 = tpu.matmul %927, %999, %cst_537 {dimension_numbers = #tpu.dot_dimension_numbers<[1], [0], [0], [1], [0, 0, 1, 1], [], []>} : vector<2x64xf32>, vector<64x64xf32>, vector<2x64xf32> -> vector<2x64xf32>
    %1001 = arith.addf %997, %1000 : vector<2x64xf32>
    %1002 = vector.extract_strided_slice %1 {offsets = [0, 0, 0], sizes = [1, 1, 64], strides = [1, 1, 1]} : vector<4x1x64xf32> to vector<1x1x64xf32>
    %1003 = vector.shape_cast %1002 : vector<1x1x64xf32> to vector<1x64xf32>
    %1004 = vector.broadcast %1003 : vector<1x64xf32> to vector<2x64xf32>
    %1005 = arith.addf %1001, %1004 : vector<2x64xf32>
    %1006 = arith.negf %1005 : vector<2x64xf32>
    %1007 = math.exp %1006 : vector<2x64xf32>
    %cst_538 = arith.constant 1.000000e+00 : f32
    %1008 = vector.broadcast %cst_538 : f32 to vector<2x64xf32>
    %1009 = arith.addf %1008, %1007 : vector<2x64xf32>
    %1010 = arith.divf %1008, %1009 : vector<2x64xf32>
    %c1_539 = arith.constant 1 : index
    %c0_540 = arith.constant 0 : index
    %c0_541 = arith.constant 0 : index
    %1011 = vector.load %arg4[%c1_539, %c0_540, %c0_541] : memref<4x64x64xf32, #tpu.memory_space<vmem>>, vector<1x64x64xf32>
    %1012 = vector.shape_cast %1011 : vector<1x64x64xf32> to vector<64x64xf32>
    %cst_542 = arith.constant dense<0.000000e+00> : vector<2x64xf32>
    %1013 = tpu.matmul %994, %1012, %cst_542 {dimension_numbers = #tpu.dot_dimension_numbers<[1], [0], [0], [1], [0, 0, 1, 1], [], []>} : vector<2x64xf32>, vector<64x64xf32>, vector<2x64xf32> -> vector<2x64xf32>
    %c1_543 = arith.constant 1 : index
    %c0_544 = arith.constant 0 : index
    %c0_545 = arith.constant 0 : index
    %1014 = vector.load %arg5[%c1_543, %c0_544, %c0_545] : memref<4x64x64xf32, #tpu.memory_space<vmem>>, vector<1x64x64xf32>
    %1015 = vector.shape_cast %1014 : vector<1x64x64xf32> to vector<64x64xf32>
    %cst_546 = arith.constant dense<0.000000e+00> : vector<2x64xf32>
    %1016 = tpu.matmul %927, %1015, %cst_546 {dimension_numbers = #tpu.dot_dimension_numbers<[1], [0], [0], [1], [0, 0, 1, 1], [], []>} : vector<2x64xf32>, vector<64x64xf32>, vector<2x64xf32> -> vector<2x64xf32>
    %1017 = arith.addf %1013, %1016 : vector<2x64xf32>
    %1018 = vector.extract_strided_slice %1 {offsets = [1, 0, 0], sizes = [1, 1, 64], strides = [1, 1, 1]} : vector<4x1x64xf32> to vector<1x1x64xf32>
    %1019 = vector.shape_cast %1018 : vector<1x1x64xf32> to vector<1x64xf32>
    %1020 = vector.broadcast %1019 : vector<1x64xf32> to vector<2x64xf32>
    %1021 = arith.addf %1017, %1020 : vector<2x64xf32>
    %1022 = arith.negf %1021 : vector<2x64xf32>
    %1023 = math.exp %1022 : vector<2x64xf32>
    %cst_547 = arith.constant 1.000000e+00 : f32
    %1024 = vector.broadcast %cst_547 : f32 to vector<2x64xf32>
    %1025 = arith.addf %1024, %1023 : vector<2x64xf32>
    %1026 = arith.divf %1024, %1025 : vector<2x64xf32>
    %c2_548 = arith.constant 2 : index
    %c0_549 = arith.constant 0 : index
    %c0_550 = arith.constant 0 : index
    %1027 = vector.load %arg4[%c2_548, %c0_549, %c0_550] : memref<4x64x64xf32, #tpu.memory_space<vmem>>, vector<1x64x64xf32>
    %1028 = vector.shape_cast %1027 : vector<1x64x64xf32> to vector<64x64xf32>
    %cst_551 = arith.constant dense<0.000000e+00> : vector<2x64xf32>
    %1029 = tpu.matmul %994, %1028, %cst_551 {dimension_numbers = #tpu.dot_dimension_numbers<[1], [0], [0], [1], [0, 0, 1, 1], [], []>} : vector<2x64xf32>, vector<64x64xf32>, vector<2x64xf32> -> vector<2x64xf32>
    %c2_552 = arith.constant 2 : index
    %c0_553 = arith.constant 0 : index
    %c0_554 = arith.constant 0 : index
    %1030 = vector.load %arg5[%c2_552, %c0_553, %c0_554] : memref<4x64x64xf32, #tpu.memory_space<vmem>>, vector<1x64x64xf32>
    %1031 = vector.shape_cast %1030 : vector<1x64x64xf32> to vector<64x64xf32>
    %cst_555 = arith.constant dense<0.000000e+00> : vector<2x64xf32>
    %1032 = tpu.matmul %927, %1031, %cst_555 {dimension_numbers = #tpu.dot_dimension_numbers<[1], [0], [0], [1], [0, 0, 1, 1], [], []>} : vector<2x64xf32>, vector<64x64xf32>, vector<2x64xf32> -> vector<2x64xf32>
    %1033 = arith.addf %1029, %1032 : vector<2x64xf32>
    %1034 = vector.extract_strided_slice %1 {offsets = [2, 0, 0], sizes = [1, 1, 64], strides = [1, 1, 1]} : vector<4x1x64xf32> to vector<1x1x64xf32>
    %1035 = vector.shape_cast %1034 : vector<1x1x64xf32> to vector<1x64xf32>
    %1036 = vector.broadcast %1035 : vector<1x64xf32> to vector<2x64xf32>
    %1037 = arith.addf %1033, %1036 : vector<2x64xf32>
    %1038 = math.tanh %1037 : vector<2x64xf32>
    %c3_556 = arith.constant 3 : index
    %c0_557 = arith.constant 0 : index
    %c0_558 = arith.constant 0 : index
    %1039 = vector.load %arg4[%c3_556, %c0_557, %c0_558] : memref<4x64x64xf32, #tpu.memory_space<vmem>>, vector<1x64x64xf32>
    %1040 = vector.shape_cast %1039 : vector<1x64x64xf32> to vector<64x64xf32>
    %cst_559 = arith.constant dense<0.000000e+00> : vector<2x64xf32>
    %1041 = tpu.matmul %994, %1040, %cst_559 {dimension_numbers = #tpu.dot_dimension_numbers<[1], [0], [0], [1], [0, 0, 1, 1], [], []>} : vector<2x64xf32>, vector<64x64xf32>, vector<2x64xf32> -> vector<2x64xf32>
    %c3_560 = arith.constant 3 : index
    %c0_561 = arith.constant 0 : index
    %c0_562 = arith.constant 0 : index
    %1042 = vector.load %arg5[%c3_560, %c0_561, %c0_562] : memref<4x64x64xf32, #tpu.memory_space<vmem>>, vector<1x64x64xf32>
    %1043 = vector.shape_cast %1042 : vector<1x64x64xf32> to vector<64x64xf32>
    %cst_563 = arith.constant dense<0.000000e+00> : vector<2x64xf32>
    %1044 = tpu.matmul %927, %1043, %cst_563 {dimension_numbers = #tpu.dot_dimension_numbers<[1], [0], [0], [1], [0, 0, 1, 1], [], []>} : vector<2x64xf32>, vector<64x64xf32>, vector<2x64xf32> -> vector<2x64xf32>
    %1045 = arith.addf %1041, %1044 : vector<2x64xf32>
    %1046 = vector.extract_strided_slice %1 {offsets = [3, 0, 0], sizes = [1, 1, 64], strides = [1, 1, 1]} : vector<4x1x64xf32> to vector<1x1x64xf32>
    %1047 = vector.shape_cast %1046 : vector<1x1x64xf32> to vector<1x64xf32>
    %1048 = vector.broadcast %1047 : vector<1x64xf32> to vector<2x64xf32>
    %1049 = arith.addf %1045, %1048 : vector<2x64xf32>
    %1050 = arith.negf %1049 : vector<2x64xf32>
    %1051 = math.exp %1050 : vector<2x64xf32>
    %cst_564 = arith.constant 1.000000e+00 : f32
    %1052 = vector.broadcast %cst_564 : f32 to vector<2x64xf32>
    %1053 = arith.addf %1052, %1051 : vector<2x64xf32>
    %1054 = arith.divf %1052, %1053 : vector<2x64xf32>
    %1055 = arith.mulf %1026, %925 : vector<2x64xf32>
    %1056 = arith.mulf %1010, %1038 : vector<2x64xf32>
    %1057 = arith.addf %1055, %1056 : vector<2x64xf32>
    %1058 = math.tanh %1057 : vector<2x64xf32>
    %1059 = arith.mulf %1054, %1058 : vector<2x64xf32>
    %c0_565 = arith.constant 0 : index
    %c0_566 = arith.constant 0 : index
    %1060 = vector.load %arg7[%c0_565, %c0_566] : memref<64x24xf32, #tpu.memory_space<vmem>>, vector<64x24xf32>
    %cst_567 = arith.constant dense<0.000000e+00> : vector<2x24xf32>
    %1061 = tpu.matmul %1059, %1060, %cst_567 {dimension_numbers = #tpu.dot_dimension_numbers<[1], [0], [0], [1], [0, 0, 1, 1], [], []>} : vector<2x64xf32>, vector<64x24xf32>, vector<2x24xf32> -> vector<2x24xf32>
    %c0_568 = arith.constant 0 : index
    %c0_569 = arith.constant 0 : index
    %1062 = vector.load %arg8[%c0_568, %c0_569] : memref<1x24xf32, #tpu.memory_space<vmem>>, vector<1x24xf32>
    %1063 = vector.broadcast %1062 : vector<1x24xf32> to vector<2x24xf32>
    %1064 = arith.addf %1061, %1063 : vector<2x24xf32>
    %c0_570 = arith.constant 0 : index
    %c0_571 = arith.constant 0 : index
    %1065 = vector.load %arg9[%c0_570, %c0_571] : memref<2x24xf32, #tpu.memory_space<vmem>>, vector<2x24xf32>
    tpu.vector_store %arg9[%c0_570, %c0_571], %1064 {strides = array<i32>} : memref<2x24xf32, #tpu.memory_space<vmem>>, vector<2x24xf32>,
    return
  }
}

</mosaic_0001>

<bundles_post_ra>
// kernel: _loganomaly_forward_fn.1
= control target key start
LH: loop header
LB: loop body
LE: loop exit
PB: predicated region body
PF: predicated region fallthrough
CT: control target
= control target key end

     0   :  { %14 = vsyncpa [#allocation3], 0  ;;  %s17041_s0 = inlined_call_operand.vmem [shape: f32[2,8,32], index: 0, kind: input, shape index: {}]   ;;  %s17042_s1 = inlined_call_operand.hbm [shape: f32[4,32,64], index: 1, kind: input, shape index: {}]   ;;  %s17043_s2 = inlined_call_operand.hbm [shape: f32[4,64,64], index: 2, kind: input, shape index: {}]   ;;  %s17044_s3 = inlined_call_operand.vmem [shape: f32[4,1,64], index: 3, kind: input, shape index: {}]   ;;  %s17045_s4 = inlined_call_operand.hbm [shape: f32[4,64,64], index: 4, kind: input, shape index: {}]   ;;  %s17046_s5 = inlined_call_operand.hbm [shape: f32[4,64,64], index: 5, kind: input, shape index: {}]   ;;  %s17047_s6 = inlined_call_operand.vmem [shape: f32[4,1,64], index: 6, kind: input, shape index: {}]   ;;  %s17048_s7 = inlined_call_operand.vmem [shape: f32[64,24], index: 7, kind: input, shape index: {}]   ;;  %s17049_s8 = inlined_call_operand.vmem [shape: f32[1,24], index: 8, kind: input, shape index: {}]   ;;  %s17050_s9 = inlined_call_operand.hbm [shape: f32[2,24], index: 9, kind: output, shape index: {}]  }
   0x1   :  { %15 = vsyncpa [#allocation6], 0 }
   0x2   :  { %16 = vsyncpa [#allocation9], 0 }
   0x3   :  { %17 = vsyncpa [#allocation4], 0  ;;  %s15042_s30 = smov [#allocation5]   ;;  %s15043_s11 = smov [#allocation2]  }
   0x4   :  { %s37_s10 = sshll.u32 %s15042_s30, 4  ;;  %s25_s12 = sshll.u32 %s15043_s11, 4  ;;  %s38_s10 = int_to_ptr.vmem [resolvable:$true] %s37_s10  ;;  %s15102_s12 = int_to_ptr.vmem [resolvable:$true] %s25_s12 }
   0x5   :  { %s14924_s15 = scalar_lea.hbm %s17043_s2, 4096 }
   0x6   :  { %p14925_p0 = scmp.ne.s32.totalorder %s17043_s2, %s14924_s15  ;;  %p14928_p1 = scmp.lt.u32.totalorder %s14924_s15, %s17043_s2 }
   0x8   :  { %p14930_p2 = pnand %p14928_p1, %p14925_p0 }
   0xa   :  { %14933 = shalt.err (!%p14930_p2)
}
   0xb   :  { %s14934_s20 = scalar_lea.vmem %s38_s10, 4096  ;;  %p14939_p4 = scmp.lt.s32.totalorder %s38_s10, %s38_s10 }
   0xc   :  { %p14935_p3 = scmp.ne.s32.totalorder %s38_s10, %s14934_s20  ;;  %p14940_p5 = scmp.lt.s32.totalorder %s14934_s20, %s14934_s20 }
   0xe   :  { %p14941_p6 = por %p14940_p5, %p14939_p4 }
  0x10   :  { %p14942_p7 = pnand %p14941_p6, %p14935_p3 }
  0x12   :  { %14945 = shalt.err (!%p14942_p7)
}
  0x13   :  { %s15044_s21 = smov 128   ;;  %s15045_s22 = smov 8  }
  0x14   :  { %43 = dma.hbm_to_vmem [thread:$0]  %s17043_s2, 4096, %s38_s10, [#allocation6], %s15044_s21, %s15044_s21, %s15045_s22  }
  0x15   :  { %s14946_s27 = scalar_lea.hbm %s17042_s1, 2048 }
  0x16   :  { %p14947_p8 = scmp.ne.s32.totalorder %s17042_s1, %s14946_s27  ;;  %p14950_p9 = scmp.lt.u32.totalorder %s14946_s27, %s17042_s1 }
  0x18   :  { %p14952_p10 = pnand %p14950_p9, %p14947_p8 }
  0x1a   :  { %14955 = shalt.err (!%p14952_p10)
}
  0x1b   :  { %s14956_s13 = scalar_lea.vmem %s15102_s12, 2048  ;;  %p14961_p12 = scmp.lt.s32.totalorder %s15102_s12, %s15102_s12 }
  0x1c   :  { %p14957_p11 = scmp.ne.s32.totalorder %s15102_s12, %s14956_s13  ;;  %p14962_p13 = scmp.lt.s32.totalorder %s14956_s13, %s14956_s13 }
  0x1e   :  { %p14963_p0 = por %p14962_p13, %p14961_p12 }
  0x20   :  { %p14964_p1 = pnand %p14963_p0, %p14957_p11 }
  0x22   :  { %14967 = shalt.err (!%p14964_p1)
}
  0x23   :  { %31 = dma.hbm_to_vmem [thread:$0]  %s17042_s1, 2048, %s15102_s12, [#allocation3], %s15044_s21, %s15044_s21, %s15045_s22  }
  0x24   :  { %s15046_s14 = smov [#allocation7]   ;;  %s15047_s16 = smov [#allocation8]  }
  0x25   :  { %s51_s15 = sshll.u32 %s15046_s14, 4  ;;  %s63_s17 = sshll.u32 %s15047_s16, 4  ;;  %s52_s15 = int_to_ptr.vmem [resolvable:$true] %s51_s15  ;;  %s15139_s17 = int_to_ptr.vmem [resolvable:$true] %s63_s17 }
  0x26   :  { %s14968_s20 = scalar_lea.hbm %s17045_s4, 4096 }
  0x27   :  { %p14969_p2 = scmp.ne.s32.totalorder %s17045_s4, %s14968_s20  ;;  %p14972_p3 = scmp.lt.u32.totalorder %s14968_s20, %s17045_s4 }
  0x29   :  { %p14974_p4 = pnand %p14972_p3, %p14969_p2 }
  0x2b   :  { %14977 = shalt.err (!%p14974_p4)
}
  0x2c   :  { %s14978_s1 = scalar_lea.vmem %s52_s15, 4096  ;;  %p14983_p6 = scmp.lt.s32.totalorder %s52_s15, %s52_s15 }
  0x2d   :  { %p14979_p5 = scmp.ne.s32.totalorder %s52_s15, %s14978_s1  ;;  %p14984_p7 = scmp.lt.s32.totalorder %s14978_s1, %s14978_s1 }
  0x2f   :  { %p14985_p8 = por %p14984_p7, %p14983_p6 }
  0x31   :  { %p14986_p9 = pnand %p14985_p8, %p14979_p5 }
  0x33   :  { %14989 = shalt.err (!%p14986_p9)
}
  0x34   :  { %57 = dma.hbm_to_vmem [thread:$0]  %s17045_s4, 4096, %s52_s15, [#allocation6], %s15044_s21, %s15044_s21, %s15045_s22  }
  0x35   :  { %s14990_s30 = scalar_lea.hbm %s17046_s5, 4096 }
  0x36   :  { %p14991_p10 = scmp.ne.s32.totalorder %s17046_s5, %s14990_s30  ;;  %p14994_p11 = scmp.lt.u32.totalorder %s14990_s30, %s17046_s5 }
  0x38   :  { %p14996_p12 = pnand %p14994_p11, %p14991_p10 }
  0x3a   :  { %14999 = shalt.err (!%p14996_p12)
}
  0x3b   :  { %s15000_s14 = scalar_lea.vmem %s15139_s17, 4096  ;;  %p15005_p0 = scmp.lt.s32.totalorder %s15139_s17, %s15139_s17 }
  0x3c   :  { %p15001_p13 = scmp.ne.s32.totalorder %s15139_s17, %s15000_s14  ;;  %p15006_p1 = scmp.lt.s32.totalorder %s15000_s14, %s15000_s14 }
  0x3e   :  { %p15007_p2 = por %p15006_p1, %p15005_p0 }
  0x40   :  { %p15008_p3 = pnand %p15007_p2, %p15001_p13 }
  0x42   :  { %15011 = shalt.err (!%p15008_p3)
}
  0x43   :  { %69 = dma.hbm_to_vmem [thread:$0]  %s17046_s5, 4096, %s15139_s17, [#allocation9], %s15044_s21, %s15044_s21, %s15045_s22  }
  0x44   :  { %15034 = dma.done.wait [#allocation3], 2048  }
  0x45   :  { %15035 = vsyncadd [#allocation3], 4294965248 }
  0x46   :  { %15036 = dma.done.wait [#allocation6], 8192  }
  0x47   :  { %15037 = vsyncadd [#allocation6], 4294959104 }
  0x48   :  { %15038 = dma.done.wait [#allocation9], 4096  }
  0x49   :  { %15039 = vsyncadd [#allocation9], 4294963200  ;;  %v17053_v0 = vmov 0.0|0.0   ;;  %vm15049_vm0 = vmmov 0   ;;  %v17051_v1 = vmov 0.0   ;;  %v102_v2 = vld [vmem:[#allocation5] sm:$0xff] }
  0x4a   :  { %13282 = vmatprep.subr.bf16.mxu0 %v17053_v0  ;;  %13294 = vmatprep.subr.bf16.mxu1 %v17053_v0  ;;  %v103_v3 = vld [vmem:[#allocation5 + $0x8] sm:$0xff]  ;;  %v98_v4 = vld [vmem:[#allocation2] sm:$0xff]  ;;  %v104_v7 = vld [vmem:[#allocation5 + $0x10] sm:$0xff]  ;;  %vm187_vm1 = vcmask 1041409   ;;  %vm189_vm2 = vcmask 261120   ;;  %vm110_vm3 = vcmask 523264  }
  0x4b   :  { %11114 = vmatprep.mubr.msk.f32.mxu1 %vm15049_vm0, %v17051_v1  ;;  %11103 = vmatprep.mubr.msk.f32.mxu0 %vm15049_vm0, %v17051_v1  ;;  %v15182_v5 = vpack.c.bf16 %v103_v3, %v102_v2  ;;  %v99_v6 = vld [vmem:[#allocation2 + $0x8] sm:$0xff]  ;;  %v105_v8 = vld [vmem:[#allocation5 + $0x18] sm:$0xff]  ;;  %v100_v10 = vld [vmem:[#allocation2 + $0x10] sm:$0xff]  ;;  %s15051_s4 = smov [#allocation10]   ;;  %vm9857_vm4 = vcmask 189440  }
  0x4c   :  { %v15184_v9 = vpack.c.bf16 %v99_v6, %v98_v4  ;;  %v101_v11 = vld [vmem:[#allocation2 + $0x18] sm:$0xff]  ;;  %v15187_v12 = vpack.c.bf16 %v105_v8, %v104_v7  ;;  %v15192_v13 = vld [vmem:[%s17041_s0 + $0x8] sm:$0xff]  ;;  %v106_v16 = vld [vmem:[#allocation5 + $0x20] sm:$0xff]  ;;  %s9865_s15 = sshll.u32 %s15051_s4, 4  ;;  %s9866_s15 = int_to_ptr.vmem [resolvable:$true] %s9865_s15 }
  0x4d   :  { %13284 = vmatpush3.bf16.msra.mxu0 %v15182_v5  ;;  %v15196_v14 = vpack.c.bf16 %v101_v11, %v100_v10  ;;  %v186_v15 = vrot.slane %v15192_v13, 7  ;;  %v107_v17 = vld [vmem:[#allocation5 + $0x28] sm:$0xff]  ;;  %v15203_v18 = vld [vmem:[%s17041_s0] sm:$0xff]  ;;  %v108_v24 = vld [vmem:[#allocation5 + $0x30] sm:$0xff]  ;;  %s15012_s5 = scalar_lea.vmem %s9866_s15, 32  ;;  %p15017_p5 = scmp.lt.s32.totalorder %s9866_s15, %s9866_s15 }
  0x4e   :  { %17132 = vst [vmem:[#allocation15_spill] sm:$0xff] %v15184_v9  ;;  %13296 = vmatpush3.bf16.msra.mxu1 %v15184_v9  ;;  %13285 = vmatprep.subr.bf16.mxu0 %v17053_v0  ;;  %v281_v19 = vld [vmem:[#allocation5 + $0x40] sm:$0xff]  ;;  %v282_v20 = vld [vmem:[#allocation5 + $0x48] sm:$0xff]  ;;  %v15206_v21 = vpack.c.bf16 %v107_v17, %v106_v16  ;;  %v109_v25 = vld [vmem:[#allocation5 + $0x38] sm:$0xff]  ;;  %p15013_p4 = scmp.ne.s32.totalorder %s9866_s15, %s15012_s5  ;;  %p15018_p6 = scmp.lt.s32.totalorder %s15012_s5, %s15012_s5 }
  0x4f   :  { %17133 = vst [vmem:[#allocation16_spill] sm:$0xff] %v15196_v14  ;;  %13297 = vmatprep.subr.bf16.mxu1 %v17053_v0  ;;  %v15212_v22 = vsel %vm187_vm1, %v186_v15, %v15203_v18  ;;  %v15214_v23 = vpack.c.bf16 %v282_v20, %v281_v19  ;;  %v283_v26 = vld [vmem:[#allocation5 + $0x50] sm:$0xff]  ;;  %v284_v27 = vld [vmem:[#allocation5 + $0x58] sm:$0xff]  ;;  %v15220_v28 = vpack.c.bf16 %v109_v25, %v108_v24  ;;  %v448_v30 = vld [vmem:[#allocation5 + $0x80] sm:$0xff] }
  0x50   :  { %17134 = vst [vmem:[#allocation17_spill] sm:$0xff] %v15206_v21  ;;  %v15224_v29 = vpack.c.bf16 %v284_v27, %v283_v26  ;;  %v449_v31 = vld [vmem:[#allocation5 + $0x88] sm:$0xff]  ;;  %v285_v32 = vld [vmem:[#allocation5 + $0x60] sm:$0xff]  ;;  %v450_v36 = vld [vmem:[#allocation5 + $0x90] sm:$0xff]  ;;  %p15019_p7 = por %p15018_p6, %p15017_p5 }
  0x51   :  { %13287 = vmatpush3.bf16.msra.mxu0 %v15187_v12  ;;  %17135 = vst [vmem:[#allocation18_spill] sm:$0xff] %v15214_v23  ;;  %17136 = vst [vmem:[#allocation19_spill] sm:$0xff] %v15220_v28  ;;  %v286_v33 = vld [vmem:[#allocation5 + $0x68] sm:$0xff]  ;;  %v15230_v34 = vpack.c.bf16 %v449_v31, %v448_v30  ;;  %v451_v37 = vld [vmem:[#allocation5 + $0x98] sm:$0xff] }
  0x52   :  { %13299 = vmatpush3.bf16.msra.mxu1 %v15196_v14  ;;  %13288 = vmatprep.subr.bf16.mxu0 %v17053_v0  ;;  %17137 = vst [vmem:[#allocation20_spill] sm:$0xff] %v15224_v29  ;;  %v15233_v35 = vpack.c.bf16 %v286_v33, %v285_v32  ;;  %v287_v38 = vld [vmem:[#allocation5 + $0x70] sm:$0xff]  ;;  %v288_v39 = vld [vmem:[#allocation5 + $0x78] sm:$0xff]  ;;  %v15239_v40 = vpack.c.bf16 %v451_v37, %v450_v36  ;;  %v452_v42 = vld [vmem:[#allocation5 + $0xa0] sm:$0xff]  ;;  %p15020_p8 = pnand %p15019_p7, %p15013_p4 }
  0x53   :  { %13300 = vmatprep.subr.bf16.mxu1 %v17053_v0  ;;  %v15244_v41 = vpack.c.bf16 %v288_v39, %v287_v38  ;;  %v453_v43 = vld [vmem:[#allocation5 + $0xa8] sm:$0xff]  ;;  %v276_v44 = vld [vmem:[#allocation2 + $0x20] sm:$0xff]  ;;  %v454_v48 = vld [vmem:[#allocation5 + $0xb0] sm:$0xff] }
  0x54   :  { %17138 = vst [vmem:[#allocation21_spill] sm:$0xff] %v15233_v35  ;;  %v277_v45 = vld [vmem:[#allocation2 + $0x28] sm:$0xff]  ;;  %v15249_v46 = vpack.c.bf16 %v453_v43, %v452_v42  ;;  %v455_v49 = vld [vmem:[#allocation5 + $0xb8] sm:$0xff]  ;;  %v278_v50 = vld [vmem:[#allocation2 + $0x30] sm:$0xff] }
  0x55   :  { %11115 = vmatmul.mubr.msk.f32.vlgmr.msra.gmra.mrb[0].mxu1 %vm189_vm2, %v15212_v22  ;;  %13290 = vmatpush3.bf16.msra.mxu0 %v15206_v21  ;;  %17139 = vst [vmem:[#allocation22_spill] sm:$0xff] %v15244_v41  ;;  %v15252_v47 = vpack.c.bf16 %v277_v45, %v276_v44  ;;  %v279_v51 = vld [vmem:[#allocation2 + $0x38] sm:$0xff]  ;;  %v15258_v52 = vpack.c.bf16 %v455_v49, %v454_v48  ;;  %v605_v54 = vld [vmem:[#allocation2 + $0x60] sm:$0xff]  ;;  %v606_v55 = vld [vmem:[#allocation2 + $0x68] sm:$0xff] }
  0x56   :  { %13302 = vmatpush3.bf16.msra.mxu1 %v15214_v23  ;;  %13291 = vmatprep.subr.bf16.mxu0 %v17053_v0  ;;  %17140 = vst [vmem:[#allocation23_spill] sm:$0xff] %v15249_v46  ;;  %v15261_v53 = vpack.c.bf16 %v279_v51, %v278_v50  ;;  %v443_v56 = vld [vmem:[#allocation2 + $0x40] sm:$0xff]  ;;  %v444_v57 = vld [vmem:[#allocation2 + $0x48] sm:$0xff]  ;;  %v15268_v58 = vpack.c.bf16 %v606_v55, %v605_v54  ;;  %v607_v60 = vld [vmem:[#allocation2 + $0x70] sm:$0xff] }
  0x57   :  { %13303 = vmatprep.subr.bf16.mxu1 %v17053_v0  ;;  %11133 = vmatprep.mubr.msk.f32.mxu1 %vm15049_vm0, %v17051_v1  ;;  %17141 = vst [vmem:[#allocation24_spill] sm:$0xff] %v15258_v52  ;;  %v15271_v59 = vpack.c.bf16 %v444_v57, %v443_v56  ;;  %v608_v61 = vld [vmem:[#allocation2 + $0x78] sm:$0xff]  ;;  %v445_v62 = vld [vmem:[#allocation2 + $0x50] sm:$0xff]  ;;  %v610_v4 = vld [vmem:[#allocation5 + $0xc0] sm:$0xff] }
  0x58   :  { %17142 = vst [vmem:[#allocation25_spill] sm:$0xff] %v15268_v58  ;;  %v446_v63 = vld [vmem:[#allocation2 + $0x58] sm:$0xff]  ;;  %v15279_v2 = vpack.c.bf16 %v608_v61, %v607_v60  ;;  %v611_v6 = vld [vmem:[#allocation5 + $0xc8] sm:$0xff]  ;;  %v612_v8 = vld [vmem:[#allocation5 + $0xd0] sm:$0xff] }
  0x59   :  { %13293 = vmatpush3.bf16.msra.mxu0 %v15220_v28  ;;  %17143 = vst [vmem:[#allocation26_spill] sm:$0xff] %v15271_v59  ;;  %v15282_v3 = vpack.c.bf16 %v446_v63, %v445_v62  ;;  %v15292_v7 = vpack.c.bf16 %v611_v6, %v610_v4  ;;  %v613_v10 = vld [vmem:[#allocation5 + $0xd8] sm:$0xff]  ;;  %v614_v15 = vld [vmem:[#allocation5 + $0xe0] sm:$0xff]  ;;  %v615_v16 = vld [vmem:[#allocation5 + $0xe8] sm:$0xff] }
  0x5a   :  { %13305 = vmatpush3.bf16.msra.mxu1 %v15224_v29  ;;  %13318 = vmatprep.subr.bf16.mxu0 %v17053_v0  ;;  %17144 = vst [vmem:[#allocation27_spill] sm:$0xff] %v15279_v2  ;;  %v15303_v11 = vpack.c.bf16 %v613_v10, %v612_v8  ;;  %v15309_v17 = vpack.c.bf16 %v615_v16, %v614_v15  ;;  %v616_v19 = vld [vmem:[#allocation5 + $0xf0] sm:$0xff]  ;;  %v617_v20 = vld [vmem:[#allocation5 + $0xf8] sm:$0xff]  ;;  %v784_v24 = vld [vmem:[#allocation8] sm:$0xff] }
  0x5b   :  { %13306 = vmatprep.subr.bf16.mxu1 %v17053_v0  ;;  %17145 = vst [vmem:[#allocation28_spill] sm:$0xff] %v15282_v3  ;;  %17146 = vst [vmem:[#allocation29_spill] sm:$0xff] %v15292_v7  ;;  %v785_v25 = vld [vmem:[#allocation8 + $0x8] sm:$0xff]  ;;  %v786_v27 = vld [vmem:[#allocation8 + $0x10] sm:$0xff] }
  0x5c   :  { %11104 = vmatmul.mubr.f32.vlgmr.msra.gmra.mrb[0].mxu0 %v17051_v1  ;;  %17147 = vst [vmem:[#allocation30_spill] sm:$0xff] %v15303_v11  ;;  %17148 = vst [vmem:[#allocation31_spill] sm:$0xff] %v15309_v17  ;;  %v15321_v26 = vpack.c.bf16 %v785_v25, %v784_v24  ;;  %v787_v30 = vld [vmem:[#allocation8 + $0x18] sm:$0xff]  ;;  %v788_v32 = vld [vmem:[#allocation8 + $0x20] sm:$0xff] }
  0x5d   :  { %13320 = vmatpush3.bf16.msra.mxu0 %v15230_v34  ;;  %11163 = vmatprep.mubr.msk.f32.mxu0 %vm15049_vm0, %v17051_v1  ;;  %v15325_v31 = vpack.c.bf16 %v787_v30, %v786_v27  ;;  %v789_v33 = vld [vmem:[#allocation8 + $0x28] sm:$0xff]  ;;  %v790_v37 = vld [vmem:[#allocation8 + $0x30] sm:$0xff]  ;;  %v791_v38 = vld [vmem:[#allocation8 + $0x38] sm:$0xff] }
  0x5e   :  { %13308 = vmatpush3.bf16.msra.mxu1 %v15233_v35  ;;  %13321 = vmatprep.subr.bf16.mxu0 %v17053_v0  ;;  %17150 = vst [vmem:[#allocation33_spill] sm:$0xff] %v15321_v26  ;;  %v15329_v36 = vpack.c.bf16 %v789_v33, %v788_v32  ;;  %v15333_v39 = vpack.c.bf16 %v791_v38, %v790_v37  ;;  %v958_v42 = vld [vmem:[#allocation8 + $0x40] sm:$0xff]  ;;  %v959_v43 = vld [vmem:[#allocation8 + $0x48] sm:$0xff]  ;;  %v960_v45 = vld [vmem:[#allocation8 + $0x50] sm:$0xff] }
  0x5f   :  { %13309 = vmatprep.subr.bf16.mxu1 %v17053_v0  ;;  %17151 = vst [vmem:[#allocation34_spill] sm:$0xff] %v15325_v31  ;;  %v15337_v44 = vpack.c.bf16 %v959_v43, %v958_v42  ;;  %v961_v48 = vld [vmem:[#allocation8 + $0x58] sm:$0xff]  ;;  %v962_v50 = vld [vmem:[#allocation8 + $0x60] sm:$0xff]  ;;  %v963_v51 = vld [vmem:[#allocation8 + $0x68] sm:$0xff] }
  0x60   :  { %17152 = vst [vmem:[#allocation35_spill] sm:$0xff] %v15329_v36  ;;  %17153 = vst [vmem:[#allocation36_spill] sm:$0xff] %v15333_v39  ;;  %v15344_v49 = vpack.c.bf16 %v961_v48, %v960_v45  ;;  %v15348_v54 = vpack.c.bf16 %v963_v51, %v962_v50  ;;  %v964_v55 = vld [vmem:[#allocation8 + $0x70] sm:$0xff]  ;;  %v965_v56 = vld [vmem:[#allocation8 + $0x78] sm:$0xff] }
  0x61   :  { %13323 = vmatpush3.bf16.msra.mxu0 %v15239_v40  ;;  %v15352_v57 = vpack.c.bf16 %v965_v56, %v964_v55  ;;  %v1129_v60 = vld [vmem:[#allocation8 + $0x80] sm:$0xff]  ;;  %v1130_v61 = vld [vmem:[#allocation8 + $0x88] sm:$0xff]  ;;  %v1131_v63 = vld [vmem:[#allocation8 + $0x90] sm:$0xff] }
  0x62   :  { %13311 = vmatpush3.bf16.msra.mxu1 %v15244_v41  ;;  %13324 = vmatprep.subr.bf16.mxu0 %v17053_v0  ;;  %v15356_v62 = vpack.c.bf16 %v1130_v61, %v1129_v60  ;;  %v1132_v4 = vld [vmem:[#allocation8 + $0x98] sm:$0xff]  ;;  %v1133_v8 = vld [vmem:[#allocation8 + $0xa0] sm:$0xff]  ;;  %v1134_v10 = vld [vmem:[#allocation8 + $0xa8] sm:$0xff] }
  0x63   :  { %13312 = vmatprep.subr.bf16.mxu1 %v17053_v0  ;;  %v15363_v6 = vpack.c.bf16 %v1132_v4, %v1131_v63  ;;  %v15367_v15 = vpack.c.bf16 %v1134_v10, %v1133_v8  ;;  %v1135_v16 = vld [vmem:[#allocation8 + $0xb0] sm:$0xff]  ;;  %v1295_v24 = vld [vmem:[#allocation8 + $0xc0] sm:$0xff]  ;;  %v1296_v25 = vld [vmem:[#allocation8 + $0xc8] sm:$0xff] }
  0x64   :  { %v15375_v27 = vpack.c.bf16 %v1296_v25, %v1295_v24  ;;  %v1297_v30 = vld [vmem:[#allocation8 + $0xd0] sm:$0xff]  ;;  %v1298_v32 = vld [vmem:[#allocation8 + $0xd8] sm:$0xff]  ;;  %v1299_v37 = vld [vmem:[#allocation8 + $0xe0] sm:$0xff] }
  0x65   :  { %11134 = vmatmul.mubr.f32.vlgmr.msra.gmra.mrb[2].mxu1 %v17051_v1  ;;  %13326 = vmatpush3.bf16.msra.mxu0 %v15249_v46  ;;  %v15382_v33 = vpack.c.bf16 %v1298_v32, %v1297_v30  ;;  %v1300_v38 = vld [vmem:[#allocation8 + $0xe8] sm:$0xff]  ;;  %v1301_v43 = vld [vmem:[#allocation8 + $0xf0] sm:$0xff]  ;;  %v1302_v45 = vld [vmem:[#allocation8 + $0xf8] sm:$0xff] }
  0x66   :  { %13314 = vmatpush3.bf16.msra.mxu1 %v15252_v47  ;;  %11144 = vmatprep.mubr.msk.f32.mxu1 %vm15049_vm0, %v17051_v1  ;;  %v15386_v42 = vpack.c.bf16 %v1300_v38, %v1299_v37  ;;  %v15390_v48 = vpack.c.bf16 %v1302_v45, %v1301_v43  ;;  %v776_v50 = vld [vmem:[#allocation7] sm:$0xff]  ;;  %v777_v51 = vld [vmem:[#allocation7 + $0x8] sm:$0xff]  ;;  %v778_v56 = vld [vmem:[#allocation7 + $0x10] sm:$0xff] }
  0x67   :  { %13315 = vmatprep.subr.bf16.mxu1 %v17053_v0  ;;  %13327 = vmatprep.subr.bf16.mxu0 %v17053_v0  ;;  %v15394_v55 = vpack.c.bf16 %v777_v51, %v776_v50  ;;  %v779_v60 = vld [vmem:[#allocation7 + $0x18] sm:$0xff]  ;;  %v780_v63 = vld [vmem:[#allocation7 + $0x20] sm:$0xff]  ;;  %v781_v4 = vld [vmem:[#allocation7 + $0x28] sm:$0xff] }
  0x68   :  { %v15401_v61 = vpack.c.bf16 %v779_v60, %v778_v56  ;;  %v15409_v8 = vpack.c.bf16 %v781_v4, %v780_v63  ;;  %v782_v10 = vld [vmem:[#allocation7 + $0x30] sm:$0xff]  ;;  %v15424_v32 = vld [vmem:[%s17044_s3] ss:$0 sm:$0xff]  ;;  %v15430_v60 = vld [vmem:[%s17044_s3 + $0x1] ss:$0 sm:$0xff] }
  0x69   :  { %13329 = vmatpush3.bf16.msra.mxu0 %v15258_v52  ;;  %17154 = vst [vmem:[#allocation37_spill] sm:$0xff] %v15394_v55 }
  0x6a   :  { %13317 = vmatpush3.bf16.msra.mxu1 %v15261_v53  ;;  %13348 = vmatprep.subr.bf16.mxu0 %v17053_v0  ;;  %17155 = vst [vmem:[#allocation38_spill] sm:$0xff] %v15401_v61  ;;  %17156 = vst [vmem:[#allocation39_spill] sm:$0xff] %v15409_v8 }
  0x6b   :  { %13330 = vmatprep.subr.bf16.mxu1 %v17053_v0 }
  0x6c   :  { %11164 = vmatmul.mubr.f32.vlgmr.msra.gmra.mrb[2].mxu0 %v17051_v1 }
  0x6d   :  { %11145 = vmatmul.mubr.msk.f32.vlgmr.msra.gmra.mrb[4].mxu1 %vm189_vm2, %v15212_v22  ;;  %13350 = vmatpush3.bf16.msra.mxu0 %v15268_v58 }
  0x6e   :  { %13332 = vmatpush3.bf16.msra.mxu1 %v15271_v59  ;;  %11174 = vmatprep.mubr.msk.f32.mxu1 %vm15049_vm0, %v17051_v1 }
  0x6f   :  { %13333 = vmatprep.subr.bf16.mxu1 %v17053_v0  ;;  %13351 = vmatprep.subr.bf16.mxu0 %v17053_v0 }
  0x70   :  { %11204 = vmatprep.mubr.msk.f32.mxu0 %vm15049_vm0, %v17051_v1 }
  0x71   :  { %13353 = vmatpush3.bf16.msra.mxu0 %v15279_v2 }
  0x72   :  { %13335 = vmatpush3.bf16.msra.mxu1 %v15282_v3  ;;  %13354 = vmatprep.subr.bf16.mxu0 %v17053_v0 }
  0x73   :  { %13336 = vmatprep.subr.bf16.mxu1 %v17053_v0 }
  0x74   :  { %11205 = vmatmul.mubr.msk.f32.vlgmr.msra.gmra.mrb[4].mxu0 %vm189_vm2, %v15212_v22 }
  0x75   :  { %11175 = vmatmul.mubr.msk.f32.vlgmr.msra.gmra.mrb[6].mxu1 %vm189_vm2, %v15212_v22  ;;  %11223 = vmatprep.mubr.msk.f32.mxu0 %vm15049_vm0, %v17051_v1  ;;  %v15313_v22 = vpack.c.bf16 %v617_v20, %v616_v19  ;;  %v1136_v19 = vld [vmem:[#allocation8 + $0xb8] sm:$0xff] }
  0x76   :  { %13338 = vmatpush3.bf16.msra.mxu1 %v15292_v7  ;;  %11193 = vmatprep.mubr.msk.f32.mxu1 %vm15049_vm0, %v17051_v1  ;;  %v15371_v20 = vpack.c.bf16 %v1136_v19, %v1135_v16  ;;  %v783_v16 = vld [vmem:[#allocation7 + $0x38] sm:$0xff] }
  0x77   :  { %13339 = vmatprep.subr.bf16.mxu1 %v17053_v0  ;;  %17149 = vst [vmem:[#allocation32_spill] sm:$0xff] %v15313_v22  ;;  %13356 = vmatpush3.bf16.msra.mxu0 %v15321_v26  ;;  %v15415_v19 = vpack.c.bf16 %v783_v16, %v782_v10 }
  0x78   :  { %13357 = vmatprep.subr.bf16.mxu0 %v17053_v0 }
  0x79   :  { %17157 = vst [vmem:[#allocation40_spill] sm:$0xff] %v15415_v19 }
  0x7a   :  { %13341 = vmatpush3.bf16.msra.mxu1 %v15303_v11 }
  0x7b   :  { %13342 = vmatprep.subr.bf16.mxu1 %v17053_v0  ;;  %13359 = vmatpush3.bf16.msra.mxu0 %v15325_v31 }
  0x7c   :  { %13360 = vmatprep.subr.bf16.mxu0 %v17053_v0 }
  0x7e   :  { %13344 = vmatpush3.bf16.msra.mxu1 %v15309_v17 }
  0x7f   :  { %13345 = vmatprep.subr.bf16.mxu1 %v17053_v0  ;;  %13362 = vmatpush3.bf16.msra.mxu0 %v15329_v36 }
  0x80   :  { %13363 = vmatprep.subr.bf16.mxu0 %v17053_v0 }
  0x82   :  { %13347 = vmatpush3.bf16.msra.mxu1 %v15313_v22 }
  0x83   :  { %13366 = vmatprep.subr.bf16.mxu1 %v17053_v0  ;;  %13365 = vmatpush3.bf16.msra.mxu0 %v15333_v39 }
  0x84   :  { %13378 = vmatprep.subr.bf16.mxu0 %v17053_v0 }
  0x85   :  { %11194 = vmatmul.mubr.f32.vlgmr.msra.gmra.mrb[8].mxu1 %v17051_v1 }
  0x86   :  { %11242 = vmatprep.mubr.msk.f32.mxu1 %vm15049_vm0, %v17051_v1  ;;  %11224 = vmatmul.mubr.f32.vlgmr.msra.gmra.mrb[6].mxu0 %v17051_v1 }
  0x87   :  { %13380 = vmatpush3.bf16.msra.mxu0 %v15337_v44  ;;  %11261 = vmatprep.mubr.msk.f32.mxu0 %vm15049_vm0, %v17051_v1 }
  0x88   :  { %13381 = vmatprep.subr.bf16.mxu0 %v17053_v0  ;;  %13368 = vmatpush3.bf16.msra.mxu1 %v15394_v55 }
  0x89   :  { %13369 = vmatprep.subr.bf16.mxu1 %v17053_v0 }
  0x8b   :  { %13383 = vmatpush3.bf16.msra.mxu0 %v15344_v49 }
  0x8c   :  { %13384 = vmatprep.subr.bf16.mxu0 %v17053_v0  ;;  %13371 = vmatpush3.bf16.msra.mxu1 %v15401_v61 }
  0x8d   :  { %13372 = vmatprep.subr.bf16.mxu1 %v17053_v0 }
  0x8f   :  { %13386 = vmatpush3.bf16.msra.mxu0 %v15348_v54 }
  0x90   :  { %13387 = vmatprep.subr.bf16.mxu0 %v17053_v0  ;;  %13374 = vmatpush3.bf16.msra.mxu1 %v15409_v8 }
  0x91   :  { %13375 = vmatprep.subr.bf16.mxu1 %v17053_v0 }
  0x93   :  { %13389 = vmatpush3.bf16.msra.mxu0 %v15352_v57 }
  0x94   :  { %13402 = vmatprep.subr.bf16.mxu0 %v17053_v0  ;;  %13377 = vmatpush3.bf16.msra.mxu1 %v15415_v19 }
  0x95   :  { %13390 = vmatprep.subr.bf16.mxu1 %v17053_v0 }
  0x96   :  { %11262 = vmatmul.mubr.f32.vlgmr.msra.gmra.mrb[8].mxu0 %v17051_v1 }
  0x97   :  { %13404 = vmatpush3.bf16.msra.mxu0 %v15356_v62  ;;  %11299 = vmatprep.mubr.msk.f32.mxu0 %vm15049_vm0, %v17051_v1 }
  0x98   :  { %13405 = vmatprep.subr.bf16.mxu0 %v17053_v0 }
  0x9b   :  { %13407 = vmatpush3.bf16.msra.mxu0 %v15363_v6 }
  0x9c   :  { %13408 = vmatprep.subr.bf16.mxu0 %v17053_v0 }
  0x9f   :  { %13410 = vmatpush3.bf16.msra.mxu0 %v15367_v15 }
  0xa0   :  { %13411 = vmatprep.subr.bf16.mxu0 %v17053_v0 }
  0xa3   :  { %13413 = vmatpush3.bf16.msra.mxu0 %v15371_v20 }
  0xa4   :  { %13426 = vmatprep.subr.bf16.mxu0 %v17053_v0 }
  0xa6   :  { %11300 = vmatmul.mubr.f32.vlgmr.msra.gmra.mrb[10].mxu0 %v17051_v1 }
  0xa7   :  { %13428 = vmatpush3.bf16.msra.mxu0 %v15375_v27  ;;  %11337 = vmatprep.mubr.msk.f32.mxu0 %vm15049_vm0, %v17051_v1 }
  0xa8   :  { %13429 = vmatprep.subr.bf16.mxu0 %v17053_v0 }
  0xab   :  { %13431 = vmatpush3.bf16.msra.mxu0 %v15382_v33 }
  0xac   :  { %13432 = vmatprep.subr.bf16.mxu0 %v17053_v0 }
  0xaf   :  { %13434 = vmatpush3.bf16.msra.mxu0 %v15386_v42 }
  0xb0   :  { %13435 = vmatprep.subr.bf16.mxu0 %v17053_v0 }
  0xb3   :  { %13437 = vmatpush3.bf16.msra.mxu0 %v15390_v48 }
  0xb4   :  { %13450 = vmatprep.subr.bf16.mxu0 %v17053_v0 }
  0xb6   :  { %11338 = vmatmul.mubr.f32.vlgmr.msra.gmra.mrb[12].mxu0 %v17051_v1 }
  0xb7   :  { %13452 = vmatpush3.bf16.msra.mxu0 %v15182_v5  ;;  %11375 = vmatprep.mubr.msk.f32.mxu0 %vm15049_vm0, %v17051_v1 }
  0xb8   :  { %13453 = vmatprep.subr.bf16.mxu0 %v17053_v0 }
  0xbb   :  { %13455 = vmatpush3.bf16.msra.mxu0 %v15187_v12 }
  0xbc   :  { %13456 = vmatprep.subr.bf16.mxu0 %v17053_v0 }
  0xbf   :  { %13458 = vmatpush3.bf16.msra.mxu0 %v15206_v21 }
  0xc0   :  { %13459 = vmatprep.subr.bf16.mxu0 %v17053_v0 }
  0xc3   :  { %13461 = vmatpush3.bf16.msra.mxu0 %v15220_v28 }
  0xc4   :  { %13480 = vmatprep.subr.bf16.mxu0 %v17053_v0 }
 0x128   :  { %v258_v24 = vpop.f32.mrb[0].mxu1 }
 0x129   :  { %v11116_v25 = vpop.f32.mrb[1].mxu1 }
 0x12f   :  { %v180_v30 = vpop.f32.mrb[0].mxu0 }
 0x130   :  { %v259_v37 = vadd.f32 %v258_v24, %v180_v30  ;;  %v11105_v38 = vpop.f32.mrb[1].mxu0 }
 0x132   :  { %v268_v43 = vadd.f32 %v15424_v32, %v259_v37 }
 0x134   :  { %v9878_v45 = vmul.f32 -1.442695, %v268_v43  ;;  %v15436_v43 = vld [vmem:[%s17044_s3 + $0x2] ss:$0 sm:$0xff] }
 0x136   :  { %14648 = vpow2.f32 %v9878_v45 }
 0x138   :  { %v355_v50 = vpop.f32.mrb[2].mxu1 }
 0x139   :  { %v11135_v51 = vpop.f32.mrb[3].mxu1 }
 0x13f   :  { %v522_v56 = vpop.f32.mrb[2].mxu0 }
 0x140   :  { %v425_v63 = vpop.f32.mrb[4].mxu1  ;;  %v11165_v4 = vpop.f32.mrb[3].mxu0 }
 0x141   :  { %v426_v10 = vadd.f32 %v425_v63, %v355_v50  ;;  %v11146_v16 = vpop.f32.mrb[5].mxu1  ;;  %v14649_v24 = vpop.eup %14648 }
 0x142   :  { %v272_v38 = vadd.f32 1.0, %v14649_v24  ;;  %v15442_v24 = vld [vmem:[%s17044_s3 + $0x3] ss:$0 sm:$0xff] }
 0x143   :  { %v435_v25 = vadd.f32 %v15430_v60, %v426_v10 }
 0x145   :  { %v9881_v30 = vmul.f32 -1.442695, %v435_v25 }
 0x147   :  { %14650 = vpow2.f32 %v9881_v30  ;;  %v754_v37 = vpop.f32.mrb[4].mxu0 }
 0x148   :  { %v592_v45 = vpop.f32.mrb[6].mxu1  ;;  %v11206_v51 = vpop.f32.mrb[5].mxu0  ;;  %14652 = vrcp.f32 %v272_v38 }
 0x149   :  { %v593_v1 = vadd.f32 %v592_v45, %v522_v56  ;;  %v11176_v0 = vpop.f32.mrb[7].mxu1 }
 0x14b   :  { %v602_v4 = vadd.f32 %v15436_v43, %v593_v1 }
 0x14d   :  { %14654 = vtanh.f32 %v602_v4 }
 0x151   :  { %v14651_v50 = vpop.eup %14650 }
 0x152   :  { %v439_v63 = vadd.f32 1.0, %v14651_v50  ;;  %v14653_v10 = vpop.eup %14652 }
 0x154   :  { %14656 = vrcp.f32 %v439_v63  ;;  %v949_v63 = vld [vmem:[#allocation7 + $0x40] sm:$0xff] }
 0x157   :  { %v14655_v16 = vpop.eup %14654 }
 0x158   :  { %v772_v25 = vmul.f32 %v14655_v16, %v14653_v10  ;;  %v684_v30 = vpop.f32.mrb[8].mxu1  ;;  %v950_v10 = vld [vmem:[#allocation7 + $0x48] sm:$0xff] }
 0x159   :  { %v755_v28 = vadd.f32 %v754_v37, %v684_v30  ;;  %v11195_v51 = vpop.f32.mrb[9].mxu1  ;;  %v15448_v37 = vpack.c.bf16 %v950_v10, %v949_v63  ;;  %v956_v63 = vld [vmem:[#allocation7 + $0x78] sm:$0xff] }
 0x15a   :  { %v952_v51 = vld [vmem:[#allocation7 + $0x58] sm:$0xff] }
 0x15b   :  { %v764_v0 = vadd.f32 %v15442_v24, %v755_v28  ;;  %v951_v28 = vld [vmem:[#allocation7 + $0x50] sm:$0xff] }
 0x15d   :  { %v9886_v56 = vmul.f32 -1.442695, %v764_v0  ;;  %v1531_v0 = vrot.slane %v15203_v18, 1 }
 0x15e   :  { %v14657_v1 = vpop.eup %14656 }
 0x15f   :  { %v771_v38 = vmul.f32 0.0, %v14657_v1  ;;  %14658 = vpow2.f32 %v9886_v56  ;;  %v17158_v56 = vmov 0.0|0.0   ;;  %v954_v1 = vld [vmem:[#allocation7 + $0x68] sm:$0xff]  ;;  %v15473_v18 = vsel %vm187_vm1, %v15192_v13, %v1531_v0  ;;  %v1120_v13 = vld [vmem:[#allocation7 + $0x80] sm:$0xff]  ;;  %v1123_v0 = vld [vmem:[#allocation7 + $0x98] sm:$0xff] }
 0x161   :  { %v15445_v45 = vadd.f32 %v772_v25, %v771_v38  ;;  %v15458_v25 = vpack.c.bf16 %v952_v51, %v951_v28  ;;  %v17159_v38 = vmov 0.0   ;;  %v1122_v51 = vld [vmem:[#allocation7 + $0x90] sm:$0xff] }
 0x163   :  { %14660 = vtanh.f32 %v15445_v45 }
 0x169   :  { %v14659_v4 = vpop.eup %14658 }
 0x16a   :  { %v768_v50 = vadd.f32 1.0, %v14659_v4 }
 0x16c   :  { %14662 = vrcp.f32 %v768_v50  ;;  %v955_v50 = vld [vmem:[#allocation7 + $0x70] sm:$0xff] }
 0x16d   :  { %v14661_v16 = vpop.eup %14660  ;;  %v15481_v10 = vpack.c.bf16 %v956_v63, %v955_v50  ;;  %v1125_v50 = vld [vmem:[#allocation7 + $0xa8] sm:$0xff]  ;;  %v15501_v63 = vpop.f32.mrb[6].mxu0 }
 0x176   :  { %v14663_v21 = vpop.eup %14662 }
 0x177   :  { %v15450_v30 = vmul.f32 %v14663_v21, %v14661_v16  ;;  %v953_v21 = vld [vmem:[#allocation7 + $0x60] sm:$0xff]  ;;  %v1121_v16 = vld [vmem:[#allocation7 + $0x88] sm:$0xff] }
 0x178   :  { %v15469_v4 = vpack.c.bf16 %v954_v1, %v953_v21  ;;  %v15489_v28 = vpack.c.bf16 %v1121_v16, %v1120_v13  ;;  %v15497_v21 = vpack.c.bf16 %v1123_v0, %v1122_v51  ;;  %v1124_v1 = vld [vmem:[#allocation7 + $0xa0] sm:$0xff]  ;;  %v11225_v13 = vpop.f32.mrb[7].mxu0  ;;  %v1126_v51 = vld [vmem:[#allocation7 + $0xb0] sm:$0xff]  ;;  %v1127_v0 = vld [vmem:[#allocation7 + $0xb8] sm:$0xff] }
 0x179   :  { %11243 = vmatmul.mubr.msk.f32.vlgmr.msra.gmra.mrb[10].mxu1 %vm110_vm3, %v15450_v30  ;;  %11376 = vmatmul.mubr.msk.f32.vlgmr.msra.gmra.mrb[14].mxu0 %vm110_vm3, %v15450_v30  ;;  %v15507_v16 = vpack.c.bf16 %v1125_v50, %v1124_v1  ;;  %v1286_v13 = vld [vmem:[#allocation7 + $0xc0] sm:$0xff]  ;;  %v1287_v1 = vld [vmem:[#allocation7 + $0xc8] sm:$0xff] }
 0x17a   :  { %13392 = vmatpush3.bf16.msra.mxu1 %v15448_v37  ;;  %13482 = vmatpush3.bf16.msra.mxu0 %v15252_v47  ;;  %v15522_v50 = vpack.c.bf16 %v1287_v1, %v1286_v13  ;;  %v1290_v13 = vld [vmem:[#allocation7 + $0xe0] sm:$0xff]  ;;  %v1291_v1 = vld [vmem:[#allocation7 + $0xe8] sm:$0xff] }
 0x17b   :  { %13393 = vmatprep.subr.bf16.mxu1 %v17158_v56  ;;  %13483 = vmatprep.subr.bf16.mxu0 %v17158_v56 }
 0x17c   :  { %11416 = vmatprep.mubr.msk.f32.mxu0 %vm15049_vm0, %v17159_v38  ;;  %11280 = vmatprep.mubr.msk.f32.mxu1 %vm15049_vm0, %v17159_v38  ;;  %17160 = vst [vmem:[#allocation41_spill] sm:$0xff] %v15522_v50 }
 0x17e   :  { %13395 = vmatpush3.bf16.msra.mxu1 %v15458_v25  ;;  %13485 = vmatpush3.bf16.msra.mxu0 %v15261_v53 }
 0x17f   :  { %13396 = vmatprep.subr.bf16.mxu1 %v17158_v56  ;;  %13486 = vmatprep.subr.bf16.mxu0 %v17158_v56 }
 0x181   :  { %11417 = vmatmul.mubr.msk.f32.vlgmr.msra.gmra.mrb[16].mxu0 %vm189_vm2, %v15473_v18 }
 0x182   :  { %13398 = vmatpush3.bf16.msra.mxu1 %v15469_v4  ;;  %13488 = vmatpush3.bf16.msra.mxu0 %v15230_v34 }
 0x183   :  { %13399 = vmatprep.subr.bf16.mxu1 %v17158_v56  ;;  %13489 = vmatprep.subr.bf16.mxu0 %v17158_v56 }
 0x184   :  { %11435 = vmatprep.mubr.msk.f32.mxu0 %vm15049_vm0, %v17159_v38 }
 0x186   :  { %13401 = vmatpush3.bf16.msra.mxu1 %v15481_v10  ;;  %13491 = vmatpush3.bf16.msra.mxu0 %v15239_v40 }
 0x187   :  { %13414 = vmatprep.subr.bf16.mxu1 %v17158_v56  ;;  %13492 = vmatprep.subr.bf16.mxu0 %v17158_v56 }
 0x189   :  { %11281 = vmatmul.mubr.msk.f32.vlgmr.msra.gmra.mrb[12].mxu1 %vm110_vm3, %v15450_v30 }
 0x18a   :  { %13416 = vmatpush3.bf16.msra.mxu1 %v15489_v28  ;;  %13494 = vmatpush3.bf16.msra.mxu0 %v15249_v46  ;;  %v15514_v46 = vpack.c.bf16 %v1127_v0, %v1126_v51  ;;  %v1288_v51 = vld [vmem:[#allocation7 + $0xd0] sm:$0xff]  ;;  %v1289_v0 = vld [vmem:[#allocation7 + $0xd8] sm:$0xff] }
 0x18b   :  { %13417 = vmatprep.subr.bf16.mxu1 %v17158_v56  ;;  %13495 = vmatprep.subr.bf16.mxu0 %v17158_v56 }
 0x18c   :  { %11318 = vmatprep.mubr.msk.f32.mxu1 %vm15049_vm0, %v17159_v38 }
 0x18e   :  { %13419 = vmatpush3.bf16.msra.mxu1 %v15497_v21  ;;  %13497 = vmatpush3.bf16.msra.mxu0 %v15258_v52 }
 0x18f   :  { %13420 = vmatprep.subr.bf16.mxu1 %v17158_v56  ;;  %13516 = vmatprep.subr.bf16.mxu0 %v17158_v56 }
 0x191   :  { %11436 = vmatmul.mubr.msk.f32.vlgmr.msra.gmra.mrb[18].mxu0 %vm110_vm3, %v15450_v30 }
 0x192   :  { %13422 = vmatpush3.bf16.msra.mxu1 %v15507_v16  ;;  %13518 = vmatpush3.bf16.msra.mxu0 %v15268_v58  ;;  %v15532_v58 = vpack.c.bf16 %v1289_v0, %v1288_v51  ;;  %v15544_v51 = vpack.c.bf16 %v1291_v1, %v1290_v13  ;;  %v1292_v0 = vld [vmem:[#allocation7 + $0xf0] sm:$0xff] }
 0x193   :  { %13423 = vmatprep.subr.bf16.mxu1 %v17158_v56  ;;  %13519 = vmatprep.subr.bf16.mxu0 %v17158_v56 }
 0x194   :  { %11476 = vmatprep.mubr.msk.f32.mxu0 %vm15049_vm0, %v17159_v38  ;;  %17161 = vst [vmem:[#allocation42_spill] sm:$0xff] %v15532_v58  ;;  %17162 = vst [vmem:[#allocation43_spill] sm:$0xff] %v15544_v51 }
 0x196   :  { %13425 = vmatpush3.bf16.msra.mxu1 %v15514_v46  ;;  %13521 = vmatpush3.bf16.msra.mxu0 %v15279_v2  ;;  %v15537_v2 = vpop.f32.mrb[8].mxu0 }
 0x197   :  { %13438 = vmatprep.subr.bf16.mxu1 %v17158_v56  ;;  %13522 = vmatprep.subr.bf16.mxu0 %v17158_v56  ;;  %v11263_v52 = vpop.f32.mrb[9].mxu0 }
 0x199   :  { %11319 = vmatmul.mubr.msk.f32.vlgmr.msra.gmra.mrb[14].mxu1 %vm110_vm3, %v15450_v30  ;;  %11477 = vmatmul.mubr.msk.f32.vlgmr.msra.gmra.mrb[20].mxu0 %vm189_vm2, %v15473_v18 }
 0x19a   :  { %13440 = vmatpush3.bf16.msra.mxu1 %v15522_v50  ;;  %11356 = vmatprep.mubr.msk.f32.mxu1 %vm15049_vm0, %v17159_v38  ;;  %v1293_v50 = vld [vmem:[#allocation7 + $0xf8] sm:$0xff] }
 0x19b   :  { %13441 = vmatprep.subr.bf16.mxu1 %v17158_v56  ;;  %13524 = vmatpush3.bf16.msra.mxu0 %v15321_v26  ;;  %v15550_v52 = vpack.c.bf16 %v1293_v50, %v1292_v0  ;;  %v15565_v50 = vpop.f32.mrb[10].mxu0 }
 0x19c   :  { %13525 = vmatprep.subr.bf16.mxu0 %v17158_v56  ;;  %11495 = vmatprep.mubr.msk.f32.mxu0 %vm15049_vm0, %v17159_v38  ;;  %v11301_v13 = vpop.f32.mrb[11].mxu0 }
 0x19d   :  { %17163 = vst [vmem:[#allocation44_spill] sm:$0xff] %v15550_v52  ;;  %v15579_v1 = vpop.f32.mrb[12].mxu0 }
 0x19e   :  { %13443 = vmatpush3.bf16.msra.mxu1 %v15532_v58  ;;  %v11339_v0 = vpop.f32.mrb[13].mxu0 }
 0x19f   :  { %13444 = vmatprep.subr.bf16.mxu1 %v17158_v56  ;;  %13527 = vmatpush3.bf16.msra.mxu0 %v15325_v31 }
 0x1a0   :  { %13528 = vmatprep.subr.bf16.mxu0 %v17158_v56 }
 0x1a2   :  { %13446 = vmatpush3.bf16.msra.mxu1 %v15544_v51 }
 0x1a3   :  { %13447 = vmatprep.subr.bf16.mxu1 %v17158_v56  ;;  %13530 = vmatpush3.bf16.msra.mxu0 %v15329_v36 }
 0x1a4   :  { %13531 = vmatprep.subr.bf16.mxu0 %v17158_v56 }
 0x1a6   :  { %13449 = vmatpush3.bf16.msra.mxu1 %v15550_v52 }
 0x1a7   :  { %13462 = vmatprep.subr.bf16.mxu1 %v17158_v56  ;;  %13533 = vmatpush3.bf16.msra.mxu0 %v15333_v39  ;;  %v15641_v39 = vld [vmem:[%s17047_s6 + $0x3] ss:$0 sm:$0xff] }
 0x1a8   :  { %13546 = vmatprep.subr.bf16.mxu0 %v17158_v56 }
 0x1a9   :  { %11357 = vmatmul.mubr.msk.f32.vlgmr.msra.gmra.mrb[16].mxu1 %vm110_vm3, %v15450_v30 }
 0x1aa   :  { %13464 = vmatpush3.bf16.msra.mxu1 %v15184_v9  ;;  %11386 = vmatprep.mubr.msk.f32.mxu1 %vm15049_vm0, %v17159_v38 }
 0x1ab   :  { %13465 = vmatprep.subr.bf16.mxu1 %v17158_v56 }
 0x1ae   :  { %13467 = vmatpush3.bf16.msra.mxu1 %v15196_v14 }
 0x1af   :  { %13468 = vmatprep.subr.bf16.mxu1 %v17158_v56 }
 0x1b1   :  { %11387 = vmatmul.mubr.msk.f32.vlgmr.msra.gmra.mrb[18].mxu1 %vm189_vm2, %v15473_v18 }
 0x1b2   :  { %13470 = vmatpush3.bf16.msra.mxu1 %v15214_v23  ;;  %11405 = vmatprep.mubr.msk.f32.mxu1 %vm15049_vm0, %v17159_v38 }
 0x1b3   :  { %13471 = vmatprep.subr.bf16.mxu1 %v17158_v56 }
 0x1b6   :  { %13473 = vmatpush3.bf16.msra.mxu1 %v15224_v29 }
 0x1b7   :  { %13474 = vmatprep.subr.bf16.mxu1 %v17158_v56 }
 0x1ba   :  { %13476 = vmatpush3.bf16.msra.mxu1 %v15233_v35 }
 0x1bb   :  { %13477 = vmatprep.subr.bf16.mxu1 %v17158_v56 }
 0x1be   :  { %13479 = vmatpush3.bf16.msra.mxu1 %v15244_v41 }
 0x1bf   :  { %13498 = vmatprep.subr.bf16.mxu1 %v17158_v56 }
 0x1c1   :  { %11406 = vmatmul.mubr.msk.f32.vlgmr.msra.gmra.mrb[20].mxu1 %vm110_vm3, %v15450_v30 }
 0x1c2   :  { %13500 = vmatpush3.bf16.msra.mxu1 %v15271_v59  ;;  %11446 = vmatprep.mubr.msk.f32.mxu1 %vm15049_vm0, %v17159_v38 }
 0x1c3   :  { %13501 = vmatprep.subr.bf16.mxu1 %v17158_v56 }
 0x1c6   :  { %13503 = vmatpush3.bf16.msra.mxu1 %v15282_v3 }
 0x1c7   :  { %13504 = vmatprep.subr.bf16.mxu1 %v17158_v56 }
 0x1c9   :  { %11447 = vmatmul.mubr.msk.f32.vlgmr.msra.gmra.mrb[22].mxu1 %vm189_vm2, %v15473_v18 }
 0x1ca   :  { %13506 = vmatpush3.bf16.msra.mxu1 %v15292_v7  ;;  %11465 = vmatprep.mubr.msk.f32.mxu1 %vm15049_vm0, %v17159_v38 }
 0x1cb   :  { %13507 = vmatprep.subr.bf16.mxu1 %v17158_v56 }
 0x1ce   :  { %13509 = vmatpush3.bf16.msra.mxu1 %v15303_v11 }
 0x1cf   :  { %13510 = vmatprep.subr.bf16.mxu1 %v17158_v56 }
 0x1d2   :  { %13512 = vmatpush3.bf16.msra.mxu1 %v15309_v17 }
 0x1d3   :  { %13513 = vmatprep.subr.bf16.mxu1 %v17158_v56 }
 0x1d6   :  { %13515 = vmatpush3.bf16.msra.mxu1 %v15313_v22 }
 0x1d7   :  { %13534 = vmatprep.subr.bf16.mxu1 %v17158_v56 }
 0x1d9   :  { %11466 = vmatmul.mubr.msk.f32.vlgmr.msra.gmra.mrb[24].mxu1 %vm110_vm3, %v15450_v30 }
 0x1da   :  { %13536 = vmatpush3.bf16.msra.mxu1 %v15394_v55  ;;  %11514 = vmatprep.mubr.msk.f32.mxu1 %vm15049_vm0, %v17159_v38 }
 0x1db   :  { %13537 = vmatprep.subr.bf16.mxu1 %v17158_v56 }
 0x1de   :  { %13539 = vmatpush3.bf16.msra.mxu1 %v15401_v61  ;;  %v15619_v61 = vld [vmem:[%s17047_s6] ss:$0 sm:$0xff] }
 0x1df   :  { %13540 = vmatprep.subr.bf16.mxu1 %v17158_v56  ;;  %17164 = vst [vmem:[#allocation45_spill] sm:$0xff] %v15619_v61 }
 0x1e2   :  { %13542 = vmatpush3.bf16.msra.mxu1 %v15409_v8 }
 0x1e3   :  { %13543 = vmatprep.subr.bf16.mxu1 %v17158_v56 }
 0x1e6   :  { %13545 = vmatpush3.bf16.msra.mxu1 %v15415_v19  ;;  %v15625_v19 = vld [vmem:[%s17047_s6 + $0x1] ss:$0 sm:$0xff] }
 0x1e7   :  { %13558 = vmatprep.subr.bf16.mxu1 %v17158_v56  ;;  %17165 = vst [vmem:[#allocation46_spill] sm:$0xff] %v15625_v19 }
 0x24c   :  { %v931_v30 = vpop.f32.mrb[10].mxu1  ;;  %v1527_v18 = vpop.f32.mrb[14].mxu0 }
 0x24d   :  { %v932_v13 = vadd.f32 %v931_v30, %v15501_v63  ;;  %v11244_v0 = vpop.f32.mrb[11].mxu1  ;;  %v11377_v55 = vpop.f32.mrb[15].mxu0 }
 0x24f   :  { %v941_v8 = vadd.f32 %v15619_v61, %v932_v13 }
 0x251   :  { %v9889_v11 = vmul.f32 -1.442695, %v941_v8  ;;  %v15632_v8 = vld [vmem:[%s17047_s6 + $0x2] ss:$0 sm:$0xff] }
 0x252   :  { %17166 = vst [vmem:[#allocation47_spill] sm:$0xff] %v15632_v8 }
 0x253   :  { %14664 = vpow2.f32 %v9889_v11 }
 0x254   :  { %v1748_v22 = vpop.f32.mrb[16].mxu0 }
 0x255   :  { %v11418_v17 = vpop.f32.mrb[17].mxu0 }
 0x25c   :  { %v1102_v7 = vpop.f32.mrb[12].mxu1 }
 0x25d   :  { %v1103_v63 = vadd.f32 %v1102_v7, %v15537_v2  ;;  %v11282_v30 = vpop.f32.mrb[13].mxu1  ;;  %v14665_v17 = vpop.eup %14664 }
 0x25e   :  { %v945_v41 = vadd.f32 1.0, %v14665_v17 }
 0x25f   :  { %v1112_v55 = vadd.f32 %v15625_v19, %v1103_v63 }
 0x261   :  { %v9892_v0 = vmul.f32 -1.442695, %v1112_v55 }
 0x263   :  { %14666 = vpow2.f32 %v9892_v0 }
 0x264   :  { %v1825_v3 = vpop.f32.mrb[18].mxu0  ;;  %14668 = vrcp.f32 %v945_v41 }
 0x265   :  { %v11437_v59 = vpop.f32.mrb[19].mxu0 }
 0x26c   :  { %v1273_v13 = vpop.f32.mrb[14].mxu1  ;;  %v15634_v61 = vpop.f32.mrb[20].mxu0 }
 0x26d   :  { %v14667_v35 = vpop.eup %14666  ;;  %v1274_v2 = vadd.f32 %v1273_v13, %v15565_v50  ;;  %v11320_v7 = vpop.f32.mrb[15].mxu1 }
 0x26e   :  { %v11478_v11 = vpop.f32.mrb[21].mxu0  ;;  %v1116_v63 = vadd.f32 1.0, %v14667_v35  ;;  %v14669_v59 = vpop.eup %14668 }
 0x26f   :  { %v1283_v30 = vadd.f32 %v15632_v8, %v1274_v2 }
 0x270   :  { %14670 = vrcp.f32 %v1116_v63 }
 0x271   :  { %14672 = vtanh.f32 %v1283_v30 }
 0x27a   :  { %v14671_v55 = vpop.eup %14670 }
 0x27b   :  { %v14673_v0 = vpop.eup %14672  ;;  %v1456_v17 = vmul.f32 0.0, %v14671_v55 }
 0x27c   :  { %v1457_v19 = vmul.f32 %v14673_v0, %v14669_v59  ;;  %v1439_v29 = vpop.f32.mrb[16].mxu1 }
 0x27d   :  { %v1440_v50 = vadd.f32 %v1439_v29, %v15579_v1  ;;  %v11358_v13 = vpop.f32.mrb[17].mxu1 }
 0x27e   :  { %v15644_v35 = vadd.f32 %v1457_v19, %v1456_v17 }
 0x27f   :  { %v1449_v41 = vadd.f32 %v15641_v39, %v1440_v50 }
 0x281   :  { %v9897_v2 = vmul.f32 -1.442695, %v1449_v41 }
 0x283   :  { %14674 = vpow2.f32 %v9897_v2 }
 0x284   :  { %v1601_v7 = vpop.f32.mrb[18].mxu1  ;;  %14676 = vtanh.f32 %v15644_v35 }
 0x285   :  { %v1602_v11 = vadd.f32 %v1601_v7, %v1527_v18  ;;  %v11388_v63 = vpop.f32.mrb[19].mxu1 }
 0x287   :  { %v1605_v30 = vadd.f32 %v15424_v32, %v1602_v11 }
 0x289   :  { %v9900_v59 = vmul.f32 -1.442695, %v1605_v30 }
 0x28b   :  { %14678 = vpow2.f32 %v9900_v59 }
 0x28d   :  { %v14675_v55 = vpop.eup %14674 }
 0x28e   :  { %v1453_v0 = vadd.f32 1.0, %v14675_v55  ;;  %v14677_v50 = vpop.eup %14676 }
 0x290   :  { %14680 = vrcp.f32 %v1453_v0 }
 0x294   :  { %v1678_v29 = vpop.f32.mrb[20].mxu1 }
 0x295   :  { %v1749_v1 = vadd.f32 %v1748_v22, %v1678_v29  ;;  %v11407_v19 = vpop.f32.mrb[21].mxu1  ;;  %v14679_v13 = vpop.eup %14678 }
 0x296   :  { %v1609_v7 = vadd.f32 1.0, %v14679_v13 }
 0x297   :  { %v1752_v17 = vadd.f32 %v15430_v60, %v1749_v1 }
 0x299   :  { %v9903_v41 = vmul.f32 -1.442695, %v1752_v17 }
 0x29a   :  { %v14681_v2 = vpop.eup %14680 }
 0x29b   :  { %14682 = vpow2.f32 %v9903_v41  ;;  %v1460_v18 = vmul.f32 %v14681_v2, %v14677_v50 }
 0x29c   :  { %v1895_v11 = vpop.f32.mrb[22].mxu1  ;;  %14684 = vrcp.f32 %v1609_v7 }
 0x29d   :  { %v1896_v63 = vadd.f32 %v1895_v11, %v1825_v3  ;;  %v11448_v30 = vpop.f32.mrb[23].mxu1  ;;  %11496 = vmatmul.mubr.msk.f32.vlgmr.msra.gmra.mrb[22].mxu0 %vm110_vm3, %v1460_v18 }
 0x29e   :  { %13548 = vmatpush3.bf16.msra.mxu0 %v15337_v44  ;;  %11533 = vmatprep.mubr.msk.f32.mxu0 %vm15049_vm0, %v17159_v38 }
 0x29f   :  { %v1899_v22 = vadd.f32 %v15436_v43, %v1896_v63  ;;  %13549 = vmatprep.subr.bf16.mxu0 %v17158_v56 }
 0x2a1   :  { %14686 = vtanh.f32 %v1899_v22  ;;  %v17168_v22 = vld [vmem:[#allocation19_spill] sm:$0xff] }
 0x2a2   :  { %13551 = vmatpush3.bf16.msra.mxu0 %v15344_v49 }
 0x2a3   :  { %13552 = vmatprep.subr.bf16.mxu0 %v17158_v56 }
 0x2a5   :  { %v14683_v59 = vpop.eup %14682 }
 0x2a6   :  { %v1756_v3 = vadd.f32 1.0, %v14683_v59  ;;  %13554 = vmatpush3.bf16.msra.mxu0 %v15348_v54  ;;  %v14685_v55 = vpop.eup %14684  ;;  %v15724_v59 = vld [vmem:[%s17041_s0] sm:$0xff] }
 0x2a7   :  { %13555 = vmatprep.subr.bf16.mxu0 %v17158_v56 }
 0x2a8   :  { %14688 = vrcp.f32 %v1756_v3  ;;  %v2717_v3 = vrot.slane %v15724_v59, 2 }
 0x2aa   :  { %13557 = vmatpush3.bf16.msra.mxu0 %v15352_v57 }
 0x2ab   :  { %v14687_v0 = vpop.eup %14686  ;;  %13570 = vmatprep.subr.bf16.mxu0 %v17158_v56 }
 0x2ac   :  { %v2049_v29 = vmul.f32 %v14687_v0, %v14685_v55  ;;  %v1967_v1 = vpop.f32.mrb[24].mxu1  ;;  %v15730_v55 = vld [vmem:[%s17041_s0 + $0x8] sm:$0xff] }
 0x2ad   :  { %v2038_v19 = vadd.f32 %v15634_v61, %v1967_v1  ;;  %11534 = vmatmul.mubr.msk.f32.vlgmr.msra.gmra.mrb[24].mxu0 %vm110_vm3, %v1460_v18  ;;  %v11467_v17 = vpop.f32.mrb[25].mxu1  ;;  %v2718_v0 = vrot.slane %v15730_v55, 1  ;;  %v17169_v1 = vld [vmem:[#allocation41_spill] sm:$0xff] }
 0x2ae   :  { %13572 = vmatpush3.bf16.msra.mxu0 %v15356_v62  ;;  %11571 = vmatprep.mubr.msk.f32.mxu0 %vm15049_vm0, %v17159_v38  ;;  %v17171_v17 = vld [vmem:[#allocation24_spill] sm:$0xff] }
 0x2af   :  { %v2041_v50 = vadd.f32 %v15442_v24, %v2038_v19  ;;  %13573 = vmatprep.subr.bf16.mxu0 %v17158_v56  ;;  %v17170_v19 = vld [vmem:[#allocation23_spill] sm:$0xff] }
 0x2b1   :  { %v9908_v13 = vmul.f32 -1.442695, %v2041_v50  ;;  %v17172_v50 = vld [vmem:[#allocation25_spill] sm:$0xff] }
 0x2b2   :  { %v14689_v41 = vpop.eup %14688  ;;  %13575 = vmatpush3.bf16.msra.mxu0 %v15363_v6 }
 0x2b3   :  { %v2048_v2 = vmul.f32 %v14689_v41, %v15445_v45  ;;  %14690 = vpow2.f32 %v9908_v13  ;;  %13576 = vmatprep.subr.bf16.mxu0 %v17158_v56  ;;  %v17173_v13 = vld [vmem:[#allocation27_spill] sm:$0xff]  ;;  %v17174_v41 = vld [vmem:[#allocation20_spill] sm:$0xff] }
 0x2b5   :  { %v15672_v61 = vadd.f32 %v2049_v29, %v2048_v2  ;;  %v15742_v29 = vsel %vm187_vm1, %v2718_v0, %v2717_v3  ;;  %v17175_v2 = vld [vmem:[#allocation36_spill] sm:$0xff]  ;;  %v17180_v3 = vld [vmem:[#allocation29_spill] sm:$0xff]  ;;  %v17181_v0 = vld [vmem:[#allocation30_spill] sm:$0xff] }
 0x2b6   :  { %13578 = vmatpush3.bf16.msra.mxu0 %v15367_v15 }
 0x2b7   :  { %13579 = vmatprep.subr.bf16.mxu0 %v17158_v56  ;;  %14692 = vtanh.f32 %v15672_v61 }
 0x2ba   :  { %13581 = vmatpush3.bf16.msra.mxu0 %v15371_v20 }
 0x2bb   :  { %13594 = vmatprep.subr.bf16.mxu0 %v17158_v56 }
 0x2bd   :  { %v14691_v7 = vpop.eup %14690  ;;  %11572 = vmatmul.mubr.msk.f32.vlgmr.msra.gmra.mrb[26].mxu0 %vm110_vm3, %v1460_v18 }
 0x2be   :  { %v2045_v11 = vadd.f32 1.0, %v14691_v7  ;;  %13596 = vmatpush3.bf16.msra.mxu0 %v15375_v27  ;;  %11609 = vmatprep.mubr.msk.f32.mxu0 %vm15049_vm0, %v17159_v38  ;;  %v17176_v7 = vld [vmem:[#allocation21_spill] sm:$0xff] }
 0x2bf   :  { %13597 = vmatprep.subr.bf16.mxu0 %v17158_v56 }
 0x2c0   :  { %14694 = vrcp.f32 %v2045_v11  ;;  %v17177_v11 = vld [vmem:[#allocation22_spill] sm:$0xff] }
 0x2c1   :  { %v14693_v45 = vpop.eup %14692 }
 0x2c2   :  { %13599 = vmatpush3.bf16.msra.mxu0 %v15382_v33 }
 0x2c3   :  { %13600 = vmatprep.subr.bf16.mxu0 %v17158_v56 }
 0x2c6   :  { %13602 = vmatpush3.bf16.msra.mxu0 %v15386_v42 }
 0x2c7   :  { %13603 = vmatprep.subr.bf16.mxu0 %v17158_v56 }
 0x2ca   :  { %v14695_v63 = vpop.eup %14694  ;;  %13605 = vmatpush3.bf16.msra.mxu0 %v15390_v48 }
 0x2cb   :  { %v15689_v30 = vmul.f32 %v14695_v63, %v14693_v45  ;;  %13618 = vmatprep.subr.bf16.mxu0 %v17158_v56  ;;  %v17178_v45 = vld [vmem:[#allocation26_spill] sm:$0xff]  ;;  %v17179_v63 = vld [vmem:[#allocation28_spill] sm:$0xff] }
 0x2cd   :  { %11610 = vmatmul.mubr.msk.f32.vlgmr.msra.gmra.mrb[28].mxu0 %vm110_vm3, %v1460_v18  ;;  %11515 = vmatmul.mubr.msk.f32.vlgmr.msra.gmra.mrb[26].mxu1 %vm110_vm3, %v15689_v30  ;;  %v17167_v18 = vld [vmem:[#allocation17_spill] sm:$0xff] }
 0x2ce   :  { %13560 = vmatpush3.bf16.msra.mxu1 %v15448_v37  ;;  %13620 = vmatpush3.bf16.msra.mxu0 %v15182_v5 }
 0x2cf   :  { %13561 = vmatprep.subr.bf16.mxu1 %v17158_v56  ;;  %13621 = vmatprep.subr.bf16.mxu0 %v17158_v56 }
 0x2d0   :  { %11552 = vmatprep.mubr.msk.f32.mxu1 %vm15049_vm0, %v17159_v38  ;;  %11647 = vmatprep.mubr.msk.f32.mxu0 %vm15049_vm0, %v17159_v38 }
 0x2d2   :  { %13563 = vmatpush3.bf16.msra.mxu1 %v15458_v25  ;;  %13623 = vmatpush3.bf16.msra.mxu0 %v15187_v12 }
 0x2d3   :  { %13564 = vmatprep.subr.bf16.mxu1 %v17158_v56  ;;  %13624 = vmatprep.subr.bf16.mxu0 %v17158_v56 }
 0x2d6   :  { %13566 = vmatpush3.bf16.msra.mxu1 %v15469_v4  ;;  %13626 = vmatpush3.bf16.msra.mxu0 %v17167_v18 }
 0x2d7   :  { %13567 = vmatprep.subr.bf16.mxu1 %v17158_v56  ;;  %13627 = vmatprep.subr.bf16.mxu0 %v17158_v56 }
 0x2da   :  { %13569 = vmatpush3.bf16.msra.mxu1 %v15481_v10  ;;  %13629 = vmatpush3.bf16.msra.mxu0 %v17168_v22 }
 0x2db   :  { %13582 = vmatprep.subr.bf16.mxu1 %v17158_v56  ;;  %13648 = vmatprep.subr.bf16.mxu0 %v17158_v56 }
 0x2dd   :  { %11553 = vmatmul.mubr.msk.f32.vlgmr.msra.gmra.mrb[28].mxu1 %vm110_vm3, %v15689_v30  ;;  %11648 = vmatmul.mubr.msk.f32.vlgmr.msra.gmra.mrb[30].mxu0 %vm110_vm3, %v15689_v30 }
 0x2de   :  { %13584 = vmatpush3.bf16.msra.mxu1 %v15489_v28  ;;  %13650 = vmatpush3.bf16.msra.mxu0 %v15252_v47 }
 0x2df   :  { %13585 = vmatprep.subr.bf16.mxu1 %v17158_v56  ;;  %13651 = vmatprep.subr.bf16.mxu0 %v17158_v56 }
 0x2e0   :  { %11688 = vmatprep.mubr.msk.f32.mxu0 %vm15049_vm0, %v17159_v38  ;;  %11590 = vmatprep.mubr.msk.f32.mxu1 %vm15049_vm0, %v17159_v38 }
 0x2e2   :  { %13587 = vmatpush3.bf16.msra.mxu1 %v15497_v21  ;;  %13653 = vmatpush3.bf16.msra.mxu0 %v15261_v53 }
 0x2e3   :  { %13588 = vmatprep.subr.bf16.mxu1 %v17158_v56  ;;  %13654 = vmatprep.subr.bf16.mxu0 %v17158_v56 }
 0x2e5   :  { %11689 = vmatmul.mubr.msk.f32.vlgmr.msra.gmra.mrb[32].mxu0 %vm189_vm2, %v15742_v29 }
 0x2e6   :  { %13590 = vmatpush3.bf16.msra.mxu1 %v15507_v16  ;;  %13656 = vmatpush3.bf16.msra.mxu0 %v15230_v34 }
 0x2e7   :  { %13591 = vmatprep.subr.bf16.mxu1 %v17158_v56  ;;  %13657 = vmatprep.subr.bf16.mxu0 %v17158_v56 }
 0x2e8   :  { %11707 = vmatprep.mubr.msk.f32.mxu0 %vm15049_vm0, %v17159_v38 }
 0x2ea   :  { %13593 = vmatpush3.bf16.msra.mxu1 %v15514_v46  ;;  %13659 = vmatpush3.bf16.msra.mxu0 %v15239_v40 }
 0x2eb   :  { %13606 = vmatprep.subr.bf16.mxu1 %v17158_v56  ;;  %13660 = vmatprep.subr.bf16.mxu0 %v17158_v56 }
 0x2ed   :  { %11591 = vmatmul.mubr.msk.f32.vlgmr.msra.gmra.mrb[30].mxu1 %vm110_vm3, %v15689_v30 }
 0x2ee   :  { %13608 = vmatpush3.bf16.msra.mxu1 %v17169_v1  ;;  %13662 = vmatpush3.bf16.msra.mxu0 %v17170_v19 }
 0x2ef   :  { %13609 = vmatprep.subr.bf16.mxu1 %v17158_v56  ;;  %13663 = vmatprep.subr.bf16.mxu0 %v17158_v56 }
 0x2f0   :  { %11628 = vmatprep.mubr.msk.f32.mxu1 %vm15049_vm0, %v17159_v38 }
 0x2f2   :  { %13611 = vmatpush3.bf16.msra.mxu1 %v15532_v58  ;;  %13665 = vmatpush3.bf16.msra.mxu0 %v17171_v17 }
 0x2f3   :  { %13612 = vmatprep.subr.bf16.mxu1 %v17158_v56  ;;  %13684 = vmatprep.subr.bf16.mxu0 %v17158_v56 }
 0x2f5   :  { %11708 = vmatmul.mubr.msk.f32.vlgmr.msra.gmra.mrb[34].mxu0 %vm110_vm3, %v15689_v30 }
 0x2f6   :  { %13614 = vmatpush3.bf16.msra.mxu1 %v15544_v51  ;;  %13686 = vmatpush3.bf16.msra.mxu0 %v17172_v50  ;;  %v17189_v51 = vld [vmem:[#allocation46_spill] sm:$0xff] }
 0x2f7   :  { %13615 = vmatprep.subr.bf16.mxu1 %v17158_v56  ;;  %13687 = vmatprep.subr.bf16.mxu0 %v17158_v56 }
 0x2f8   :  { %11748 = vmatprep.mubr.msk.f32.mxu0 %vm15049_vm0, %v17159_v38 }
 0x2fa   :  { %13617 = vmatpush3.bf16.msra.mxu1 %v15550_v52  ;;  %13689 = vmatpush3.bf16.msra.mxu0 %v17173_v13 }
 0x2fb   :  { %13630 = vmatprep.subr.bf16.mxu1 %v17158_v56  ;;  %13690 = vmatprep.subr.bf16.mxu0 %v17158_v56 }
 0x2fd   :  { %11629 = vmatmul.mubr.msk.f32.vlgmr.msra.gmra.mrb[32].mxu1 %vm110_vm3, %v15689_v30  ;;  %11749 = vmatmul.mubr.msk.f32.vlgmr.msra.gmra.mrb[36].mxu0 %vm189_vm2, %v15742_v29 }
 0x2fe   :  { %13632 = vmatpush3.bf16.msra.mxu1 %v15184_v9  ;;  %11658 = vmatprep.mubr.msk.f32.mxu1 %vm15049_vm0, %v17159_v38 }
 0x2ff   :  { %13633 = vmatprep.subr.bf16.mxu1 %v17158_v56  ;;  %13692 = vmatpush3.bf16.msra.mxu0 %v15321_v26 }
 0x300   :  { %13693 = vmatprep.subr.bf16.mxu0 %v17158_v56  ;;  %11767 = vmatprep.mubr.msk.f32.mxu0 %vm15049_vm0, %v17159_v38 }
 0x302   :  { %13635 = vmatpush3.bf16.msra.mxu1 %v15196_v14  ;;  %v17188_v14 = vld [vmem:[#allocation45_spill] sm:$0xff] }
 0x303   :  { %13636 = vmatprep.subr.bf16.mxu1 %v17158_v56  ;;  %13695 = vmatpush3.bf16.msra.mxu0 %v15325_v31 }
 0x304   :  { %13696 = vmatprep.subr.bf16.mxu0 %v17158_v56 }
 0x305   :  { %11659 = vmatmul.mubr.msk.f32.vlgmr.msra.gmra.mrb[34].mxu1 %vm189_vm2, %v15742_v29 }
 0x306   :  { %13638 = vmatpush3.bf16.msra.mxu1 %v15214_v23  ;;  %11677 = vmatprep.mubr.msk.f32.mxu1 %vm15049_vm0, %v17159_v38 }
 0x307   :  { %13639 = vmatprep.subr.bf16.mxu1 %v17158_v56  ;;  %13698 = vmatpush3.bf16.msra.mxu0 %v15329_v36 }
 0x308   :  { %13699 = vmatprep.subr.bf16.mxu0 %v17158_v56 }
 0x30a   :  { %13641 = vmatpush3.bf16.msra.mxu1 %v17174_v41 }
 0x30b   :  { %13642 = vmatprep.subr.bf16.mxu1 %v17158_v56  ;;  %13701 = vmatpush3.bf16.msra.mxu0 %v17175_v2 }
 0x30c   :  { %13714 = vmatprep.subr.bf16.mxu0 %v17158_v56 }
 0x30e   :  { %13644 = vmatpush3.bf16.msra.mxu1 %v17176_v7 }
 0x30f   :  { %13645 = vmatprep.subr.bf16.mxu1 %v17158_v56 }
 0x312   :  { %13647 = vmatpush3.bf16.msra.mxu1 %v17177_v11 }
 0x313   :  { %13666 = vmatprep.subr.bf16.mxu1 %v17158_v56 }
 0x315   :  { %11678 = vmatmul.mubr.msk.f32.vlgmr.msra.gmra.mrb[36].mxu1 %vm110_vm3, %v15689_v30 }
 0x316   :  { %13668 = vmatpush3.bf16.msra.mxu1 %v17178_v45  ;;  %11718 = vmatprep.mubr.msk.f32.mxu1 %vm15049_vm0, %v17159_v38  ;;  %v17182_v45 = vld [vmem:[#allocation31_spill] sm:$0xff] }
 0x317   :  { %13669 = vmatprep.subr.bf16.mxu1 %v17158_v56 }
 0x31a   :  { %13671 = vmatpush3.bf16.msra.mxu1 %v17179_v63  ;;  %v17183_v63 = vld [vmem:[#allocation32_spill] sm:$0xff] }
 0x31b   :  { %13672 = vmatprep.subr.bf16.mxu1 %v17158_v56 }
 0x31d   :  { %11719 = vmatmul.mubr.msk.f32.vlgmr.msra.gmra.mrb[38].mxu1 %vm189_vm2, %v15742_v29  ;;  %v17184_v29 = vld [vmem:[#allocation37_spill] sm:$0xff] }
 0x31e   :  { %13674 = vmatpush3.bf16.msra.mxu1 %v17180_v3  ;;  %11737 = vmatprep.mubr.msk.f32.mxu1 %vm15049_vm0, %v17159_v38 }
 0x31f   :  { %13675 = vmatprep.subr.bf16.mxu1 %v17158_v56 }
 0x322   :  { %13677 = vmatpush3.bf16.msra.mxu1 %v17181_v0  ;;  %v17185_v0 = vld [vmem:[#allocation38_spill] sm:$0xff] }
 0x323   :  { %13678 = vmatprep.subr.bf16.mxu1 %v17158_v56 }
 0x326   :  { %13680 = vmatpush3.bf16.msra.mxu1 %v17182_v45  ;;  %v17186_v45 = vld [vmem:[#allocation39_spill] sm:$0xff] }
 0x327   :  { %13681 = vmatprep.subr.bf16.mxu1 %v17158_v56 }
 0x32a   :  { %13683 = vmatpush3.bf16.msra.mxu1 %v17183_v63  ;;  %v17187_v63 = vld [vmem:[#allocation40_spill] sm:$0xff] }
 0x32b   :  { %13702 = vmatprep.subr.bf16.mxu1 %v17158_v56 }
 0x32d   :  { %11738 = vmatmul.mubr.msk.f32.vlgmr.msra.gmra.mrb[40].mxu1 %vm110_vm3, %v15689_v30 }
 0x32e   :  { %13704 = vmatpush3.bf16.msra.mxu1 %v17184_v29  ;;  %11786 = vmatprep.mubr.msk.f32.mxu1 %vm15049_vm0, %v17159_v38 }
 0x32f   :  { %13705 = vmatprep.subr.bf16.mxu1 %v17158_v56 }
 0x332   :  { %13707 = vmatpush3.bf16.msra.mxu1 %v17185_v0 }
 0x333   :  { %13708 = vmatprep.subr.bf16.mxu1 %v17158_v56 }
 0x336   :  { %13710 = vmatpush3.bf16.msra.mxu1 %v17186_v45 }
 0x337   :  { %13711 = vmatprep.subr.bf16.mxu1 %v17158_v56 }
 0x33a   :  { %13713 = vmatpush3.bf16.msra.mxu1 %v17187_v63 }
 0x33b   :  { %13726 = vmatprep.subr.bf16.mxu1 %v17158_v56 }
 0x370   :  { %v2122_v30 = vpop.f32.mrb[22].mxu0 }
 0x371   :  { %v11497_v3 = vpop.f32.mrb[23].mxu0 }
 0x380   :  { %v2272_v29 = vpop.f32.mrb[24].mxu0 }
 0x381   :  { %v11535_v11 = vpop.f32.mrb[25].mxu0 }
 0x390   :  { %v2419_v7 = vpop.f32.mrb[26].mxu0 }
 0x391   :  { %v11573_v2 = vpop.f32.mrb[27].mxu0 }
 0x3a0   :  { %v2561_v41 = vpop.f32.mrb[28].mxu0  ;;  %v2195_v36 = vpop.f32.mrb[26].mxu1 }
 0x3a1   :  { %v2196_v23 = vadd.f32 %v2195_v36, %v2122_v30  ;;  %v11611_v0 = vpop.f32.mrb[29].mxu0  ;;  %v11516_v31 = vpop.f32.mrb[27].mxu1 }
 0x3a3   :  { %v2199_v26 = vadd.f32 %v17188_v14, %v2196_v23 }
 0x3a5   :  { %v9911_v45 = vmul.f32 -1.442695, %v2199_v26 }
 0x3a7   :  { %14696 = vpow2.f32 %v9911_v45 }
 0x3b0   :  { %v2342_v9 = vpop.f32.mrb[28].mxu1  ;;  %v2713_v13 = vpop.f32.mrb[30].mxu0 }
 0x3b1   :  { %v2343_v52 = vadd.f32 %v2342_v9, %v2272_v29  ;;  %v11554_v63 = vpop.f32.mrb[29].mxu1  ;;  %v11649_v50 = vpop.f32.mrb[31].mxu0 }
 0x3b2   :  { %v14697_v58 = vpop.eup %14696 }
 0x3b3   :  { %v2346_v3 = vadd.f32 %v17189_v51, %v2343_v52  ;;  %v2203_v19 = vadd.f32 1.0, %v14697_v58 }
 0x3b5   :  { %v9914_v17 = vmul.f32 -1.442695, %v2346_v3 }
 0x3b7   :  { %14698 = vpow2.f32 %v9914_v17 }
 0x3b8   :  { %v2935_v11 = vpop.f32.mrb[32].mxu0  ;;  %14700 = vrcp.f32 %v2203_v19 }
 0x3b9   :  { %v11690_v2 = vpop.f32.mrb[33].mxu0 }
 0x3c0   :  { %v2489_v36 = vpop.f32.mrb[30].mxu1 }
 0x3c1   :  { %v14699_v0 = vpop.eup %14698  ;;  %v2490_v31 = vadd.f32 %v2489_v36, %v2419_v7  ;;  %v11592_v30 = vpop.f32.mrb[31].mxu1 }
 0x3c2   :  { %v2350_v23 = vadd.f32 1.0, %v14699_v0  ;;  %v14701_v45 = vpop.eup %14700 }
 0x3c3   :  { %v2493_v26 = vadd.f32 %v15632_v8, %v2490_v31 }
 0x3c4   :  { %14702 = vrcp.f32 %v2350_v23 }
 0x3c5   :  { %14704 = vtanh.f32 %v2493_v26 }
 0x3c8   :  { %v3012_v9 = vpop.f32.mrb[34].mxu0 }
 0x3c9   :  { %v11709_v50 = vpop.f32.mrb[35].mxu0 }
 0x3ce   :  { %v14703_v52 = vpop.eup %14702 }
 0x3cf   :  { %v14705_v63 = vpop.eup %14704  ;;  %v2642_v17 = vmul.f32 %v14703_v52, %v15644_v35 }
 0x3d0   :  { %v2643_v29 = vmul.f32 %v14705_v63, %v14701_v45  ;;  %v2631_v3 = vpop.f32.mrb[32].mxu1  ;;  %v3224_v58 = vpop.f32.mrb[36].mxu0 }
 0x3d1   :  { %v2632_v2 = vadd.f32 %v2631_v3, %v2561_v41  ;;  %v11630_v51 = vpop.f32.mrb[33].mxu1  ;;  %v11750_v7 = vpop.f32.mrb[37].mxu0 }
 0x3d2   :  { %v15850_v36 = vadd.f32 %v2643_v29, %v2642_v17 }
 0x3d3   :  { %v2635_v19 = vadd.f32 %v15641_v39, %v2632_v2 }
 0x3d5   :  { %v9919_v0 = vmul.f32 -1.442695, %v2635_v19 }
 0x3d7   :  { %14706 = vpow2.f32 %v9919_v0 }
 0x3d8   :  { %v2788_v31 = vpop.f32.mrb[34].mxu1  ;;  %14708 = vtanh.f32 %v15850_v36 }
 0x3d9   :  { %v2789_v30 = vadd.f32 %v2788_v31, %v2713_v13  ;;  %v11660_v23 = vpop.f32.mrb[35].mxu1 }
 0x3db   :  { %v2792_v26 = vadd.f32 %v15424_v32, %v2789_v30 }
 0x3dd   :  { %v9922_v50 = vmul.f32 -1.442695, %v2792_v26 }
 0x3df   :  { %14710 = vpow2.f32 %v9922_v50 }
 0x3e1   :  { %v14707_v8 = vpop.eup %14706 }
 0x3e2   :  { %v2639_v35 = vadd.f32 1.0, %v14707_v8  ;;  %v14709_v63 = vpop.eup %14708 }
 0x3e4   :  { %14712 = vrcp.f32 %v2639_v35 }
 0x3e8   :  { %v2865_v51 = vpop.f32.mrb[36].mxu1 }
 0x3e9   :  { %v2936_v41 = vadd.f32 %v2935_v11, %v2865_v51  ;;  %v11679_v45 = vpop.f32.mrb[37].mxu1  ;;  %v14711_v17 = vpop.eup %14710 }
 0x3ea   :  { %v2796_v2 = vadd.f32 1.0, %v14711_v17  ;;  %v3905_v17 = vrot.slane %v15730_v55, 2 }
 0x3eb   :  { %v2939_v52 = vadd.f32 %v15430_v60, %v2936_v41 }
 0x3ed   :  { %v9925_v29 = vmul.f32 -1.442695, %v2939_v52 }
 0x3ee   :  { %v14713_v3 = vpop.eup %14712 }
 0x3ef   :  { %14714 = vpow2.f32 %v9925_v29  ;;  %v2646_v13 = vmul.f32 %v14713_v3, %v14709_v63  ;;  %v3904_v63 = vrot.slane %v15724_v59, 3  ;;  %v17190_v3 = vld [vmem:[#allocation23_spill] sm:$0xff] }
 0x3f0   :  { %v3082_v32 = vpop.f32.mrb[38].mxu1  ;;  %14716 = vrcp.f32 %v2796_v2  ;;  %v17192_v2 = vld [vmem:[#allocation24_spill] sm:$0xff] }
 0x3f1   :  { %v3083_v7 = vadd.f32 %v3082_v32, %v3012_v9  ;;  %v11720_v19 = vpop.f32.mrb[39].mxu1  ;;  %11768 = vmatmul.mubr.msk.f32.vlgmr.msra.gmra.mrb[38].mxu0 %vm110_vm3, %v2646_v13  ;;  %v15937_v29 = vsel %vm187_vm1, %v3905_v17, %v3904_v63  ;;  %v17193_v32 = vld [vmem:[#allocation43_spill] sm:$0xff]  ;;  %v17213_v63 = vld [vmem:[#allocation37_spill] sm:$0xff]  ;;  %v17214_v17 = vld [vmem:[#allocation38_spill] sm:$0xff] }
 0x3f2   :  { %13716 = vmatpush3.bf16.msra.mxu0 %v15337_v44  ;;  %11805 = vmatprep.mubr.msk.f32.mxu0 %vm15049_vm0, %v17159_v38  ;;  %v17195_v19 = vld [vmem:[#allocation44_spill] sm:$0xff] }
 0x3f3   :  { %v3086_v8 = vadd.f32 %v15436_v43, %v3083_v7  ;;  %13717 = vmatprep.subr.bf16.mxu0 %v17158_v56  ;;  %v17194_v7 = vld [vmem:[#allocation25_spill] sm:$0xff] }
 0x3f5   :  { %14718 = vtanh.f32 %v3086_v8  ;;  %v17196_v8 = vld [vmem:[#allocation27_spill] sm:$0xff] }
 0x3f6   :  { %13719 = vmatpush3.bf16.msra.mxu0 %v15344_v49 }
 0x3f7   :  { %13720 = vmatprep.subr.bf16.mxu0 %v17158_v56 }
 0x3f9   :  { %v14715_v60 = vpop.eup %14714 }
 0x3fa   :  { %v2943_v11 = vadd.f32 1.0, %v14715_v60  ;;  %13722 = vmatpush3.bf16.msra.mxu0 %v15348_v54  ;;  %v14717_v9 = vpop.eup %14716  ;;  %v17197_v60 = vld [vmem:[#allocation15_spill] sm:$0xff] }
 0x3fb   :  { %13723 = vmatprep.subr.bf16.mxu0 %v17158_v56 }
 0x3fc   :  { %14720 = vrcp.f32 %v2943_v11  ;;  %v17198_v11 = vld [vmem:[#allocation33_spill] sm:$0xff] }
 0x3fe   :  { %13725 = vmatpush3.bf16.msra.mxu0 %v15352_v57 }
 0x3ff   :  { %v14719_v0 = vpop.eup %14718  ;;  %13738 = vmatprep.subr.bf16.mxu0 %v17158_v56 }
 0x400   :  { %v3236_v43 = vmul.f32 %v14719_v0, %v14717_v9  ;;  %v3154_v31 = vpop.f32.mrb[40].mxu1  ;;  %v17199_v9 = vld [vmem:[#allocation16_spill] sm:$0xff]  ;;  %v17200_v0 = vld [vmem:[#allocation34_spill] sm:$0xff] }
 0x401   :  { %v3225_v30 = vadd.f32 %v3224_v58, %v3154_v31  ;;  %11806 = vmatmul.mubr.msk.f32.vlgmr.msra.gmra.mrb[40].mxu0 %vm110_vm3, %v2646_v13  ;;  %v11739_v23 = vpop.f32.mrb[41].mxu1  ;;  %v17202_v31 = vld [vmem:[#allocation35_spill] sm:$0xff] }
 0x402   :  { %13740 = vmatpush3.bf16.msra.mxu0 %v15356_v62  ;;  %11843 = vmatprep.mubr.msk.f32.mxu0 %vm15049_vm0, %v17159_v38  ;;  %v17204_v23 = vld [vmem:[#allocation36_spill] sm:$0xff] }
 0x403   :  { %v3228_v26 = vadd.f32 %v15442_v24, %v3225_v30  ;;  %13741 = vmatprep.subr.bf16.mxu0 %v17158_v56  ;;  %v17203_v30 = vld [vmem:[#allocation20_spill] sm:$0xff] }
 0x405   :  { %v9930_v50 = vmul.f32 -1.442695, %v3228_v26  ;;  %v17205_v26 = vld [vmem:[#allocation21_spill] sm:$0xff] }
 0x406   :  { %v14721_v35 = vpop.eup %14720  ;;  %13743 = vmatpush3.bf16.msra.mxu0 %v15363_v6 }
 0x407   :  { %v3235_v51 = vmul.f32 %v14721_v35, %v15672_v61  ;;  %14722 = vpow2.f32 %v9930_v50  ;;  %13744 = vmatprep.subr.bf16.mxu0 %v17158_v56  ;;  %v17206_v50 = vld [vmem:[#allocation22_spill] sm:$0xff] }
 0x408   :  { %v17207_v35 = vld [vmem:[#allocation26_spill] sm:$0xff] }
 0x409   :  { %v15877_v58 = vadd.f32 %v3236_v43, %v3235_v51  ;;  %v17201_v43 = vld [vmem:[#allocation18_spill] sm:$0xff]  ;;  %v17208_v51 = vld [vmem:[#allocation28_spill] sm:$0xff] }
 0x40a   :  { %13746 = vmatpush3.bf16.msra.mxu0 %v15367_v15 }
 0x40b   :  { %13747 = vmatprep.subr.bf16.mxu0 %v17158_v56  ;;  %14724 = vtanh.f32 %v15877_v58 }
 0x40e   :  { %13749 = vmatpush3.bf16.msra.mxu0 %v15371_v20 }
 0x40f   :  { %13762 = vmatprep.subr.bf16.mxu0 %v17158_v56 }
 0x411   :  { %v14723_v24 = vpop.eup %14722  ;;  %11844 = vmatmul.mubr.msk.f32.vlgmr.msra.gmra.mrb[42].mxu0 %vm110_vm3, %v2646_v13 }
 0x412   :  { %v3232_v41 = vadd.f32 1.0, %v14723_v24  ;;  %13764 = vmatpush3.bf16.msra.mxu0 %v15375_v27  ;;  %11881 = vmatprep.mubr.msk.f32.mxu0 %vm15049_vm0, %v17159_v38  ;;  %v17209_v24 = vld [vmem:[#allocation29_spill] sm:$0xff] }
 0x413   :  { %13765 = vmatprep.subr.bf16.mxu0 %v17158_v56 }
 0x414   :  { %14726 = vrcp.f32 %v3232_v41  ;;  %v17210_v41 = vld [vmem:[#allocation30_spill] sm:$0xff] }
 0x415   :  { %v14725_v61 = vpop.eup %14724 }
 0x416   :  { %13767 = vmatpush3.bf16.msra.mxu0 %v15382_v33 }
 0x417   :  { %13768 = vmatprep.subr.bf16.mxu0 %v17158_v56 }
 0x41a   :  { %13770 = vmatpush3.bf16.msra.mxu0 %v15386_v42 }
 0x41b   :  { %13771 = vmatprep.subr.bf16.mxu0 %v17158_v56 }
 0x41e   :  { %v14727_v45 = vpop.eup %14726  ;;  %13773 = vmatpush3.bf16.msra.mxu0 %v15390_v48 }
 0x41f   :  { %v15894_v52 = vmul.f32 %v14727_v45, %v14725_v61  ;;  %13786 = vmatprep.subr.bf16.mxu0 %v17158_v56  ;;  %v17211_v61 = vld [vmem:[#allocation31_spill] sm:$0xff]  ;;  %v17212_v45 = vld [vmem:[#allocation32_spill] sm:$0xff] }
 0x421   :  { %11882 = vmatmul.mubr.msk.f32.vlgmr.msra.gmra.mrb[44].mxu0 %vm110_vm3, %v2646_v13  ;;  %11787 = vmatmul.mubr.msk.f32.vlgmr.msra.gmra.mrb[42].mxu1 %vm110_vm3, %v15894_v52  ;;  %v17191_v13 = vld [vmem:[#allocation42_spill] sm:$0xff] }
 0x422   :  { %13728 = vmatpush3.bf16.msra.mxu1 %v15448_v37  ;;  %13788 = vmatpush3.bf16.msra.mxu0 %v15182_v5 }
 0x423   :  { %13729 = vmatprep.subr.bf16.mxu1 %v17158_v56  ;;  %13789 = vmatprep.subr.bf16.mxu0 %v17158_v56 }
 0x424   :  { %11824 = vmatprep.mubr.msk.f32.mxu1 %vm15049_vm0, %v17159_v38  ;;  %11919 = vmatprep.mubr.msk.f32.mxu0 %vm15049_vm0, %v17159_v38 }
 0x426   :  { %13731 = vmatpush3.bf16.msra.mxu1 %v15458_v25  ;;  %13791 = vmatpush3.bf16.msra.mxu0 %v15187_v12 }
 0x427   :  { %13732 = vmatprep.subr.bf16.mxu1 %v17158_v56  ;;  %13792 = vmatprep.subr.bf16.mxu0 %v17158_v56 }
 0x42a   :  { %13734 = vmatpush3.bf16.msra.mxu1 %v15469_v4  ;;  %13794 = vmatpush3.bf16.msra.mxu0 %v17167_v18 }
 0x42b   :  { %13735 = vmatprep.subr.bf16.mxu1 %v17158_v56  ;;  %13795 = vmatprep.subr.bf16.mxu0 %v17158_v56 }
 0x42e   :  { %13737 = vmatpush3.bf16.msra.mxu1 %v15481_v10  ;;  %13797 = vmatpush3.bf16.msra.mxu0 %v17168_v22 }
 0x42f   :  { %13750 = vmatprep.subr.bf16.mxu1 %v17158_v56  ;;  %13816 = vmatprep.subr.bf16.mxu0 %v17158_v56 }
 0x431   :  { %11825 = vmatmul.mubr.msk.f32.vlgmr.msra.gmra.mrb[44].mxu1 %vm110_vm3, %v15894_v52  ;;  %11920 = vmatmul.mubr.msk.f32.vlgmr.msra.gmra.mrb[46].mxu0 %vm110_vm3, %v15894_v52 }
 0x432   :  { %13752 = vmatpush3.bf16.msra.mxu1 %v15489_v28  ;;  %13818 = vmatpush3.bf16.msra.mxu0 %v15252_v47 }
 0x433   :  { %13753 = vmatprep.subr.bf16.mxu1 %v17158_v56  ;;  %13819 = vmatprep.subr.bf16.mxu0 %v17158_v56 }
 0x434   :  { %11960 = vmatprep.mubr.msk.f32.mxu0 %vm15049_vm0, %v17159_v38  ;;  %11862 = vmatprep.mubr.msk.f32.mxu1 %vm15049_vm0, %v17159_v38 }
 0x436   :  { %13755 = vmatpush3.bf16.msra.mxu1 %v15497_v21  ;;  %13821 = vmatpush3.bf16.msra.mxu0 %v15261_v53 }
 0x437   :  { %13756 = vmatprep.subr.bf16.mxu1 %v17158_v56  ;;  %13822 = vmatprep.subr.bf16.mxu0 %v17158_v56 }
 0x439   :  { %11961 = vmatmul.mubr.msk.f32.vlgmr.msra.gmra.mrb[48].mxu0 %vm189_vm2, %v15937_v29 }
 0x43a   :  { %13758 = vmatpush3.bf16.msra.mxu1 %v15507_v16  ;;  %13824 = vmatpush3.bf16.msra.mxu0 %v15230_v34 }
 0x43b   :  { %13759 = vmatprep.subr.bf16.mxu1 %v17158_v56  ;;  %13825 = vmatprep.subr.bf16.mxu0 %v17158_v56 }
 0x43c   :  { %11979 = vmatprep.mubr.msk.f32.mxu0 %vm15049_vm0, %v17159_v38 }
 0x43e   :  { %13761 = vmatpush3.bf16.msra.mxu1 %v15514_v46  ;;  %13827 = vmatpush3.bf16.msra.mxu0 %v15239_v40 }
 0x43f   :  { %13774 = vmatprep.subr.bf16.mxu1 %v17158_v56  ;;  %13828 = vmatprep.subr.bf16.mxu0 %v17158_v56 }
 0x441   :  { %11863 = vmatmul.mubr.msk.f32.vlgmr.msra.gmra.mrb[46].mxu1 %vm110_vm3, %v15894_v52 }
 0x442   :  { %13776 = vmatpush3.bf16.msra.mxu1 %v17169_v1  ;;  %13830 = vmatpush3.bf16.msra.mxu0 %v17190_v3 }
 0x443   :  { %13777 = vmatprep.subr.bf16.mxu1 %v17158_v56  ;;  %13831 = vmatprep.subr.bf16.mxu0 %v17158_v56 }
 0x444   :  { %11900 = vmatprep.mubr.msk.f32.mxu1 %vm15049_vm0, %v17159_v38 }
 0x446   :  { %13779 = vmatpush3.bf16.msra.mxu1 %v17191_v13  ;;  %13833 = vmatpush3.bf16.msra.mxu0 %v17192_v2 }
 0x447   :  { %13780 = vmatprep.subr.bf16.mxu1 %v17158_v56  ;;  %13852 = vmatprep.subr.bf16.mxu0 %v17158_v56 }
 0x449   :  { %11980 = vmatmul.mubr.msk.f32.vlgmr.msra.gmra.mrb[50].mxu0 %vm110_vm3, %v15894_v52 }
 0x44a   :  { %13782 = vmatpush3.bf16.msra.mxu1 %v17193_v32  ;;  %13854 = vmatpush3.bf16.msra.mxu0 %v17194_v7 }
 0x44b   :  { %13783 = vmatprep.subr.bf16.mxu1 %v17158_v56  ;;  %13855 = vmatprep.subr.bf16.mxu0 %v17158_v56 }
 0x44c   :  { %12020 = vmatprep.mubr.msk.f32.mxu0 %vm15049_vm0, %v17159_v38 }
 0x44e   :  { %13785 = vmatpush3.bf16.msra.mxu1 %v17195_v19  ;;  %13857 = vmatpush3.bf16.msra.mxu0 %v17196_v8 }
 0x44f   :  { %13798 = vmatprep.subr.bf16.mxu1 %v17158_v56  ;;  %13858 = vmatprep.subr.bf16.mxu0 %v17158_v56 }
 0x451   :  { %11901 = vmatmul.mubr.msk.f32.vlgmr.msra.gmra.mrb[48].mxu1 %vm110_vm3, %v15894_v52  ;;  %12021 = vmatmul.mubr.msk.f32.vlgmr.msra.gmra.mrb[52].mxu0 %vm189_vm2, %v15937_v29 }
 0x452   :  { %13800 = vmatpush3.bf16.msra.mxu1 %v17197_v60  ;;  %11930 = vmatprep.mubr.msk.f32.mxu1 %vm15049_vm0, %v17159_v38 }
 0x453   :  { %13801 = vmatprep.subr.bf16.mxu1 %v17158_v56  ;;  %13860 = vmatpush3.bf16.msra.mxu0 %v17198_v11  ;;  %v17217_v11 = vld [vmem:[#allocation46_spill] sm:$0xff] }
 0x454   :  { %13861 = vmatprep.subr.bf16.mxu0 %v17158_v56  ;;  %12039 = vmatprep.mubr.msk.f32.mxu0 %vm15049_vm0, %v17159_v38 }
 0x456   :  { %13803 = vmatpush3.bf16.msra.mxu1 %v17199_v9 }
 0x457   :  { %13804 = vmatprep.subr.bf16.mxu1 %v17158_v56  ;;  %13863 = vmatpush3.bf16.msra.mxu0 %v17200_v0 }
 0x458   :  { %13864 = vmatprep.subr.bf16.mxu0 %v17158_v56 }
 0x459   :  { %11931 = vmatmul.mubr.msk.f32.vlgmr.msra.gmra.mrb[50].mxu1 %vm189_vm2, %v15937_v29 }
 0x45a   :  { %13806 = vmatpush3.bf16.msra.mxu1 %v17201_v43  ;;  %11949 = vmatprep.mubr.msk.f32.mxu1 %vm15049_vm0, %v17159_v38 }
 0x45b   :  { %13807 = vmatprep.subr.bf16.mxu1 %v17158_v56  ;;  %13866 = vmatpush3.bf16.msra.mxu0 %v17202_v31 }
 0x45c   :  { %13867 = vmatprep.subr.bf16.mxu0 %v17158_v56 }
 0x45e   :  { %13809 = vmatpush3.bf16.msra.mxu1 %v17203_v30 }
 0x45f   :  { %13810 = vmatprep.subr.bf16.mxu1 %v17158_v56  ;;  %13869 = vmatpush3.bf16.msra.mxu0 %v17204_v23 }
 0x460   :  { %13882 = vmatprep.subr.bf16.mxu0 %v17158_v56 }
 0x462   :  { %13812 = vmatpush3.bf16.msra.mxu1 %v17205_v26 }
 0x463   :  { %13813 = vmatprep.subr.bf16.mxu1 %v17158_v56 }
 0x466   :  { %13815 = vmatpush3.bf16.msra.mxu1 %v17206_v50 }
 0x467   :  { %13834 = vmatprep.subr.bf16.mxu1 %v17158_v56 }
 0x469   :  { %11950 = vmatmul.mubr.msk.f32.vlgmr.msra.gmra.mrb[52].mxu1 %vm110_vm3, %v15894_v52 }
 0x46a   :  { %13836 = vmatpush3.bf16.msra.mxu1 %v17207_v35  ;;  %11990 = vmatprep.mubr.msk.f32.mxu1 %vm15049_vm0, %v17159_v38 }
 0x46b   :  { %13837 = vmatprep.subr.bf16.mxu1 %v17158_v56 }
 0x46e   :  { %13839 = vmatpush3.bf16.msra.mxu1 %v17208_v51 }
 0x46f   :  { %13840 = vmatprep.subr.bf16.mxu1 %v17158_v56 }
 0x471   :  { %11991 = vmatmul.mubr.msk.f32.vlgmr.msra.gmra.mrb[54].mxu1 %vm189_vm2, %v15937_v29  ;;  %v17215_v29 = vld [vmem:[#allocation39_spill] sm:$0xff] }
 0x472   :  { %13842 = vmatpush3.bf16.msra.mxu1 %v17209_v24  ;;  %12009 = vmatprep.mubr.msk.f32.mxu1 %vm15049_vm0, %v17159_v38 }
 0x473   :  { %13843 = vmatprep.subr.bf16.mxu1 %v17158_v56 }
 0x476   :  { %13845 = vmatpush3.bf16.msra.mxu1 %v17210_v41 }
 0x477   :  { %13846 = vmatprep.subr.bf16.mxu1 %v17158_v56 }
 0x47a   :  { %13848 = vmatpush3.bf16.msra.mxu1 %v17211_v61 }
 0x47b   :  { %13849 = vmatprep.subr.bf16.mxu1 %v17158_v56 }
 0x47e   :  { %13851 = vmatpush3.bf16.msra.mxu1 %v17212_v45  ;;  %v17216_v45 = vld [vmem:[#allocation40_spill] sm:$0xff] }
 0x47f   :  { %13870 = vmatprep.subr.bf16.mxu1 %v17158_v56 }
 0x481   :  { %12010 = vmatmul.mubr.msk.f32.vlgmr.msra.gmra.mrb[56].mxu1 %vm110_vm3, %v15894_v52 }
 0x482   :  { %13872 = vmatpush3.bf16.msra.mxu1 %v17213_v63  ;;  %12058 = vmatprep.mubr.msk.f32.mxu1 %vm15049_vm0, %v17159_v38 }
 0x483   :  { %13873 = vmatprep.subr.bf16.mxu1 %v17158_v56 }
 0x486   :  { %13875 = vmatpush3.bf16.msra.mxu1 %v17214_v17 }
 0x487   :  { %13876 = vmatprep.subr.bf16.mxu1 %v17158_v56 }
 0x48a   :  { %13878 = vmatpush3.bf16.msra.mxu1 %v17215_v29 }
 0x48b   :  { %13879 = vmatprep.subr.bf16.mxu1 %v17158_v56 }
 0x48e   :  { %13881 = vmatpush3.bf16.msra.mxu1 %v17216_v45 }
 0x48f   :  { %13894 = vmatprep.subr.bf16.mxu1 %v17158_v56 }
 0x4c4   :  { %v3309_v52 = vpop.f32.mrb[38].mxu0 }
 0x4c5   :  { %v11769_v61 = vpop.f32.mrb[39].mxu0 }
 0x4d4   :  { %v3459_v63 = vpop.f32.mrb[40].mxu0 }
 0x4d5   :  { %v11807_v41 = vpop.f32.mrb[41].mxu0 }
 0x4e4   :  { %v3606_v24 = vpop.f32.mrb[42].mxu0 }
 0x4e5   :  { %v11845_v51 = vpop.f32.mrb[43].mxu0 }
 0x4f4   :  { %v3748_v35 = vpop.f32.mrb[44].mxu0  ;;  %v3382_v50 = vpop.f32.mrb[42].mxu1 }
 0x4f5   :  { %v3383_v26 = vadd.f32 %v3382_v50, %v3309_v52  ;;  %v11883_v17 = vpop.f32.mrb[45].mxu0  ;;  %v11788_v23 = vpop.f32.mrb[43].mxu1 }
 0x4f7   :  { %v3386_v30 = vadd.f32 %v17188_v14, %v3383_v26 }
 0x4f9   :  { %v9933_v29 = vmul.f32 -1.442695, %v3386_v30  ;;  %v17218_v30 = vld [vmem:[#allocation47_spill] sm:$0xff] }
 0x4fb   :  { %14728 = vpow2.f32 %v9933_v29 }
 0x504   :  { %v3529_v31 = vpop.f32.mrb[44].mxu1  ;;  %v3900_v43 = vpop.f32.mrb[46].mxu0 }
 0x505   :  { %v3530_v0 = vadd.f32 %v3529_v31, %v3459_v63  ;;  %v11826_v45 = vpop.f32.mrb[45].mxu1  ;;  %v11921_v9 = vpop.f32.mrb[47].mxu0 }
 0x506   :  { %v14729_v8 = vpop.eup %14728 }
 0x507   :  { %v3533_v61 = vadd.f32 %v17217_v11, %v3530_v0  ;;  %v3390_v19 = vadd.f32 1.0, %v14729_v8 }
 0x509   :  { %v9936_v60 = vmul.f32 -1.442695, %v3533_v61 }
 0x50b   :  { %14730 = vpow2.f32 %v9936_v60 }
 0x50c   :  { %v4122_v41 = vpop.f32.mrb[48].mxu0  ;;  %14732 = vrcp.f32 %v3390_v19 }
 0x50d   :  { %v11962_v51 = vpop.f32.mrb[49].mxu0 }
 0x514   :  { %v3676_v50 = vpop.f32.mrb[46].mxu1 }
 0x515   :  { %v14731_v17 = vpop.eup %14730  ;;  %v3677_v23 = vadd.f32 %v3676_v50, %v3606_v24  ;;  %v11864_v52 = vpop.f32.mrb[47].mxu1 }
 0x516   :  { %v3537_v14 = vadd.f32 1.0, %v14731_v17  ;;  %v14733_v45 = vpop.eup %14732 }
 0x517   :  { %v3680_v26 = vadd.f32 %v17218_v30, %v3677_v23  ;;  %v16051_v30 = vld [vmem:[%s17044_s3] ss:$0 sm:$0xff] }
 0x518   :  { %14734 = vrcp.f32 %v3537_v14 }
 0x519   :  { %14736 = vtanh.f32 %v3680_v26 }
 0x51c   :  { %v4199_v9 = vpop.f32.mrb[50].mxu0 }
 0x51d   :  { %v11981_v31 = vpop.f32.mrb[51].mxu0 }
 0x522   :  { %v14735_v11 = vpop.eup %14734 }
 0x523   :  { %v14737_v0 = vpop.eup %14736  ;;  %v3829_v60 = vmul.f32 %v14735_v11, %v15850_v36 }
 0x524   :  { %v3830_v63 = vmul.f32 %v14737_v0, %v14733_v45  ;;  %v3818_v29 = vpop.f32.mrb[48].mxu1  ;;  %v4411_v8 = vpop.f32.mrb[52].mxu0 }
 0x525   :  { %v3819_v61 = vadd.f32 %v3818_v29, %v3748_v35  ;;  %v11902_v51 = vpop.f32.mrb[49].mxu1  ;;  %v12022_v24 = vpop.f32.mrb[53].mxu0 }
 0x526   :  { %v16045_v50 = vadd.f32 %v3830_v63, %v3829_v60 }
 0x527   :  { %v3822_v19 = vadd.f32 %v15641_v39, %v3819_v61 }
 0x529   :  { %v9941_v17 = vmul.f32 -1.442695, %v3822_v19 }
 0x52b   :  { %14738 = vpow2.f32 %v9941_v17 }
 0x52c   :  { %v3975_v23 = vpop.f32.mrb[50].mxu1  ;;  %14740 = vtanh.f32 %v16045_v50 }
 0x52d   :  { %v3976_v52 = vadd.f32 %v3975_v23, %v3900_v43  ;;  %v11932_v14 = vpop.f32.mrb[51].mxu1  ;;  %v16058_v43 = vld [vmem:[%s17044_s3 + $0x1] ss:$0 sm:$0xff] }
 0x52f   :  { %v3979_v36 = vadd.f32 %v16051_v30, %v3976_v52 }
 0x531   :  { %v9944_v26 = vmul.f32 -1.442695, %v3979_v36 }
 0x533   :  { %14742 = vpow2.f32 %v9944_v26 }
 0x535   :  { %v14739_v35 = vpop.eup %14738 }
 0x536   :  { %v3826_v31 = vadd.f32 1.0, %v14739_v35  ;;  %v14741_v60 = vpop.eup %14740 }
 0x538   :  { %14744 = vrcp.f32 %v3826_v31 }
 0x53c   :  { %v4052_v39 = vpop.f32.mrb[52].mxu1 }
 0x53d   :  { %v4123_v45 = vadd.f32 %v4122_v41, %v4052_v39  ;;  %v11951_v11 = vpop.f32.mrb[53].mxu1  ;;  %v14743_v63 = vpop.eup %14742  ;;  %v16068_v41 = vld [vmem:[%s17044_s3 + $0x2] ss:$0 sm:$0xff] }
 0x53e   :  { %v3983_v24 = vadd.f32 1.0, %v14743_v63  ;;  %v16085_v11 = vld [vmem:[%s17044_s3 + $0x3] ss:$0 sm:$0xff] }
 0x53f   :  { %v4126_v0 = vadd.f32 %v16058_v43, %v4123_v45 }
 0x541   :  { %v9947_v29 = vmul.f32 -1.442695, %v4126_v0 }
 0x542   :  { %v14745_v61 = vpop.eup %14744 }
 0x543   :  { %14746 = vpow2.f32 %v9947_v29  ;;  %v3833_v51 = vmul.f32 %v14745_v61, %v14741_v60 }
 0x544   :  { %v4269_v19 = vpop.f32.mrb[54].mxu1  ;;  %14748 = vrcp.f32 %v3983_v24 }
 0x545   :  { %v4270_v17 = vadd.f32 %v4269_v19, %v4199_v9  ;;  %v11992_v23 = vpop.f32.mrb[55].mxu1  ;;  %12040 = vmatmul.mubr.msk.f32.vlgmr.msra.gmra.mrb[54].mxu0 %vm110_vm3, %v3833_v51 }
 0x546   :  { %13884 = vmatpush3.bf16.msra.mxu0 %v15337_v44  ;;  %12077 = vmatprep.mubr.msk.f32.mxu0 %vm15049_vm0, %v17159_v38  ;;  %v5092_v23 = vrot.slane %v15730_v55, 3  ;;  %v17220_v55 = vld [vmem:[#allocation27_spill] sm:$0xff] }
 0x547   :  { %v4273_v52 = vadd.f32 %v16068_v41, %v4270_v17  ;;  %13885 = vmatprep.subr.bf16.mxu0 %v17158_v56 }
 0x549   :  { %14750 = vtanh.f32 %v4273_v52 }
 0x54a   :  { %13887 = vmatpush3.bf16.msra.mxu0 %v15344_v49 }
 0x54b   :  { %13888 = vmatprep.subr.bf16.mxu0 %v17158_v56 }
 0x54d   :  { %v14747_v9 = vpop.eup %14746 }
 0x54e   :  { %v4130_v14 = vadd.f32 1.0, %v14747_v9  ;;  %13890 = vmatpush3.bf16.msra.mxu0 %v15348_v54  ;;  %v14749_v36 = vpop.eup %14748  ;;  %v17221_v9 = vld [vmem:[#allocation15_spill] sm:$0xff] }
 0x54f   :  { %13891 = vmatprep.subr.bf16.mxu0 %v17158_v56 }
 0x550   :  { %14752 = vrcp.f32 %v4130_v14  ;;  %v17222_v14 = vld [vmem:[#allocation33_spill] sm:$0xff] }
 0x552   :  { %13893 = vmatpush3.bf16.msra.mxu0 %v15352_v57 }
 0x553   :  { %v14751_v26 = vpop.eup %14750  ;;  %13906 = vmatprep.subr.bf16.mxu0 %v17158_v56 }
 0x554   :  { %v4423_v35 = vmul.f32 %v14751_v26, %v14749_v36  ;;  %v4341_v31 = vpop.f32.mrb[56].mxu1  ;;  %v17223_v36 = vld [vmem:[#allocation16_spill] sm:$0xff]  ;;  %v17224_v26 = vld [vmem:[#allocation34_spill] sm:$0xff] }
 0x555   :  { %v4412_v39 = vadd.f32 %v4411_v8, %v4341_v31  ;;  %12078 = vmatmul.mubr.msk.f32.vlgmr.msra.gmra.mrb[56].mxu0 %vm110_vm3, %v3833_v51  ;;  %v12011_v45 = vpop.f32.mrb[57].mxu1  ;;  %v17226_v31 = vld [vmem:[#allocation35_spill] sm:$0xff] }
 0x556   :  { %13908 = vmatpush3.bf16.msra.mxu0 %v15356_v62  ;;  %12115 = vmatprep.mubr.msk.f32.mxu0 %vm15049_vm0, %v17159_v38  ;;  %v17228_v45 = vld [vmem:[#allocation36_spill] sm:$0xff] }
 0x557   :  { %v4415_v0 = vadd.f32 %v16085_v11, %v4412_v39  ;;  %13909 = vmatprep.subr.bf16.mxu0 %v17158_v56  ;;  %v17227_v39 = vld [vmem:[#allocation20_spill] sm:$0xff] }
 0x559   :  { %v9952_v60 = vmul.f32 -1.442695, %v4415_v0  ;;  %v17229_v0 = vld [vmem:[#allocation21_spill] sm:$0xff] }
 0x55a   :  { %v14753_v63 = vpop.eup %14752  ;;  %13911 = vmatpush3.bf16.msra.mxu0 %v15363_v6 }
 0x55b   :  { %v4422_v8 = vmul.f32 %v14753_v63, %v15877_v58  ;;  %14754 = vpow2.f32 %v9952_v60  ;;  %13912 = vmatprep.subr.bf16.mxu0 %v17158_v56  ;;  %v17230_v60 = vld [vmem:[#allocation22_spill] sm:$0xff] }
 0x55c   :  { %v17231_v63 = vld [vmem:[#allocation26_spill] sm:$0xff] }
 0x55d   :  { %v16092_v29 = vadd.f32 %v4423_v35, %v4422_v8  ;;  %v17225_v35 = vld [vmem:[#allocation18_spill] sm:$0xff]  ;;  %v17232_v8 = vld [vmem:[#allocation28_spill] sm:$0xff] }
 0x55e   :  { %13914 = vmatpush3.bf16.msra.mxu0 %v15367_v15 }
 0x55f   :  { %13915 = vmatprep.subr.bf16.mxu0 %v17158_v56  ;;  %14756 = vtanh.f32 %v16092_v29 }
 0x562   :  { %13917 = vmatpush3.bf16.msra.mxu0 %v15371_v20 }
 0x563   :  { %13930 = vmatprep.subr.bf16.mxu0 %v17158_v56 }
 0x565   :  { %v14755_v61 = vpop.eup %14754  ;;  %12116 = vmatmul.mubr.msk.f32.vlgmr.msra.gmra.mrb[58].mxu0 %vm110_vm3, %v3833_v51 }
 0x566   :  { %v4419_v24 = vadd.f32 1.0, %v14755_v61  ;;  %13932 = vmatpush3.bf16.msra.mxu0 %v15375_v27  ;;  %12153 = vmatprep.mubr.msk.f32.mxu0 %vm15049_vm0, %v17159_v38  ;;  %v17233_v61 = vld [vmem:[#allocation29_spill] sm:$0xff] }
 0x567   :  { %13933 = vmatprep.subr.bf16.mxu0 %v17158_v56 }
 0x568   :  { %14758 = vrcp.f32 %v4419_v24  ;;  %v17234_v24 = vld [vmem:[#allocation30_spill] sm:$0xff] }
 0x569   :  { %v14757_v58 = vpop.eup %14756 }
 0x56a   :  { %13935 = vmatpush3.bf16.msra.mxu0 %v15382_v33 }
 0x56b   :  { %13936 = vmatprep.subr.bf16.mxu0 %v17158_v56 }
 0x56e   :  { %13938 = vmatpush3.bf16.msra.mxu0 %v15386_v42 }
 0x56f   :  { %13939 = vmatprep.subr.bf16.mxu0 %v17158_v56 }
 0x572   :  { %v14759_v19 = vpop.eup %14758  ;;  %13941 = vmatpush3.bf16.msra.mxu0 %v15390_v48 }
 0x573   :  { %v16109_v17 = vmul.f32 %v14759_v19, %v14757_v58  ;;  %13954 = vmatprep.subr.bf16.mxu0 %v17158_v56  ;;  %v17235_v58 = vld [vmem:[#allocation31_spill] sm:$0xff]  ;;  %v17236_v19 = vld [vmem:[#allocation32_spill] sm:$0xff] }
 0x575   :  { %12154 = vmatmul.mubr.msk.f32.vlgmr.msra.gmra.mrb[60].mxu0 %vm110_vm3, %v3833_v51  ;;  %12059 = vmatmul.mubr.msk.f32.vlgmr.msra.gmra.mrb[58].mxu1 %vm110_vm3, %v16109_v17  ;;  %v5091_v51 = vrot.slane %v15724_v59, 4  ;;  %v17219_v59 = vld [vmem:[#allocation44_spill] sm:$0xff] }
 0x576   :  { %13896 = vmatpush3.bf16.msra.mxu1 %v15448_v37  ;;  %13956 = vmatpush3.bf16.msra.mxu0 %v15182_v5 }
 0x577   :  { %13897 = vmatprep.subr.bf16.mxu1 %v17158_v56  ;;  %13957 = vmatprep.subr.bf16.mxu0 %v17158_v56  ;;  %v16152_v52 = vsel %vm187_vm1, %v5092_v23, %v5091_v51  ;;  %v17237_v51 = vld [vmem:[#allocation37_spill] sm:$0xff]  ;;  %v17238_v23 = vld [vmem:[#allocation38_spill] sm:$0xff] }
 0x578   :  { %12096 = vmatprep.mubr.msk.f32.mxu1 %vm15049_vm0, %v17159_v38  ;;  %12191 = vmatprep.mubr.msk.f32.mxu0 %vm15049_vm0, %v17159_v38 }
 0x57a   :  { %13899 = vmatpush3.bf16.msra.mxu1 %v15458_v25  ;;  %13959 = vmatpush3.bf16.msra.mxu0 %v15187_v12 }
 0x57b   :  { %13900 = vmatprep.subr.bf16.mxu1 %v17158_v56  ;;  %13960 = vmatprep.subr.bf16.mxu0 %v17158_v56 }
 0x57e   :  { %13902 = vmatpush3.bf16.msra.mxu1 %v15469_v4  ;;  %13962 = vmatpush3.bf16.msra.mxu0 %v17167_v18 }
 0x57f   :  { %13903 = vmatprep.subr.bf16.mxu1 %v17158_v56  ;;  %13963 = vmatprep.subr.bf16.mxu0 %v17158_v56 }
 0x582   :  { %13905 = vmatpush3.bf16.msra.mxu1 %v15481_v10  ;;  %13965 = vmatpush3.bf16.msra.mxu0 %v17168_v22 }
 0x583   :  { %13918 = vmatprep.subr.bf16.mxu1 %v17158_v56  ;;  %13984 = vmatprep.subr.bf16.mxu0 %v17158_v56 }
 0x585   :  { %12097 = vmatmul.mubr.msk.f32.vlgmr.msra.gmra.mrb[60].mxu1 %vm110_vm3, %v16109_v17  ;;  %12192 = vmatmul.mubr.msk.f32.vlgmr.msra.gmra.mrb[62].mxu0 %vm110_vm3, %v16109_v17 }
 0x586   :  { %13920 = vmatpush3.bf16.msra.mxu1 %v15489_v28  ;;  %13986 = vmatpush3.bf16.msra.mxu0 %v15252_v47 }
 0x587   :  { %13921 = vmatprep.subr.bf16.mxu1 %v17158_v56  ;;  %13987 = vmatprep.subr.bf16.mxu0 %v17158_v56 }
 0x588   :  { %12232 = vmatprep.mubr.msk.f32.mxu0 %vm15049_vm0, %v17159_v38  ;;  %12134 = vmatprep.mubr.msk.f32.mxu1 %vm15049_vm0, %v17159_v38 }
 0x58a   :  { %13923 = vmatpush3.bf16.msra.mxu1 %v15497_v21  ;;  %13989 = vmatpush3.bf16.msra.mxu0 %v15261_v53 }
 0x58b   :  { %13924 = vmatprep.subr.bf16.mxu1 %v17158_v56  ;;  %13990 = vmatprep.subr.bf16.mxu0 %v17158_v56 }
 0x58d   :  { %12233 = vmatmul.mubr.msk.f32.vlgmr.msra.gmra.mrb[64].mxu0 %vm189_vm2, %v16152_v52 }
 0x58e   :  { %13926 = vmatpush3.bf16.msra.mxu1 %v15507_v16  ;;  %13992 = vmatpush3.bf16.msra.mxu0 %v15230_v34 }
 0x58f   :  { %13927 = vmatprep.subr.bf16.mxu1 %v17158_v56  ;;  %13993 = vmatprep.subr.bf16.mxu0 %v17158_v56 }
 0x590   :  { %12251 = vmatprep.mubr.msk.f32.mxu0 %vm15049_vm0, %v17159_v38 }
 0x592   :  { %13929 = vmatpush3.bf16.msra.mxu1 %v15514_v46  ;;  %13995 = vmatpush3.bf16.msra.mxu0 %v15239_v40 }
 0x593   :  { %13942 = vmatprep.subr.bf16.mxu1 %v17158_v56  ;;  %13996 = vmatprep.subr.bf16.mxu0 %v17158_v56 }
 0x595   :  { %12135 = vmatmul.mubr.msk.f32.vlgmr.msra.gmra.mrb[62].mxu1 %vm110_vm3, %v16109_v17 }
 0x596   :  { %13944 = vmatpush3.bf16.msra.mxu1 %v17169_v1  ;;  %13998 = vmatpush3.bf16.msra.mxu0 %v17190_v3 }
 0x597   :  { %13945 = vmatprep.subr.bf16.mxu1 %v17158_v56  ;;  %13999 = vmatprep.subr.bf16.mxu0 %v17158_v56 }
 0x598   :  { %12172 = vmatprep.mubr.msk.f32.mxu1 %vm15049_vm0, %v17159_v38 }
 0x59a   :  { %13947 = vmatpush3.bf16.msra.mxu1 %v17191_v13  ;;  %14001 = vmatpush3.bf16.msra.mxu0 %v17192_v2 }
 0x59b   :  { %13948 = vmatprep.subr.bf16.mxu1 %v17158_v56  ;;  %14020 = vmatprep.subr.bf16.mxu0 %v17158_v56 }
 0x59d   :  { %12252 = vmatmul.mubr.msk.f32.vlgmr.msra.gmra.mrb[66].mxu0 %vm110_vm3, %v16109_v17 }
 0x59e   :  { %13950 = vmatpush3.bf16.msra.mxu1 %v17193_v32  ;;  %14022 = vmatpush3.bf16.msra.mxu0 %v17194_v7 }
 0x59f   :  { %13951 = vmatprep.subr.bf16.mxu1 %v17158_v56  ;;  %14023 = vmatprep.subr.bf16.mxu0 %v17158_v56 }
 0x5a0   :  { %12292 = vmatprep.mubr.msk.f32.mxu0 %vm15049_vm0, %v17159_v38 }
 0x5a2   :  { %13953 = vmatpush3.bf16.msra.mxu1 %v17219_v59  ;;  %14025 = vmatpush3.bf16.msra.mxu0 %v17220_v55 }
 0x5a3   :  { %13966 = vmatprep.subr.bf16.mxu1 %v17158_v56  ;;  %14026 = vmatprep.subr.bf16.mxu0 %v17158_v56 }
 0x5a5   :  { %12173 = vmatmul.mubr.msk.f32.vlgmr.msra.gmra.mrb[64].mxu1 %vm110_vm3, %v16109_v17  ;;  %12293 = vmatmul.mubr.msk.f32.vlgmr.msra.gmra.mrb[68].mxu0 %vm189_vm2, %v16152_v52 }
 0x5a6   :  { %13968 = vmatpush3.bf16.msra.mxu1 %v17221_v9  ;;  %12202 = vmatprep.mubr.msk.f32.mxu1 %vm15049_vm0, %v17159_v38 }
 0x5a7   :  { %13969 = vmatprep.subr.bf16.mxu1 %v17158_v56  ;;  %14028 = vmatpush3.bf16.msra.mxu0 %v17222_v14 }
 0x5a8   :  { %14029 = vmatprep.subr.bf16.mxu0 %v17158_v56  ;;  %12311 = vmatprep.mubr.msk.f32.mxu0 %vm15049_vm0, %v17159_v38 }
 0x5aa   :  { %13971 = vmatpush3.bf16.msra.mxu1 %v17223_v36 }
 0x5ab   :  { %13972 = vmatprep.subr.bf16.mxu1 %v17158_v56  ;;  %14031 = vmatpush3.bf16.msra.mxu0 %v17224_v26 }
 0x5ac   :  { %14032 = vmatprep.subr.bf16.mxu0 %v17158_v56 }
 0x5ad   :  { %12203 = vmatmul.mubr.msk.f32.vlgmr.msra.gmra.mrb[66].mxu1 %vm189_vm2, %v16152_v52 }
 0x5ae   :  { %13974 = vmatpush3.bf16.msra.mxu1 %v17225_v35  ;;  %12221 = vmatprep.mubr.msk.f32.mxu1 %vm15049_vm0, %v17159_v38 }
 0x5af   :  { %13975 = vmatprep.subr.bf16.mxu1 %v17158_v56  ;;  %14034 = vmatpush3.bf16.msra.mxu0 %v17226_v31 }
 0x5b0   :  { %14035 = vmatprep.subr.bf16.mxu0 %v17158_v56 }
 0x5b2   :  { %13977 = vmatpush3.bf16.msra.mxu1 %v17227_v39 }
 0x5b3   :  { %13978 = vmatprep.subr.bf16.mxu1 %v17158_v56  ;;  %14037 = vmatpush3.bf16.msra.mxu0 %v17228_v45 }
 0x5b4   :  { %14050 = vmatprep.subr.bf16.mxu0 %v17158_v56 }
 0x5b6   :  { %13980 = vmatpush3.bf16.msra.mxu1 %v17229_v0 }
 0x5b7   :  { %13981 = vmatprep.subr.bf16.mxu1 %v17158_v56 }
 0x5ba   :  { %13983 = vmatpush3.bf16.msra.mxu1 %v17230_v60 }
 0x5bb   :  { %14002 = vmatprep.subr.bf16.mxu1 %v17158_v56 }
 0x5bd   :  { %12222 = vmatmul.mubr.msk.f32.vlgmr.msra.gmra.mrb[68].mxu1 %vm110_vm3, %v16109_v17 }
 0x5be   :  { %14004 = vmatpush3.bf16.msra.mxu1 %v17231_v63  ;;  %12262 = vmatprep.mubr.msk.f32.mxu1 %vm15049_vm0, %v17159_v38 }
 0x5bf   :  { %14005 = vmatprep.subr.bf16.mxu1 %v17158_v56 }
 0x5c2   :  { %14007 = vmatpush3.bf16.msra.mxu1 %v17232_v8 }
 0x5c3   :  { %14008 = vmatprep.subr.bf16.mxu1 %v17158_v56 }
 0x5c5   :  { %12263 = vmatmul.mubr.msk.f32.vlgmr.msra.gmra.mrb[70].mxu1 %vm189_vm2, %v16152_v52  ;;  %v17239_v52 = vld [vmem:[#allocation39_spill] sm:$0xff] }
 0x5c6   :  { %14010 = vmatpush3.bf16.msra.mxu1 %v17233_v61  ;;  %12281 = vmatprep.mubr.msk.f32.mxu1 %vm15049_vm0, %v17159_v38 }
 0x5c7   :  { %14011 = vmatprep.subr.bf16.mxu1 %v17158_v56 }
 0x5ca   :  { %14013 = vmatpush3.bf16.msra.mxu1 %v17234_v24 }
 0x5cb   :  { %14014 = vmatprep.subr.bf16.mxu1 %v17158_v56 }
 0x5ce   :  { %14016 = vmatpush3.bf16.msra.mxu1 %v17235_v58 }
 0x5cf   :  { %14017 = vmatprep.subr.bf16.mxu1 %v17158_v56 }
 0x5d2   :  { %14019 = vmatpush3.bf16.msra.mxu1 %v17236_v19  ;;  %v17240_v19 = vld [vmem:[#allocation40_spill] sm:$0xff] }
 0x5d3   :  { %14038 = vmatprep.subr.bf16.mxu1 %v17158_v56 }
 0x5d5   :  { %12282 = vmatmul.mubr.msk.f32.vlgmr.msra.gmra.mrb[72].mxu1 %vm110_vm3, %v16109_v17 }
 0x5d6   :  { %14040 = vmatpush3.bf16.msra.mxu1 %v17237_v51  ;;  %12330 = vmatprep.mubr.msk.f32.mxu1 %vm15049_vm0, %v17159_v38 }
 0x5d7   :  { %14041 = vmatprep.subr.bf16.mxu1 %v17158_v56 }
 0x5da   :  { %14043 = vmatpush3.bf16.msra.mxu1 %v17238_v23 }
 0x5db   :  { %14044 = vmatprep.subr.bf16.mxu1 %v17158_v56 }
 0x5de   :  { %14046 = vmatpush3.bf16.msra.mxu1 %v17239_v52  ;;  %v16259_v52 = vld [vmem:[%s17047_s6] ss:$0 sm:$0xff] }
 0x5df   :  { %14047 = vmatprep.subr.bf16.mxu1 %v17158_v56  ;;  %17241 = vst [vmem:[#allocation17_spill] sm:$0xff] %v16259_v52 }
 0x5e2   :  { %14049 = vmatpush3.bf16.msra.mxu1 %v17240_v19 }
 0x5e3   :  { %14062 = vmatprep.subr.bf16.mxu1 %v17158_v56 }
 0x618   :  { %v4496_v17 = vpop.f32.mrb[54].mxu0 }
 0x619   :  { %v12041_v58 = vpop.f32.mrb[55].mxu0 }
 0x628   :  { %v4646_v51 = vpop.f32.mrb[56].mxu0 }
 0x629   :  { %v12079_v24 = vpop.f32.mrb[57].mxu0 }
 0x638   :  { %v4793_v61 = vpop.f32.mrb[58].mxu0 }
 0x639   :  { %v12117_v8 = vpop.f32.mrb[59].mxu0 }
 0x648   :  { %v4935_v63 = vpop.f32.mrb[60].mxu0  ;;  %v4569_v60 = vpop.f32.mrb[58].mxu1 }
 0x649   :  { %v4570_v0 = vadd.f32 %v4569_v60, %v4496_v17  ;;  %v12155_v23 = vpop.f32.mrb[61].mxu0  ;;  %v12060_v45 = vpop.f32.mrb[59].mxu1  ;;  %v16265_v60 = vld [vmem:[%s17047_s6 + $0x1] ss:$0 sm:$0xff] }
 0x64a   :  { %17242 = vst [vmem:[#allocation19_spill] sm:$0xff] %v16265_v60 }
 0x64b   :  { %v4573_v19 = vadd.f32 %v16259_v52, %v4570_v0 }
 0x64d   :  { %v9955_v39 = vmul.f32 -1.442695, %v4573_v19 }
 0x64f   :  { %14760 = vpow2.f32 %v9955_v39  ;;  %v16271_v39 = vld [vmem:[%s17047_s6 + $0x2] ss:$0 sm:$0xff] }
 0x650   :  { %17243 = vst [vmem:[#allocation41_spill] sm:$0xff] %v16271_v39 }
 0x658   :  { %v4716_v31 = vpop.f32.mrb[60].mxu1  ;;  %v5087_v35 = vpop.f32.mrb[62].mxu0 }
 0x659   :  { %v4717_v58 = vadd.f32 %v4716_v31, %v4646_v51  ;;  %v12098_v26 = vpop.f32.mrb[61].mxu1  ;;  %v12193_v24 = vpop.f32.mrb[63].mxu0 }
 0x65a   :  { %v14761_v36 = vpop.eup %14760 }
 0x65b   :  { %v4720_v45 = vadd.f32 %v16265_v60, %v4717_v58  ;;  %v4577_v0 = vadd.f32 1.0, %v14761_v36 }
 0x65d   :  { %v9958_v8 = vmul.f32 -1.442695, %v4720_v45 }
 0x65f   :  { %14762 = vpow2.f32 %v9958_v8 }
 0x660   :  { %v5309_v23 = vpop.f32.mrb[64].mxu0  ;;  %14764 = vrcp.f32 %v4577_v0 }
 0x661   :  { %v12234_v17 = vpop.f32.mrb[65].mxu0 }
 0x668   :  { %v4863_v19 = vpop.f32.mrb[62].mxu1 }
 0x669   :  { %v14763_v52 = vpop.eup %14762  ;;  %v4864_v14 = vadd.f32 %v4863_v19, %v4793_v61  ;;  %v12136_v31 = vpop.f32.mrb[63].mxu1 }
 0x66a   :  { %v4724_v26 = vadd.f32 1.0, %v14763_v52  ;;  %v14765_v45 = vpop.eup %14764 }
 0x66b   :  { %v4867_v51 = vadd.f32 %v16271_v39, %v4864_v14  ;;  %v16280_v14 = vld [vmem:[%s17047_s6 + $0x3] ss:$0 sm:$0xff] }
 0x66c   :  { %14766 = vrcp.f32 %v4724_v26 }
 0x66d   :  { %14768 = vtanh.f32 %v4867_v51 }
 0x670   :  { %v5386_v58 = vpop.f32.mrb[66].mxu0 }
 0x671   :  { %v12253_v24 = vpop.f32.mrb[67].mxu0 }
 0x676   :  { %v14767_v8 = vpop.eup %14766 }
 0x677   :  { %v14769_v36 = vpop.eup %14768  ;;  %v5016_v17 = vmul.f32 %v14767_v8, %v16045_v50 }
 0x678   :  { %v5017_v61 = vmul.f32 %v14769_v36, %v14765_v45  ;;  %v5005_v19 = vpop.f32.mrb[64].mxu1  ;;  %v5598_v52 = vpop.f32.mrb[68].mxu0 }
 0x679   :  { %v5006_v0 = vadd.f32 %v5005_v19, %v4935_v63  ;;  %v12174_v31 = vpop.f32.mrb[65].mxu1  ;;  %v12294_v60 = vpop.f32.mrb[69].mxu0 }
 0x67a   :  { %v16275_v9 = vadd.f32 %v5017_v61, %v5016_v17 }
 0x67b   :  { %v5009_v26 = vadd.f32 %v16280_v14, %v5006_v0 }
 0x67d   :  { %v9963_v51 = vmul.f32 -1.442695, %v5009_v26 }
 0x67f   :  { %14770 = vpow2.f32 %v9963_v51 }
 0x680   :  { %v5162_v24 = vpop.f32.mrb[66].mxu1  ;;  %14772 = vtanh.f32 %v16275_v9 }
 0x681   :  { %v5163_v39 = vadd.f32 %v5162_v24, %v5087_v35  ;;  %v12204_v50 = vpop.f32.mrb[67].mxu1 }
 0x683   :  { %v5166_v45 = vadd.f32 %v16051_v30, %v5163_v39 }
 0x685   :  { %v9966_v8 = vmul.f32 -1.442695, %v5166_v45 }
 0x687   :  { %14774 = vpow2.f32 %v9966_v8 }
 0x689   :  { %v14771_v63 = vpop.eup %14770 }
 0x68a   :  { %v5013_v60 = vadd.f32 1.0, %v14771_v63  ;;  %v14773_v0 = vpop.eup %14772 }
 0x68c   :  { %14776 = vrcp.f32 %v5013_v60 }
 0x690   :  { %v5239_v36 = vpop.f32.mrb[68].mxu1 }
 0x691   :  { %v5310_v17 = vadd.f32 %v5309_v23, %v5239_v36  ;;  %v12223_v61 = vpop.f32.mrb[69].mxu1  ;;  %v14775_v31 = vpop.eup %14774 }
 0x692   :  { %v5170_v24 = vadd.f32 1.0, %v14775_v31 }
 0x693   :  { %v5313_v19 = vadd.f32 %v16058_v43, %v5310_v17 }
 0x695   :  { %v9969_v26 = vmul.f32 -1.442695, %v5313_v19 }
 0x696   :  { %v14777_v51 = vpop.eup %14776 }
 0x697   :  { %14778 = vpow2.f32 %v9969_v26  ;;  %v5020_v35 = vmul.f32 %v14777_v51, %v14773_v0 }
 0x698   :  { %v5456_v39 = vpop.f32.mrb[70].mxu1  ;;  %14780 = vrcp.f32 %v5170_v24 }
 0x699   :  { %v5457_v50 = vadd.f32 %v5456_v39, %v5386_v58  ;;  %v12264_v45 = vpop.f32.mrb[71].mxu1  ;;  %12312 = vmatmul.mubr.msk.f32.vlgmr.msra.gmra.mrb[70].mxu0 %vm110_vm3, %v5020_v35 }
 0x69a   :  { %14052 = vmatpush3.bf16.msra.mxu0 %v15337_v44  ;;  %12349 = vmatprep.mubr.msk.f32.mxu0 %vm15049_vm0, %v17159_v38 }
 0x69b   :  { %v5460_v23 = vadd.f32 %v16068_v41, %v5457_v50  ;;  %14053 = vmatprep.subr.bf16.mxu0 %v17158_v56 }
 0x69d   :  { %14782 = vtanh.f32 %v5460_v23 }
 0x69e   :  { %14055 = vmatpush3.bf16.msra.mxu0 %v15344_v49 }
 0x69f   :  { %14056 = vmatprep.subr.bf16.mxu0 %v17158_v56 }
 0x6a1   :  { %v14779_v8 = vpop.eup %14778 }
 0x6a2   :  { %v5317_v58 = vadd.f32 1.0, %v14779_v8  ;;  %14058 = vmatpush3.bf16.msra.mxu0 %v15348_v54  ;;  %v14781_v63 = vpop.eup %14780  ;;  %v16365_v8 = vld [vmem:[%s17041_s0 + $0x8] sm:$0xff] }
 0x6a3   :  { %14059 = vmatprep.subr.bf16.mxu0 %v17158_v56 }
 0x6a4   :  { %14784 = vrcp.f32 %v5317_v58  ;;  %v6279_v58 = vrot.slane %v16365_v8, 4 }
 0x6a6   :  { %14061 = vmatpush3.bf16.msra.mxu0 %v15352_v57 }
 0x6a7   :  { %v14783_v60 = vpop.eup %14782  ;;  %14074 = vmatprep.subr.bf16.mxu0 %v17158_v56 }
 0x6a8   :  { %v5610_v36 = vmul.f32 %v14783_v60, %v14781_v63  ;;  %v5528_v17 = vpop.f32.mrb[72].mxu1  ;;  %v17244_v60 = vld [vmem:[#allocation15_spill] sm:$0xff] }
 0x6a9   :  { %v5599_v61 = vadd.f32 %v5598_v52, %v5528_v17  ;;  %12350 = vmatmul.mubr.msk.f32.vlgmr.msra.gmra.mrb[72].mxu0 %vm110_vm3, %v5020_v35  ;;  %v12283_v19 = vpop.f32.mrb[73].mxu1  ;;  %v17246_v17 = vld [vmem:[#allocation16_spill] sm:$0xff] }
 0x6aa   :  { %14076 = vmatpush3.bf16.msra.mxu0 %v15356_v62  ;;  %12387 = vmatprep.mubr.msk.f32.mxu0 %vm15049_vm0, %v17159_v38  ;;  %v17248_v19 = vld [vmem:[#allocation18_spill] sm:$0xff] }
 0x6ab   :  { %v5602_v0 = vadd.f32 %v16085_v11, %v5599_v61  ;;  %14077 = vmatprep.subr.bf16.mxu0 %v17158_v56  ;;  %v17247_v61 = vld [vmem:[#allocation34_spill] sm:$0xff] }
 0x6ad   :  { %v9974_v31 = vmul.f32 -1.442695, %v5602_v0  ;;  %v17249_v0 = vld [vmem:[#allocation35_spill] sm:$0xff] }
 0x6ae   :  { %v14785_v26 = vpop.eup %14784  ;;  %14079 = vmatpush3.bf16.msra.mxu0 %v15363_v6 }
 0x6af   :  { %v5609_v51 = vmul.f32 %v14785_v26, %v16092_v29  ;;  %14786 = vpow2.f32 %v9974_v31  ;;  %14080 = vmatprep.subr.bf16.mxu0 %v17158_v56  ;;  %v17250_v31 = vld [vmem:[#allocation20_spill] sm:$0xff] }
 0x6b0   :  { %v17251_v26 = vld [vmem:[#allocation36_spill] sm:$0xff] }
 0x6b1   :  { %v16307_v52 = vadd.f32 %v5610_v36, %v5609_v51  ;;  %v17245_v36 = vld [vmem:[#allocation33_spill] sm:$0xff] }
 0x6b2   :  { %14082 = vmatpush3.bf16.msra.mxu0 %v15367_v15  ;;  %v17252_v51 = vld [vmem:[#allocation21_spill] sm:$0xff] }
 0x6b3   :  { %14083 = vmatprep.subr.bf16.mxu0 %v17158_v56  ;;  %14788 = vtanh.f32 %v16307_v52 }
 0x6b6   :  { %14085 = vmatpush3.bf16.msra.mxu0 %v15371_v20 }
 0x6b7   :  { %14098 = vmatprep.subr.bf16.mxu0 %v17158_v56 }
 0x6b9   :  { %v14787_v24 = vpop.eup %14786  ;;  %12388 = vmatmul.mubr.msk.f32.vlgmr.msra.gmra.mrb[74].mxu0 %vm110_vm3, %v5020_v35 }
 0x6ba   :  { %v5606_v39 = vadd.f32 1.0, %v14787_v24  ;;  %14100 = vmatpush3.bf16.msra.mxu0 %v15375_v27  ;;  %12425 = vmatprep.mubr.msk.f32.mxu0 %vm15049_vm0, %v17159_v38  ;;  %v17253_v24 = vld [vmem:[#allocation22_spill] sm:$0xff] }
 0x6bb   :  { %14101 = vmatprep.subr.bf16.mxu0 %v17158_v56 }
 0x6bc   :  { %14790 = vrcp.f32 %v5606_v39  ;;  %v17254_v39 = vld [vmem:[#allocation26_spill] sm:$0xff] }
 0x6bd   :  { %v14789_v29 = vpop.eup %14788 }
 0x6be   :  { %14103 = vmatpush3.bf16.msra.mxu0 %v15382_v33 }
 0x6bf   :  { %14104 = vmatprep.subr.bf16.mxu0 %v17158_v56 }
 0x6c2   :  { %14106 = vmatpush3.bf16.msra.mxu0 %v15386_v42 }
 0x6c3   :  { %14107 = vmatprep.subr.bf16.mxu0 %v17158_v56 }
 0x6c6   :  { %v14791_v50 = vpop.eup %14790  ;;  %14109 = vmatpush3.bf16.msra.mxu0 %v15390_v48 }
 0x6c7   :  { %v16324_v45 = vmul.f32 %v14791_v50, %v14789_v29  ;;  %14122 = vmatprep.subr.bf16.mxu0 %v17158_v56  ;;  %v17255_v29 = vld [vmem:[#allocation28_spill] sm:$0xff]  ;;  %v17256_v50 = vld [vmem:[#allocation29_spill] sm:$0xff] }
 0x6c9   :  { %12426 = vmatmul.mubr.msk.f32.vlgmr.msra.gmra.mrb[76].mxu0 %vm110_vm3, %v5020_v35  ;;  %12331 = vmatmul.mubr.msk.f32.vlgmr.msra.gmra.mrb[74].mxu1 %vm110_vm3, %v16324_v45  ;;  %v16359_v35 = vld [vmem:[%s17041_s0] sm:$0xff] }
 0x6ca   :  { %14064 = vmatpush3.bf16.msra.mxu1 %v15448_v37  ;;  %14124 = vmatpush3.bf16.msra.mxu0 %v15182_v5  ;;  %v6278_v23 = vrot.slane %v16359_v35, 5 }
 0x6cb   :  { %14065 = vmatprep.subr.bf16.mxu1 %v17158_v56  ;;  %14125 = vmatprep.subr.bf16.mxu0 %v17158_v56 }
 0x6cc   :  { %12368 = vmatprep.mubr.msk.f32.mxu1 %vm15049_vm0, %v17159_v38  ;;  %12463 = vmatprep.mubr.msk.f32.mxu0 %vm15049_vm0, %v17159_v38  ;;  %v16377_v63 = vsel %vm187_vm1, %v6279_v58, %v6278_v23  ;;  %v17257_v23 = vld [vmem:[#allocation30_spill] sm:$0xff]  ;;  %v17258_v58 = vld [vmem:[#allocation31_spill] sm:$0xff] }
 0x6ce   :  { %14067 = vmatpush3.bf16.msra.mxu1 %v15458_v25  ;;  %14127 = vmatpush3.bf16.msra.mxu0 %v15187_v12 }
 0x6cf   :  { %14068 = vmatprep.subr.bf16.mxu1 %v17158_v56  ;;  %14128 = vmatprep.subr.bf16.mxu0 %v17158_v56 }
 0x6d2   :  { %14070 = vmatpush3.bf16.msra.mxu1 %v15469_v4  ;;  %14130 = vmatpush3.bf16.msra.mxu0 %v17167_v18 }
 0x6d3   :  { %14071 = vmatprep.subr.bf16.mxu1 %v17158_v56  ;;  %14131 = vmatprep.subr.bf16.mxu0 %v17158_v56 }
 0x6d6   :  { %14073 = vmatpush3.bf16.msra.mxu1 %v15481_v10  ;;  %14133 = vmatpush3.bf16.msra.mxu0 %v17168_v22 }
 0x6d7   :  { %14086 = vmatprep.subr.bf16.mxu1 %v17158_v56  ;;  %14152 = vmatprep.subr.bf16.mxu0 %v17158_v56 }
 0x6d9   :  { %12369 = vmatmul.mubr.msk.f32.vlgmr.msra.gmra.mrb[76].mxu1 %vm110_vm3, %v16324_v45  ;;  %12464 = vmatmul.mubr.msk.f32.vlgmr.msra.gmra.mrb[78].mxu0 %vm110_vm3, %v16324_v45 }
 0x6da   :  { %14088 = vmatpush3.bf16.msra.mxu1 %v15489_v28  ;;  %14154 = vmatpush3.bf16.msra.mxu0 %v15252_v47 }
 0x6db   :  { %14089 = vmatprep.subr.bf16.mxu1 %v17158_v56  ;;  %14155 = vmatprep.subr.bf16.mxu0 %v17158_v56 }
 0x6dc   :  { %12504 = vmatprep.mubr.msk.f32.mxu0 %vm15049_vm0, %v17159_v38  ;;  %12406 = vmatprep.mubr.msk.f32.mxu1 %vm15049_vm0, %v17159_v38 }
 0x6de   :  { %14091 = vmatpush3.bf16.msra.mxu1 %v15497_v21  ;;  %14157 = vmatpush3.bf16.msra.mxu0 %v15261_v53 }
 0x6df   :  { %14092 = vmatprep.subr.bf16.mxu1 %v17158_v56  ;;  %14158 = vmatprep.subr.bf16.mxu0 %v17158_v56 }
 0x6e1   :  { %12505 = vmatmul.mubr.msk.f32.vlgmr.msra.gmra.mrb[80].mxu0 %vm189_vm2, %v16377_v63 }
 0x6e2   :  { %14094 = vmatpush3.bf16.msra.mxu1 %v15507_v16  ;;  %14160 = vmatpush3.bf16.msra.mxu0 %v15230_v34 }
 0x6e3   :  { %14095 = vmatprep.subr.bf16.mxu1 %v17158_v56  ;;  %14161 = vmatprep.subr.bf16.mxu0 %v17158_v56 }
 0x6e4   :  { %12523 = vmatprep.mubr.msk.f32.mxu0 %vm15049_vm0, %v17159_v38 }
 0x6e6   :  { %14097 = vmatpush3.bf16.msra.mxu1 %v15514_v46  ;;  %14163 = vmatpush3.bf16.msra.mxu0 %v15239_v40 }
 0x6e7   :  { %14110 = vmatprep.subr.bf16.mxu1 %v17158_v56  ;;  %14164 = vmatprep.subr.bf16.mxu0 %v17158_v56 }
 0x6e9   :  { %12407 = vmatmul.mubr.msk.f32.vlgmr.msra.gmra.mrb[78].mxu1 %vm110_vm3, %v16324_v45 }
 0x6ea   :  { %14112 = vmatpush3.bf16.msra.mxu1 %v17169_v1  ;;  %14166 = vmatpush3.bf16.msra.mxu0 %v17190_v3 }
 0x6eb   :  { %14113 = vmatprep.subr.bf16.mxu1 %v17158_v56  ;;  %14167 = vmatprep.subr.bf16.mxu0 %v17158_v56 }
 0x6ec   :  { %12444 = vmatprep.mubr.msk.f32.mxu1 %vm15049_vm0, %v17159_v38 }
 0x6ee   :  { %14115 = vmatpush3.bf16.msra.mxu1 %v17191_v13  ;;  %14169 = vmatpush3.bf16.msra.mxu0 %v17192_v2 }
 0x6ef   :  { %14116 = vmatprep.subr.bf16.mxu1 %v17158_v56  ;;  %14188 = vmatprep.subr.bf16.mxu0 %v17158_v56 }
 0x6f1   :  { %12524 = vmatmul.mubr.msk.f32.vlgmr.msra.gmra.mrb[82].mxu0 %vm110_vm3, %v16324_v45 }
 0x6f2   :  { %14118 = vmatpush3.bf16.msra.mxu1 %v17193_v32  ;;  %14190 = vmatpush3.bf16.msra.mxu0 %v17194_v7  ;;  %v17265_v7 = vld [vmem:[#allocation19_spill] sm:$0xff] }
 0x6f3   :  { %14119 = vmatprep.subr.bf16.mxu1 %v17158_v56  ;;  %14191 = vmatprep.subr.bf16.mxu0 %v17158_v56 }
 0x6f4   :  { %12564 = vmatprep.mubr.msk.f32.mxu0 %vm15049_vm0, %v17159_v38 }
 0x6f6   :  { %14121 = vmatpush3.bf16.msra.mxu1 %v17219_v59  ;;  %14193 = vmatpush3.bf16.msra.mxu0 %v17220_v55 }
 0x6f7   :  { %14134 = vmatprep.subr.bf16.mxu1 %v17158_v56  ;;  %14194 = vmatprep.subr.bf16.mxu0 %v17158_v56 }
 0x6f9   :  { %12445 = vmatmul.mubr.msk.f32.vlgmr.msra.gmra.mrb[80].mxu1 %vm110_vm3, %v16324_v45  ;;  %12565 = vmatmul.mubr.msk.f32.vlgmr.msra.gmra.mrb[84].mxu0 %vm189_vm2, %v16377_v63 }
 0x6fa   :  { %14136 = vmatpush3.bf16.msra.mxu1 %v17244_v60  ;;  %12474 = vmatprep.mubr.msk.f32.mxu1 %vm15049_vm0, %v17159_v38 }
 0x6fb   :  { %14137 = vmatprep.subr.bf16.mxu1 %v17158_v56  ;;  %14196 = vmatpush3.bf16.msra.mxu0 %v17245_v36 }
 0x6fc   :  { %14197 = vmatprep.subr.bf16.mxu0 %v17158_v56  ;;  %12583 = vmatprep.mubr.msk.f32.mxu0 %vm15049_vm0, %v17159_v38 }
 0x6fe   :  { %14139 = vmatpush3.bf16.msra.mxu1 %v17246_v17 }
 0x6ff   :  { %14140 = vmatprep.subr.bf16.mxu1 %v17158_v56  ;;  %14199 = vmatpush3.bf16.msra.mxu0 %v17247_v61  ;;  %v17264_v61 = vld [vmem:[#allocation17_spill] sm:$0xff] }
 0x700   :  { %14200 = vmatprep.subr.bf16.mxu0 %v17158_v56 }
 0x701   :  { %12475 = vmatmul.mubr.msk.f32.vlgmr.msra.gmra.mrb[82].mxu1 %vm189_vm2, %v16377_v63 }
 0x702   :  { %14142 = vmatpush3.bf16.msra.mxu1 %v17248_v19  ;;  %12493 = vmatprep.mubr.msk.f32.mxu1 %vm15049_vm0, %v17159_v38 }
 0x703   :  { %14143 = vmatprep.subr.bf16.mxu1 %v17158_v56  ;;  %14202 = vmatpush3.bf16.msra.mxu0 %v17249_v0 }
 0x704   :  { %14203 = vmatprep.subr.bf16.mxu0 %v17158_v56 }
 0x706   :  { %14145 = vmatpush3.bf16.msra.mxu1 %v17250_v31 }
 0x707   :  { %14146 = vmatprep.subr.bf16.mxu1 %v17158_v56  ;;  %14205 = vmatpush3.bf16.msra.mxu0 %v17251_v26 }
 0x708   :  { %14218 = vmatprep.subr.bf16.mxu0 %v17158_v56 }
 0x70a   :  { %14148 = vmatpush3.bf16.msra.mxu1 %v17252_v51 }
 0x70b   :  { %14149 = vmatprep.subr.bf16.mxu1 %v17158_v56 }
 0x70e   :  { %14151 = vmatpush3.bf16.msra.mxu1 %v17253_v24 }
 0x70f   :  { %14170 = vmatprep.subr.bf16.mxu1 %v17158_v56 }
 0x711   :  { %12494 = vmatmul.mubr.msk.f32.vlgmr.msra.gmra.mrb[84].mxu1 %vm110_vm3, %v16324_v45 }
 0x712   :  { %14172 = vmatpush3.bf16.msra.mxu1 %v17254_v39  ;;  %12534 = vmatprep.mubr.msk.f32.mxu1 %vm15049_vm0, %v17159_v38 }
 0x713   :  { %14173 = vmatprep.subr.bf16.mxu1 %v17158_v56 }
 0x716   :  { %14175 = vmatpush3.bf16.msra.mxu1 %v17255_v29  ;;  %v17259_v29 = vld [vmem:[#allocation32_spill] sm:$0xff] }
 0x717   :  { %14176 = vmatprep.subr.bf16.mxu1 %v17158_v56 }
 0x719   :  { %12535 = vmatmul.mubr.msk.f32.vlgmr.msra.gmra.mrb[86].mxu1 %vm189_vm2, %v16377_v63  ;;  %v17260_v63 = vld [vmem:[#allocation37_spill] sm:$0xff] }
 0x71a   :  { %14178 = vmatpush3.bf16.msra.mxu1 %v17256_v50  ;;  %12553 = vmatprep.mubr.msk.f32.mxu1 %vm15049_vm0, %v17159_v38 }
 0x71b   :  { %14179 = vmatprep.subr.bf16.mxu1 %v17158_v56 }
 0x71e   :  { %14181 = vmatpush3.bf16.msra.mxu1 %v17257_v23  ;;  %v17261_v23 = vld [vmem:[#allocation38_spill] sm:$0xff] }
 0x71f   :  { %14182 = vmatprep.subr.bf16.mxu1 %v17158_v56 }
 0x722   :  { %14184 = vmatpush3.bf16.msra.mxu1 %v17258_v58  ;;  %v17262_v58 = vld [vmem:[#allocation39_spill] sm:$0xff] }
 0x723   :  { %14185 = vmatprep.subr.bf16.mxu1 %v17158_v56 }
 0x726   :  { %14187 = vmatpush3.bf16.msra.mxu1 %v17259_v29  ;;  %v17263_v29 = vld [vmem:[#allocation40_spill] sm:$0xff] }
 0x727   :  { %14206 = vmatprep.subr.bf16.mxu1 %v17158_v56 }
 0x729   :  { %12554 = vmatmul.mubr.msk.f32.vlgmr.msra.gmra.mrb[88].mxu1 %vm110_vm3, %v16324_v45 }
 0x72a   :  { %14208 = vmatpush3.bf16.msra.mxu1 %v17260_v63  ;;  %12602 = vmatprep.mubr.msk.f32.mxu1 %vm15049_vm0, %v17159_v38 }
 0x72b   :  { %14209 = vmatprep.subr.bf16.mxu1 %v17158_v56 }
 0x72e   :  { %14211 = vmatpush3.bf16.msra.mxu1 %v17261_v23 }
 0x72f   :  { %14212 = vmatprep.subr.bf16.mxu1 %v17158_v56 }
 0x732   :  { %14214 = vmatpush3.bf16.msra.mxu1 %v17262_v58 }
 0x733   :  { %14215 = vmatprep.subr.bf16.mxu1 %v17158_v56 }
 0x736   :  { %14217 = vmatpush3.bf16.msra.mxu1 %v17263_v29 }
 0x737   :  { %14230 = vmatprep.subr.bf16.mxu1 %v17158_v56 }
 0x76c   :  { %v5683_v45 = vpop.f32.mrb[70].mxu0 }
 0x76d   :  { %v12313_v50 = vpop.f32.mrb[71].mxu0 }
 0x77c   :  { %v5833_v63 = vpop.f32.mrb[72].mxu0 }
 0x77d   :  { %v12351_v39 = vpop.f32.mrb[73].mxu0 }
 0x78c   :  { %v5980_v24 = vpop.f32.mrb[74].mxu0 }
 0x78d   :  { %v12389_v51 = vpop.f32.mrb[75].mxu0 }
 0x79c   :  { %v6122_v26 = vpop.f32.mrb[76].mxu0  ;;  %v5756_v31 = vpop.f32.mrb[74].mxu1 }
 0x79d   :  { %v5757_v0 = vadd.f32 %v5756_v31, %v5683_v45  ;;  %v12427_v23 = vpop.f32.mrb[77].mxu0  ;;  %v12332_v19 = vpop.f32.mrb[75].mxu1 }
 0x79f   :  { %v5760_v17 = vadd.f32 %v17264_v61, %v5757_v0 }
 0x7a1   :  { %v9977_v58 = vmul.f32 -1.442695, %v5760_v17  ;;  %v17266_v17 = vld [vmem:[#allocation41_spill] sm:$0xff] }
 0x7a3   :  { %14792 = vpow2.f32 %v9977_v58 }
 0x7ac   :  { %v5903_v36 = vpop.f32.mrb[76].mxu1  ;;  %v6274_v60 = vpop.f32.mrb[78].mxu0 }
 0x7ad   :  { %v5904_v55 = vadd.f32 %v5903_v36, %v5833_v63  ;;  %v12370_v29 = vpop.f32.mrb[77].mxu1  ;;  %v12465_v59 = vpop.f32.mrb[79].mxu0 }
 0x7ae   :  { %v14793_v2 = vpop.eup %14792 }
 0x7af   :  { %v5907_v50 = vadd.f32 %v17265_v7, %v5904_v55  ;;  %v5764_v13 = vadd.f32 1.0, %v14793_v2 }
 0x7b1   :  { %v9980_v32 = vmul.f32 -1.442695, %v5907_v50 }
 0x7b3   :  { %14794 = vpow2.f32 %v9980_v32 }
 0x7b4   :  { %v6496_v39 = vpop.f32.mrb[80].mxu0  ;;  %14796 = vrcp.f32 %v5764_v13 }
 0x7b5   :  { %v12506_v51 = vpop.f32.mrb[81].mxu0 }
 0x7bc   :  { %v6050_v31 = vpop.f32.mrb[78].mxu1 }
 0x7bd   :  { %v14795_v23 = vpop.eup %14794  ;;  %v6051_v19 = vadd.f32 %v6050_v31, %v5980_v24  ;;  %v12408_v45 = vpop.f32.mrb[79].mxu1 }
 0x7be   :  { %v5911_v0 = vadd.f32 1.0, %v14795_v23  ;;  %v14797_v29 = vpop.eup %14796 }
 0x7bf   :  { %v6054_v61 = vadd.f32 %v17266_v17, %v6051_v19 }
 0x7c0   :  { %14798 = vrcp.f32 %v5911_v0 }
 0x7c1   :  { %14800 = vtanh.f32 %v6054_v61 }
 0x7c4   :  { %v6573_v59 = vpop.f32.mrb[82].mxu0 }
 0x7c5   :  { %v12525_v36 = vpop.f32.mrb[83].mxu0 }
 0x7ca   :  { %v14799_v55 = vpop.eup %14798 }
 0x7cb   :  { %v14801_v58 = vpop.eup %14800  ;;  %v6203_v32 = vmul.f32 %v14799_v55, %v16275_v9 }
 0x7cc   :  { %v6204_v63 = vmul.f32 %v14801_v58, %v14797_v29  ;;  %v6192_v50 = vpop.f32.mrb[80].mxu1  ;;  %v6785_v2 = vpop.f32.mrb[84].mxu0 }
 0x7cd   :  { %v6193_v51 = vadd.f32 %v6192_v50, %v6122_v26  ;;  %v12446_v7 = vpop.f32.mrb[81].mxu1  ;;  %v12566_v24 = vpop.f32.mrb[85].mxu0 }
 0x7ce   :  { %v16485_v31 = vadd.f32 %v6204_v63, %v6203_v32 }
 0x7cf   :  { %v6196_v13 = vadd.f32 %v16280_v14, %v6193_v51 }
 0x7d1   :  { %v9985_v23 = vmul.f32 -1.442695, %v6196_v13 }
 0x7d3   :  { %14802 = vpow2.f32 %v9985_v23 }
 0x7d4   :  { %v6349_v61 = vpop.f32.mrb[82].mxu1  ;;  %14804 = vtanh.f32 %v16485_v31 }
 0x7d5   :  { %v6350_v19 = vadd.f32 %v6349_v61, %v6274_v60  ;;  %v12476_v45 = vpop.f32.mrb[83].mxu1 }
 0x7d7   :  { %v6353_v0 = vadd.f32 %v16051_v30, %v6350_v19 }
 0x7d9   :  { %v9988_v36 = vmul.f32 -1.442695, %v6353_v0 }
 0x7db   :  { %14806 = vpow2.f32 %v9988_v36 }
 0x7dd   :  { %v14803_v17 = vpop.eup %14802 }
 0x7de   :  { %v6200_v9 = vadd.f32 1.0, %v14803_v17  ;;  %v14805_v58 = vpop.eup %14804 }
 0x7e0   :  { %14808 = vrcp.f32 %v6200_v9 }
 0x7e4   :  { %v6426_v7 = vpop.f32.mrb[84].mxu1 }
 0x7e5   :  { %v6497_v26 = vadd.f32 %v6496_v39, %v6426_v7  ;;  %v12495_v29 = vpop.f32.mrb[85].mxu1  ;;  %v14807_v32 = vpop.eup %14806 }
 0x7e6   :  { %v6357_v51 = vadd.f32 1.0, %v14807_v32  ;;  %v7466_v32 = vrot.slane %v16365_v8, 5 }
 0x7e7   :  { %v6500_v55 = vadd.f32 %v16058_v43, %v6497_v26 }
 0x7e9   :  { %v9991_v63 = vmul.f32 -1.442695, %v6500_v55 }
 0x7ea   :  { %v14809_v50 = vpop.eup %14808 }
 0x7eb   :  { %14810 = vpow2.f32 %v9991_v63  ;;  %v6207_v60 = vmul.f32 %v14809_v50, %v14805_v58  ;;  %v7465_v58 = vrot.slane %v16359_v35, 6  ;;  %v17267_v50 = vld [vmem:[#allocation42_spill] sm:$0xff] }
 0x7ec   :  { %v6643_v30 = vpop.f32.mrb[86].mxu1  ;;  %14812 = vrcp.f32 %v6357_v51  ;;  %v17269_v51 = vld [vmem:[#allocation43_spill] sm:$0xff] }
 0x7ed   :  { %v6644_v24 = vadd.f32 %v6643_v30, %v6573_v59  ;;  %v12536_v13 = vpop.f32.mrb[87].mxu1  ;;  %12584 = vmatmul.mubr.msk.f32.vlgmr.msra.gmra.mrb[86].mxu0 %vm110_vm3, %v6207_v60  ;;  %v16572_v63 = vsel %vm187_vm1, %v7466_v32, %v7465_v58  ;;  %v17270_v30 = vld [vmem:[#allocation25_spill] sm:$0xff]  ;;  %v17290_v58 = vld [vmem:[#allocation38_spill] sm:$0xff]  ;;  %v17291_v32 = vld [vmem:[#allocation39_spill] sm:$0xff] }
 0x7ee   :  { %14220 = vmatpush3.bf16.msra.mxu0 %v15337_v44  ;;  %12621 = vmatprep.mubr.msk.f32.mxu0 %vm15049_vm0, %v17159_v38  ;;  %v17272_v13 = vld [vmem:[#allocation27_spill] sm:$0xff] }
 0x7ef   :  { %v6647_v39 = vadd.f32 %v16068_v41, %v6644_v24  ;;  %14221 = vmatprep.subr.bf16.mxu0 %v17158_v56  ;;  %v17271_v24 = vld [vmem:[#allocation44_spill] sm:$0xff] }
 0x7f1   :  { %14814 = vtanh.f32 %v6647_v39  ;;  %v17273_v39 = vld [vmem:[#allocation15_spill] sm:$0xff] }
 0x7f2   :  { %14223 = vmatpush3.bf16.msra.mxu0 %v15344_v49 }
 0x7f3   :  { %14224 = vmatprep.subr.bf16.mxu0 %v17158_v56 }
 0x7f5   :  { %v14811_v43 = vpop.eup %14810 }
 0x7f6   :  { %v6504_v17 = vadd.f32 1.0, %v14811_v43  ;;  %14226 = vmatpush3.bf16.msra.mxu0 %v15348_v54  ;;  %v14813_v59 = vpop.eup %14812  ;;  %v17274_v43 = vld [vmem:[#allocation33_spill] sm:$0xff] }
 0x7f7   :  { %14227 = vmatprep.subr.bf16.mxu0 %v17158_v56 }
 0x7f8   :  { %14816 = vrcp.f32 %v6504_v17  ;;  %v17275_v17 = vld [vmem:[#allocation16_spill] sm:$0xff] }
 0x7fa   :  { %14229 = vmatpush3.bf16.msra.mxu0 %v15352_v57 }
 0x7fb   :  { %v14815_v23 = vpop.eup %14814  ;;  %14242 = vmatprep.subr.bf16.mxu0 %v17158_v56 }
 0x7fc   :  { %v6797_v41 = vmul.f32 %v14815_v23, %v14813_v59  ;;  %v6715_v61 = vpop.f32.mrb[88].mxu1  ;;  %v17276_v59 = vld [vmem:[#allocation34_spill] sm:$0xff] }
 0x7fd   :  { %v6786_v19 = vadd.f32 %v6785_v2, %v6715_v61  ;;  %12622 = vmatmul.mubr.msk.f32.vlgmr.msra.gmra.mrb[88].mxu0 %vm110_vm3, %v6207_v60  ;;  %v12555_v45 = vpop.f32.mrb[89].mxu1  ;;  %v17277_v23 = vld [vmem:[#allocation18_spill] sm:$0xff]  ;;  %v17279_v61 = vld [vmem:[#allocation20_spill] sm:$0xff] }
 0x7fe   :  { %14244 = vmatpush3.bf16.msra.mxu0 %v15356_v62  ;;  %12659 = vmatprep.mubr.msk.f32.mxu0 %vm15049_vm0, %v17159_v38  ;;  %v17281_v45 = vld [vmem:[#allocation21_spill] sm:$0xff] }
 0x7ff   :  { %v6789_v0 = vadd.f32 %v16085_v11, %v6786_v19  ;;  %14245 = vmatprep.subr.bf16.mxu0 %v17158_v56  ;;  %v17280_v19 = vld [vmem:[#allocation36_spill] sm:$0xff] }
 0x801   :  { %v9996_v36 = vmul.f32 -1.442695, %v6789_v0  ;;  %v17282_v0 = vld [vmem:[#allocation22_spill] sm:$0xff] }
 0x802   :  { %v14817_v9 = vpop.eup %14816  ;;  %14247 = vmatpush3.bf16.msra.mxu0 %v15363_v6 }
 0x803   :  { %v6796_v7 = vmul.f32 %v14817_v9, %v16307_v52  ;;  %14818 = vpow2.f32 %v9996_v36  ;;  %14248 = vmatprep.subr.bf16.mxu0 %v17158_v56  ;;  %v17283_v36 = vld [vmem:[#allocation26_spill] sm:$0xff]  ;;  %v17284_v9 = vld [vmem:[#allocation28_spill] sm:$0xff] }
 0x805   :  { %v16512_v2 = vadd.f32 %v6797_v41, %v6796_v7  ;;  %v17278_v41 = vld [vmem:[#allocation35_spill] sm:$0xff]  ;;  %v17285_v7 = vld [vmem:[#allocation29_spill] sm:$0xff] }
 0x806   :  { %14250 = vmatpush3.bf16.msra.mxu0 %v15367_v15 }
 0x807   :  { %14251 = vmatprep.subr.bf16.mxu0 %v17158_v56  ;;  %14820 = vtanh.f32 %v16512_v2 }
 0x80a   :  { %14253 = vmatpush3.bf16.msra.mxu0 %v15371_v20 }
 0x80b   :  { %14266 = vmatprep.subr.bf16.mxu0 %v17158_v56 }
 0x80d   :  { %v14819_v11 = vpop.eup %14818  ;;  %12660 = vmatmul.mubr.msk.f32.vlgmr.msra.gmra.mrb[90].mxu0 %vm110_vm3, %v6207_v60 }
 0x80e   :  { %v6793_v26 = vadd.f32 1.0, %v14819_v11  ;;  %14268 = vmatpush3.bf16.msra.mxu0 %v15375_v27  ;;  %12697 = vmatprep.mubr.msk.f32.mxu0 %vm15049_vm0, %v17159_v38  ;;  %v17286_v11 = vld [vmem:[#allocation30_spill] sm:$0xff] }
 0x80f   :  { %14269 = vmatprep.subr.bf16.mxu0 %v17158_v56 }
 0x810   :  { %14822 = vrcp.f32 %v6793_v26  ;;  %v17287_v26 = vld [vmem:[#allocation31_spill] sm:$0xff] }
 0x811   :  { %v14821_v52 = vpop.eup %14820 }
 0x812   :  { %14271 = vmatpush3.bf16.msra.mxu0 %v15382_v33 }
 0x813   :  { %14272 = vmatprep.subr.bf16.mxu0 %v17158_v56 }
 0x816   :  { %14274 = vmatpush3.bf16.msra.mxu0 %v15386_v42 }
 0x817   :  { %14275 = vmatprep.subr.bf16.mxu0 %v17158_v56 }
 0x81a   :  { %v14823_v29 = vpop.eup %14822  ;;  %14277 = vmatpush3.bf16.msra.mxu0 %v15390_v48 }
 0x81b   :  { %v16529_v55 = vmul.f32 %v14823_v29, %v14821_v52  ;;  %14290 = vmatprep.subr.bf16.mxu0 %v17158_v56  ;;  %v17288_v52 = vld [vmem:[#allocation32_spill] sm:$0xff]  ;;  %v17289_v29 = vld [vmem:[#allocation37_spill] sm:$0xff] }
 0x81d   :  { %12698 = vmatmul.mubr.msk.f32.vlgmr.msra.gmra.mrb[92].mxu0 %vm110_vm3, %v6207_v60  ;;  %12603 = vmatmul.mubr.msk.f32.vlgmr.msra.gmra.mrb[90].mxu1 %vm110_vm3, %v16529_v55  ;;  %v17268_v60 = vld [vmem:[#allocation24_spill] sm:$0xff] }
 0x81e   :  { %14232 = vmatpush3.bf16.msra.mxu1 %v15448_v37  ;;  %14292 = vmatpush3.bf16.msra.mxu0 %v15182_v5 }
 0x81f   :  { %14233 = vmatprep.subr.bf16.mxu1 %v17158_v56  ;;  %14293 = vmatprep.subr.bf16.mxu0 %v17158_v56 }
 0x820   :  { %12640 = vmatprep.mubr.msk.f32.mxu1 %vm15049_vm0, %v17159_v38  ;;  %12735 = vmatprep.mubr.msk.f32.mxu0 %vm15049_vm0, %v17159_v38 }
 0x822   :  { %14235 = vmatpush3.bf16.msra.mxu1 %v15458_v25  ;;  %14295 = vmatpush3.bf16.msra.mxu0 %v15187_v12 }
 0x823   :  { %14236 = vmatprep.subr.bf16.mxu1 %v17158_v56  ;;  %14296 = vmatprep.subr.bf16.mxu0 %v17158_v56 }
 0x826   :  { %14238 = vmatpush3.bf16.msra.mxu1 %v15469_v4  ;;  %14298 = vmatpush3.bf16.msra.mxu0 %v17167_v18 }
 0x827   :  { %14239 = vmatprep.subr.bf16.mxu1 %v17158_v56  ;;  %14299 = vmatprep.subr.bf16.mxu0 %v17158_v56 }
 0x82a   :  { %14241 = vmatpush3.bf16.msra.mxu1 %v15481_v10  ;;  %14301 = vmatpush3.bf16.msra.mxu0 %v17168_v22 }
 0x82b   :  { %14254 = vmatprep.subr.bf16.mxu1 %v17158_v56  ;;  %14320 = vmatprep.subr.bf16.mxu0 %v17158_v56 }
 0x82d   :  { %12641 = vmatmul.mubr.msk.f32.vlgmr.msra.gmra.mrb[92].mxu1 %vm110_vm3, %v16529_v55  ;;  %12736 = vmatmul.mubr.msk.f32.vlgmr.msra.gmra.mrb[94].mxu0 %vm110_vm3, %v16529_v55 }
 0x82e   :  { %14256 = vmatpush3.bf16.msra.mxu1 %v15489_v28  ;;  %14322 = vmatpush3.bf16.msra.mxu0 %v15252_v47 }
 0x82f   :  { %14257 = vmatprep.subr.bf16.mxu1 %v17158_v56  ;;  %14323 = vmatprep.subr.bf16.mxu0 %v17158_v56 }
 0x830   :  { %12776 = vmatprep.mubr.msk.f32.mxu0 %vm15049_vm0, %v17159_v38  ;;  %12678 = vmatprep.mubr.msk.f32.mxu1 %vm15049_vm0, %v17159_v38 }
 0x832   :  { %14259 = vmatpush3.bf16.msra.mxu1 %v15497_v21  ;;  %14325 = vmatpush3.bf16.msra.mxu0 %v15261_v53 }
 0x833   :  { %14260 = vmatprep.subr.bf16.mxu1 %v17158_v56  ;;  %14326 = vmatprep.subr.bf16.mxu0 %v17158_v56 }
 0x835   :  { %12777 = vmatmul.mubr.msk.f32.vlgmr.msra.gmra.mrb[96].mxu0 %vm189_vm2, %v16572_v63 }
 0x836   :  { %14262 = vmatpush3.bf16.msra.mxu1 %v15507_v16  ;;  %14328 = vmatpush3.bf16.msra.mxu0 %v15230_v34 }
 0x837   :  { %14263 = vmatprep.subr.bf16.mxu1 %v17158_v56  ;;  %14329 = vmatprep.subr.bf16.mxu0 %v17158_v56 }
 0x838   :  { %12795 = vmatprep.mubr.msk.f32.mxu0 %vm15049_vm0, %v17159_v38 }
 0x83a   :  { %14265 = vmatpush3.bf16.msra.mxu1 %v15514_v46  ;;  %14331 = vmatpush3.bf16.msra.mxu0 %v15239_v40 }
 0x83b   :  { %14278 = vmatprep.subr.bf16.mxu1 %v17158_v56  ;;  %14332 = vmatprep.subr.bf16.mxu0 %v17158_v56 }
 0x83d   :  { %12679 = vmatmul.mubr.msk.f32.vlgmr.msra.gmra.mrb[94].mxu1 %vm110_vm3, %v16529_v55 }
 0x83e   :  { %14280 = vmatpush3.bf16.msra.mxu1 %v17169_v1  ;;  %14334 = vmatpush3.bf16.msra.mxu0 %v17190_v3 }
 0x83f   :  { %14281 = vmatprep.subr.bf16.mxu1 %v17158_v56  ;;  %14335 = vmatprep.subr.bf16.mxu0 %v17158_v56 }
 0x840   :  { %12716 = vmatprep.mubr.msk.f32.mxu1 %vm15049_vm0, %v17159_v38 }
 0x842   :  { %14283 = vmatpush3.bf16.msra.mxu1 %v17267_v50  ;;  %14337 = vmatpush3.bf16.msra.mxu0 %v17268_v60 }
 0x843   :  { %14284 = vmatprep.subr.bf16.mxu1 %v17158_v56  ;;  %14356 = vmatprep.subr.bf16.mxu0 %v17158_v56 }
 0x845   :  { %12796 = vmatmul.mubr.msk.f32.vlgmr.msra.gmra.mrb[98].mxu0 %vm110_vm3, %v16529_v55 }
 0x846   :  { %14286 = vmatpush3.bf16.msra.mxu1 %v17269_v51  ;;  %14358 = vmatpush3.bf16.msra.mxu0 %v17270_v30 }
 0x847   :  { %14287 = vmatprep.subr.bf16.mxu1 %v17158_v56  ;;  %14359 = vmatprep.subr.bf16.mxu0 %v17158_v56 }
 0x848   :  { %12836 = vmatprep.mubr.msk.f32.mxu0 %vm15049_vm0, %v17159_v38 }
 0x84a   :  { %14289 = vmatpush3.bf16.msra.mxu1 %v17271_v24  ;;  %14361 = vmatpush3.bf16.msra.mxu0 %v17272_v13 }
 0x84b   :  { %14302 = vmatprep.subr.bf16.mxu1 %v17158_v56  ;;  %14362 = vmatprep.subr.bf16.mxu0 %v17158_v56 }
 0x84d   :  { %12717 = vmatmul.mubr.msk.f32.vlgmr.msra.gmra.mrb[96].mxu1 %vm110_vm3, %v16529_v55  ;;  %12837 = vmatmul.mubr.msk.f32.vlgmr.msra.gmra.mrb[100].mxu0 %vm189_vm2, %v16572_v63 }
 0x84e   :  { %14304 = vmatpush3.bf16.msra.mxu1 %v17273_v39  ;;  %12746 = vmatprep.mubr.msk.f32.mxu1 %vm15049_vm0, %v17159_v38 }
 0x84f   :  { %14305 = vmatprep.subr.bf16.mxu1 %v17158_v56  ;;  %14364 = vmatpush3.bf16.msra.mxu0 %v17274_v43  ;;  %v17294_v43 = vld [vmem:[#allocation19_spill] sm:$0xff] }
 0x850   :  { %14365 = vmatprep.subr.bf16.mxu0 %v17158_v56  ;;  %12855 = vmatprep.mubr.msk.f32.mxu0 %vm15049_vm0, %v17159_v38 }
 0x852   :  { %14307 = vmatpush3.bf16.msra.mxu1 %v17275_v17 }
 0x853   :  { %14308 = vmatprep.subr.bf16.mxu1 %v17158_v56  ;;  %14367 = vmatpush3.bf16.msra.mxu0 %v17276_v59 }
 0x854   :  { %14368 = vmatprep.subr.bf16.mxu0 %v17158_v56 }
 0x855   :  { %12747 = vmatmul.mubr.msk.f32.vlgmr.msra.gmra.mrb[98].mxu1 %vm189_vm2, %v16572_v63 }
 0x856   :  { %14310 = vmatpush3.bf16.msra.mxu1 %v17277_v23  ;;  %12765 = vmatprep.mubr.msk.f32.mxu1 %vm15049_vm0, %v17159_v38 }
 0x857   :  { %14311 = vmatprep.subr.bf16.mxu1 %v17158_v56  ;;  %14370 = vmatpush3.bf16.msra.mxu0 %v17278_v41 }
 0x858   :  { %14371 = vmatprep.subr.bf16.mxu0 %v17158_v56 }
 0x85a   :  { %14313 = vmatpush3.bf16.msra.mxu1 %v17279_v61 }
 0x85b   :  { %14314 = vmatprep.subr.bf16.mxu1 %v17158_v56  ;;  %14373 = vmatpush3.bf16.msra.mxu0 %v17280_v19  ;;  %v17293_v19 = vld [vmem:[#allocation17_spill] sm:$0xff] }
 0x85c   :  { %14386 = vmatprep.subr.bf16.mxu0 %v17158_v56 }
 0x85e   :  { %14316 = vmatpush3.bf16.msra.mxu1 %v17281_v45 }
 0x85f   :  { %14317 = vmatprep.subr.bf16.mxu1 %v17158_v56 }
 0x862   :  { %14319 = vmatpush3.bf16.msra.mxu1 %v17282_v0 }
 0x863   :  { %14338 = vmatprep.subr.bf16.mxu1 %v17158_v56 }
 0x865   :  { %12766 = vmatmul.mubr.msk.f32.vlgmr.msra.gmra.mrb[100].mxu1 %vm110_vm3, %v16529_v55 }
 0x866   :  { %14340 = vmatpush3.bf16.msra.mxu1 %v17283_v36  ;;  %12806 = vmatprep.mubr.msk.f32.mxu1 %vm15049_vm0, %v17159_v38 }
 0x867   :  { %14341 = vmatprep.subr.bf16.mxu1 %v17158_v56 }
 0x86a   :  { %14343 = vmatpush3.bf16.msra.mxu1 %v17284_v9 }
 0x86b   :  { %14344 = vmatprep.subr.bf16.mxu1 %v17158_v56 }
 0x86d   :  { %12807 = vmatmul.mubr.msk.f32.vlgmr.msra.gmra.mrb[102].mxu1 %vm189_vm2, %v16572_v63  ;;  %v17292_v63 = vld [vmem:[#allocation40_spill] sm:$0xff] }
 0x86e   :  { %14346 = vmatpush3.bf16.msra.mxu1 %v17285_v7  ;;  %12825 = vmatprep.mubr.msk.f32.mxu1 %vm15049_vm0, %v17159_v38 }
 0x86f   :  { %14347 = vmatprep.subr.bf16.mxu1 %v17158_v56 }
 0x872   :  { %14349 = vmatpush3.bf16.msra.mxu1 %v17286_v11 }
 0x873   :  { %14350 = vmatprep.subr.bf16.mxu1 %v17158_v56 }
 0x876   :  { %14352 = vmatpush3.bf16.msra.mxu1 %v17287_v26 }
 0x877   :  { %14353 = vmatprep.subr.bf16.mxu1 %v17158_v56 }
 0x87a   :  { %14355 = vmatpush3.bf16.msra.mxu1 %v17288_v52 }
 0x87b   :  { %14374 = vmatprep.subr.bf16.mxu1 %v17158_v56 }
 0x87d   :  { %12826 = vmatmul.mubr.msk.f32.vlgmr.msra.gmra.mrb[104].mxu1 %vm110_vm3, %v16529_v55 }
 0x87e   :  { %14376 = vmatpush3.bf16.msra.mxu1 %v17289_v29  ;;  %12874 = vmatprep.mubr.msk.f32.mxu1 %vm15049_vm0, %v17159_v38 }
 0x87f   :  { %14377 = vmatprep.subr.bf16.mxu1 %v17158_v56 }
 0x882   :  { %14379 = vmatpush3.bf16.msra.mxu1 %v17290_v58 }
 0x883   :  { %14380 = vmatprep.subr.bf16.mxu1 %v17158_v56 }
 0x886   :  { %14382 = vmatpush3.bf16.msra.mxu1 %v17291_v32 }
 0x887   :  { %14383 = vmatprep.subr.bf16.mxu1 %v17158_v56 }
 0x88a   :  { %14385 = vmatpush3.bf16.msra.mxu1 %v17292_v63 }
 0x88b   :  { %14398 = vmatprep.subr.bf16.mxu1 %v17158_v56 }
 0x8c0   :  { %v6870_v55 = vpop.f32.mrb[86].mxu0 }
 0x8c1   :  { %v12585_v52 = vpop.f32.mrb[87].mxu0 }
 0x8d0   :  { %v7020_v29 = vpop.f32.mrb[88].mxu0 }
 0x8d1   :  { %v12623_v26 = vpop.f32.mrb[89].mxu0 }
 0x8e0   :  { %v7167_v11 = vpop.f32.mrb[90].mxu0 }
 0x8e1   :  { %v12661_v7 = vpop.f32.mrb[91].mxu0 }
 0x8f0   :  { %v7309_v9 = vpop.f32.mrb[92].mxu0  ;;  %v6943_v36 = vpop.f32.mrb[90].mxu1 }
 0x8f1   :  { %v6944_v0 = vadd.f32 %v6943_v36, %v6870_v55  ;;  %v12699_v58 = vpop.f32.mrb[93].mxu0  ;;  %v12604_v45 = vpop.f32.mrb[91].mxu1 }
 0x8f3   :  { %v6947_v61 = vadd.f32 %v17293_v19, %v6944_v0 }
 0x8f5   :  { %v9999_v32 = vmul.f32 -1.442695, %v6947_v61  ;;  %v17295_v61 = vld [vmem:[#allocation41_spill] sm:$0xff] }
 0x8f7   :  { %14824 = vpow2.f32 %v9999_v32 }
 0x900   :  { %v7090_v41 = vpop.f32.mrb[92].mxu1  ;;  %v7461_v23 = vpop.f32.mrb[94].mxu0 }
 0x901   :  { %v7091_v59 = vadd.f32 %v7090_v41, %v7020_v29  ;;  %v12642_v63 = vpop.f32.mrb[93].mxu1  ;;  %v12737_v17 = vpop.f32.mrb[95].mxu0 }
 0x902   :  { %v14825_v13 = vpop.eup %14824 }
 0x903   :  { %v7094_v52 = vadd.f32 %v17294_v43, %v7091_v59  ;;  %v6951_v24 = vadd.f32 1.0, %v14825_v13 }
 0x905   :  { %v10002_v39 = vmul.f32 -1.442695, %v7094_v52 }
 0x907   :  { %14826 = vpow2.f32 %v10002_v39 }
 0x908   :  { %v7683_v26 = vpop.f32.mrb[96].mxu0  ;;  %14828 = vrcp.f32 %v6951_v24 }
 0x909   :  { %v12778_v7 = vpop.f32.mrb[97].mxu0 }
 0x910   :  { %v7237_v36 = vpop.f32.mrb[94].mxu1 }
 0x911   :  { %v14827_v58 = vpop.eup %14826  ;;  %v7238_v45 = vadd.f32 %v7237_v36, %v7167_v11  ;;  %v12680_v55 = vpop.f32.mrb[95].mxu1 }
 0x912   :  { %v7098_v19 = vadd.f32 1.0, %v14827_v58  ;;  %v14829_v29 = vpop.eup %14828 }
 0x913   :  { %v7241_v0 = vadd.f32 %v17295_v61, %v7238_v45  ;;  %v16686_v61 = vld [vmem:[%s17044_s3] ss:$0 sm:$0xff] }
 0x914   :  { %14830 = vrcp.f32 %v7098_v19 }
 0x915   :  { %14832 = vtanh.f32 %v7241_v0 }
 0x918   :  { %v7760_v17 = vpop.f32.mrb[98].mxu0 }
 0x919   :  { %v12797_v41 = vpop.f32.mrb[99].mxu0 }
 0x91e   :  { %v14831_v43 = vpop.eup %14830 }
 0x91f   :  { %v14833_v59 = vpop.eup %14832  ;;  %v7390_v39 = vmul.f32 %v14831_v43, %v16485_v31 }
 0x920   :  { %v7391_v32 = vmul.f32 %v14833_v59, %v14829_v29  ;;  %v7379_v63 = vpop.f32.mrb[96].mxu1  ;;  %v7972_v13 = vpop.f32.mrb[100].mxu0 }
 0x921   :  { %v7380_v52 = vadd.f32 %v7379_v63, %v7309_v9  ;;  %v12718_v7 = vpop.f32.mrb[97].mxu1  ;;  %v12838_v11 = vpop.f32.mrb[101].mxu0 }
 0x922   :  { %v16680_v36 = vadd.f32 %v7391_v32, %v7390_v39 }
 0x923   :  { %v7383_v24 = vadd.f32 %v16280_v14, %v7380_v52 }
 0x925   :  { %v10007_v58 = vmul.f32 -1.442695, %v7383_v24 }
 0x927   :  { %14834 = vpow2.f32 %v10007_v58 }
 0x928   :  { %v7536_v45 = vpop.f32.mrb[98].mxu1  ;;  %14836 = vtanh.f32 %v16680_v36 }
 0x929   :  { %v7537_v55 = vadd.f32 %v7536_v45, %v7461_v23  ;;  %v12748_v19 = vpop.f32.mrb[99].mxu1  ;;  %v16693_v23 = vld [vmem:[%s17044_s3 + $0x1] ss:$0 sm:$0xff] }
 0x92b   :  { %v7540_v31 = vadd.f32 %v16686_v61, %v7537_v55 }
 0x92d   :  { %v10010_v0 = vmul.f32 -1.442695, %v7540_v31 }
 0x92f   :  { %14838 = vpow2.f32 %v10010_v0 }
 0x931   :  { %v14835_v9 = vpop.eup %14834 }
 0x932   :  { %v7387_v41 = vadd.f32 1.0, %v14835_v9  ;;  %v14837_v39 = vpop.eup %14836 }
 0x934   :  { %14840 = vrcp.f32 %v7387_v41 }
 0x938   :  { %v7613_v14 = vpop.f32.mrb[100].mxu1 }
 0x939   :  { %v7684_v29 = vadd.f32 %v7683_v26, %v7613_v14  ;;  %v12767_v43 = vpop.f32.mrb[101].mxu1  ;;  %v14839_v32 = vpop.eup %14838  ;;  %v16703_v26 = vld [vmem:[%s17044_s3 + $0x2] ss:$0 sm:$0xff] }
 0x93a   :  { %v7544_v11 = vadd.f32 1.0, %v14839_v32  ;;  %v16720_v43 = vld [vmem:[%s17044_s3 + $0x3] ss:$0 sm:$0xff] }
 0x93b   :  { %v7687_v59 = vadd.f32 %v16693_v23, %v7684_v29 }
 0x93d   :  { %v10013_v63 = vmul.f32 -1.442695, %v7687_v59 }
 0x93e   :  { %v14841_v52 = vpop.eup %14840 }
 0x93f   :  { %14842 = vpow2.f32 %v10013_v63  ;;  %v7394_v7 = vmul.f32 %v14841_v52, %v14837_v39 }
 0x940   :  { %v7830_v24 = vpop.f32.mrb[102].mxu1  ;;  %14844 = vrcp.f32 %v7544_v11 }
 0x941   :  { %v7831_v58 = vadd.f32 %v7830_v24, %v7760_v17  ;;  %v12808_v45 = vpop.f32.mrb[103].mxu1  ;;  %12856 = vmatmul.mubr.msk.f32.vlgmr.msra.gmra.mrb[102].mxu0 %vm110_vm3, %v7394_v7 }
 0x942   :  { %14388 = vmatpush3.bf16.msra.mxu0 %v15337_v44  ;;  %12893 = vmatprep.mubr.msk.f32.mxu0 %vm15049_vm0, %v17159_v38  ;;  %v17307_v45 = vld [vmem:[#allocation22_spill] sm:$0xff] }
 0x943   :  { %v7834_v55 = vadd.f32 %v16703_v26, %v7831_v58  ;;  %14389 = vmatprep.subr.bf16.mxu0 %v17158_v56 }
 0x945   :  { %14846 = vtanh.f32 %v7834_v55  ;;  %v17308_v55 = vld [vmem:[#allocation26_spill] sm:$0xff] }
 0x946   :  { %14391 = vmatpush3.bf16.msra.mxu0 %v15344_v49 }
 0x947   :  { %14392 = vmatprep.subr.bf16.mxu0 %v17158_v56 }
 0x949   :  { %v14843_v17 = vpop.eup %14842 }
 0x94a   :  { %v7691_v19 = vadd.f32 1.0, %v14843_v17  ;;  %14394 = vmatpush3.bf16.msra.mxu0 %v15348_v54  ;;  %v14845_v31 = vpop.eup %14844  ;;  %v17309_v17 = vld [vmem:[#allocation28_spill] sm:$0xff] }
 0x94b   :  { %14395 = vmatprep.subr.bf16.mxu0 %v17158_v56 }
 0x94c   :  { %14848 = vrcp.f32 %v7691_v19  ;;  %v17310_v19 = vld [vmem:[#allocation29_spill] sm:$0xff] }
 0x94e   :  { %14397 = vmatpush3.bf16.msra.mxu0 %v15352_v57 }
 0x94f   :  { %v14847_v0 = vpop.eup %14846  ;;  %14410 = vmatprep.subr.bf16.mxu0 %v17158_v56 }
 0x950   :  { %v7984_v9 = vmul.f32 %v14847_v0, %v14845_v31  ;;  %v7902_v41 = vpop.f32.mrb[104].mxu1  ;;  %v17311_v31 = vld [vmem:[#allocation30_spill] sm:$0xff]  ;;  %v17312_v0 = vld [vmem:[#allocation31_spill] sm:$0xff] }
 0x951   :  { %v7973_v14 = vadd.f32 %v7972_v13, %v7902_v41  ;;  %12894 = vmatmul.mubr.msk.f32.vlgmr.msra.gmra.mrb[104].mxu0 %vm110_vm3, %v7394_v7  ;;  %v12827_v29 = vpop.f32.mrb[105].mxu1  ;;  %v17314_v41 = vld [vmem:[#allocation37_spill] sm:$0xff] }
 0x952   :  { %14412 = vmatpush3.bf16.msra.mxu0 %v15356_v62  ;;  %12931 = vmatprep.mubr.msk.f32.mxu0 %vm15049_vm0, %v17159_v38  ;;  %v17316_v29 = vld [vmem:[#allocation39_spill] sm:$0xff] }
 0x953   :  { %v7976_v59 = vadd.f32 %v16720_v43, %v7973_v14  ;;  %14413 = vmatprep.subr.bf16.mxu0 %v17158_v56  ;;  %v17315_v14 = vld [vmem:[#allocation38_spill] sm:$0xff] }
 0x955   :  { %v10018_v39 = vmul.f32 -1.442695, %v7976_v59  ;;  %v17317_v59 = vld [vmem:[#allocation40_spill] sm:$0xff] }
 0x956   :  { %v14849_v32 = vpop.eup %14848  ;;  %14415 = vmatpush3.bf16.msra.mxu0 %v15363_v6 }
 0x957   :  { %v7983_v13 = vmul.f32 %v14849_v32, %v16512_v2  ;;  %14850 = vpow2.f32 %v10018_v39  ;;  %14416 = vmatprep.subr.bf16.mxu0 %v17158_v56 }
 0x959   :  { %v16727_v63 = vadd.f32 %v7984_v9, %v7983_v13  ;;  %v17313_v9 = vld [vmem:[#allocation32_spill] sm:$0xff] }
 0x95a   :  { %14418 = vmatpush3.bf16.msra.mxu0 %v15367_v15 }
 0x95b   :  { %14419 = vmatprep.subr.bf16.mxu0 %v17158_v56  ;;  %14852 = vtanh.f32 %v16727_v63 }
 0x95e   :  { %14421 = vmatpush3.bf16.msra.mxu0 %v15371_v20 }
 0x95f   :  { %14434 = vmatprep.subr.bf16.mxu0 %v17158_v56 }
 0x961   :  { %v14851_v52 = vpop.eup %14850  ;;  %12932 = vmatmul.mubr.msk.f32.vlgmr.msra.gmra.mrb[106].mxu0 %vm110_vm3, %v7394_v7 }
 0x962   :  { %v7980_v11 = vadd.f32 1.0, %v14851_v52  ;;  %14436 = vmatpush3.bf16.msra.mxu0 %v15375_v27  ;;  %12969 = vmatprep.mubr.msk.f32.mxu0 %vm15049_vm0, %v17159_v38 }
 0x963   :  { %14437 = vmatprep.subr.bf16.mxu0 %v17158_v56 }
 0x964   :  { %14854 = vrcp.f32 %v7980_v11 }
 0x965   :  { %v14853_v2 = vpop.eup %14852 }
 0x966   :  { %14439 = vmatpush3.bf16.msra.mxu0 %v15382_v33 }
 0x967   :  { %14440 = vmatprep.subr.bf16.mxu0 %v17158_v56 }
 0x96a   :  { %14442 = vmatpush3.bf16.msra.mxu0 %v15386_v42 }
 0x96b   :  { %14443 = vmatprep.subr.bf16.mxu0 %v17158_v56 }
 0x96e   :  { %v14855_v24 = vpop.eup %14854  ;;  %14445 = vmatpush3.bf16.msra.mxu0 %v15390_v48 }
 0x96f   :  { %v16744_v58 = vmul.f32 %v14855_v24, %v14853_v2  ;;  %14458 = vmatprep.subr.bf16.mxu0 %v17158_v56 }
 0x971   :  { %12970 = vmatmul.mubr.msk.f32.vlgmr.msra.gmra.mrb[108].mxu0 %vm110_vm3, %v7394_v7  ;;  %12875 = vmatmul.mubr.msk.f32.vlgmr.msra.gmra.mrb[106].mxu1 %vm110_vm3, %v16744_v58  ;;  %v17306_v7 = vld [vmem:[#allocation21_spill] sm:$0xff] }
 0x972   :  { %14400 = vmatpush3.bf16.msra.mxu1 %v15448_v37  ;;  %14460 = vmatpush3.bf16.msra.mxu0 %v15182_v5  ;;  %v8652_v5 = vrot.slane %v16359_v35, 7  ;;  %v17302_v35 = vld [vmem:[#allocation18_spill] sm:$0xff] }
 0x973   :  { %14401 = vmatprep.subr.bf16.mxu1 %v17158_v56  ;;  %14461 = vmatprep.subr.bf16.mxu0 %v17158_v56 }
 0x974   :  { %12912 = vmatprep.mubr.msk.f32.mxu1 %vm15049_vm0, %v17159_v38  ;;  %13007 = vmatprep.mubr.msk.f32.mxu0 %vm15049_vm0, %v17159_v38 }
 0x976   :  { %14403 = vmatpush3.bf16.msra.mxu1 %v15458_v25  ;;  %14463 = vmatpush3.bf16.msra.mxu0 %v15187_v12  ;;  %v8653_v12 = vrot.slane %v16365_v8, 6  ;;  %v17303_v8 = vld [vmem:[#allocation35_spill] sm:$0xff] }
 0x977   :  { %14404 = vmatprep.subr.bf16.mxu1 %v17158_v56  ;;  %14464 = vmatprep.subr.bf16.mxu0 %v17158_v56 }
 0x97a   :  { %14406 = vmatpush3.bf16.msra.mxu1 %v15469_v4  ;;  %14466 = vmatpush3.bf16.msra.mxu0 %v17167_v18  ;;  %v17299_v18 = vld [vmem:[#allocation33_spill] sm:$0xff] }
 0x97b   :  { %14407 = vmatprep.subr.bf16.mxu1 %v17158_v56  ;;  %14467 = vmatprep.subr.bf16.mxu0 %v17158_v56 }
 0x97e   :  { %14409 = vmatpush3.bf16.msra.mxu1 %v15481_v10  ;;  %14469 = vmatpush3.bf16.msra.mxu0 %v17168_v22  ;;  %v17300_v22 = vld [vmem:[#allocation16_spill] sm:$0xff] }
 0x97f   :  { %14422 = vmatprep.subr.bf16.mxu1 %v17158_v56  ;;  %14488 = vmatprep.subr.bf16.mxu0 %v17158_v56 }
 0x981   :  { %12913 = vmatmul.mubr.msk.f32.vlgmr.msra.gmra.mrb[108].mxu1 %vm110_vm3, %v16744_v58  ;;  %13008 = vmatmul.mubr.msk.f32.vlgmr.msra.gmra.mrb[110].mxu0 %vm110_vm3, %v16744_v58 }
 0x982   :  { %14424 = vmatpush3.bf16.msra.mxu1 %v15489_v28  ;;  %14490 = vmatpush3.bf16.msra.mxu0 %v15252_v47  ;;  %v16787_v47 = vsel %vm187_vm1, %v8653_v12, %v8652_v5 }
 0x983   :  { %14425 = vmatprep.subr.bf16.mxu1 %v17158_v56  ;;  %14491 = vmatprep.subr.bf16.mxu0 %v17158_v56 }
 0x984   :  { %13048 = vmatprep.mubr.msk.f32.mxu0 %vm15049_vm0, %v17159_v38  ;;  %12950 = vmatprep.mubr.msk.f32.mxu1 %vm15049_vm0, %v17159_v38 }
 0x986   :  { %14427 = vmatpush3.bf16.msra.mxu1 %v15497_v21  ;;  %14493 = vmatpush3.bf16.msra.mxu0 %v15261_v53  ;;  %v17298_v53 = vld [vmem:[#allocation15_spill] sm:$0xff] }
 0x987   :  { %14428 = vmatprep.subr.bf16.mxu1 %v17158_v56  ;;  %14494 = vmatprep.subr.bf16.mxu0 %v17158_v56 }
 0x989   :  { %13049 = vmatmul.mubr.msk.f32.vlgmr.msra.gmra.mrb[112].mxu0 %vm189_vm2, %v16787_v47 }
 0x98a   :  { %14430 = vmatpush3.bf16.msra.mxu1 %v15507_v16  ;;  %14496 = vmatpush3.bf16.msra.mxu0 %v15230_v34  ;;  %v17296_v34 = vld [vmem:[#allocation44_spill] sm:$0xff] }
 0x98b   :  { %14431 = vmatprep.subr.bf16.mxu1 %v17158_v56  ;;  %14497 = vmatprep.subr.bf16.mxu0 %v17158_v56 }
 0x98c   :  { %13067 = vmatprep.mubr.msk.f32.mxu0 %vm15049_vm0, %v17159_v38 }
 0x98e   :  { %14433 = vmatpush3.bf16.msra.mxu1 %v15514_v46  ;;  %14499 = vmatpush3.bf16.msra.mxu0 %v15239_v40  ;;  %v17297_v40 = vld [vmem:[#allocation27_spill] sm:$0xff] }
 0x98f   :  { %14446 = vmatprep.subr.bf16.mxu1 %v17158_v56  ;;  %14500 = vmatprep.subr.bf16.mxu0 %v17158_v56 }
 0x991   :  { %12951 = vmatmul.mubr.msk.f32.vlgmr.msra.gmra.mrb[110].mxu1 %vm110_vm3, %v16744_v58 }
 0x992   :  { %14448 = vmatpush3.bf16.msra.mxu1 %v17169_v1  ;;  %14502 = vmatpush3.bf16.msra.mxu0 %v17190_v3  ;;  %v17301_v3 = vld [vmem:[#allocation34_spill] sm:$0xff] }
 0x993   :  { %14449 = vmatprep.subr.bf16.mxu1 %v17158_v56  ;;  %14503 = vmatprep.subr.bf16.mxu0 %v17158_v56 }
 0x994   :  { %12988 = vmatprep.mubr.msk.f32.mxu1 %vm15049_vm0, %v17159_v38 }
 0x996   :  { %14451 = vmatpush3.bf16.msra.mxu1 %v17267_v50  ;;  %14505 = vmatpush3.bf16.msra.mxu0 %v17268_v60  ;;  %v17304_v60 = vld [vmem:[#allocation20_spill] sm:$0xff] }
 0x997   :  { %14452 = vmatprep.subr.bf16.mxu1 %v17158_v56  ;;  %14524 = vmatprep.subr.bf16.mxu0 %v17158_v56 }
 0x999   :  { %13068 = vmatmul.mubr.msk.f32.vlgmr.msra.gmra.mrb[114].mxu0 %vm110_vm3, %v16744_v58 }
 0x99a   :  { %14454 = vmatpush3.bf16.msra.mxu1 %v17269_v51  ;;  %14526 = vmatpush3.bf16.msra.mxu0 %v17270_v30  ;;  %v17305_v30 = vld [vmem:[#allocation36_spill] sm:$0xff] }
 0x99b   :  { %14455 = vmatprep.subr.bf16.mxu1 %v17158_v56  ;;  %14527 = vmatprep.subr.bf16.mxu0 %v17158_v56 }
 0x99c   :  { %13108 = vmatprep.mubr.msk.f32.mxu0 %vm15049_vm0, %v17159_v38 }
 0x99e   :  { %14457 = vmatpush3.bf16.msra.mxu1 %v17296_v34  ;;  %14529 = vmatpush3.bf16.msra.mxu0 %v17297_v40  ;;  %v16894_v40 = vld [vmem:[%s17047_s6] ss:$0 sm:$0xff] }
 0x99f   :  { %14470 = vmatprep.subr.bf16.mxu1 %v17158_v56  ;;  %14530 = vmatprep.subr.bf16.mxu0 %v17158_v56 }
 0x9a1   :  { %12989 = vmatmul.mubr.msk.f32.vlgmr.msra.gmra.mrb[112].mxu1 %vm110_vm3, %v16744_v58  ;;  %13109 = vmatmul.mubr.msk.f32.vlgmr.msra.gmra.mrb[116].mxu0 %vm189_vm2, %v16787_v47 }
 0x9a2   :  { %14472 = vmatpush3.bf16.msra.mxu1 %v17298_v53  ;;  %13018 = vmatprep.mubr.msk.f32.mxu1 %vm15049_vm0, %v17159_v38 }
 0x9a3   :  { %14473 = vmatprep.subr.bf16.mxu1 %v17158_v56  ;;  %14532 = vmatpush3.bf16.msra.mxu0 %v17299_v18 }
 0x9a4   :  { %14533 = vmatprep.subr.bf16.mxu0 %v17158_v56  ;;  %13127 = vmatprep.mubr.msk.f32.mxu0 %vm15049_vm0, %v17159_v38 }
 0x9a6   :  { %14475 = vmatpush3.bf16.msra.mxu1 %v17300_v22 }
 0x9a7   :  { %14476 = vmatprep.subr.bf16.mxu1 %v17158_v56  ;;  %14535 = vmatpush3.bf16.msra.mxu0 %v17301_v3 }
 0x9a8   :  { %14536 = vmatprep.subr.bf16.mxu0 %v17158_v56 }
 0x9a9   :  { %13019 = vmatmul.mubr.msk.f32.vlgmr.msra.gmra.mrb[114].mxu1 %vm189_vm2, %v16787_v47 }
 0x9aa   :  { %14478 = vmatpush3.bf16.msra.mxu1 %v17302_v35  ;;  %13037 = vmatprep.mubr.msk.f32.mxu1 %vm15049_vm0, %v17159_v38 }
 0x9ab   :  { %14479 = vmatprep.subr.bf16.mxu1 %v17158_v56  ;;  %14538 = vmatpush3.bf16.msra.mxu0 %v17303_v8 }
 0x9ac   :  { %14539 = vmatprep.subr.bf16.mxu0 %v17158_v56 }
 0x9ae   :  { %14481 = vmatpush3.bf16.msra.mxu1 %v17304_v60 }
 0x9af   :  { %14482 = vmatprep.subr.bf16.mxu1 %v17158_v56  ;;  %14541 = vmatpush3.bf16.msra.mxu0 %v17305_v30  ;;  %v16900_v30 = vld [vmem:[%s17047_s6 + $0x1] ss:$0 sm:$0xff] }
 0x9b0   :  { %14554 = vmatprep.subr.bf16.mxu0 %v17158_v56 }
 0x9b2   :  { %14484 = vmatpush3.bf16.msra.mxu1 %v17306_v7 }
 0x9b3   :  { %14485 = vmatprep.subr.bf16.mxu1 %v17158_v56 }
 0x9b6   :  { %14487 = vmatpush3.bf16.msra.mxu1 %v17307_v45 }
 0x9b7   :  { %14506 = vmatprep.subr.bf16.mxu1 %v17158_v56 }
 0x9b9   :  { %13038 = vmatmul.mubr.msk.f32.vlgmr.msra.gmra.mrb[116].mxu1 %vm110_vm3, %v16744_v58 }
 0x9ba   :  { %14508 = vmatpush3.bf16.msra.mxu1 %v17308_v55  ;;  %13078 = vmatprep.mubr.msk.f32.mxu1 %vm15049_vm0, %v17159_v38 }
 0x9bb   :  { %14509 = vmatprep.subr.bf16.mxu1 %v17158_v56 }
 0x9be   :  { %14511 = vmatpush3.bf16.msra.mxu1 %v17309_v17 }
 0x9bf   :  { %14512 = vmatprep.subr.bf16.mxu1 %v17158_v56 }
 0x9c1   :  { %13079 = vmatmul.mubr.msk.f32.vlgmr.msra.gmra.mrb[118].mxu1 %vm189_vm2, %v16787_v47 }
 0x9c2   :  { %14514 = vmatpush3.bf16.msra.mxu1 %v17310_v19  ;;  %13097 = vmatprep.mubr.msk.f32.mxu1 %vm15049_vm0, %v17159_v38 }
 0x9c3   :  { %14515 = vmatprep.subr.bf16.mxu1 %v17158_v56 }
 0x9c6   :  { %14517 = vmatpush3.bf16.msra.mxu1 %v17311_v31 }
 0x9c7   :  { %14518 = vmatprep.subr.bf16.mxu1 %v17158_v56 }
 0x9ca   :  { %14520 = vmatpush3.bf16.msra.mxu1 %v17312_v0 }
 0x9cb   :  { %14521 = vmatprep.subr.bf16.mxu1 %v17158_v56 }
 0x9ce   :  { %14523 = vmatpush3.bf16.msra.mxu1 %v17313_v9 }
 0x9cf   :  { %14542 = vmatprep.subr.bf16.mxu1 %v17158_v56 }
 0x9d1   :  { %13098 = vmatmul.mubr.msk.f32.vlgmr.msra.gmra.mrb[120].mxu1 %vm110_vm3, %v16744_v58 }
 0x9d2   :  { %14544 = vmatpush3.bf16.msra.mxu1 %v17314_v41  ;;  %13146 = vmatprep.mubr.msk.f32.mxu1 %vm15049_vm0, %v17159_v38 }
 0x9d3   :  { %14545 = vmatprep.subr.bf16.mxu1 %v17158_v56 }
 0x9d6   :  { %14547 = vmatpush3.bf16.msra.mxu1 %v17315_v14 }
 0x9d7   :  { %14548 = vmatprep.subr.bf16.mxu1 %v17158_v56 }
 0x9da   :  { %14550 = vmatpush3.bf16.msra.mxu1 %v17316_v29 }
 0x9db   :  { %14551 = vmatprep.subr.bf16.mxu1 %v17158_v56 }
 0x9de   :  { %14553 = vmatpush3.bf16.msra.mxu1 %v17317_v59  ;;  %v16906_v59 = vld [vmem:[%s17047_s6 + $0x2] ss:$0 sm:$0xff] }
 0x9df   :  { %14566 = vmatprep.subr.bf16.mxu1 %v17158_v56 }
 0xa14   :  { %v8057_v39 = vpop.f32.mrb[102].mxu0 }
 0xa15   :  { %v12857_v32 = vpop.f32.mrb[103].mxu0 }
 0xa24   :  { %v8207_v13 = vpop.f32.mrb[104].mxu0 }
 0xa25   :  { %v12895_v52 = vpop.f32.mrb[105].mxu0 }
 0xa34   :  { %v8354_v11 = vpop.f32.mrb[106].mxu0 }
 0xa35   :  { %v12933_v2 = vpop.f32.mrb[107].mxu0 }
 0xa44   :  { %v8496_v24 = vpop.f32.mrb[108].mxu0  ;;  %v8130_v58 = vpop.f32.mrb[106].mxu1 }
 0xa45   :  { %v8131_v5 = vadd.f32 %v8130_v58, %v8057_v39  ;;  %v12971_v12 = vpop.f32.mrb[109].mxu0  ;;  %v12876_v47 = vpop.f32.mrb[107].mxu1 }
 0xa47   :  { %v8134_v53 = vadd.f32 %v16894_v40, %v8131_v5 }
 0xa49   :  { %v10021_v18 = vmul.f32 -1.442695, %v8134_v53 }
 0xa4b   :  { %14856 = vpow2.f32 %v10021_v18 }
 0xa54   :  { %v8277_v22 = vpop.f32.mrb[108].mxu1  ;;  %v8648_v3 = vpop.f32.mrb[110].mxu0 }
 0xa55   :  { %v8278_v35 = vadd.f32 %v8277_v22, %v8207_v13  ;;  %v12914_v8 = vpop.f32.mrb[109].mxu1  ;;  %v13009_v60 = vpop.f32.mrb[111].mxu0 }
 0xa56   :  { %v14857_v19 = vpop.eup %14856  ;;  %v16915_v8 = vld [vmem:[%s17047_s6 + $0x3] ss:$0 sm:$0xff] }
 0xa57   :  { %v8281_v7 = vadd.f32 %v16900_v30, %v8278_v35  ;;  %v8138_v31 = vadd.f32 1.0, %v14857_v19 }
 0xa59   :  { %v10024_v45 = vmul.f32 -1.442695, %v8281_v7 }
 0xa5b   :  { %14858 = vpow2.f32 %v10024_v45 }
 0xa5c   :  { %v8870_v55 = vpop.f32.mrb[112].mxu0  ;;  %14860 = vrcp.f32 %v8138_v31 }
 0xa5d   :  { %v13050_v17 = vpop.f32.mrb[113].mxu0 }
 0xa64   :  { %v8424_v0 = vpop.f32.mrb[110].mxu1 }
 0xa65   :  { %v14859_v9 = vpop.eup %14858  ;;  %v8425_v41 = vadd.f32 %v8424_v0, %v8354_v11  ;;  %v12952_v14 = vpop.f32.mrb[111].mxu1 }
 0xa66   :  { %v8285_v29 = vadd.f32 1.0, %v14859_v9  ;;  %v14861_v52 = vpop.eup %14860 }
 0xa67   :  { %v8428_v39 = vadd.f32 %v16906_v59, %v8425_v41 }
 0xa68   :  { %14862 = vrcp.f32 %v8285_v29 }
 0xa69   :  { %14864 = vtanh.f32 %v8428_v39 }
 0xa6c   :  { %v8947_v32 = vpop.f32.mrb[114].mxu0 }
 0xa6d   :  { %v13069_v13 = vpop.f32.mrb[115].mxu0 }
 0xa72   :  { %v14863_v2 = vpop.eup %14862 }
 0xa73   :  { %v14865_v58 = vpop.eup %14864  ;;  %v8577_v5 = vmul.f32 %v14863_v2, %v16680_v36 }
 0xa74   :  { %v8578_v11 = vmul.f32 %v14865_v58, %v14861_v52  ;;  %v8566_v12 = vpop.f32.mrb[112].mxu1  ;;  %v9159_v47 = vpop.f32.mrb[116].mxu0 }
 0xa75   :  { %v8567_v53 = vadd.f32 %v8566_v12, %v8496_v24  ;;  %v12990_v18 = vpop.f32.mrb[113].mxu1  ;;  %v13110_v22 = vpop.f32.mrb[117].mxu0 }
 0xa76   :  { %v16910_v35 = vadd.f32 %v8578_v11, %v8577_v5 }
 0xa77   :  { %v8570_v60 = vadd.f32 %v16915_v8, %v8567_v53 }
 0xa79   :  { %v10029_v7 = vmul.f32 -1.442695, %v8570_v60 }
 0xa7b   :  { %14866 = vpow2.f32 %v10029_v7 }
 0xa7c   :  { %v8723_v45 = vpop.f32.mrb[114].mxu1  ;;  %14868 = vtanh.f32 %v16910_v35 }
 0xa7d   :  { %v8724_v17 = vadd.f32 %v8723_v45, %v8648_v3  ;;  %v13020_v36 = vpop.f32.mrb[115].mxu1 }
 0xa7f   :  { %v8727_v19 = vadd.f32 %v16686_v61, %v8724_v17 }
 0xa81   :  { %v10032_v31 = vmul.f32 -1.442695, %v8727_v19 }
 0xa83   :  { %14870 = vpow2.f32 %v10032_v31 }
 0xa85   :  { %v14867_v24 = vpop.eup %14866 }
 0xa86   :  { %v8574_v0 = vadd.f32 1.0, %v14867_v24  ;;  %v14869_v39 = vpop.eup %14868 }
 0xa88   :  { %14872 = vrcp.f32 %v8574_v0 }
 0xa8c   :  { %v8800_v9 = vpop.f32.mrb[116].mxu1 }
 0xa8d   :  { %v8871_v41 = vadd.f32 %v8870_v55, %v8800_v9  ;;  %v13039_v14 = vpop.f32.mrb[117].mxu1  ;;  %v14871_v13 = vpop.eup %14870 }
 0xa8e   :  { %v8731_v58 = vadd.f32 1.0, %v14871_v13 }
 0xa8f   :  { %v8874_v29 = vadd.f32 %v16693_v23, %v8871_v41 }
 0xa91   :  { %v10035_v52 = vmul.f32 -1.442695, %v8874_v29 }
 0xa92   :  { %v14873_v2 = vpop.eup %14872 }
 0xa93   :  { %14874 = vpow2.f32 %v10035_v52  ;;  %v8581_v3 = vmul.f32 %v14873_v2, %v14869_v39 }
 0xa94   :  { %v9017_v61 = vpop.f32.mrb[118].mxu1  ;;  %14876 = vrcp.f32 %v8731_v58 }
 0xa95   :  { %v9018_v5 = vadd.f32 %v9017_v61, %v8947_v32  ;;  %v13080_v11 = vpop.f32.mrb[119].mxu1  ;;  %13128 = vmatmul.mubr.msk.f32.vlgmr.msra.gmra.mrb[118].mxu0 %vm110_vm3, %v8581_v3 }
 0xa96   :  { %14556 = vmatpush3.bf16.msra.mxu0 %v15337_v44  ;;  %13165 = vmatprep.mubr.msk.f32.mxu0 %vm15049_vm0, %v17159_v38 }
 0xa97   :  { %v9021_v55 = vadd.f32 %v16703_v26, %v9018_v5  ;;  %14557 = vmatprep.subr.bf16.mxu0 %v17158_v56 }
 0xa99   :  { %14878 = vtanh.f32 %v9021_v55 }
 0xa9a   :  { %14559 = vmatpush3.bf16.msra.mxu0 %v15344_v49 }
 0xa9b   :  { %14560 = vmatprep.subr.bf16.mxu0 %v17158_v56 }
 0xa9d   :  { %v14875_v23 = vpop.eup %14874 }
 0xa9e   :  { %v8878_v32 = vadd.f32 1.0, %v14875_v23  ;;  %14562 = vmatpush3.bf16.msra.mxu0 %v15348_v54  ;;  %v14877_v44 = vpop.eup %14876 }
 0xa9f   :  { %14563 = vmatprep.subr.bf16.mxu0 %v17158_v56 }
 0xaa0   :  { %14880 = vrcp.f32 %v8878_v32 }
 0xaa2   :  { %14565 = vmatpush3.bf16.msra.mxu0 %v15352_v57 }
 0xaa3   :  { %v14879_v12 = vpop.eup %14878  ;;  %14578 = vmatprep.subr.bf16.mxu0 %v17158_v56 }
 0xaa4   :  { %v9171_v26 = vmul.f32 %v14879_v12, %v14877_v44  ;;  %v9089_v53 = vpop.f32.mrb[120].mxu1 }
 0xaa5   :  { %v9160_v18 = vadd.f32 %v9159_v47, %v9089_v53  ;;  %13166 = vmatmul.mubr.msk.f32.vlgmr.msra.gmra.mrb[120].mxu0 %vm110_vm3, %v8581_v3  ;;  %v13099_v49 = vpop.f32.mrb[121].mxu1 }
 0xaa6   :  { %14580 = vmatpush3.bf16.msra.mxu0 %v15356_v62  ;;  %13203 = vmatprep.mubr.msk.f32.mxu0 %vm15049_vm0, %v17159_v38 }
 0xaa7   :  { %v9163_v54 = vadd.f32 %v16720_v43, %v9160_v18  ;;  %14581 = vmatprep.subr.bf16.mxu0 %v17158_v56 }
 0xaa9   :  { %v10040_v22 = vmul.f32 -1.442695, %v9163_v54 }
 0xaaa   :  { %v14881_v57 = vpop.eup %14880  ;;  %14583 = vmatpush3.bf16.msra.mxu0 %v15363_v6 }
 0xaab   :  { %v9170_v60 = vmul.f32 %v14881_v57, %v16727_v63  ;;  %14882 = vpow2.f32 %v10040_v22  ;;  %14584 = vmatprep.subr.bf16.mxu0 %v17158_v56 }
 0xaad   :  { %v9172_v47 = vadd.f32 %v9171_v26, %v9170_v60 }
 0xaae   :  { %14586 = vmatpush3.bf16.msra.mxu0 %v15367_v15 }
 0xaaf   :  { %14587 = vmatprep.subr.bf16.mxu0 %v17158_v56  ;;  %14884 = vtanh.f32 %v9172_v47 }
 0xab2   :  { %14589 = vmatpush3.bf16.msra.mxu0 %v15371_v20 }
 0xab3   :  { %14602 = vmatprep.subr.bf16.mxu0 %v17158_v56 }
 0xab5   :  { %v14883_v62 = vpop.eup %14882  ;;  %13204 = vmatmul.mubr.msk.f32.vlgmr.msra.gmra.mrb[122].mxu0 %vm110_vm3, %v8581_v3 }
 0xab6   :  { %v9167_v43 = vadd.f32 1.0, %v14883_v62  ;;  %14604 = vmatpush3.bf16.msra.mxu0 %v15375_v27  ;;  %13241 = vmatprep.mubr.msk.f32.mxu0 %vm15049_vm0, %v17159_v38  ;;  %v9770_v27 = vld [vmem:[%s17048_s7 + $0x8] sm:$0xff] }
 0xab7   :  { %14605 = vmatprep.subr.bf16.mxu0 %v17158_v56 }
 0xab8   :  { %14886 = vrcp.f32 %v9167_v43 }
 0xab9   :  { %v14885_v6 = vpop.eup %14884 }
 0xaba   :  { %14607 = vmatpush3.bf16.msra.mxu0 %v15382_v33 }
 0xabb   :  { %14608 = vmatprep.subr.bf16.mxu0 %v17158_v56 }
 0xabe   :  { %14610 = vmatpush3.bf16.msra.mxu0 %v15386_v42  ;;  %v9771_v42 = vld [vmem:[%s17048_s7 + $0x10] sm:$0xff] }
 0xabf   :  { %14611 = vmatprep.subr.bf16.mxu0 %v17158_v56 }
 0xac2   :  { %v14887_v15 = vpop.eup %14886  ;;  %14613 = vmatpush3.bf16.msra.mxu0 %v15390_v48  ;;  %v9772_v48 = vld [vmem:[%s17048_s7 + $0x18] sm:$0xff] }
 0xac3   :  { %v9174_v20 = vmul.f32 %v14887_v15, %v14885_v6  ;;  %14626 = vmatprep.subr.bf16.mxu0 %v17158_v56 }
 0xac5   :  { %13242 = vmatmul.mubr.msk.f32.vlgmr.msra.gmra.mrb[124].mxu0 %vm110_vm3, %v8581_v3  ;;  %13147 = vmatmul.mubr.msk.f32.vlgmr.msra.gmra.mrb[122].mxu1 %vm110_vm3, %v9174_v20 }
 0xac6   :  { %14568 = vmatpush3.bf16.msra.mxu1 %v15448_v37  ;;  %13184 = vmatprep.mubr.msk.f32.mxu1 %vm15049_vm0, %v17159_v38  ;;  %v14630_v37 = vpack.c.bf16 %v9772_v48, %v9771_v42 }
 0xac7   :  { %14569 = vmatprep.subr.bf16.mxu1 %v17158_v56  ;;  %13279 = vmatprep.mubr.msk.f32.mxu0 %vm15049_vm0, %v17159_v38 }
 0xaca   :  { %14571 = vmatpush3.bf16.msra.mxu1 %v15458_v25  ;;  %v9773_v25 = vld [vmem:[%s17048_s7 + $0x20] sm:$0xff] }
 0xacb   :  { %14572 = vmatprep.subr.bf16.mxu1 %v17158_v56 }
 0xace   :  { %14574 = vmatpush3.bf16.msra.mxu1 %v15469_v4 }
 0xacf   :  { %14575 = vmatprep.subr.bf16.mxu1 %v17158_v56 }
 0xad2   :  { %14577 = vmatpush3.bf16.msra.mxu1 %v15481_v10  ;;  %v9775_v10 = vld [vmem:[%s17048_s7 + $0x30] sm:$0xff] }
 0xad3   :  { %14590 = vmatprep.subr.bf16.mxu1 %v17158_v56 }
 0xad5   :  { %13185 = vmatmul.mubr.msk.f32.vlgmr.msra.gmra.mrb[124].mxu1 %vm110_vm3, %v9174_v20 }
 0xad6   :  { %14592 = vmatpush3.bf16.msra.mxu1 %v15489_v28  ;;  %13222 = vmatprep.mubr.msk.f32.mxu1 %vm15049_vm0, %v17159_v38  ;;  %v9776_v28 = vld [vmem:[%s17048_s7 + $0x38] sm:$0xff] }
 0xad7   :  { %14593 = vmatprep.subr.bf16.mxu1 %v17158_v56 }
 0xada   :  { %14595 = vmatpush3.bf16.msra.mxu1 %v15497_v21  ;;  %v14636_v21 = vpack.c.bf16 %v9776_v28, %v9775_v10 }
 0xadb   :  { %14596 = vmatprep.subr.bf16.mxu1 %v17158_v56 }
 0xade   :  { %14598 = vmatpush3.bf16.msra.mxu1 %v15507_v16 }
 0xadf   :  { %14599 = vmatprep.subr.bf16.mxu1 %v17158_v56 }
 0xae2   :  { %14601 = vmatpush3.bf16.msra.mxu1 %v15514_v46  ;;  %v9769_v46 = vld [vmem:[%s17048_s7] sm:$0xff] }
 0xae3   :  { %14614 = vmatprep.subr.bf16.mxu1 %v17158_v56  ;;  %v14627_v33 = vpack.c.bf16 %v9770_v27, %v9769_v46 }
 0xae5   :  { %13223 = vmatmul.mubr.msk.f32.vlgmr.msra.gmra.mrb[126].mxu1 %vm110_vm3, %v9174_v20  ;;  %14628 = vmatpush3.bf16.msra.mxu0 %v14627_v33 }
 0xae6   :  { %14616 = vmatpush3.bf16.msra.mxu1 %v17169_v1  ;;  %13260 = vmatprep.mubr.msk.f32.mxu1 %vm15049_vm0, %v17159_v38  ;;  %v9774_v38 = vld [vmem:[%s17048_s7 + $0x28] sm:$0xff] }
 0xae7   :  { %14617 = vmatprep.subr.bf16.mxu1 %v17158_v56  ;;  %14629 = vmatprep.subr.bf16.mxu0 %v17158_v56  ;;  %v14633_v4 = vpack.c.bf16 %v9774_v38, %v9773_v25 }
 0xae9   :  { %14631 = vmatpush3.bf16.msra.mxu0 %v14630_v37 }
 0xaea   :  { %14619 = vmatpush3.bf16.msra.mxu1 %v17267_v50  ;;  %14632 = vmatprep.subr.bf16.mxu0 %v17158_v56 }
 0xaeb   :  { %14620 = vmatprep.subr.bf16.mxu1 %v17158_v56 }
 0xaed   :  { %14634 = vmatpush3.bf16.msra.mxu0 %v14633_v4 }
 0xaee   :  { %14622 = vmatpush3.bf16.msra.mxu1 %v17269_v51  ;;  %14635 = vmatprep.subr.bf16.mxu0 %v17158_v56 }
 0xaef   :  { %14623 = vmatprep.subr.bf16.mxu1 %v17158_v56 }
 0xaf1   :  { %14637 = vmatpush3.bf16.msra.mxu0 %v14636_v21 }
 0xaf2   :  { %14625 = vmatpush3.bf16.msra.mxu1 %v17296_v34 }
 0xaf5   :  { %13261 = vmatmul.mubr.msk.f32.vlgmr.msra.gmra.mrb[128].mxu1 %vm110_vm3, %v9174_v20 }
 0xb68   :  { %v9244_v16 = vpop.f32.mrb[118].mxu0 }
 0xb69   :  { %v13129_v1 = vpop.f32.mrb[119].mxu0 }
 0xb78   :  { %v9394_v50 = vpop.f32.mrb[120].mxu0 }
 0xb79   :  { %v13167_v51 = vpop.f32.mrb[121].mxu0 }
 0xb88   :  { %v9541_v63 = vpop.f32.mrb[122].mxu0 }
 0xb89   :  { %v13205_v34 = vpop.f32.mrb[123].mxu0 }
 0xb98   :  { %v9683_v7 = vpop.f32.mrb[124].mxu0  ;;  %v9317_v45 = vpop.f32.mrb[122].mxu1 }
 0xb99   :  { %v9318_v17 = vadd.f32 %v9317_v45, %v9244_v16  ;;  %v13243_v36 = vpop.f32.mrb[125].mxu0  ;;  %v13148_v19 = vpop.f32.mrb[123].mxu1 }
 0xb9b   :  { %v9321_v31 = vadd.f32 %v16894_v40, %v9318_v17 }
 0xb9d   :  { %v10043_v24 = vmul.f32 -1.442695, %v9321_v31 }
 0xb9f   :  { %14888 = vpow2.f32 %v10043_v24 }
 0xba8   :  { %v9464_v0 = vpop.f32.mrb[124].mxu1 }
 0xba9   :  { %v9465_v9 = vadd.f32 %v9464_v0, %v9394_v50  ;;  %v13186_v41 = vpop.f32.mrb[125].mxu1  ;;  %v14889_v29 = vpop.eup %14888 }
 0xbaa   :  { %v9325_v39 = vadd.f32 1.0, %v14889_v29 }
 0xbab   :  { %v9468_v56 = vadd.f32 %v16900_v30, %v9465_v9 }
 0xbad   :  { %v10046_v14 = vmul.f32 -1.442695, %v9468_v56 }
 0xbaf   :  { %14890 = vpow2.f32 %v10046_v14 }
 0xbb0   :  { %14892 = vrcp.f32 %v9325_v39 }
 0xbb8   :  { %v9611_v13 = vpop.f32.mrb[126].mxu1 }
 0xbb9   :  { %v14891_v52 = vpop.eup %14890  ;;  %v9612_v2 = vadd.f32 %v9611_v13, %v9541_v63  ;;  %v13224_v3 = vpop.f32.mrb[127].mxu1 }
 0xbba   :  { %v9472_v58 = vadd.f32 1.0, %v14891_v52  ;;  %v14893_v40 = vpop.eup %14892 }
 0xbbb   :  { %v9615_v61 = vadd.f32 %v16906_v59, %v9612_v2 }
 0xbbc   :  { %14894 = vrcp.f32 %v9472_v58 }
 0xbbd   :  { %14896 = vtanh.f32 %v9615_v61 }
 0xbc6   :  { %v14895_v5 = vpop.eup %14894 }
 0xbc7   :  { %v14897_v11 = vpop.eup %14896  ;;  %v9764_v55 = vmul.f32 %v14895_v5, %v16910_v35  ;;  %v10052_v35 = vld [vmem:[%s17049_s8] ss:$0 sm:$0xff] }
 0xbc8   :  { %v9765_v30 = vmul.f32 %v14897_v11, %v14893_v40  ;;  %v9753_v23 = vpop.f32.mrb[128].mxu1 }
 0xbc9   :  { %v9754_v32 = vadd.f32 %v9753_v23, %v9683_v7  ;;  %v13262_v44 = vpop.f32.mrb[129].mxu1 }
 0xbca   :  { %v9766_v12 = vadd.f32 %v9765_v30, %v9764_v55 }
 0xbcb   :  { %v9757_v26 = vadd.f32 %v16915_v8, %v9754_v32 }
 0xbcd   :  { %v10051_v53 = vmul.f32 -1.442695, %v9757_v26 }
 0xbcf   :  { %14898 = vpow2.f32 %v10051_v53 }
 0xbd0   :  { %14900 = vtanh.f32 %v9766_v12 }
 0xbd9   :  { %v14899_v18 = vpop.eup %14898 }
 0xbda   :  { %v9761_v49 = vadd.f32 1.0, %v14899_v18  ;;  %v14901_v59 = vpop.eup %14900 }
 0xbdc   :  { %14902 = vrcp.f32 %v9761_v49 }
 0xbe6   :  { %v14903_v54 = vpop.eup %14902 }
 0xbe7   :  { %v9768_v22 = vmul.f32 %v14903_v54, %v14901_v59 }
 0xbe9   :  { %13280 = vmatmul.mubr.msk.f32.vlgmr.msra.gmra.mrb[126].mxu0 %vm110_vm3, %v9768_v22 }
 0xcbc   :  { %v9853_v57 = vpop.f32.mrb[126].mxu0 }
 0xcbd   :  { %v9854_v8 = vadd.f32 %v10052_v35, %v9853_v57  ;;  %v13281_v60 = vpop.f32.mrb[127].mxu0 }
 0xcbf   :  { %9858 = vst.msk [vmem:[#allocation10] sm:$0x3] %vm9857_vm4, %v9854_v8 }
 0xcc0   :  { %15023 = shalt.err (!%p15020_p8)
}
 0xcc1   :  { %s15024_s22 = scalar_lea.hbm %s17050_s9, 32 }
 0xcc2   :  { %p15025_p9 = scmp.ne.s32.totalorder %s17050_s9, %s15024_s22  ;;  %p15028_p10 = scmp.lt.u32.totalorder %s15024_s22, %s17050_s9 }
 0xcc4   :  { %p15030_p11 = pnand %p15028_p10, %p15025_p9 }
 0xcc6   :  { %15033 = shalt.err (!%p15030_p11)
}
 0xcc7   :  { %9868 = dma.vmem_to_hbm [thread:$0]  %s9866_s15, 32, %s17050_s9, [#allocation4]  }
 0xcc8   :  { %15040 = dma.done.wait [#allocation4], 32  }
 0xcc9   :  { %15041 = vsyncadd [#allocation4], 4294967264 }
 0xcca   :  { %9872 = vsyncpa [#allocation3], 1 }
 0xccb   :  { %9873 = vsyncpa [#allocation6], 1 }
 0xccc   :  { %9874 = vsyncpa [#allocation9], 1 }
 0xccd   :  { %9875 = vsyncpa [#allocation4], 1 }

</bundles_post_ra>
